<compile_context>
chip_gen: v7x
topology: tpu7x:2x2x1
jax: 0.10.0
libtpu: 0.0.40
codegen_flags: <defaults>
</compile_context>

<pallas_src>
import math
import functools

import jax
import jax.numpy as jnp
from jax import lax
from jax.experimental import pallas as pl
from jax.experimental.pallas import tpu as pltpu


# ----------------------------------------------------------------------------
# helpers
# ----------------------------------------------------------------------------

def _round_up(x, m):
    return (x + m - 1) // m * m


def _pick_tile(d, prefs):
    for t in prefs:
        if d % t == 0:
            return t
    return d


# ----------------------------------------------------------------------------
# Pallas kernel: linear (bias + optional ReLU fused), single full-extent K block
# ----------------------------------------------------------------------------

def _linear_kernel(x_ref, w_ref, b_ref, o_ref, *, relu):
    acc = jnp.dot(x_ref[...], w_ref[...], preferred_element_type=jnp.float32)
    acc = acc + b_ref[...]
    if relu:
        acc = jnp.maximum(acc, 0.0)
    o_ref[...] = acc.astype(o_ref.dtype)


def pallas_linear(x, w, b=None, relu=False, out_dtype=jnp.float32):
    """(M,K) @ (K,N) + b. bf16 MXU operands, f32 accumulate, fused bias/ReLU.

    K is kept as a single full-extent block (no activation padding along K);
    all uses in this model have K <= 256.  Weight / bias padding along N is on
    compile-time constants (folded by XLA).
    """
    M, K = x.shape
    K2, N = w.shape
    assert K == K2
    assert K <= 2048  # TODO(synk): re-introduce K tiling for very deep contractions

    Mp = _round_up(max(M, 8), 8)
    Np = _round_up(max(N, 128), 128)

    xb = x.astype(jnp.bfloat16)
    if M != Mp:
        xb = jnp.pad(xb, ((0, Mp - M), (0, 0)))
    wb = w.astype(jnp.bfloat16)
    if N != Np:
        wb = jnp.pad(wb, ((0, 0), (0, Np - N)))
    if b is None:
        bp = jnp.zeros((1, Np), jnp.float32)
    else:
        bp = b.astype(jnp.float32).reshape(1, N)
        if N != Np:
            bp = jnp.pad(bp, ((0, 0), (0, Np - N)))

    tm = Mp if Mp <= 512 else _pick_tile(Mp, (512, 256, 128, 64, 32, 16, 8))
    tn = Np if Np <= 512 else _pick_tile(Np, (512, 256, 128))
    grid = (Mp // tm, Np // tn)

    out = pl.pallas_call(
        functools.partial(_linear_kernel, relu=relu),
        out_shape=jax.ShapeDtypeStruct((Mp, Np), out_dtype),
        grid=grid,
        in_specs=[
            pl.BlockSpec((tm, K), lambda i, j: (i, 0)),
            pl.BlockSpec((K, tn), lambda i, j: (0, j)),
            pl.BlockSpec((1, tn), lambda i, j: (0, j)),
        ],
        out_specs=pl.BlockSpec((tm, tn), lambda i, j: (i, j)),
        compiler_params=pltpu.CompilerParams(
            dimension_semantics=("parallel", "parallel")),
    )(xb, wb, bp)

    if (M, N) != (Mp, Np):
        out = out[:M, :N]
    return out


# ----------------------------------------------------------------------------
# Pallas kernel: fused transformer encoder layer
#   QKV proj -> per-head softmax(QK^T)V -> single out-proj -> +res -> LN
#   -> FFN (linear-ReLU-linear) -> +res -> LN, all in one pallas_call.
# ----------------------------------------------------------------------------

def _encoder_layer_kernel(x_ref, wqkv_ref, bqkv_ref, wo_ref, bo_ref,
                          g1_ref, bln1_ref, w1_ref, b1_ref, w2_ref, b2_ref,
                          g2_ref, bln2_ref, *out_refs, n_head, d_k, want_attn):
    if want_attn:
        o_ref, a_ref = out_refs
    else:
        (o_ref,) = out_refs
        a_ref = None

    HK = n_head * d_k
    x = x_ref[...]                                         # (n, d_model) f32
    xb = x.astype(jnp.bfloat16)

    # fused QKV projection; attention scale already folded into the Q columns.
    qkv = jnp.dot(xb, wqkv_ref[...],
                  preferred_element_type=jnp.float32) + bqkv_ref[...]  # (n, 3*HK)

    ctx_parts = []
    for h in range(n_head):                                # unrolled at trace time
        q = qkv[:, h * d_k:(h + 1) * d_k]
        k = qkv[:, HK + h * d_k:HK + (h + 1) * d_k]
        v = qkv[:, 2 * HK + h * d_k:2 * HK + (h + 1) * d_k]
        s = lax.dot_general(q.astype(jnp.bfloat16), k.astype(jnp.bfloat16),
                            (((1,), (1,)), ((), ())),
                            preferred_element_type=jnp.float32)       # (n, n)
        s = s - jnp.max(s, axis=-1, keepdims=True)
        e = jnp.exp(s)
        p = e / jnp.sum(e, axis=-1, keepdims=True)         # exact softmax
        if a_ref is not None:
            a_ref[h] = p
        ctx_parts.append(jnp.dot(p.astype(jnp.bfloat16), v.astype(jnp.bfloat16),
                                 preferred_element_type=jnp.float32))  # (n, dk)
    ctx = jnp.concatenate(ctx_parts, axis=-1)              # (n, HK) f32

    # single deep output projection + residual + LayerNorm
    y = jnp.dot(ctx.astype(jnp.bfloat16), wo_ref[...],
                preferred_element_type=jnp.float32) + bo_ref[...] + x
    mu = jnp.mean(y, axis=-1, keepdims=True)
    yc = y - mu
    var = jnp.mean(yc * yc, axis=-1, keepdims=True)
    x1 = yc * lax.rsqrt(var + 1e-5) * g1_ref[...] + bln1_ref[...]

    # position-wise FFN + residual + LayerNorm
    h1 = jnp.dot(x1.astype(jnp.bfloat16), w1_ref[...],
                 preferred_element_type=jnp.float32) + b1_ref[...]
    h1 = jnp.maximum(h1, 0.0)
    y2 = jnp.dot(h1.astype(jnp.bfloat16), w2_ref[...],
                 preferred_element_type=jnp.float32) + b2_ref[...] + x1
    mu2 = jnp.mean(y2, axis=-1, keepdims=True)
    yc2 = y2 - mu2
    var2 = jnp.mean(yc2 * yc2, axis=-1, keepdims=True)
    o_ref[...] = yc2 * lax.rsqrt(var2 + 1e-5) * g2_ref[...] + bln2_ref[...]


def encoder_layer(p, x, n_head, d_k, want_attn):
    n, d_model = x.shape
    d_inner = p["w1"].shape[1]
    HK = n_head * d_k
    scale = 1.0 / math.sqrt(d_k)

    # Fold the attention scale into the Q slice of the QKV weights/bias
    # (weights are trace-time constants -> constant-folded by XLA).
    wqkv = jnp.concatenate([p["wqkv"][:, :HK] * scale, p["wqkv"][:, HK:]], axis=1)
    bqkv = jnp.concatenate([p["bqkv"][:HK] * scale, p["bqkv"][HK:]], axis=0)

    def full2(shape):
        return pl.BlockSpec(shape, lambda i: (0, 0))

    in_specs = [
        full2((n, d_model)),            # x
        full2((d_model, 3 * HK)),       # wqkv
        full2((1, 3 * HK)),             # bqkv
        full2((HK, d_model)),           # wo
        full2((1, d_model)),            # bo
        full2((1, d_model)),            # ln1 gamma
        full2((1, d_model)),            # ln1 beta
        full2((d_model, d_inner)),      # w1
        full2((1, d_inner)),            # b1
        full2((d_inner, d_model)),      # w2
        full2((1, d_model)),            # b2
        full2((1, d_model)),            # ln2 gamma
        full2((1, d_model)),            # ln2 beta
    ]
    out_shapes = [jax.ShapeDtypeStruct((n, d_model), jnp.float32)]
    out_specs = [full2((n, d_model))]
    if want_attn:
        # TODO(synk): n << 128 here so the attention store is a masked vst; a
        # lane-dense (H*n, n_pad) slab would be preferable at realistic n.
        out_shapes.append(jax.ShapeDtypeStruct((n_head, n, n), jnp.float32))
        out_specs.append(pl.BlockSpec((n_head, n, n), lambda i: (0, 0, 0)))

    res = pl.pallas_call(
        functools.partial(_encoder_layer_kernel, n_head=n_head, d_k=d_k,
                          want_attn=want_attn),
        out_shape=tuple(out_shapes),
        grid=(1,),
        in_specs=in_specs,
        out_specs=tuple(out_specs),
        compiler_params=pltpu.CompilerParams(
            dimension_semantics=("arbitrary",)),
    )(x.astype(jnp.float32),
      wqkv.astype(jnp.bfloat16),
      bqkv.astype(jnp.float32).reshape(1, -1),
      p["wo"].astype(jnp.bfloat16),
      p["bo"].astype(jnp.float32).reshape(1, -1),
      p["ln1_g"].astype(jnp.float32).reshape(1, -1),
      p["ln1_b"].astype(jnp.float32).reshape(1, -1),
      p["w1"].astype(jnp.bfloat16),
      p["b1"].astype(jnp.float32).reshape(1, -1),
      p["w2"].astype(jnp.bfloat16),
      p["b2"].astype(jnp.float32).reshape(1, -1),
      p["ln2_g"].astype(jnp.float32).reshape(1, -1),
      p["ln2_b"].astype(jnp.float32).reshape(1, -1))

    if want_attn:
        return res[0], res[1]
    return res[0], None


# ----------------------------------------------------------------------------
# Rigid transform geometry (glue, plain JAX)
# ----------------------------------------------------------------------------

def _skew(v):
    z = jnp.zeros_like(v[..., 0])
    return jnp.stack([
        jnp.stack([z, -v[..., 2], v[..., 1]], -1),
        jnp.stack([v[..., 2], z, -v[..., 0]], -1),
        jnp.stack([-v[..., 1], v[..., 0], z], -1),
    ], -2)


def axisangle_to_mat(ax):
    r, t = ax[:, :3], ax[:, 3:]
    theta = jnp.linalg.norm(r, axis=-1, keepdims=True)
    k = r / jnp.maximum(theta, 1e-8)
    K = _skew(k)
    I = jnp.eye(3, dtype=jnp.float32)[None]
    s = jnp.sin(theta)[..., None]
    c = jnp.cos(theta)[..., None]
    R = I + s * K + (1.0 - c) * (K @ K)
    return jnp.concatenate([R, t[..., None]], axis=-1)           # (N,3,4)


def mat2axisangle(mat):
    R, t = mat[:, :, :3], mat[:, :, 3]
    cos_t = jnp.clip((R[:, 0, 0] + R[:, 1, 1] + R[:, 2, 2] - 1.0) / 2.0, -1.0, 1.0)
    theta = jnp.arccos(cos_t)
    w = jnp.stack([R[:, 2, 1] - R[:, 1, 2],
                   R[:, 0, 2] - R[:, 2, 0],
                   R[:, 1, 0] - R[:, 0, 1]], axis=-1) * 0.5
    sin_t = jnp.sin(theta)
    scale = jnp.where(sin_t > 1e-6, theta / jnp.maximum(sin_t, 1e-6), 1.0)
    return jnp.concatenate([w * scale[:, None], t], axis=-1)     # (N,6)


def mat2point(mat, w, h, res_s):
    dx = (w - 1) / 2.0 * res_s
    dy = (h - 1) / 2.0 * res_s
    p = jnp.array([[-dx, -dy, 0.0, 1.0],
                   [dx, -dy, 0.0, 1.0],
                   [-dx, dy, 0.0, 1.0]], jnp.float32)
    pts = jnp.einsum("nij,kj->nki", mat, p)                      # (N,3,3)
    return pts.reshape(mat.shape[0], 9)


def point2mat(theta):
    p = theta.reshape(-1, 3, 3)
    p1, p2, p3 = p[:, 0], p[:, 1], p[:, 2]
    v1 = p2 - p1
    v2 = p3 - p1
    nx = v1 / jnp.maximum(jnp.linalg.norm(v1, axis=-1, keepdims=True), 1e-8)
    nz = jnp.cross(v1, v2)
    nz = nz / jnp.maximum(jnp.linalg.norm(nz, axis=-1, keepdims=True), 1e-8)
    ny = jnp.cross(nz, nx)
    R = jnp.stack([nx, ny, nz], axis=-1)
    t = p1 + 0.5 * v1 + 0.5 * v2
    return jnp.concatenate([R, t[..., None]], axis=-1)


def mat_update_resolution(mat, res_from, res_to):
    return jnp.concatenate([mat[:, :, :3], mat[:, :, 3:4] * (res_from / res_to)], -1)


def ax_update_resolution(ax, res_from, res_to):
    return jnp.concatenate([ax[:, :3], ax[:, 3:] * (res_from / res_to)], -1)


# ----------------------------------------------------------------------------
# slice acquisition operators (glue, plain JAX)
# ----------------------------------------------------------------------------

def _slice_voxel_coords(mats, slice_shape, vol_shape, res_ratio):
    h, w = slice_shape
    D, H, W = vol_shape
    ys = (jnp.arange(h, dtype=jnp.float32) - (h - 1) / 2.0) * res_ratio
    xs = (jnp.arange(w, dtype=jnp.float32) - (w - 1) / 2.0) * res_ratio
    yy, xx = jnp.meshgrid(ys, xs, indexing="ij")
    pts = jnp.stack([xx, yy, jnp.zeros_like(xx)], axis=-1)       # (h,w,3)
    world = jnp.einsum("nij,hwj->nhwi", mats[:, :, :3], pts) + mats[:, None, None, :, 3]
    zi = world[..., 2] + (D - 1) / 2.0
    yi = world[..., 1] + (H - 1) / 2.0
    xi = world[..., 0] + (W - 1) / 2.0
    return zi, yi, xi


def _corner_iter(zi, yi, xi, D, H, W):
    z0, y0, x0 = jnp.floor(zi), jnp.floor(yi), jnp.floor(xi)
    fz, fy, fx = zi - z0, yi - y0, xi - x0
    for oz in (0, 1):
        wz = fz if oz else 1.0 - fz
        for oy in (0, 1):
            wy = fy if oy else 1.0 - fy
            for ox in (0, 1):
                wx = fx if ox else 1.0 - fx
                zz, yy_, xx_ = z0 + oz, y0 + oy, x0 + ox
                valid = ((zz >= 0) & (zz < D) & (yy_ >= 0) & (yy_ < H)
                         & (xx_ >= 0) & (xx_ < W))
                zc = jnp.clip(zz, 0, D - 1).astype(jnp.int32)
                yc = jnp.clip(yy_, 0, H - 1).astype(jnp.int32)
                xc = jnp.clip(xx_, 0, W - 1).astype(jnp.int32)
                yield zc, yc, xc, jnp.where(valid, wz * wy * wx, 0.0)


def slice_acquisition(mats, volume, vol_mask, slices_mask, psf, slice_shape,
                      res_ratio, need_weight, interp_psf):
    # TODO(synk): nesvor's PSF-weighted CUDA sampling approximated by trilinear
    # interpolation; `psf` is ignored.
    D, H, W = volume.shape
    vol = volume if vol_mask is None else volume * vol_mask
    zi, yi, xi = _slice_voxel_coords(mats, slice_shape, (D, H, W), res_ratio)
    out = jnp.zeros(zi.shape, jnp.float32)
    for zc, yc, xc, wgt in _corner_iter(zi, yi, xi, D, H, W):
        out = out + wgt * vol[zc, yc, xc]
    out = out[:, None, :, :]
    if slices_mask is not None:
        out = out * slices_mask
    return out


def slice_acquisition_adjoint(mats, psf, slices, slices_mask, vol_mask, vol_shape,
                              res_ratio, need_weight, equalize):
    D, H, W = vol_shape
    s = slices[:, 0]
    if slices_mask is not None:
        s = s * slices_mask[:, 0]
    zi, yi, xi = _slice_voxel_coords(mats, s.shape[1:], (D, H, W), res_ratio)
    vol = jnp.zeros((D, H, W), jnp.float32)
    wsum = jnp.zeros((D, H, W), jnp.float32)
    ones = jnp.ones_like(s) if slices_mask is None else slices_mask[:, 0]
    for zc, yc, xc, wgt in _corner_iter(zi, yi, xi, D, H, W):
        vol = vol.at[zc, yc, xc].add(wgt * s)
        if equalize:
            wsum = wsum.at[zc, yc, xc].add(wgt * ones)
    if equalize:
        vol = vol / jnp.maximum(wsum, 1e-3)
    if vol_mask is not None:
        vol = vol * vol_mask
    return vol


def cg(A, b, x, n_iter, tol):
    # TODO(synk): tol-based early stop omitted (SVoRT uses tol=0 anyway).
    r = b - A(x)
    p = r
    rs = jnp.sum(r * r)
    for _ in range(n_iter):
        Ap = A(p)
        alpha = rs / (jnp.sum(p * Ap) + 1e-12)
        x = x + alpha * p
        r = r - alpha * Ap
        rs_new = jnp.sum(r * r)
        p = r + (rs_new / (rs + 1e-12)) * p
        rs = rs_new
    return x


def gaussian_blur(x, sigma, truncated):
    radius = int(truncated * sigma + 0.5)
    coords = jnp.arange(-radius, radius + 1, dtype=jnp.float32)
    g = jnp.exp(-0.5 * (coords / sigma) ** 2)
    g = g / jnp.sum(g)
    kh = g.reshape(1, 1, -1, 1)
    kw = g.reshape(1, 1, 1, -1)
    dn = ("NCHW", "OIHW", "NCHW")
    x = lax.conv_general_dilated(x, kh, (1, 1), "SAME", dimension_numbers=dn)
    x = lax.conv_general_dilated(x, kw, (1, 1), "SAME", dimension_numbers=dn)
    return x


# ----------------------------------------------------------------------------
# ResNet-style image encoder.
# Convolutions use XLA's native TPU conv (im2col materialization removed per
# perf review); eval-mode BatchNorm scale/shift is folded into the conv weights.
# The final fc goes through the Pallas linear kernel.
# ----------------------------------------------------------------------------

def conv_bn(x, w, g, b, stride=1, relu=True):
    # eval-mode BN (running mean=0, var=1) folded into the conv weights/bias
    wf = w * g[:, None, None, None]
    dn = ("NCHW", "OIHW", "NCHW")
    y = lax.conv_general_dilated(x, wf, (stride, stride), "SAME",
                                 dimension_numbers=dn)
    y = y + b[None, :, None, None]
    if relu:
        y = jax.nn.relu(y)
    return y


def maxpool3x3s2(x):
    return lax.reduce_window(x, -jnp.inf, lax.max, (1, 1, 3, 3), (1, 1, 2, 2), "SAME")


def _w(key, shape, scale=0.02):
    return scale * jax.random.normal(key, shape, jnp.float32)


def init_resnet(key, d_in, d_model, width=64, n_blocks=2):
    ks = iter(jax.random.split(key, 2 + 2 * n_blocks))
    p = {
        "conv1_w": _w(next(ks), (width, d_in, 7, 7), 0.05),
        "bn1_g": jnp.ones((width,), jnp.float32),
        "bn1_b": jnp.zeros((width,), jnp.float32),
        "fc_w": _w(next(ks), (width, d_model)),
        "fc_b": jnp.zeros((d_model,), jnp.float32),
        "blocks": [],
    }
    for _ in range(n_blocks):
        p["blocks"].append({
            "c1": _w(next(ks), (width, width, 3, 3), 0.05),
            "g1": jnp.ones((width,), jnp.float32), "b1": jnp.zeros((width,), jnp.float32),
            "c2": _w(next(ks), (width, width, 3, 3), 0.05),
            "g2": jnp.ones((width,), jnp.float32), "b2": jnp.zeros((width,), jnp.float32),
        })
    return p


def resnet_forward(p, x):
    # TODO(synk): ResNet-50/34 depth reduced to a 2-block residual CNN for this
    # small synthetic demo (stem conv / residual blocks / global pool / fc kept).
    x = conv_bn(x, p["conv1_w"], p["bn1_g"], p["bn1_b"], stride=2, relu=True)
    x = maxpool3x3s2(x)
    for blk in p["blocks"]:
        r = x
        y = conv_bn(x, blk["c1"], blk["g1"], blk["b1"], stride=1, relu=True)
        y = conv_bn(y, blk["c2"], blk["g2"], blk["b2"], stride=1, relu=False)
        x = jax.nn.relu(y + r)
    x = x.mean(axis=(2, 3))
    return pallas_linear(x, p["fc_w"], p["fc_b"])


# ----------------------------------------------------------------------------
# Transformer encoder + positional encoding
# ----------------------------------------------------------------------------

def pos_encoding(pos, d_model):
    # TODO(synk): nesvor's PositionalEncoding module approximated with a fixed
    # sinusoidal encoding summed over the input features.
    half = d_model // 2
    freqs = jnp.exp(-jnp.arange(half, dtype=jnp.float32) * (math.log(10000.0) / half))
    ang = pos[:, :, None].astype(jnp.float32) * freqs[None, None, :]
    pe = jnp.concatenate([jnp.sin(ang), jnp.cos(ang)], axis=-1)
    return pe.sum(axis=1)


def init_encoder(key, n_layers, n_head, d_k, d_model, d_inner):
    layers = []
    for l in range(n_layers):
        ks = jax.random.split(jax.random.fold_in(key, l), 4)
        layers.append({
            "wqkv": _w(ks[0], (d_model, 3 * n_head * d_k)),
            "bqkv": jnp.zeros((3 * n_head * d_k,), jnp.float32),
            "wo": _w(ks[1], (n_head * d_k, d_model)),
            "bo": jnp.zeros((d_model,), jnp.float32),
            "ln1_g": jnp.ones((d_model,), jnp.float32),
            "ln1_b": jnp.zeros((d_model,), jnp.float32),
            "w1": _w(ks[2], (d_model, d_inner)),
            "b1": jnp.zeros((d_inner,), jnp.float32),
            "w2": _w(ks[3], (d_inner, d_model)),
            "b2": jnp.zeros((d_model,), jnp.float32),
            "ln2_g": jnp.ones((d_model,), jnp.float32),
            "ln2_b": jnp.zeros((d_model,), jnp.float32),
        })
    return layers


def encoder_forward(layers, x, pe, n_head, d_k, need_attn=True):
    x = x + pe
    attn = None
    n_layers = len(layers)
    for li, p in enumerate(layers):
        last = (li == n_layers - 1) and need_attn
        x, a = encoder_layer(p, x, n_head, d_k, want_attn=last)
        if last:
            attn = a
    return x, attn


# ----------------------------------------------------------------------------
# SVRtransformer / SRRtransformer / SRR / SVoRT
# ----------------------------------------------------------------------------

def init_svrnet(key, res_d_in, d_model, d_inner, n_head, n_layers, d_out):
    d_k = d_model // n_head
    return {
        "resnet": init_resnet(jax.random.fold_in(key, 0), res_d_in, d_model),
        "enc": init_encoder(jax.random.fold_in(key, 1), n_layers, n_head, d_k,
                            d_model, d_inner),
        "fc_w": _w(jax.random.fold_in(key, 2), (d_model, d_out)),
        "fc_b": jnp.zeros((d_out,), jnp.float32),
        "n_head": n_head, "d_k": d_k, "d_model": d_model, "res_d_in": res_d_in,
    }


def pos_augment(slices, slices_est, res_d_in):
    n, _, h, w = slices.shape
    y = jnp.linspace(-(h - 1) / 256.0, (h - 1) / 256.0, h, dtype=jnp.float32)
    x = jnp.linspace(-(w - 1) / 256.0, (w - 1) / 256.0, w, dtype=jnp.float32)
    yy, xx = jnp.meshgrid(y, x, indexing="ij")
    yg = jnp.broadcast_to(yy[None, None], (n, 1, h, w))
    xg = jnp.broadcast_to(xx[None, None], (n, 1, h, w))
    if slices_est is not None:
        return jnp.concatenate([slices, slices_est, yg, xg], axis=1)
    elif res_d_in == 3:
        return jnp.concatenate([slices, yg, xg], axis=1)
    else:
        return jnp.concatenate([slices, 0.0 * slices, yg, xg], axis=1)


def svrnet_forward(net, theta, slices, pos, volume, pa):
    res_s, res_r = pa["res_s"], pa["res_r"]
    y = None
    if volume is not None:
        mats = mat_update_resolution(point2mat(theta), 1.0, res_r)
        y = slice_acquisition(mats, volume, None, None, pa["psf"], pa["slice_shape"],
                              res_s / res_r, False, False)
    pos_full = jnp.concatenate([theta, pos], axis=-1)
    pe = pos_encoding(pos_full, net["d_model"])
    x_img = pos_augment(slices, y, net["res_d_in"])
    feat = resnet_forward(net["resnet"], x_img)
    feat, attn = encoder_forward(net["enc"], feat, pe, net["n_head"], net["d_k"],
                                 need_attn=True)
    out = pallas_linear(feat, net["fc_w"], net["fc_b"])
    return theta + out * 1.0, attn          # res_scale = 1


def srr_forward(mats, slices, volume, pa, p, slices_mask, vol_mask, n_iter=2):
    ratio = pa["res_s"] / pa["res_r"]

    def A(x):
        return slice_acquisition(mats, x, vol_mask, slices_mask, pa["psf"],
                                 pa["slice_shape"], ratio, False, False)

    def At(x):
        return slice_acquisition_adjoint(mats, pa["psf"], x, slices_mask, vol_mask,
                                         pa["volume_shape"], ratio, False, False)

    def AtA(x):
        s = A(x)
        if p is not None:
            s = s * p
        return At(s)

    b = At(slices * p if p is not None else slices)
    volume = cg(AtA, b, volume, n_iter, 0.0)
    return jax.nn.relu(volume)


def srrnet_forward(net, ax, mats, slices, volume, pa, idx):
    ratio = pa["res_s"] / pa["res_r"]
    mask_stacks = (gaussian_blur(slices, 1.0, 3) > 0).astype(jnp.float32)
    slices_est = slice_acquisition(mats, volume, None, mask_stacks, pa["psf"],
                                   pa["slice_shape"], ratio, False, False)
    idx_full = jnp.concatenate([ax, idx], axis=-1)
    x = jnp.concatenate([slices, slices_est], axis=1)
    pe = pos_encoding(idx_full, net["d_model"])
    feat = resnet_forward(net["resnet"], x)
    feat, _ = encoder_forward(net["enc"], feat, pe, net["n_head"], net["d_k"],
                              need_attn=False)
    score = pallas_linear(feat, net["fc_w"], net["fc_b"])          # (N,1)
    score = jax.nn.softmax(score, axis=0) * score.shape[0]
    score = jnp.minimum(score, 3.0)
    p = score.reshape(-1, 1, 1, 1)
    volume = srr_forward(mats, slices, volume, pa, p, mask_stacks, None, n_iter=2)
    return volume, score


def svort_forward(models, stacks, positions, transforms_ax, pa,
                  n_iter=3, vol=True, iqa=True, pe_flag=True):
    n, _, h, w = stacks.shape
    res_s, res_r = pa["res_s"], pa["res_r"]
    if not pe_flag:
        transforms_ax = transforms_ax * 0
        positions = positions * 0
    mats0 = axisangle_to_mat(transforms_ax)
    theta = mat2point(mats0, w, h, res_s)
    volume = None
    mask_stacks = (gaussian_blur(stacks, 1.0, 3) > 0).astype(jnp.float32)
    thetas, volumes, trans = [], [], []
    attn = None
    for i in range(n_iter):
        theta, attn = svrnet_forward(
            models["svrnet"][i], theta, stacks, positions,
            None if (volume is None or not vol) else volume, pa)
        thetas.append(theta)
        tmat = point2mat(theta)
        trans.append(tmat)
        mat = mat_update_resolution(tmat, 1.0, res_r)
        volume = slice_acquisition_adjoint(mat, pa["psf"], stacks, mask_stacks, None,
                                           pa["volume_shape"], res_s / res_r,
                                           False, True)
        ax = mat2axisangle(tmat)
        ax = ax_update_resolution(ax, 1.0, res_s)
        if iqa:
            volume, _iqa_score = srrnet_forward(models["srrnet"], ax, mat, stacks,
                                                volume, pa, positions)
        volumes.append(volume)
    return trans, volumes, thetas, attn


# ----------------------------------------------------------------------------
# main
# ----------------------------------------------------------------------------

if __name__ == "__main__":
    key = jax.random.PRNGKey(0)
    N, H, W, D = 8, 16, 16, 16

    pa = {
        "psf": jnp.ones((3, 3, 3), jnp.float32) / 27.0,   # ignored (see TODO above)
        "slice_shape": (H, W),
        "res_s": 1.0,
        "res_r": 1.0,
        "volume_shape": (D, H, W),
    }

    k1, k2, k3, k4 = jax.random.split(key, 4)
    stacks = jax.random.uniform(k1, (N, 1, H, W), jnp.float32)
    positions = jax.random.uniform(k2, (N, 2), jnp.float32)
    transforms_ax = 0.1 * jax.random.normal(k3, (N, 6), jnp.float32)

    # TODO(synk): widths halved and transformer depth reduced (d_model 512->256 /
    # 256->128, n_layers 4->2) relative to the original SVoRT for this small demo.
    n_iter = 3
    svrnets = []
    for i in range(n_iter):
        res_d_in = 4 if i > 0 else 3
        svrnets.append(init_svrnet(jax.random.fold_in(k4, i), res_d_in,
                                   d_model=256, d_inner=512, n_head=8,
                                   n_layers=2, d_out=9))
    srrnet = init_svrnet(jax.random.fold_in(k4, 100), 2,
                         d_model=128, d_inner=256, n_head=4, n_layers=2, d_out=1)
    models = {"svrnet": svrnets, "srrnet": srrnet}

    @jax.jit
    def run(stacks, positions, transforms_ax):
        return svort_forward(models, stacks, positions, transforms_ax, pa,
                             n_iter=n_iter)

    trans, volumes, thetas, attn = run(stacks, positions, transforms_ax)
    jax.block_until_ready((trans, volumes, thetas, attn))
    assert all(bool(jnp.all(jnp.isfinite(v))) for v in volumes)
    assert all(bool(jnp.all(jnp.isfinite(t))) for t in thetas)
    assert bool(jnp.all(jnp.isfinite(attn)))
    print("KERNEL_OK")
</pallas_src>

<mosaic_0001>
module attributes {stable_mosaic.version = 11 : i64} {
  func.func private @main(%arg0: i32) attributes {dimension_semantics = [#tpu.dimension_semantics<core_parallel>], iteration_bounds = array<i64: 2>, tpu.core_type = #tpu.core_type<sc_scalar_subcore>, window_params = []} {
    return
  }
}

module attributes {stable_mosaic.version = 11 : i64} {
  func.func private @main(%arg0: i32) attributes {dimension_semantics = [#tpu.dimension_semantics<core_parallel>], iteration_bounds = array<i64: 2>, tpu.core_type = #tpu.core_type<sc_scalar_subcore>, window_params = []} {
    return
  }
}

module attributes {stable_mosaic.version = 11 : i64} {
  func.func @_linear_kernel(%arg0: i32, %arg1: i32, %arg2: memref<8x64xbf16, #tpu.memory_space<vmem>>, %arg3: memref<64x256xbf16, #tpu.memory_space<vmem>>, %arg4: memref<1x256xf32, #tpu.memory_space<vmem>>, %arg5: memref<8x256xf32, #tpu.memory_space<vmem>>) attributes {dimension_semantics = [#tpu.dimension_semantics<parallel>, #tpu.dimension_semantics<parallel>], iteration_bounds = array<i64: 1, 1>, scalar_prefetch = 0 : i64, scratch_operands = 0 : i64, tpu.core_type = #tpu.core_type<tc>, window_params = [{transform_indices = @transform_0, window_bounds = array<i64: 8, 64>}, {transform_indices = @transform_1, window_bounds = array<i64: 64, 256>}, {transform_indices = @transform_2, window_bounds = array<i64: 1, 256>}, {transform_indices = @transform_3, window_bounds = array<i64: 8, 256>}]} {
    %c0 = arith.constant 0 : index
    %c0_0 = arith.constant 0 : index
    %0 = vector.load %arg2[%c0, %c0_0] : memref<8x64xbf16, #tpu.memory_space<vmem>>, vector<8x64xbf16>
    %c0_1 = arith.constant 0 : index
    %c0_2 = arith.constant 0 : index
    %1 = vector.load %arg3[%c0_1, %c0_2] : memref<64x256xbf16, #tpu.memory_space<vmem>>, vector<64x256xbf16>
    %cst = arith.constant dense<0.000000e+00> : vector<8x256xf32>
    %2 = tpu.matmul %0, %1, %cst {dimension_numbers = #tpu.dot_dimension_numbers<[1], [0], [0], [1], [0, 0, 1, 1], [], []>} : vector<8x64xbf16>, vector<64x256xbf16>, vector<8x256xf32> -> vector<8x256xf32>
    %c0_3 = arith.constant 0 : index
    %c0_4 = arith.constant 0 : index
    %3 = vector.load %arg4[%c0_3, %c0_4] : memref<1x256xf32, #tpu.memory_space<vmem>>, vector<1x256xf32>
    %4 = vector.broadcast %3 : vector<1x256xf32> to vector<8x256xf32>
    %5 = arith.addf %2, %4 : vector<8x256xf32>
    %c0_5 = arith.constant 0 : index
    %c0_6 = arith.constant 0 : index
    %6 = vector.load %arg5[%c0_5, %c0_6] : memref<8x256xf32, #tpu.memory_space<vmem>>, vector<8x256xf32>
    tpu.vector_store %arg5[%c0_5, %c0_6], %5 {strides = array<i32>} : memref<8x256xf32, #tpu.memory_space<vmem>>, vector<8x256xf32>,
    return
  }
  func.func @transform_0(%arg0: i32, %arg1: i32) -> (i32, i32) {
    %c0_i32 = arith.constant 0 : i32
    %c0_i32_0 = arith.constant 0 : i32
    return %arg0, %c0_i32 : i32, i32
  }
  func.func @transform_1(%arg0: i32, %arg1: i32) -> (i32, i32) {
    %c0_i32 = arith.constant 0 : i32
    %c0_i32_0 = arith.constant 0 : i32
    return %c0_i32, %arg1 : i32, i32
  }
  func.func @transform_2(%arg0: i32, %arg1: i32) -> (i32, i32) {
    %c0_i32 = arith.constant 0 : i32
    %c0_i32_0 = arith.constant 0 : i32
    return %c0_i32, %arg1 : i32, i32
  }
  func.func @transform_3(%arg0: i32, %arg1: i32) -> (i32, i32) {
    %c0_i32 = arith.constant 0 : i32
    return %arg0, %arg1 : i32, i32
  }
}

module attributes {stable_mosaic.version = 11 : i64} {
  func.func @_encoder_layer_kernel(%arg0: i32, %arg1: memref<8x256xf32, #tpu.memory_space<vmem>>, %arg2: memref<256x768xbf16, #tpu.memory_space<vmem>>, %arg3: memref<1x768xf32, #tpu.memory_space<vmem>>, %arg4: memref<256x256xbf16, #tpu.memory_space<vmem>>, %arg5: memref<1x256xf32, #tpu.memory_space<vmem>>, %arg6: memref<1x256xf32, #tpu.memory_space<vmem>>, %arg7: memref<1x256xf32, #tpu.memory_space<vmem>>, %arg8: memref<256x512xbf16, #tpu.memory_space<vmem>>, %arg9: memref<1x512xf32, #tpu.memory_space<vmem>>, %arg10: memref<512x256xbf16, #tpu.memory_space<vmem>>, %arg11: memref<1x256xf32, #tpu.memory_space<vmem>>, %arg12: memref<1x256xf32, #tpu.memory_space<vmem>>, %arg13: memref<1x256xf32, #tpu.memory_space<vmem>>, %arg14: memref<8x256xf32, #tpu.memory_space<vmem>>) attributes {dimension_semantics = [#tpu.dimension_semantics<arbitrary>], iteration_bounds = array<i64: 1>, scalar_prefetch = 0 : i64, scratch_operands = 0 : i64, tpu.core_type = #tpu.core_type<tc>, window_params = [{pipeline_mode = #tpu.pipeline_mode<synchronous>, transform_indices = @transform_0, window_bounds = array<i64: 8, 256>}, {pipeline_mode = #tpu.pipeline_mode<synchronous>, transform_indices = @transform_1, window_bounds = array<i64: 256, 768>}, {pipeline_mode = #tpu.pipeline_mode<synchronous>, transform_indices = @transform_2, window_bounds = array<i64: 1, 768>}, {pipeline_mode = #tpu.pipeline_mode<synchronous>, transform_indices = @transform_3, window_bounds = array<i64: 256, 256>}, {pipeline_mode = #tpu.pipeline_mode<synchronous>, transform_indices = @transform_4, window_bounds = array<i64: 1, 256>}, {pipeline_mode = #tpu.pipeline_mode<synchronous>, transform_indices = @transform_5, window_bounds = array<i64: 1, 256>}, {pipeline_mode = #tpu.pipeline_mode<synchronous>, transform_indices = @transform_6, window_bounds = array<i64: 1, 256>}, {pipeline_mode = #tpu.pipeline_mode<synchronous>, transform_indices = @transform_7, window_bounds = array<i64: 256, 512>}, {pipeline_mode = #tpu.pipeline_mode<synchronous>, transform_indices = @transform_8, window_bounds = array<i64: 1, 512>}, {pipeline_mode = #tpu.pipeline_mode<synchronous>, transform_indices = @transform_9, window_bounds = array<i64: 512, 256>}, {pipeline_mode = #tpu.pipeline_mode<synchronous>, transform_indices = @transform_10, window_bounds = array<i64: 1, 256>}, {pipeline_mode = #tpu.pipeline_mode<synchronous>, transform_indices = @transform_11, window_bounds = array<i64: 1, 256>}, {pipeline_mode = #tpu.pipeline_mode<synchronous>, transform_indices = @transform_12, window_bounds = array<i64: 1, 256>}, {pipeline_mode = #tpu.pipeline_mode<synchronous>, transform_indices = @transform_13, window_bounds = array<i64: 8, 256>}]} {
    %c0 = arith.constant 0 : index
    %c0_0 = arith.constant 0 : index
    %0 = vector.load %arg1[%c0, %c0_0] : memref<8x256xf32, #tpu.memory_space<vmem>>, vector<8x256xf32>
    %1 = arith.truncf %0 : vector<8x256xf32> to vector<8x256xbf16>
    %c0_1 = arith.constant 0 : index
    %c0_2 = arith.constant 0 : index
    %2 = vector.load %arg2[%c0_1, %c0_2] : memref<256x768xbf16, #tpu.memory_space<vmem>>, vector<256x768xbf16>
    %cst = arith.constant dense<0.000000e+00> : vector<8x768xf32>
    %3 = tpu.matmul %1, %2, %cst {dimension_numbers = #tpu.dot_dimension_numbers<[1], [0], [0], [1], [0, 0, 1, 1], [], []>} : vector<8x256xbf16>, vector<256x768xbf16>, vector<8x768xf32> -> vector<8x768xf32>
    %c0_3 = arith.constant 0 : index
    %c0_4 = arith.constant 0 : index
    %4 = vector.load %arg3[%c0_3, %c0_4] : memref<1x768xf32, #tpu.memory_space<vmem>>, vector<1x768xf32>
    %5 = vector.broadcast %4 : vector<1x768xf32> to vector<8x768xf32>
    %6 = arith.addf %3, %5 : vector<8x768xf32>
    %7 = vector.extract_strided_slice %6 {offsets = [0, 0], sizes = [8, 32], strides = [1, 1]} : vector<8x768xf32> to vector<8x32xf32>
    %8 = vector.extract_strided_slice %6 {offsets = [0, 256], sizes = [8, 32], strides = [1, 1]} : vector<8x768xf32> to vector<8x32xf32>
    %9 = vector.extract_strided_slice %6 {offsets = [0, 512], sizes = [8, 32], strides = [1, 1]} : vector<8x768xf32> to vector<8x32xf32>
    %10 = arith.truncf %7 : vector<8x32xf32> to vector<8x32xbf16>
    %11 = arith.truncf %8 : vector<8x32xf32> to vector<8x32xbf16>
    %cst_5 = arith.constant dense<0.000000e+00> : vector<8x8xf32>
    %12 = tpu.matmul %10, %11, %cst_5 {dimension_numbers = #tpu.dot_dimension_numbers<[1], [1], [0], [0], [0, 0, 1, 0], [], []>} : vector<8x32xbf16>, vector<8x32xbf16>, vector<8x8xf32> -> vector<8x8xf32>
    %cst_6 = arith.constant dense<0xFF800000> : vector<8xf32>
    %13 = vector.multi_reduction <maximumf>, %12, %cst_6 [1] : vector<8x8xf32> to vector<8xf32>
    %14 = vector.shape_cast %13 : vector<8xf32> to vector<8x1xf32>
    %15 = vector.broadcast %14 : vector<8x1xf32> to vector<8x8xf32>
    %16 = arith.subf %12, %15 : vector<8x8xf32>
    %17 = math.exp %16 : vector<8x8xf32>
    %cst_7 = arith.constant dense<0.000000e+00> : vector<8xf32>
    %18 = vector.multi_reduction <add>, %17, %cst_7 [1] : vector<8x8xf32> to vector<8xf32>
    %19 = vector.shape_cast %18 : vector<8xf32> to vector<8x1xf32>
    %20 = vector.broadcast %19 : vector<8x1xf32> to vector<8x8xf32>
    %21 = arith.divf %17, %20 : vector<8x8xf32>
    %22 = arith.truncf %21 : vector<8x8xf32> to vector<8x8xbf16>
    %23 = arith.truncf %9 : vector<8x32xf32> to vector<8x32xbf16>
    %cst_8 = arith.constant dense<0.000000e+00> : vector<8x32xf32>
    %24 = tpu.matmul %22, %23, %cst_8 {dimension_numbers = #tpu.dot_dimension_numbers<[1], [0], [0], [1], [0, 0, 1, 1], [], []>} : vector<8x8xbf16>, vector<8x32xbf16>, vector<8x32xf32> -> vector<8x32xf32>
    %25 = vector.extract_strided_slice %6 {offsets = [0, 32], sizes = [8, 32], strides = [1, 1]} : vector<8x768xf32> to vector<8x32xf32>
    %26 = vector.extract_strided_slice %6 {offsets = [0, 288], sizes = [8, 32], strides = [1, 1]} : vector<8x768xf32> to vector<8x32xf32>
    %27 = vector.extract_strided_slice %6 {offsets = [0, 544], sizes = [8, 32], strides = [1, 1]} : vector<8x768xf32> to vector<8x32xf32>
    %28 = arith.truncf %25 : vector<8x32xf32> to vector<8x32xbf16>
    %29 = arith.truncf %26 : vector<8x32xf32> to vector<8x32xbf16>
    %cst_9 = arith.constant dense<0.000000e+00> : vector<8x8xf32>
    %30 = tpu.matmul %28, %29, %cst_9 {dimension_numbers = #tpu.dot_dimension_numbers<[1], [1], [0], [0], [0, 0, 1, 0], [], []>} : vector<8x32xbf16>, vector<8x32xbf16>, vector<8x8xf32> -> vector<8x8xf32>
    %cst_10 = arith.constant dense<0xFF800000> : vector<8xf32>
    %31 = vector.multi_reduction <maximumf>, %30, %cst_10 [1] : vector<8x8xf32> to vector<8xf32>
    %32 = vector.shape_cast %31 : vector<8xf32> to vector<8x1xf32>
    %33 = vector.broadcast %32 : vector<8x1xf32> to vector<8x8xf32>
    %34 = arith.subf %30, %33 : vector<8x8xf32>
    %35 = math.exp %34 : vector<8x8xf32>
    %cst_11 = arith.constant dense<0.000000e+00> : vector<8xf32>
    %36 = vector.multi_reduction <add>, %35, %cst_11 [1] : vector<8x8xf32> to vector<8xf32>
    %37 = vector.shape_cast %36 : vector<8xf32> to vector<8x1xf32>
    %38 = vector.broadcast %37 : vector<8x1xf32> to vector<8x8xf32>
    %39 = arith.divf %35, %38 : vector<8x8xf32>
    %40 = arith.truncf %39 : vector<8x8xf32> to vector<8x8xbf16>
    %41 = arith.truncf %27 : vector<8x32xf32> to vector<8x32xbf16>
    %cst_12 = arith.constant dense<0.000000e+00> : vector<8x32xf32>
    %42 = tpu.matmul %40, %41, %cst_12 {dimension_numbers = #tpu.dot_dimension_numbers<[1], [0], [0], [1], [0, 0, 1, 1], [], []>} : vector<8x8xbf16>, vector<8x32xbf16>, vector<8x32xf32> -> vector<8x32xf32>
    %43 = vector.extract_strided_slice %6 {offsets = [0, 64], sizes = [8, 32], strides = [1, 1]} : vector<8x768xf32> to vector<8x32xf32>
    %44 = vector.extract_strided_slice %6 {offsets = [0, 320], sizes = [8, 32], strides = [1, 1]} : vector<8x768xf32> to vector<8x32xf32>
    %45 = vector.extract_strided_slice %6 {offsets = [0, 576], sizes = [8, 32], strides = [1, 1]} : vector<8x768xf32> to vector<8x32xf32>
    %46 = arith.truncf %43 : vector<8x32xf32> to vector<8x32xbf16>
    %47 = arith.truncf %44 : vector<8x32xf32> to vector<8x32xbf16>
    %cst_13 = arith.constant dense<0.000000e+00> : vector<8x8xf32>
    %48 = tpu.matmul %46, %47, %cst_13 {dimension_numbers = #tpu.dot_dimension_numbers<[1], [1], [0], [0], [0, 0, 1, 0], [], []>} : vector<8x32xbf16>, vector<8x32xbf16>, vector<8x8xf32> -> vector<8x8xf32>
    %cst_14 = arith.constant dense<0xFF800000> : vector<8xf32>
    %49 = vector.multi_reduction <maximumf>, %48, %cst_14 [1] : vector<8x8xf32> to vector<8xf32>
    %50 = vector.shape_cast %49 : vector<8xf32> to vector<8x1xf32>
    %51 = vector.broadcast %50 : vector<8x1xf32> to vector<8x8xf32>
    %52 = arith.subf %48, %51 : vector<8x8xf32>
    %53 = math.exp %52 : vector<8x8xf32>
    %cst_15 = arith.constant dense<0.000000e+00> : vector<8xf32>
    %54 = vector.multi_reduction <add>, %53, %cst_15 [1] : vector<8x8xf32> to vector<8xf32>
    %55 = vector.shape_cast %54 : vector<8xf32> to vector<8x1xf32>
    %56 = vector.broadcast %55 : vector<8x1xf32> to vector<8x8xf32>
    %57 = arith.divf %53, %56 : vector<8x8xf32>
    %58 = arith.truncf %57 : vector<8x8xf32> to vector<8x8xbf16>
    %59 = arith.truncf %45 : vector<8x32xf32> to vector<8x32xbf16>
    %cst_16 = arith.constant dense<0.000000e+00> : vector<8x32xf32>
    %60 = tpu.matmul %58, %59, %cst_16 {dimension_numbers = #tpu.dot_dimension_numbers<[1], [0], [0], [1], [0, 0, 1, 1], [], []>} : vector<8x8xbf16>, vector<8x32xbf16>, vector<8x32xf32> -> vector<8x32xf32>
    %61 = vector.extract_strided_slice %6 {offsets = [0, 96], sizes = [8, 32], strides = [1, 1]} : vector<8x768xf32> to vector<8x32xf32>
    %62 = vector.extract_strided_slice %6 {offsets = [0, 352], sizes = [8, 32], strides = [1, 1]} : vector<8x768xf32> to vector<8x32xf32>
    %63 = vector.extract_strided_slice %6 {offsets = [0, 608], sizes = [8, 32], strides = [1, 1]} : vector<8x768xf32> to vector<8x32xf32>
    %64 = arith.truncf %61 : vector<8x32xf32> to vector<8x32xbf16>
    %65 = arith.truncf %62 : vector<8x32xf32> to vector<8x32xbf16>
    %cst_17 = arith.constant dense<0.000000e+00> : vector<8x8xf32>
    %66 = tpu.matmul %64, %65, %cst_17 {dimension_numbers = #tpu.dot_dimension_numbers<[1], [1], [0], [0], [0, 0, 1, 0], [], []>} : vector<8x32xbf16>, vector<8x32xbf16>, vector<8x8xf32> -> vector<8x8xf32>
    %cst_18 = arith.constant dense<0xFF800000> : vector<8xf32>
    %67 = vector.multi_reduction <maximumf>, %66, %cst_18 [1] : vector<8x8xf32> to vector<8xf32>
    %68 = vector.shape_cast %67 : vector<8xf32> to vector<8x1xf32>
    %69 = vector.broadcast %68 : vector<8x1xf32> to vector<8x8xf32>
    %70 = arith.subf %66, %69 : vector<8x8xf32>
    %71 = math.exp %70 : vector<8x8xf32>
    %cst_19 = arith.constant dense<0.000000e+00> : vector<8xf32>
    %72 = vector.multi_reduction <add>, %71, %cst_19 [1] : vector<8x8xf32> to vector<8xf32>
    %73 = vector.shape_cast %72 : vector<8xf32> to vector<8x1xf32>
    %74 = vector.broadcast %73 : vector<8x1xf32> to vector<8x8xf32>
    %75 = arith.divf %71, %74 : vector<8x8xf32>
    %76 = arith.truncf %75 : vector<8x8xf32> to vector<8x8xbf16>
    %77 = arith.truncf %63 : vector<8x32xf32> to vector<8x32xbf16>
    %cst_20 = arith.constant dense<0.000000e+00> : vector<8x32xf32>
    %78 = tpu.matmul %76, %77, %cst_20 {dimension_numbers = #tpu.dot_dimension_numbers<[1], [0], [0], [1], [0, 0, 1, 1], [], []>} : vector<8x8xbf16>, vector<8x32xbf16>, vector<8x32xf32> -> vector<8x32xf32>
    %79 = vector.extract_strided_slice %6 {offsets = [0, 128], sizes = [8, 32], strides = [1, 1]} : vector<8x768xf32> to vector<8x32xf32>
    %80 = vector.extract_strided_slice %6 {offsets = [0, 384], sizes = [8, 32], strides = [1, 1]} : vector<8x768xf32> to vector<8x32xf32>
    %81 = vector.extract_strided_slice %6 {offsets = [0, 640], sizes = [8, 32], strides = [1, 1]} : vector<8x768xf32> to vector<8x32xf32>
    %82 = arith.truncf %79 : vector<8x32xf32> to vector<8x32xbf16>
    %83 = arith.truncf %80 : vector<8x32xf32> to vector<8x32xbf16>
    %cst_21 = arith.constant dense<0.000000e+00> : vector<8x8xf32>
    %84 = tpu.matmul %82, %83, %cst_21 {dimension_numbers = #tpu.dot_dimension_numbers<[1], [1], [0], [0], [0, 0, 1, 0], [], []>} : vector<8x32xbf16>, vector<8x32xbf16>, vector<8x8xf32> -> vector<8x8xf32>
    %cst_22 = arith.constant dense<0xFF800000> : vector<8xf32>
    %85 = vector.multi_reduction <maximumf>, %84, %cst_22 [1] : vector<8x8xf32> to vector<8xf32>
    %86 = vector.shape_cast %85 : vector<8xf32> to vector<8x1xf32>
    %87 = vector.broadcast %86 : vector<8x1xf32> to vector<8x8xf32>
    %88 = arith.subf %84, %87 : vector<8x8xf32>
    %89 = math.exp %88 : vector<8x8xf32>
    %cst_23 = arith.constant dense<0.000000e+00> : vector<8xf32>
    %90 = vector.multi_reduction <add>, %89, %cst_23 [1] : vector<8x8xf32> to vector<8xf32>
    %91 = vector.shape_cast %90 : vector<8xf32> to vector<8x1xf32>
    %92 = vector.broadcast %91 : vector<8x1xf32> to vector<8x8xf32>
    %93 = arith.divf %89, %92 : vector<8x8xf32>
    %94 = arith.truncf %93 : vector<8x8xf32> to vector<8x8xbf16>
    %95 = arith.truncf %81 : vector<8x32xf32> to vector<8x32xbf16>
    %cst_24 = arith.constant dense<0.000000e+00> : vector<8x32xf32>
    %96 = tpu.matmul %94, %95, %cst_24 {dimension_numbers = #tpu.dot_dimension_numbers<[1], [0], [0], [1], [0, 0, 1, 1], [], []>} : vector<8x8xbf16>, vector<8x32xbf16>, vector<8x32xf32> -> vector<8x32xf32>
    %97 = vector.extract_strided_slice %6 {offsets = [0, 160], sizes = [8, 32], strides = [1, 1]} : vector<8x768xf32> to vector<8x32xf32>
    %98 = vector.extract_strided_slice %6 {offsets = [0, 416], sizes = [8, 32], strides = [1, 1]} : vector<8x768xf32> to vector<8x32xf32>
    %99 = vector.extract_strided_slice %6 {offsets = [0, 672], sizes = [8, 32], strides = [1, 1]} : vector<8x768xf32> to vector<8x32xf32>
    %100 = arith.truncf %97 : vector<8x32xf32> to vector<8x32xbf16>
    %101 = arith.truncf %98 : vector<8x32xf32> to vector<8x32xbf16>
    %cst_25 = arith.constant dense<0.000000e+00> : vector<8x8xf32>
    %102 = tpu.matmul %100, %101, %cst_25 {dimension_numbers = #tpu.dot_dimension_numbers<[1], [1], [0], [0], [0, 0, 1, 0], [], []>} : vector<8x32xbf16>, vector<8x32xbf16>, vector<8x8xf32> -> vector<8x8xf32>
    %cst_26 = arith.constant dense<0xFF800000> : vector<8xf32>
    %103 = vector.multi_reduction <maximumf>, %102, %cst_26 [1] : vector<8x8xf32> to vector<8xf32>
    %104 = vector.shape_cast %103 : vector<8xf32> to vector<8x1xf32>
    %105 = vector.broadcast %104 : vector<8x1xf32> to vector<8x8xf32>
    %106 = arith.subf %102, %105 : vector<8x8xf32>
    %107 = math.exp %106 : vector<8x8xf32>
    %cst_27 = arith.constant dense<0.000000e+00> : vector<8xf32>
    %108 = vector.multi_reduction <add>, %107, %cst_27 [1] : vector<8x8xf32> to vector<8xf32>
    %109 = vector.shape_cast %108 : vector<8xf32> to vector<8x1xf32>
    %110 = vector.broadcast %109 : vector<8x1xf32> to vector<8x8xf32>
    %111 = arith.divf %107, %110 : vector<8x8xf32>
    %112 = arith.truncf %111 : vector<8x8xf32> to vector<8x8xbf16>
    %113 = arith.truncf %99 : vector<8x32xf32> to vector<8x32xbf16>
    %cst_28 = arith.constant dense<0.000000e+00> : vector<8x32xf32>
    %114 = tpu.matmul %112, %113, %cst_28 {dimension_numbers = #tpu.dot_dimension_numbers<[1], [0], [0], [1], [0, 0, 1, 1], [], []>} : vector<8x8xbf16>, vector<8x32xbf16>, vector<8x32xf32> -> vector<8x32xf32>
    %115 = vector.extract_strided_slice %6 {offsets = [0, 192], sizes = [8, 32], strides = [1, 1]} : vector<8x768xf32> to vector<8x32xf32>
    %116 = vector.extract_strided_slice %6 {offsets = [0, 448], sizes = [8, 32], strides = [1, 1]} : vector<8x768xf32> to vector<8x32xf32>
    %117 = vector.extract_strided_slice %6 {offsets = [0, 704], sizes = [8, 32], strides = [1, 1]} : vector<8x768xf32> to vector<8x32xf32>
    %118 = arith.truncf %115 : vector<8x32xf32> to vector<8x32xbf16>
    %119 = arith.truncf %116 : vector<8x32xf32> to vector<8x32xbf16>
    %cst_29 = arith.constant dense<0.000000e+00> : vector<8x8xf32>
    %120 = tpu.matmul %118, %119, %cst_29 {dimension_numbers = #tpu.dot_dimension_numbers<[1], [1], [0], [0], [0, 0, 1, 0], [], []>} : vector<8x32xbf16>, vector<8x32xbf16>, vector<8x8xf32> -> vector<8x8xf32>
    %cst_30 = arith.constant dense<0xFF800000> : vector<8xf32>
    %121 = vector.multi_reduction <maximumf>, %120, %cst_30 [1] : vector<8x8xf32> to vector<8xf32>
    %122 = vector.shape_cast %121 : vector<8xf32> to vector<8x1xf32>
    %123 = vector.broadcast %122 : vector<8x1xf32> to vector<8x8xf32>
    %124 = arith.subf %120, %123 : vector<8x8xf32>
    %125 = math.exp %124 : vector<8x8xf32>
    %cst_31 = arith.constant dense<0.000000e+00> : vector<8xf32>
    %126 = vector.multi_reduction <add>, %125, %cst_31 [1] : vector<8x8xf32> to vector<8xf32>
    %127 = vector.shape_cast %126 : vector<8xf32> to vector<8x1xf32>
    %128 = vector.broadcast %127 : vector<8x1xf32> to vector<8x8xf32>
    %129 = arith.divf %125, %128 : vector<8x8xf32>
    %130 = arith.truncf %129 : vector<8x8xf32> to vector<8x8xbf16>
    %131 = arith.truncf %117 : vector<8x32xf32> to vector<8x32xbf16>
    %cst_32 = arith.constant dense<0.000000e+00> : vector<8x32xf32>
    %132 = tpu.matmul %130, %131, %cst_32 {dimension_numbers = #tpu.dot_dimension_numbers<[1], [0], [0], [1], [0, 0, 1, 1], [], []>} : vector<8x8xbf16>, vector<8x32xbf16>, vector<8x32xf32> -> vector<8x32xf32>
    %133 = vector.extract_strided_slice %6 {offsets = [0, 224], sizes = [8, 32], strides = [1, 1]} : vector<8x768xf32> to vector<8x32xf32>
    %134 = vector.extract_strided_slice %6 {offsets = [0, 480], sizes = [8, 32], strides = [1, 1]} : vector<8x768xf32> to vector<8x32xf32>
    %135 = vector.extract_strided_slice %6 {offsets = [0, 736], sizes = [8, 32], strides = [1, 1]} : vector<8x768xf32> to vector<8x32xf32>
    %136 = arith.truncf %133 : vector<8x32xf32> to vector<8x32xbf16>
    %137 = arith.truncf %134 : vector<8x32xf32> to vector<8x32xbf16>
    %cst_33 = arith.constant dense<0.000000e+00> : vector<8x8xf32>
    %138 = tpu.matmul %136, %137, %cst_33 {dimension_numbers = #tpu.dot_dimension_numbers<[1], [1], [0], [0], [0, 0, 1, 0], [], []>} : vector<8x32xbf16>, vector<8x32xbf16>, vector<8x8xf32> -> vector<8x8xf32>
    %cst_34 = arith.constant dense<0xFF800000> : vector<8xf32>
    %139 = vector.multi_reduction <maximumf>, %138, %cst_34 [1] : vector<8x8xf32> to vector<8xf32>
    %140 = vector.shape_cast %139 : vector<8xf32> to vector<8x1xf32>
    %141 = vector.broadcast %140 : vector<8x1xf32> to vector<8x8xf32>
    %142 = arith.subf %138, %141 : vector<8x8xf32>
    %143 = math.exp %142 : vector<8x8xf32>
    %cst_35 = arith.constant dense<0.000000e+00> : vector<8xf32>
    %144 = vector.multi_reduction <add>, %143, %cst_35 [1] : vector<8x8xf32> to vector<8xf32>
    %145 = vector.shape_cast %144 : vector<8xf32> to vector<8x1xf32>
    %146 = vector.broadcast %145 : vector<8x1xf32> to vector<8x8xf32>
    %147 = arith.divf %143, %146 : vector<8x8xf32>
    %148 = arith.truncf %147 : vector<8x8xf32> to vector<8x8xbf16>
    %149 = arith.truncf %135 : vector<8x32xf32> to vector<8x32xbf16>
    %cst_36 = arith.constant dense<0.000000e+00> : vector<8x32xf32>
    %150 = tpu.matmul %148, %149, %cst_36 {dimension_numbers = #tpu.dot_dimension_numbers<[1], [0], [0], [1], [0, 0, 1, 1], [], []>} : vector<8x8xbf16>, vector<8x32xbf16>, vector<8x32xf32> -> vector<8x32xf32>
    %151 = tpu.concatenate %24, %42, %60, %78, %96, %114, %132, %150 in 1 : vector<8x32xf32>, vector<8x32xf32>, vector<8x32xf32>, vector<8x32xf32>, vector<8x32xf32>, vector<8x32xf32>, vector<8x32xf32>, vector<8x32xf32> -> vector<8x256xf32>
    %152 = arith.truncf %151 : vector<8x256xf32> to vector<8x256xbf16>
    %c0_37 = arith.constant 0 : index
    %c0_38 = arith.constant 0 : index
    %153 = vector.load %arg4[%c0_37, %c0_38] : memref<256x256xbf16, #tpu.memory_space<vmem>>, vector<256x256xbf16>
    %cst_39 = arith.constant dense<0.000000e+00> : vector<8x256xf32>
    %154 = tpu.matmul %152, %153, %cst_39 {dimension_numbers = #tpu.dot_dimension_numbers<[1], [0], [0], [1], [0, 0, 1, 1], [], []>} : vector<8x256xbf16>, vector<256x256xbf16>, vector<8x256xf32> -> vector<8x256xf32>
    %c0_40 = arith.constant 0 : index
    %c0_41 = arith.constant 0 : index
    %155 = vector.load %arg5[%c0_40, %c0_41] : memref<1x256xf32, #tpu.memory_space<vmem>>, vector<1x256xf32>
    %156 = vector.broadcast %155 : vector<1x256xf32> to vector<8x256xf32>
    %157 = arith.addf %154, %156 : vector<8x256xf32>
    %158 = arith.addf %157, %0 : vector<8x256xf32>
    %cst_42 = arith.constant dense<0.000000e+00> : vector<8xf32>
    %159 = vector.multi_reduction <add>, %158, %cst_42 [1] : vector<8x256xf32> to vector<8xf32>
    %160 = vector.shape_cast %159 : vector<8xf32> to vector<8x1xf32>
    %cst_43 = arith.constant 2.560000e+02 : f32
    %161 = vector.broadcast %cst_43 : f32 to vector<8x1xf32>
    %162 = arith.divf %160, %161 : vector<8x1xf32>
    %163 = vector.broadcast %162 : vector<8x1xf32> to vector<8x256xf32>
    %164 = arith.subf %158, %163 : vector<8x256xf32>
    %165 = arith.mulf %164, %164 : vector<8x256xf32>
    %cst_44 = arith.constant dense<0.000000e+00> : vector<8xf32>
    %166 = vector.multi_reduction <add>, %165, %cst_44 [1] : vector<8x256xf32> to vector<8xf32>
    %167 = vector.shape_cast %166 : vector<8xf32> to vector<8x1xf32>
    %cst_45 = arith.constant 2.560000e+02 : f32
    %168 = vector.broadcast %cst_45 : f32 to vector<8x1xf32>
    %169 = arith.divf %167, %168 : vector<8x1xf32>
    %cst_46 = arith.constant 9.99999974E-6 : f32
    %170 = vector.broadcast %cst_46 : f32 to vector<8x1xf32>
    %171 = arith.addf %169, %170 : vector<8x1xf32>
    %172 = math.rsqrt %171 : vector<8x1xf32>
    %173 = vector.broadcast %172 : vector<8x1xf32> to vector<8x256xf32>
    %174 = arith.mulf %164, %173 : vector<8x256xf32>
    %c0_47 = arith.constant 0 : index
    %c0_48 = arith.constant 0 : index
    %175 = vector.load %arg6[%c0_47, %c0_48] : memref<1x256xf32, #tpu.memory_space<vmem>>, vector<1x256xf32>
    %176 = vector.broadcast %175 : vector<1x256xf32> to vector<8x256xf32>
    %177 = arith.mulf %174, %176 : vector<8x256xf32>
    %c0_49 = arith.constant 0 : index
    %c0_50 = arith.constant 0 : index
    %178 = vector.load %arg7[%c0_49, %c0_50] : memref<1x256xf32, #tpu.memory_space<vmem>>, vector<1x256xf32>
    %179 = vector.broadcast %178 : vector<1x256xf32> to vector<8x256xf32>
    %180 = arith.addf %177, %179 : vector<8x256xf32>
    %181 = arith.truncf %180 : vector<8x256xf32> to vector<8x256xbf16>
    %c0_51 = arith.constant 0 : index
    %c0_52 = arith.constant 0 : index
    %182 = vector.load %arg8[%c0_51, %c0_52] : memref<256x512xbf16, #tpu.memory_space<vmem>>, vector<256x512xbf16>
    %cst_53 = arith.constant dense<0.000000e+00> : vector<8x512xf32>
    %183 = tpu.matmul %181, %182, %cst_53 {dimension_numbers = #tpu.dot_dimension_numbers<[1], [0], [0], [1], [0, 0, 1, 1], [], []>} : vector<8x256xbf16>, vector<256x512xbf16>, vector<8x512xf32> -> vector<8x512xf32>
    %c0_54 = arith.constant 0 : index
    %c0_55 = arith.constant 0 : index
    %184 = vector.load %arg9[%c0_54, %c0_55] : memref<1x512xf32, #tpu.memory_space<vmem>>, vector<1x512xf32>
    %185 = vector.broadcast %184 : vector<1x512xf32> to vector<8x512xf32>
    %186 = arith.addf %183, %185 : vector<8x512xf32>
    %cst_56 = arith.constant 0.000000e+00 : f32
    %187 = vector.broadcast %cst_56 : f32 to vector<8x512xf32>
    %188 = arith.maximumf %186, %187 : vector<8x512xf32>
    %189 = arith.truncf %188 : vector<8x512xf32> to vector<8x512xbf16>
    %c0_57 = arith.constant 0 : index
    %c0_58 = arith.constant 0 : index
    %190 = vector.load %arg10[%c0_57, %c0_58] : memref<512x256xbf16, #tpu.memory_space<vmem>>, vector<512x256xbf16>
    %cst_59 = arith.constant dense<0.000000e+00> : vector<8x256xf32>
    %191 = tpu.matmul %189, %190, %cst_59 {dimension_numbers = #tpu.dot_dimension_numbers<[1], [0], [0], [1], [0, 0, 1, 1], [], []>} : vector<8x512xbf16>, vector<512x256xbf16>, vector<8x256xf32> -> vector<8x256xf32>
    %c0_60 = arith.constant 0 : index
    %c0_61 = arith.constant 0 : index
    %192 = vector.load %arg11[%c0_60, %c0_61] : memref<1x256xf32, #tpu.memory_space<vmem>>, vector<1x256xf32>
    %193 = vector.broadcast %192 : vector<1x256xf32> to vector<8x256xf32>
    %194 = arith.addf %191, %193 : vector<8x256xf32>
    %195 = arith.addf %194, %180 : vector<8x256xf32>
    %cst_62 = arith.constant dense<0.000000e+00> : vector<8xf32>
    %196 = vector.multi_reduction <add>, %195, %cst_62 [1] : vector<8x256xf32> to vector<8xf32>
    %197 = vector.shape_cast %196 : vector<8xf32> to vector<8x1xf32>
    %cst_63 = arith.constant 2.560000e+02 : f32
    %198 = vector.broadcast %cst_63 : f32 to vector<8x1xf32>
    %199 = arith.divf %197, %198 : vector<8x1xf32>
    %200 = vector.broadcast %199 : vector<8x1xf32> to vector<8x256xf32>
    %201 = arith.subf %195, %200 : vector<8x256xf32>
    %202 = arith.mulf %201, %201 : vector<8x256xf32>
    %cst_64 = arith.constant dense<0.000000e+00> : vector<8xf32>
    %203 = vector.multi_reduction <add>, %202, %cst_64 [1] : vector<8x256xf32> to vector<8xf32>
    %204 = vector.shape_cast %203 : vector<8xf32> to vector<8x1xf32>
    %cst_65 = arith.constant 2.560000e+02 : f32
    %205 = vector.broadcast %cst_65 : f32 to vector<8x1xf32>
    %206 = arith.divf %204, %205 : vector<8x1xf32>
    %cst_66 = arith.constant 9.99999974E-6 : f32
    %207 = vector.broadcast %cst_66 : f32 to vector<8x1xf32>
    %208 = arith.addf %206, %207 : vector<8x1xf32>
    %209 = math.rsqrt %208 : vector<8x1xf32>
    %210 = vector.broadcast %209 : vector<8x1xf32> to vector<8x256xf32>
    %211 = arith.mulf %201, %210 : vector<8x256xf32>
    %c0_67 = arith.constant 0 : index
    %c0_68 = arith.constant 0 : index
    %212 = vector.load %arg12[%c0_67, %c0_68] : memref<1x256xf32, #tpu.memory_space<vmem>>, vector<1x256xf32>
    %213 = vector.broadcast %212 : vector<1x256xf32> to vector<8x256xf32>
    %214 = arith.mulf %211, %213 : vector<8x256xf32>
    %c0_69 = arith.constant 0 : index
    %c0_70 = arith.constant 0 : index
    %215 = vector.load %arg13[%c0_69, %c0_70] : memref<1x256xf32, #tpu.memory_space<vmem>>, vector<1x256xf32>
    %216 = vector.broadcast %215 : vector<1x256xf32> to vector<8x256xf32>
    %217 = arith.addf %214, %216 : vector<8x256xf32>
    %c0_71 = arith.constant 0 : index
    %c0_72 = arith.constant 0 : index
    %218 = vector.load %arg14[%c0_71, %c0_72] : memref<8x256xf32, #tpu.memory_space<vmem>>, vector<8x256xf32>
    tpu.vector_store %arg14[%c0_71, %c0_72], %217 {strides = array<i32>} : memref<8x256xf32, #tpu.memory_space<vmem>>, vector<8x256xf32>,
    return
  }
  func.func @transform_0(%arg0: i32) -> (i32, i32) {
    %c0_i32 = arith.constant 0 : i32
    %c0_i32_0 = arith.constant 0 : i32
    %c0_i32_1 = arith.constant 0 : i32
    return %c0_i32, %c0_i32_0 : i32, i32
  }
  func.func @transform_1(%arg0: i32) -> (i32, i32) {
    %c0_i32 = arith.constant 0 : i32
    %c0_i32_0 = arith.constant 0 : i32
    %c0_i32_1 = arith.constant 0 : i32
    return %c0_i32, %c0_i32_0 : i32, i32
  }
  func.func @transform_2(%arg0: i32) -> (i32, i32) {
    %c0_i32 = arith.constant 0 : i32
    %c0_i32_0 = arith.constant 0 : i32
    %c0_i32_1 = arith.constant 0 : i32
    return %c0_i32, %c0_i32_0 : i32, i32
  }
  func.func @transform_3(%arg0: i32) -> (i32, i32) {
    %c0_i32 = arith.constant 0 : i32
    %c0_i32_0 = arith.constant 0 : i32
    %c0_i32_1 = arith.constant 0 : i32
    return %c0_i32, %c0_i32_0 : i32, i32
  }
  func.func @transform_4(%arg0: i32) -> (i32, i32) {
    %c0_i32 = arith.constant 0 : i32
    %c0_i32_0 = arith.constant 0 : i32
    %c0_i32_1 = arith.constant 0 : i32
    return %c0_i32, %c0_i32_0 : i32, i32
  }
  func.func @transform_5(%arg0: i32) -> (i32, i32) {
    %c0_i32 = arith.constant 0 : i32
    %c0_i32_0 = arith.constant 0 : i32
    %c0_i32_1 = arith.constant 0 : i32
    return %c0_i32, %c0_i32_0 : i32, i32
  }
  func.func @transform_6(%arg0: i32) -> (i32, i32) {
    %c0_i32 = arith.constant 0 : i32
    %c0_i32_0 = arith.constant 0 : i32
    %c0_i32_1 = arith.constant 0 : i32
    return %c0_i32, %c0_i32_0 : i32, i32
  }
  func.func @transform_7(%arg0: i32) -> (i32, i32) {
    %c0_i32 = arith.constant 0 : i32
    %c0_i32_0 = arith.constant 0 : i32
    %c0_i32_1 = arith.constant 0 : i32
    return %c0_i32, %c0_i32_0 : i32, i32
  }
  func.func @transform_8(%arg0: i32) -> (i32, i32) {
    %c0_i32 = arith.constant 0 : i32
    %c0_i32_0 = arith.constant 0 : i32
    %c0_i32_1 = arith.constant 0 : i32
    return %c0_i32, %c0_i32_0 : i32, i32
  }
  func.func @transform_9(%arg0: i32) -> (i32, i32) {
    %c0_i32 = arith.constant 0 : i32
    %c0_i32_0 = arith.constant 0 : i32
    %c0_i32_1 = arith.constant 0 : i32
    return %c0_i32, %c0_i32_0 : i32, i32
  }
  func.func @transform_10(%arg0: i32) -> (i32, i32) {
    %c0_i32 = arith.constant 0 : i32
    %c0_i32_0 = arith.constant 0 : i32
    %c0_i32_1 = arith.constant 0 : i32
    return %c0_i32, %c0_i32_0 : i32, i32
  }
  func.func @transform_11(%arg0: i32) -> (i32, i32) {
    %c0_i32 = arith.constant 0 : i32
    %c0_i32_0 = arith.constant 0 : i32
    %c0_i32_1 = arith.constant 0 : i32
    return %c0_i32, %c0_i32_0 : i32, i32
  }
  func.func @transform_12(%arg0: i32) -> (i32, i32) {
    %c0_i32 = arith.constant 0 : i32
    %c0_i32_0 = arith.constant 0 : i32
    %c0_i32_1 = arith.constant 0 : i32
    return %c0_i32, %c0_i32_0 : i32, i32
  }
  func.func @transform_13(%arg0: i32) -> (i32, i32) {
    %c0_i32 = arith.constant 0 : i32
    %c0_i32_0 = arith.constant 0 : i32
    %c0_i32_1 = arith.constant 0 : i32
    return %c0_i32, %c0_i32_0 : i32, i32
  }
}

module attributes {stable_mosaic.version = 11 : i64} {
  func.func @_encoder_layer_kernel(%arg0: i32, %arg1: memref<8x256xf32, #tpu.memory_space<vmem>>, %arg2: memref<256x768xbf16, #tpu.memory_space<vmem>>, %arg3: memref<1x768xf32, #tpu.memory_space<vmem>>, %arg4: memref<256x256xbf16, #tpu.memory_space<vmem>>, %arg5: memref<1x256xf32, #tpu.memory_space<vmem>>, %arg6: memref<1x256xf32, #tpu.memory_space<vmem>>, %arg7: memref<1x256xf32, #tpu.memory_space<vmem>>, %arg8: memref<256x512xbf16, #tpu.memory_space<vmem>>, %arg9: memref<1x512xf32, #tpu.memory_space<vmem>>, %arg10: memref<512x256xbf16, #tpu.memory_space<vmem>>, %arg11: memref<1x256xf32, #tpu.memory_space<vmem>>, %arg12: memref<1x256xf32, #tpu.memory_space<vmem>>, %arg13: memref<1x256xf32, #tpu.memory_space<vmem>>, %arg14: memref<8x256xf32, #tpu.memory_space<vmem>>, %arg15: memref<8x8x8xf32, #tpu.memory_space<vmem>>) attributes {dimension_semantics = [#tpu.dimension_semantics<arbitrary>], iteration_bounds = array<i64: 1>, scalar_prefetch = 0 : i64, scratch_operands = 0 : i64, tpu.core_type = #tpu.core_type<tc>, window_params = [{pipeline_mode = #tpu.pipeline_mode<synchronous>, transform_indices = @transform_0, window_bounds = array<i64: 8, 256>}, {pipeline_mode = #tpu.pipeline_mode<synchronous>, transform_indices = @transform_1, window_bounds = array<i64: 256, 768>}, {pipeline_mode = #tpu.pipeline_mode<synchronous>, transform_indices = @transform_2, window_bounds = array<i64: 1, 768>}, {pipeline_mode = #tpu.pipeline_mode<synchronous>, transform_indices = @transform_3, window_bounds = array<i64: 256, 256>}, {pipeline_mode = #tpu.pipeline_mode<synchronous>, transform_indices = @transform_4, window_bounds = array<i64: 1, 256>}, {pipeline_mode = #tpu.pipeline_mode<synchronous>, transform_indices = @transform_5, window_bounds = array<i64: 1, 256>}, {pipeline_mode = #tpu.pipeline_mode<synchronous>, transform_indices = @transform_6, window_bounds = array<i64: 1, 256>}, {pipeline_mode = #tpu.pipeline_mode<synchronous>, transform_indices = @transform_7, window_bounds = array<i64: 256, 512>}, {pipeline_mode = #tpu.pipeline_mode<synchronous>, transform_indices = @transform_8, window_bounds = array<i64: 1, 512>}, {pipeline_mode = #tpu.pipeline_mode<synchronous>, transform_indices = @transform_9, window_bounds = array<i64: 512, 256>}, {pipeline_mode = #tpu.pipeline_mode<synchronous>, transform_indices = @transform_10, window_bounds = array<i64: 1, 256>}, {pipeline_mode = #tpu.pipeline_mode<synchronous>, transform_indices = @transform_11, window_bounds = array<i64: 1, 256>}, {pipeline_mode = #tpu.pipeline_mode<synchronous>, transform_indices = @transform_12, window_bounds = array<i64: 1, 256>}, {pipeline_mode = #tpu.pipeline_mode<synchronous>, transform_indices = @transform_13, window_bounds = array<i64: 8, 256>}, {pipeline_mode = #tpu.pipeline_mode<synchronous>, transform_indices = @transform_14, window_bounds = array<i64: 8, 8, 8>}]} {
    %c0 = arith.constant 0 : index
    %c0_0 = arith.constant 0 : index
    %0 = vector.load %arg1[%c0, %c0_0] : memref<8x256xf32, #tpu.memory_space<vmem>>, vector<8x256xf32>
    %1 = arith.truncf %0 : vector<8x256xf32> to vector<8x256xbf16>
    %c0_1 = arith.constant 0 : index
    %c0_2 = arith.constant 0 : index
    %2 = vector.load %arg2[%c0_1, %c0_2] : memref<256x768xbf16, #tpu.memory_space<vmem>>, vector<256x768xbf16>
    %cst = arith.constant dense<0.000000e+00> : vector<8x768xf32>
    %3 = tpu.matmul %1, %2, %cst {dimension_numbers = #tpu.dot_dimension_numbers<[1], [0], [0], [1], [0, 0, 1, 1], [], []>} : vector<8x256xbf16>, vector<256x768xbf16>, vector<8x768xf32> -> vector<8x768xf32>
    %c0_3 = arith.constant 0 : index
    %c0_4 = arith.constant 0 : index
    %4 = vector.load %arg3[%c0_3, %c0_4] : memref<1x768xf32, #tpu.memory_space<vmem>>, vector<1x768xf32>
    %5 = vector.broadcast %4 : vector<1x768xf32> to vector<8x768xf32>
    %6 = arith.addf %3, %5 : vector<8x768xf32>
    %7 = vector.extract_strided_slice %6 {offsets = [0, 0], sizes = [8, 32], strides = [1, 1]} : vector<8x768xf32> to vector<8x32xf32>
    %8 = vector.extract_strided_slice %6 {offsets = [0, 256], sizes = [8, 32], strides = [1, 1]} : vector<8x768xf32> to vector<8x32xf32>
    %9 = vector.extract_strided_slice %6 {offsets = [0, 512], sizes = [8, 32], strides = [1, 1]} : vector<8x768xf32> to vector<8x32xf32>
    %10 = arith.truncf %7 : vector<8x32xf32> to vector<8x32xbf16>
    %11 = arith.truncf %8 : vector<8x32xf32> to vector<8x32xbf16>
    %cst_5 = arith.constant dense<0.000000e+00> : vector<8x8xf32>
    %12 = tpu.matmul %10, %11, %cst_5 {dimension_numbers = #tpu.dot_dimension_numbers<[1], [1], [0], [0], [0, 0, 1, 0], [], []>} : vector<8x32xbf16>, vector<8x32xbf16>, vector<8x8xf32> -> vector<8x8xf32>
    %cst_6 = arith.constant dense<0xFF800000> : vector<8xf32>
    %13 = vector.multi_reduction <maximumf>, %12, %cst_6 [1] : vector<8x8xf32> to vector<8xf32>
    %14 = vector.shape_cast %13 : vector<8xf32> to vector<8x1xf32>
    %15 = vector.broadcast %14 : vector<8x1xf32> to vector<8x8xf32>
    %16 = arith.subf %12, %15 : vector<8x8xf32>
    %17 = math.exp %16 : vector<8x8xf32>
    %cst_7 = arith.constant dense<0.000000e+00> : vector<8xf32>
    %18 = vector.multi_reduction <add>, %17, %cst_7 [1] : vector<8x8xf32> to vector<8xf32>
    %19 = vector.shape_cast %18 : vector<8xf32> to vector<8x1xf32>
    %20 = vector.broadcast %19 : vector<8x1xf32> to vector<8x8xf32>
    %21 = arith.divf %17, %20 : vector<8x8xf32>
    %c0_8 = arith.constant 0 : index
    %c0_9 = arith.constant 0 : index
    %c0_10 = arith.constant 0 : index
    %22 = vector.load %arg15[%c0_8, %c0_9, %c0_10] : memref<8x8x8xf32, #tpu.memory_space<vmem>>, vector<1x8x8xf32>
    %23 = vector.shape_cast %22 : vector<1x8x8xf32> to vector<8x8xf32>
    %24 = vector.shape_cast %21 : vector<8x8xf32> to vector<1x8x8xf32>
    tpu.vector_store %arg15[%c0_8, %c0_9, %c0_10], %24 {strides = array<i32>} : memref<8x8x8xf32, #tpu.memory_space<vmem>>, vector<1x8x8xf32>,
    %25 = arith.truncf %21 : vector<8x8xf32> to vector<8x8xbf16>
    %26 = arith.truncf %9 : vector<8x32xf32> to vector<8x32xbf16>
    %cst_11 = arith.constant dense<0.000000e+00> : vector<8x32xf32>
    %27 = tpu.matmul %25, %26, %cst_11 {dimension_numbers = #tpu.dot_dimension_numbers<[1], [0], [0], [1], [0, 0, 1, 1], [], []>} : vector<8x8xbf16>, vector<8x32xbf16>, vector<8x32xf32> -> vector<8x32xf32>
    %28 = vector.extract_strided_slice %6 {offsets = [0, 32], sizes = [8, 32], strides = [1, 1]} : vector<8x768xf32> to vector<8x32xf32>
    %29 = vector.extract_strided_slice %6 {offsets = [0, 288], sizes = [8, 32], strides = [1, 1]} : vector<8x768xf32> to vector<8x32xf32>
    %30 = vector.extract_strided_slice %6 {offsets = [0, 544], sizes = [8, 32], strides = [1, 1]} : vector<8x768xf32> to vector<8x32xf32>
    %31 = arith.truncf %28 : vector<8x32xf32> to vector<8x32xbf16>
    %32 = arith.truncf %29 : vector<8x32xf32> to vector<8x32xbf16>
    %cst_12 = arith.constant dense<0.000000e+00> : vector<8x8xf32>
    %33 = tpu.matmul %31, %32, %cst_12 {dimension_numbers = #tpu.dot_dimension_numbers<[1], [1], [0], [0], [0, 0, 1, 0], [], []>} : vector<8x32xbf16>, vector<8x32xbf16>, vector<8x8xf32> -> vector<8x8xf32>
    %cst_13 = arith.constant dense<0xFF800000> : vector<8xf32>
    %34 = vector.multi_reduction <maximumf>, %33, %cst_13 [1] : vector<8x8xf32> to vector<8xf32>
    %35 = vector.shape_cast %34 : vector<8xf32> to vector<8x1xf32>
    %36 = vector.broadcast %35 : vector<8x1xf32> to vector<8x8xf32>
    %37 = arith.subf %33, %36 : vector<8x8xf32>
    %38 = math.exp %37 : vector<8x8xf32>
    %cst_14 = arith.constant dense<0.000000e+00> : vector<8xf32>
    %39 = vector.multi_reduction <add>, %38, %cst_14 [1] : vector<8x8xf32> to vector<8xf32>
    %40 = vector.shape_cast %39 : vector<8xf32> to vector<8x1xf32>
    %41 = vector.broadcast %40 : vector<8x1xf32> to vector<8x8xf32>
    %42 = arith.divf %38, %41 : vector<8x8xf32>
    %c1 = arith.constant 1 : index
    %c0_15 = arith.constant 0 : index
    %c0_16 = arith.constant 0 : index
    %43 = vector.load %arg15[%c1, %c0_15, %c0_16] : memref<8x8x8xf32, #tpu.memory_space<vmem>>, vector<1x8x8xf32>
    %44 = vector.shape_cast %43 : vector<1x8x8xf32> to vector<8x8xf32>
    %45 = vector.shape_cast %42 : vector<8x8xf32> to vector<1x8x8xf32>
    tpu.vector_store %arg15[%c1, %c0_15, %c0_16], %45 {strides = array<i32>} : memref<8x8x8xf32, #tpu.memory_space<vmem>>, vector<1x8x8xf32>,
    %46 = arith.truncf %42 : vector<8x8xf32> to vector<8x8xbf16>
    %47 = arith.truncf %30 : vector<8x32xf32> to vector<8x32xbf16>
    %cst_17 = arith.constant dense<0.000000e+00> : vector<8x32xf32>
    %48 = tpu.matmul %46, %47, %cst_17 {dimension_numbers = #tpu.dot_dimension_numbers<[1], [0], [0], [1], [0, 0, 1, 1], [], []>} : vector<8x8xbf16>, vector<8x32xbf16>, vector<8x32xf32> -> vector<8x32xf32>
    %49 = vector.extract_strided_slice %6 {offsets = [0, 64], sizes = [8, 32], strides = [1, 1]} : vector<8x768xf32> to vector<8x32xf32>
    %50 = vector.extract_strided_slice %6 {offsets = [0, 320], sizes = [8, 32], strides = [1, 1]} : vector<8x768xf32> to vector<8x32xf32>
    %51 = vector.extract_strided_slice %6 {offsets = [0, 576], sizes = [8, 32], strides = [1, 1]} : vector<8x768xf32> to vector<8x32xf32>
    %52 = arith.truncf %49 : vector<8x32xf32> to vector<8x32xbf16>
    %53 = arith.truncf %50 : vector<8x32xf32> to vector<8x32xbf16>
    %cst_18 = arith.constant dense<0.000000e+00> : vector<8x8xf32>
    %54 = tpu.matmul %52, %53, %cst_18 {dimension_numbers = #tpu.dot_dimension_numbers<[1], [1], [0], [0], [0, 0, 1, 0], [], []>} : vector<8x32xbf16>, vector<8x32xbf16>, vector<8x8xf32> -> vector<8x8xf32>
    %cst_19 = arith.constant dense<0xFF800000> : vector<8xf32>
    %55 = vector.multi_reduction <maximumf>, %54, %cst_19 [1] : vector<8x8xf32> to vector<8xf32>
    %56 = vector.shape_cast %55 : vector<8xf32> to vector<8x1xf32>
    %57 = vector.broadcast %56 : vector<8x1xf32> to vector<8x8xf32>
    %58 = arith.subf %54, %57 : vector<8x8xf32>
    %59 = math.exp %58 : vector<8x8xf32>
    %cst_20 = arith.constant dense<0.000000e+00> : vector<8xf32>
    %60 = vector.multi_reduction <add>, %59, %cst_20 [1] : vector<8x8xf32> to vector<8xf32>
    %61 = vector.shape_cast %60 : vector<8xf32> to vector<8x1xf32>
    %62 = vector.broadcast %61 : vector<8x1xf32> to vector<8x8xf32>
    %63 = arith.divf %59, %62 : vector<8x8xf32>
    %c2 = arith.constant 2 : index
    %c0_21 = arith.constant 0 : index
    %c0_22 = arith.constant 0 : index
    %64 = vector.load %arg15[%c2, %c0_21, %c0_22] : memref<8x8x8xf32, #tpu.memory_space<vmem>>, vector<1x8x8xf32>
    %65 = vector.shape_cast %64 : vector<1x8x8xf32> to vector<8x8xf32>
    %66 = vector.shape_cast %63 : vector<8x8xf32> to vector<1x8x8xf32>
    tpu.vector_store %arg15[%c2, %c0_21, %c0_22], %66 {strides = array<i32>} : memref<8x8x8xf32, #tpu.memory_space<vmem>>, vector<1x8x8xf32>,
    %67 = arith.truncf %63 : vector<8x8xf32> to vector<8x8xbf16>
    %68 = arith.truncf %51 : vector<8x32xf32> to vector<8x32xbf16>
    %cst_23 = arith.constant dense<0.000000e+00> : vector<8x32xf32>
    %69 = tpu.matmul %67, %68, %cst_23 {dimension_numbers = #tpu.dot_dimension_numbers<[1], [0], [0], [1], [0, 0, 1, 1], [], []>} : vector<8x8xbf16>, vector<8x32xbf16>, vector<8x32xf32> -> vector<8x32xf32>
    %70 = vector.extract_strided_slice %6 {offsets = [0, 96], sizes = [8, 32], strides = [1, 1]} : vector<8x768xf32> to vector<8x32xf32>
    %71 = vector.extract_strided_slice %6 {offsets = [0, 352], sizes = [8, 32], strides = [1, 1]} : vector<8x768xf32> to vector<8x32xf32>
    %72 = vector.extract_strided_slice %6 {offsets = [0, 608], sizes = [8, 32], strides = [1, 1]} : vector<8x768xf32> to vector<8x32xf32>
    %73 = arith.truncf %70 : vector<8x32xf32> to vector<8x32xbf16>
    %74 = arith.truncf %71 : vector<8x32xf32> to vector<8x32xbf16>
    %cst_24 = arith.constant dense<0.000000e+00> : vector<8x8xf32>
    %75 = tpu.matmul %73, %74, %cst_24 {dimension_numbers = #tpu.dot_dimension_numbers<[1], [1], [0], [0], [0, 0, 1, 0], [], []>} : vector<8x32xbf16>, vector<8x32xbf16>, vector<8x8xf32> -> vector<8x8xf32>
    %cst_25 = arith.constant dense<0xFF800000> : vector<8xf32>
    %76 = vector.multi_reduction <maximumf>, %75, %cst_25 [1] : vector<8x8xf32> to vector<8xf32>
    %77 = vector.shape_cast %76 : vector<8xf32> to vector<8x1xf32>
    %78 = vector.broadcast %77 : vector<8x1xf32> to vector<8x8xf32>
    %79 = arith.subf %75, %78 : vector<8x8xf32>
    %80 = math.exp %79 : vector<8x8xf32>
    %cst_26 = arith.constant dense<0.000000e+00> : vector<8xf32>
    %81 = vector.multi_reduction <add>, %80, %cst_26 [1] : vector<8x8xf32> to vector<8xf32>
    %82 = vector.shape_cast %81 : vector<8xf32> to vector<8x1xf32>
    %83 = vector.broadcast %82 : vector<8x1xf32> to vector<8x8xf32>
    %84 = arith.divf %80, %83 : vector<8x8xf32>
    %c3 = arith.constant 3 : index
    %c0_27 = arith.constant 0 : index
    %c0_28 = arith.constant 0 : index
    %85 = vector.load %arg15[%c3, %c0_27, %c0_28] : memref<8x8x8xf32, #tpu.memory_space<vmem>>, vector<1x8x8xf32>
    %86 = vector.shape_cast %85 : vector<1x8x8xf32> to vector<8x8xf32>
    %87 = vector.shape_cast %84 : vector<8x8xf32> to vector<1x8x8xf32>
    tpu.vector_store %arg15[%c3, %c0_27, %c0_28], %87 {strides = array<i32>} : memref<8x8x8xf32, #tpu.memory_space<vmem>>, vector<1x8x8xf32>,
    %88 = arith.truncf %84 : vector<8x8xf32> to vector<8x8xbf16>
    %89 = arith.truncf %72 : vector<8x32xf32> to vector<8x32xbf16>
    %cst_29 = arith.constant dense<0.000000e+00> : vector<8x32xf32>
    %90 = tpu.matmul %88, %89, %cst_29 {dimension_numbers = #tpu.dot_dimension_numbers<[1], [0], [0], [1], [0, 0, 1, 1], [], []>} : vector<8x8xbf16>, vector<8x32xbf16>, vector<8x32xf32> -> vector<8x32xf32>
    %91 = vector.extract_strided_slice %6 {offsets = [0, 128], sizes = [8, 32], strides = [1, 1]} : vector<8x768xf32> to vector<8x32xf32>
    %92 = vector.extract_strided_slice %6 {offsets = [0, 384], sizes = [8, 32], strides = [1, 1]} : vector<8x768xf32> to vector<8x32xf32>
    %93 = vector.extract_strided_slice %6 {offsets = [0, 640], sizes = [8, 32], strides = [1, 1]} : vector<8x768xf32> to vector<8x32xf32>
    %94 = arith.truncf %91 : vector<8x32xf32> to vector<8x32xbf16>
    %95 = arith.truncf %92 : vector<8x32xf32> to vector<8x32xbf16>
    %cst_30 = arith.constant dense<0.000000e+00> : vector<8x8xf32>
    %96 = tpu.matmul %94, %95, %cst_30 {dimension_numbers = #tpu.dot_dimension_numbers<[1], [1], [0], [0], [0, 0, 1, 0], [], []>} : vector<8x32xbf16>, vector<8x32xbf16>, vector<8x8xf32> -> vector<8x8xf32>
    %cst_31 = arith.constant dense<0xFF800000> : vector<8xf32>
    %97 = vector.multi_reduction <maximumf>, %96, %cst_31 [1] : vector<8x8xf32> to vector<8xf32>
    %98 = vector.shape_cast %97 : vector<8xf32> to vector<8x1xf32>
    %99 = vector.broadcast %98 : vector<8x1xf32> to vector<8x8xf32>
    %100 = arith.subf %96, %99 : vector<8x8xf32>
    %101 = math.exp %100 : vector<8x8xf32>
    %cst_32 = arith.constant dense<0.000000e+00> : vector<8xf32>
    %102 = vector.multi_reduction <add>, %101, %cst_32 [1] : vector<8x8xf32> to vector<8xf32>
    %103 = vector.shape_cast %102 : vector<8xf32> to vector<8x1xf32>
    %104 = vector.broadcast %103 : vector<8x1xf32> to vector<8x8xf32>
    %105 = arith.divf %101, %104 : vector<8x8xf32>
    %c4 = arith.constant 4 : index
    %c0_33 = arith.constant 0 : index
    %c0_34 = arith.constant 0 : index
    %106 = vector.load %arg15[%c4, %c0_33, %c0_34] : memref<8x8x8xf32, #tpu.memory_space<vmem>>, vector<1x8x8xf32>
    %107 = vector.shape_cast %106 : vector<1x8x8xf32> to vector<8x8xf32>
    %108 = vector.shape_cast %105 : vector<8x8xf32> to vector<1x8x8xf32>
    tpu.vector_store %arg15[%c4, %c0_33, %c0_34], %108 {strides = array<i32>} : memref<8x8x8xf32, #tpu.memory_space<vmem>>, vector<1x8x8xf32>,
    %109 = arith.truncf %105 : vector<8x8xf32> to vector<8x8xbf16>
    %110 = arith.truncf %93 : vector<8x32xf32> to vector<8x32xbf16>
    %cst_35 = arith.constant dense<0.000000e+00> : vector<8x32xf32>
    %111 = tpu.matmul %109, %110, %cst_35 {dimension_numbers = #tpu.dot_dimension_numbers<[1], [0], [0], [1], [0, 0, 1, 1], [], []>} : vector<8x8xbf16>, vector<8x32xbf16>, vector<8x32xf32> -> vector<8x32xf32>
    %112 = vector.extract_strided_slice %6 {offsets = [0, 160], sizes = [8, 32], strides = [1, 1]} : vector<8x768xf32> to vector<8x32xf32>
    %113 = vector.extract_strided_slice %6 {offsets = [0, 416], sizes = [8, 32], strides = [1, 1]} : vector<8x768xf32> to vector<8x32xf32>
    %114 = vector.extract_strided_slice %6 {offsets = [0, 672], sizes = [8, 32], strides = [1, 1]} : vector<8x768xf32> to vector<8x32xf32>
    %115 = arith.truncf %112 : vector<8x32xf32> to vector<8x32xbf16>
    %116 = arith.truncf %113 : vector<8x32xf32> to vector<8x32xbf16>
    %cst_36 = arith.constant dense<0.000000e+00> : vector<8x8xf32>
    %117 = tpu.matmul %115, %116, %cst_36 {dimension_numbers = #tpu.dot_dimension_numbers<[1], [1], [0], [0], [0, 0, 1, 0], [], []>} : vector<8x32xbf16>, vector<8x32xbf16>, vector<8x8xf32> -> vector<8x8xf32>
    %cst_37 = arith.constant dense<0xFF800000> : vector<8xf32>
    %118 = vector.multi_reduction <maximumf>, %117, %cst_37 [1] : vector<8x8xf32> to vector<8xf32>
    %119 = vector.shape_cast %118 : vector<8xf32> to vector<8x1xf32>
    %120 = vector.broadcast %119 : vector<8x1xf32> to vector<8x8xf32>
    %121 = arith.subf %117, %120 : vector<8x8xf32>
    %122 = math.exp %121 : vector<8x8xf32>
    %cst_38 = arith.constant dense<0.000000e+00> : vector<8xf32>
    %123 = vector.multi_reduction <add>, %122, %cst_38 [1] : vector<8x8xf32> to vector<8xf32>
    %124 = vector.shape_cast %123 : vector<8xf32> to vector<8x1xf32>
    %125 = vector.broadcast %124 : vector<8x1xf32> to vector<8x8xf32>
    %126 = arith.divf %122, %125 : vector<8x8xf32>
    %c5 = arith.constant 5 : index
    %c0_39 = arith.constant 0 : index
    %c0_40 = arith.constant 0 : index
    %127 = vector.load %arg15[%c5, %c0_39, %c0_40] : memref<8x8x8xf32, #tpu.memory_space<vmem>>, vector<1x8x8xf32>
    %128 = vector.shape_cast %127 : vector<1x8x8xf32> to vector<8x8xf32>
    %129 = vector.shape_cast %126 : vector<8x8xf32> to vector<1x8x8xf32>
    tpu.vector_store %arg15[%c5, %c0_39, %c0_40], %129 {strides = array<i32>} : memref<8x8x8xf32, #tpu.memory_space<vmem>>, vector<1x8x8xf32>,
    %130 = arith.truncf %126 : vector<8x8xf32> to vector<8x8xbf16>
    %131 = arith.truncf %114 : vector<8x32xf32> to vector<8x32xbf16>
    %cst_41 = arith.constant dense<0.000000e+00> : vector<8x32xf32>
    %132 = tpu.matmul %130, %131, %cst_41 {dimension_numbers = #tpu.dot_dimension_numbers<[1], [0], [0], [1], [0, 0, 1, 1], [], []>} : vector<8x8xbf16>, vector<8x32xbf16>, vector<8x32xf32> -> vector<8x32xf32>
    %133 = vector.extract_strided_slice %6 {offsets = [0, 192], sizes = [8, 32], strides = [1, 1]} : vector<8x768xf32> to vector<8x32xf32>
    %134 = vector.extract_strided_slice %6 {offsets = [0, 448], sizes = [8, 32], strides = [1, 1]} : vector<8x768xf32> to vector<8x32xf32>
    %135 = vector.extract_strided_slice %6 {offsets = [0, 704], sizes = [8, 32], strides = [1, 1]} : vector<8x768xf32> to vector<8x32xf32>
    %136 = arith.truncf %133 : vector<8x32xf32> to vector<8x32xbf16>
    %137 = arith.truncf %134 : vector<8x32xf32> to vector<8x32xbf16>
    %cst_42 = arith.constant dense<0.000000e+00> : vector<8x8xf32>
    %138 = tpu.matmul %136, %137, %cst_42 {dimension_numbers = #tpu.dot_dimension_numbers<[1], [1], [0], [0], [0, 0, 1, 0], [], []>} : vector<8x32xbf16>, vector<8x32xbf16>, vector<8x8xf32> -> vector<8x8xf32>
    %cst_43 = arith.constant dense<0xFF800000> : vector<8xf32>
    %139 = vector.multi_reduction <maximumf>, %138, %cst_43 [1] : vector<8x8xf32> to vector<8xf32>
    %140 = vector.shape_cast %139 : vector<8xf32> to vector<8x1xf32>
    %141 = vector.broadcast %140 : vector<8x1xf32> to vector<8x8xf32>
    %142 = arith.subf %138, %141 : vector<8x8xf32>
    %143 = math.exp %142 : vector<8x8xf32>
    %cst_44 = arith.constant dense<0.000000e+00> : vector<8xf32>
    %144 = vector.multi_reduction <add>, %143, %cst_44 [1] : vector<8x8xf32> to vector<8xf32>
    %145 = vector.shape_cast %144 : vector<8xf32> to vector<8x1xf32>
    %146 = vector.broadcast %145 : vector<8x1xf32> to vector<8x8xf32>
    %147 = arith.divf %143, %146 : vector<8x8xf32>
    %c6 = arith.constant 6 : index
    %c0_45 = arith.constant 0 : index
    %c0_46 = arith.constant 0 : index
    %148 = vector.load %arg15[%c6, %c0_45, %c0_46] : memref<8x8x8xf32, #tpu.memory_space<vmem>>, vector<1x8x8xf32>
    %149 = vector.shape_cast %148 : vector<1x8x8xf32> to vector<8x8xf32>
    %150 = vector.shape_cast %147 : vector<8x8xf32> to vector<1x8x8xf32>
    tpu.vector_store %arg15[%c6, %c0_45, %c0_46], %150 {strides = array<i32>} : memref<8x8x8xf32, #tpu.memory_space<vmem>>, vector<1x8x8xf32>,
    %151 = arith.truncf %147 : vector<8x8xf32> to vector<8x8xbf16>
    %152 = arith.truncf %135 : vector<8x32xf32> to vector<8x32xbf16>
    %cst_47 = arith.constant dense<0.000000e+00> : vector<8x32xf32>
    %153 = tpu.matmul %151, %152, %cst_47 {dimension_numbers = #tpu.dot_dimension_numbers<[1], [0], [0], [1], [0, 0, 1, 1], [], []>} : vector<8x8xbf16>, vector<8x32xbf16>, vector<8x32xf32> -> vector<8x32xf32>
    %154 = vector.extract_strided_slice %6 {offsets = [0, 224], sizes = [8, 32], strides = [1, 1]} : vector<8x768xf32> to vector<8x32xf32>
    %155 = vector.extract_strided_slice %6 {offsets = [0, 480], sizes = [8, 32], strides = [1, 1]} : vector<8x768xf32> to vector<8x32xf32>
    %156 = vector.extract_strided_slice %6 {offsets = [0, 736], sizes = [8, 32], strides = [1, 1]} : vector<8x768xf32> to vector<8x32xf32>
    %157 = arith.truncf %154 : vector<8x32xf32> to vector<8x32xbf16>
    %158 = arith.truncf %155 : vector<8x32xf32> to vector<8x32xbf16>
    %cst_48 = arith.constant dense<0.000000e+00> : vector<8x8xf32>
    %159 = tpu.matmul %157, %158, %cst_48 {dimension_numbers = #tpu.dot_dimension_numbers<[1], [1], [0], [0], [0, 0, 1, 0], [], []>} : vector<8x32xbf16>, vector<8x32xbf16>, vector<8x8xf32> -> vector<8x8xf32>
    %cst_49 = arith.constant dense<0xFF800000> : vector<8xf32>
    %160 = vector.multi_reduction <maximumf>, %159, %cst_49 [1] : vector<8x8xf32> to vector<8xf32>
    %161 = vector.shape_cast %160 : vector<8xf32> to vector<8x1xf32>
    %162 = vector.broadcast %161 : vector<8x1xf32> to vector<8x8xf32>
    %163 = arith.subf %159, %162 : vector<8x8xf32>
    %164 = math.exp %163 : vector<8x8xf32>
    %cst_50 = arith.constant dense<0.000000e+00> : vector<8xf32>
    %165 = vector.multi_reduction <add>, %164, %cst_50 [1] : vector<8x8xf32> to vector<8xf32>
    %166 = vector.shape_cast %165 : vector<8xf32> to vector<8x1xf32>
    %167 = vector.broadcast %166 : vector<8x1xf32> to vector<8x8xf32>
    %168 = arith.divf %164, %167 : vector<8x8xf32>
    %c7 = arith.constant 7 : index
    %c0_51 = arith.constant 0 : index
    %c0_52 = arith.constant 0 : index
    %169 = vector.load %arg15[%c7, %c0_51, %c0_52] : memref<8x8x8xf32, #tpu.memory_space<vmem>>, vector<1x8x8xf32>
    %170 = vector.shape_cast %169 : vector<1x8x8xf32> to vector<8x8xf32>
    %171 = vector.shape_cast %168 : vector<8x8xf32> to vector<1x8x8xf32>
    tpu.vector_store %arg15[%c7, %c0_51, %c0_52], %171 {strides = array<i32>} : memref<8x8x8xf32, #tpu.memory_space<vmem>>, vector<1x8x8xf32>,
    %172 = arith.truncf %168 : vector<8x8xf32> to vector<8x8xbf16>
    %173 = arith.truncf %156 : vector<8x32xf32> to vector<8x32xbf16>
    %cst_53 = arith.constant dense<0.000000e+00> : vector<8x32xf32>
    %174 = tpu.matmul %172, %173, %cst_53 {dimension_numbers = #tpu.dot_dimension_numbers<[1], [0], [0], [1], [0, 0, 1, 1], [], []>} : vector<8x8xbf16>, vector<8x32xbf16>, vector<8x32xf32> -> vector<8x32xf32>
    %175 = tpu.concatenate %27, %48, %69, %90, %111, %132, %153, %174 in 1 : vector<8x32xf32>, vector<8x32xf32>, vector<8x32xf32>, vector<8x32xf32>, vector<8x32xf32>, vector<8x32xf32>, vector<8x32xf32>, vector<8x32xf32> -> vector<8x256xf32>
    %176 = arith.truncf %175 : vector<8x256xf32> to vector<8x256xbf16>
    %c0_54 = arith.constant 0 : index
    %c0_55 = arith.constant 0 : index
    %177 = vector.load %arg4[%c0_54, %c0_55] : memref<256x256xbf16, #tpu.memory_space<vmem>>, vector<256x256xbf16>
    %cst_56 = arith.constant dense<0.000000e+00> : vector<8x256xf32>
    %178 = tpu.matmul %176, %177, %cst_56 {dimension_numbers = #tpu.dot_dimension_numbers<[1], [0], [0], [1], [0, 0, 1, 1], [], []>} : vector<8x256xbf16>, vector<256x256xbf16>, vector<8x256xf32> -> vector<8x256xf32>
    %c0_57 = arith.constant 0 : index
    %c0_58 = arith.constant 0 : index
    %179 = vector.load %arg5[%c0_57, %c0_58] : memref<1x256xf32, #tpu.memory_space<vmem>>, vector<1x256xf32>
    %180 = vector.broadcast %179 : vector<1x256xf32> to vector<8x256xf32>
    %181 = arith.addf %178, %180 : vector<8x256xf32>
    %182 = arith.addf %181, %0 : vector<8x256xf32>
    %cst_59 = arith.constant dense<0.000000e+00> : vector<8xf32>
    %183 = vector.multi_reduction <add>, %182, %cst_59 [1] : vector<8x256xf32> to vector<8xf32>
    %184 = vector.shape_cast %183 : vector<8xf32> to vector<8x1xf32>
    %cst_60 = arith.constant 2.560000e+02 : f32
    %185 = vector.broadcast %cst_60 : f32 to vector<8x1xf32>
    %186 = arith.divf %184, %185 : vector<8x1xf32>
    %187 = vector.broadcast %186 : vector<8x1xf32> to vector<8x256xf32>
    %188 = arith.subf %182, %187 : vector<8x256xf32>
    %189 = arith.mulf %188, %188 : vector<8x256xf32>
    %cst_61 = arith.constant dense<0.000000e+00> : vector<8xf32>
    %190 = vector.multi_reduction <add>, %189, %cst_61 [1] : vector<8x256xf32> to vector<8xf32>
    %191 = vector.shape_cast %190 : vector<8xf32> to vector<8x1xf32>
    %cst_62 = arith.constant 2.560000e+02 : f32
    %192 = vector.broadcast %cst_62 : f32 to vector<8x1xf32>
    %193 = arith.divf %191, %192 : vector<8x1xf32>
    %cst_63 = arith.constant 9.99999974E-6 : f32
    %194 = vector.broadcast %cst_63 : f32 to vector<8x1xf32>
    %195 = arith.addf %193, %194 : vector<8x1xf32>
    %196 = math.rsqrt %195 : vector<8x1xf32>
    %197 = vector.broadcast %196 : vector<8x1xf32> to vector<8x256xf32>
    %198 = arith.mulf %188, %197 : vector<8x256xf32>
    %c0_64 = arith.constant 0 : index
    %c0_65 = arith.constant 0 : index
    %199 = vector.load %arg6[%c0_64, %c0_65] : memref<1x256xf32, #tpu.memory_space<vmem>>, vector<1x256xf32>
    %200 = vector.broadcast %199 : vector<1x256xf32> to vector<8x256xf32>
    %201 = arith.mulf %198, %200 : vector<8x256xf32>
    %c0_66 = arith.constant 0 : index
    %c0_67 = arith.constant 0 : index
    %202 = vector.load %arg7[%c0_66, %c0_67] : memref<1x256xf32, #tpu.memory_space<vmem>>, vector<1x256xf32>
    %203 = vector.broadcast %202 : vector<1x256xf32> to vector<8x256xf32>
    %204 = arith.addf %201, %203 : vector<8x256xf32>
    %205 = arith.truncf %204 : vector<8x256xf32> to vector<8x256xbf16>
    %c0_68 = arith.constant 0 : index
    %c0_69 = arith.constant 0 : index
    %206 = vector.load %arg8[%c0_68, %c0_69] : memref<256x512xbf16, #tpu.memory_space<vmem>>, vector<256x512xbf16>
    %cst_70 = arith.constant dense<0.000000e+00> : vector<8x512xf32>
    %207 = tpu.matmul %205, %206, %cst_70 {dimension_numbers = #tpu.dot_dimension_numbers<[1], [0], [0], [1], [0, 0, 1, 1], [], []>} : vector<8x256xbf16>, vector<256x512xbf16>, vector<8x512xf32> -> vector<8x512xf32>
    %c0_71 = arith.constant 0 : index
    %c0_72 = arith.constant 0 : index
    %208 = vector.load %arg9[%c0_71, %c0_72] : memref<1x512xf32, #tpu.memory_space<vmem>>, vector<1x512xf32>
    %209 = vector.broadcast %208 : vector<1x512xf32> to vector<8x512xf32>
    %210 = arith.addf %207, %209 : vector<8x512xf32>
    %cst_73 = arith.constant 0.000000e+00 : f32
    %211 = vector.broadcast %cst_73 : f32 to vector<8x512xf32>
    %212 = arith.maximumf %210, %211 : vector<8x512xf32>
    %213 = arith.truncf %212 : vector<8x512xf32> to vector<8x512xbf16>
    %c0_74 = arith.constant 0 : index
    %c0_75 = arith.constant 0 : index
    %214 = vector.load %arg10[%c0_74, %c0_75] : memref<512x256xbf16, #tpu.memory_space<vmem>>, vector<512x256xbf16>
    %cst_76 = arith.constant dense<0.000000e+00> : vector<8x256xf32>
    %215 = tpu.matmul %213, %214, %cst_76 {dimension_numbers = #tpu.dot_dimension_numbers<[1], [0], [0], [1], [0, 0, 1, 1], [], []>} : vector<8x512xbf16>, vector<512x256xbf16>, vector<8x256xf32> -> vector<8x256xf32>
    %c0_77 = arith.constant 0 : index
    %c0_78 = arith.constant 0 : index
    %216 = vector.load %arg11[%c0_77, %c0_78] : memref<1x256xf32, #tpu.memory_space<vmem>>, vector<1x256xf32>
    %217 = vector.broadcast %216 : vector<1x256xf32> to vector<8x256xf32>
    %218 = arith.addf %215, %217 : vector<8x256xf32>
    %219 = arith.addf %218, %204 : vector<8x256xf32>
    %cst_79 = arith.constant dense<0.000000e+00> : vector<8xf32>
    %220 = vector.multi_reduction <add>, %219, %cst_79 [1] : vector<8x256xf32> to vector<8xf32>
    %221 = vector.shape_cast %220 : vector<8xf32> to vector<8x1xf32>
    %cst_80 = arith.constant 2.560000e+02 : f32
    %222 = vector.broadcast %cst_80 : f32 to vector<8x1xf32>
    %223 = arith.divf %221, %222 : vector<8x1xf32>
    %224 = vector.broadcast %223 : vector<8x1xf32> to vector<8x256xf32>
    %225 = arith.subf %219, %224 : vector<8x256xf32>
    %226 = arith.mulf %225, %225 : vector<8x256xf32>
    %cst_81 = arith.constant dense<0.000000e+00> : vector<8xf32>
    %227 = vector.multi_reduction <add>, %226, %cst_81 [1] : vector<8x256xf32> to vector<8xf32>
    %228 = vector.shape_cast %227 : vector<8xf32> to vector<8x1xf32>
    %cst_82 = arith.constant 2.560000e+02 : f32
    %229 = vector.broadcast %cst_82 : f32 to vector<8x1xf32>
    %230 = arith.divf %228, %229 : vector<8x1xf32>
    %cst_83 = arith.constant 9.99999974E-6 : f32
    %231 = vector.broadcast %cst_83 : f32 to vector<8x1xf32>
    %232 = arith.addf %230, %231 : vector<8x1xf32>
    %233 = math.rsqrt %232 : vector<8x1xf32>
    %234 = vector.broadcast %233 : vector<8x1xf32> to vector<8x256xf32>
    %235 = arith.mulf %225, %234 : vector<8x256xf32>
    %c0_84 = arith.constant 0 : index
    %c0_85 = arith.constant 0 : index
    %236 = vector.load %arg12[%c0_84, %c0_85] : memref<1x256xf32, #tpu.memory_space<vmem>>, vector<1x256xf32>
    %237 = vector.broadcast %236 : vector<1x256xf32> to vector<8x256xf32>
    %238 = arith.mulf %235, %237 : vector<8x256xf32>
    %c0_86 = arith.constant 0 : index
    %c0_87 = arith.constant 0 : index
    %239 = vector.load %arg13[%c0_86, %c0_87] : memref<1x256xf32, #tpu.memory_space<vmem>>, vector<1x256xf32>
    %240 = vector.broadcast %239 : vector<1x256xf32> to vector<8x256xf32>
    %241 = arith.addf %238, %240 : vector<8x256xf32>
    %c0_88 = arith.constant 0 : index
    %c0_89 = arith.constant 0 : index
    %242 = vector.load %arg14[%c0_88, %c0_89] : memref<8x256xf32, #tpu.memory_space<vmem>>, vector<8x256xf32>
    tpu.vector_store %arg14[%c0_88, %c0_89], %241 {strides = array<i32>} : memref<8x256xf32, #tpu.memory_space<vmem>>, vector<8x256xf32>,
    return
  }
  func.func @transform_0(%arg0: i32) -> (i32, i32) {
    %c0_i32 = arith.constant 0 : i32
    %c0_i32_0 = arith.constant 0 : i32
    %c0_i32_1 = arith.constant 0 : i32
    return %c0_i32, %c0_i32_0 : i32, i32
  }
  func.func @transform_1(%arg0: i32) -> (i32, i32) {
    %c0_i32 = arith.constant 0 : i32
    %c0_i32_0 = arith.constant 0 : i32
    %c0_i32_1 = arith.constant 0 : i32
    return %c0_i32, %c0_i32_0 : i32, i32
  }
  func.func @transform_2(%arg0: i32) -> (i32, i32) {
    %c0_i32 = arith.constant 0 : i32
    %c0_i32_0 = arith.constant 0 : i32
    %c0_i32_1 = arith.constant 0 : i32
    return %c0_i32, %c0_i32_0 : i32, i32
  }
  func.func @transform_3(%arg0: i32) -> (i32, i32) {
    %c0_i32 = arith.constant 0 : i32
    %c0_i32_0 = arith.constant 0 : i32
    %c0_i32_1 = arith.constant 0 : i32
    return %c0_i32, %c0_i32_0 : i32, i32
  }
  func.func @transform_4(%arg0: i32) -> (i32, i32) {
    %c0_i32 = arith.constant 0 : i32
    %c0_i32_0 = arith.constant 0 : i32
    %c0_i32_1 = arith.constant 0 : i32
    return %c0_i32, %c0_i32_0 : i32, i32
  }
  func.func @transform_5(%arg0: i32) -> (i32, i32) {
    %c0_i32 = arith.constant 0 : i32
    %c0_i32_0 = arith.constant 0 : i32
    %c0_i32_1 = arith.constant 0 : i32
    return %c0_i32, %c0_i32_0 : i32, i32
  }
  func.func @transform_6(%arg0: i32) -> (i32, i32) {
    %c0_i32 = arith.constant 0 : i32
    %c0_i32_0 = arith.constant 0 : i32
    %c0_i32_1 = arith.constant 0 : i32
    return %c0_i32, %c0_i32_0 : i32, i32
  }
  func.func @transform_7(%arg0: i32) -> (i32, i32) {
    %c0_i32 = arith.constant 0 : i32
    %c0_i32_0 = arith.constant 0 : i32
    %c0_i32_1 = arith.constant 0 : i32
    return %c0_i32, %c0_i32_0 : i32, i32
  }
  func.func @transform_8(%arg0: i32) -> (i32, i32) {
    %c0_i32 = arith.constant 0 : i32
    %c0_i32_0 = arith.constant 0 : i32
    %c0_i32_1 = arith.constant 0 : i32
    return %c0_i32, %c0_i32_0 : i32, i32
  }
  func.func @transform_9(%arg0: i32) -> (i32, i32) {
    %c0_i32 = arith.constant 0 : i32
    %c0_i32_0 = arith.constant 0 : i32
    %c0_i32_1 = arith.constant 0 : i32
    return %c0_i32, %c0_i32_0 : i32, i32
  }
  func.func @transform_10(%arg0: i32) -> (i32, i32) {
    %c0_i32 = arith.constant 0 : i32
    %c0_i32_0 = arith.constant 0 : i32
    %c0_i32_1 = arith.constant 0 : i32
    return %c0_i32, %c0_i32_0 : i32, i32
  }
  func.func @transform_11(%arg0: i32) -> (i32, i32) {
    %c0_i32 = arith.constant 0 : i32
    %c0_i32_0 = arith.constant 0 : i32
    %c0_i32_1 = arith.constant 0 : i32
    return %c0_i32, %c0_i32_0 : i32, i32
  }
  func.func @transform_12(%arg0: i32) -> (i32, i32) {
    %c0_i32 = arith.constant 0 : i32
    %c0_i32_0 = arith.constant 0 : i32
    %c0_i32_1 = arith.constant 0 : i32
    return %c0_i32, %c0_i32_0 : i32, i32
  }
  func.func @transform_13(%arg0: i32) -> (i32, i32) {
    %c0_i32 = arith.constant 0 : i32
    %c0_i32_0 = arith.constant 0 : i32
    %c0_i32_1 = arith.constant 0 : i32
    return %c0_i32, %c0_i32_0 : i32, i32
  }
  func.func @transform_14(%arg0: i32) -> (i32, i32, i32) {
    %c0_i32 = arith.constant 0 : i32
    %c0_i32_0 = arith.constant 0 : i32
    %c0_i32_1 = arith.constant 0 : i32
    %c0_i32_2 = arith.constant 0 : i32
    return %c0_i32, %c0_i32_0, %c0_i32_1 : i32, i32, i32
  }
}

module attributes {stable_mosaic.version = 11 : i64} {
  func.func @_linear_kernel(%arg0: i32, %arg1: i32, %arg2: memref<8x256xbf16, #tpu.memory_space<vmem>>, %arg3: memref<256x128xbf16, #tpu.memory_space<vmem>>, %arg4: memref<1x128xf32, #tpu.memory_space<vmem>>, %arg5: memref<8x128xf32, #tpu.memory_space<vmem>>) attributes {dimension_semantics = [#tpu.dimension_semantics<parallel>, #tpu.dimension_semantics<parallel>], iteration_bounds = array<i64: 1, 1>, scalar_prefetch = 0 : i64, scratch_operands = 0 : i64, tpu.core_type = #tpu.core_type<tc>, window_params = [{transform_indices = @transform_0, window_bounds = array<i64: 8, 256>}, {transform_indices = @transform_1, window_bounds = array<i64: 256, 128>}, {transform_indices = @transform_2, window_bounds = array<i64: 1, 128>}, {transform_indices = @transform_3, window_bounds = array<i64: 8, 128>}]} {
    %c0 = arith.constant 0 : index
    %c0_0 = arith.constant 0 : index
    %0 = vector.load %arg2[%c0, %c0_0] : memref<8x256xbf16, #tpu.memory_space<vmem>>, vector<8x256xbf16>
    %c0_1 = arith.constant 0 : index
    %c0_2 = arith.constant 0 : index
    %1 = vector.load %arg3[%c0_1, %c0_2] : memref<256x128xbf16, #tpu.memory_space<vmem>>, vector<256x128xbf16>
    %cst = arith.constant dense<0.000000e+00> : vector<8x128xf32>
    %2 = tpu.matmul %0, %1, %cst {dimension_numbers = #tpu.dot_dimension_numbers<[1], [0], [0], [1], [0, 0, 1, 1], [], []>} : vector<8x256xbf16>, vector<256x128xbf16>, vector<8x128xf32> -> vector<8x128xf32>
    %c0_3 = arith.constant 0 : index
    %c0_4 = arith.constant 0 : index
    %3 = vector.load %arg4[%c0_3, %c0_4] : memref<1x128xf32, #tpu.memory_space<vmem>>, vector<1x128xf32>
    %4 = vector.broadcast %3 : vector<1x128xf32> to vector<8x128xf32>
    %5 = arith.addf %2, %4 : vector<8x128xf32>
    %c0_5 = arith.constant 0 : index
    %c0_6 = arith.constant 0 : index
    %6 = vector.load %arg5[%c0_5, %c0_6] : memref<8x128xf32, #tpu.memory_space<vmem>>, vector<8x128xf32>
    tpu.vector_store %arg5[%c0_5, %c0_6], %5 {strides = array<i32>} : memref<8x128xf32, #tpu.memory_space<vmem>>, vector<8x128xf32>,
    return
  }
  func.func @transform_0(%arg0: i32, %arg1: i32) -> (i32, i32) {
    %c0_i32 = arith.constant 0 : i32
    %c0_i32_0 = arith.constant 0 : i32
    return %arg0, %c0_i32 : i32, i32
  }
  func.func @transform_1(%arg0: i32, %arg1: i32) -> (i32, i32) {
    %c0_i32 = arith.constant 0 : i32
    %c0_i32_0 = arith.constant 0 : i32
    return %c0_i32, %arg1 : i32, i32
  }
  func.func @transform_2(%arg0: i32, %arg1: i32) -> (i32, i32) {
    %c0_i32 = arith.constant 0 : i32
    %c0_i32_0 = arith.constant 0 : i32
    return %c0_i32, %arg1 : i32, i32
  }
  func.func @transform_3(%arg0: i32, %arg1: i32) -> (i32, i32) {
    %c0_i32 = arith.constant 0 : i32
    return %arg0, %arg1 : i32, i32
  }
}

module attributes {stable_mosaic.version = 11 : i64} {
  func.func @_linear_kernel(%arg0: i32, %arg1: i32, %arg2: memref<8x64xbf16, #tpu.memory_space<vmem>>, %arg3: memref<64x128xbf16, #tpu.memory_space<vmem>>, %arg4: memref<1x128xf32, #tpu.memory_space<vmem>>, %arg5: memref<8x128xf32, #tpu.memory_space<vmem>>) attributes {dimension_semantics = [#tpu.dimension_semantics<parallel>, #tpu.dimension_semantics<parallel>], iteration_bounds = array<i64: 1, 1>, scalar_prefetch = 0 : i64, scratch_operands = 0 : i64, tpu.core_type = #tpu.core_type<tc>, window_params = [{transform_indices = @transform_0, window_bounds = array<i64: 8, 64>}, {transform_indices = @transform_1, window_bounds = array<i64: 64, 128>}, {transform_indices = @transform_2, window_bounds = array<i64: 1, 128>}, {transform_indices = @transform_3, window_bounds = array<i64: 8, 128>}]} {
    %c0 = arith.constant 0 : index
    %c0_0 = arith.constant 0 : index
    %0 = vector.load %arg2[%c0, %c0_0] : memref<8x64xbf16, #tpu.memory_space<vmem>>, vector<8x64xbf16>
    %c0_1 = arith.constant 0 : index
    %c0_2 = arith.constant 0 : index
    %1 = vector.load %arg3[%c0_1, %c0_2] : memref<64x128xbf16, #tpu.memory_space<vmem>>, vector<64x128xbf16>
    %cst = arith.constant dense<0.000000e+00> : vector<8x128xf32>
    %2 = tpu.matmul %0, %1, %cst {dimension_numbers = #tpu.dot_dimension_numbers<[1], [0], [0], [1], [0, 0, 1, 1], [], []>} : vector<8x64xbf16>, vector<64x128xbf16>, vector<8x128xf32> -> vector<8x128xf32>
    %c0_3 = arith.constant 0 : index
    %c0_4 = arith.constant 0 : index
    %3 = vector.load %arg4[%c0_3, %c0_4] : memref<1x128xf32, #tpu.memory_space<vmem>>, vector<1x128xf32>
    %4 = vector.broadcast %3 : vector<1x128xf32> to vector<8x128xf32>
    %5 = arith.addf %2, %4 : vector<8x128xf32>
    %c0_5 = arith.constant 0 : index
    %c0_6 = arith.constant 0 : index
    %6 = vector.load %arg5[%c0_5, %c0_6] : memref<8x128xf32, #tpu.memory_space<vmem>>, vector<8x128xf32>
    tpu.vector_store %arg5[%c0_5, %c0_6], %5 {strides = array<i32>} : memref<8x128xf32, #tpu.memory_space<vmem>>, vector<8x128xf32>,
    return
  }
  func.func @transform_0(%arg0: i32, %arg1: i32) -> (i32, i32) {
    %c0_i32 = arith.constant 0 : i32
    %c0_i32_0 = arith.constant 0 : i32
    return %arg0, %c0_i32 : i32, i32
  }
  func.func @transform_1(%arg0: i32, %arg1: i32) -> (i32, i32) {
    %c0_i32 = arith.constant 0 : i32
    %c0_i32_0 = arith.constant 0 : i32
    return %c0_i32, %arg1 : i32, i32
  }
  func.func @transform_2(%arg0: i32, %arg1: i32) -> (i32, i32) {
    %c0_i32 = arith.constant 0 : i32
    %c0_i32_0 = arith.constant 0 : i32
    return %c0_i32, %arg1 : i32, i32
  }
  func.func @transform_3(%arg0: i32, %arg1: i32) -> (i32, i32) {
    %c0_i32 = arith.constant 0 : i32
    return %arg0, %arg1 : i32, i32
  }
}

module attributes {stable_mosaic.version = 11 : i64} {
  func.func @_encoder_layer_kernel(%arg0: i32, %arg1: memref<8x128xf32, #tpu.memory_space<vmem>>, %arg2: memref<128x384xbf16, #tpu.memory_space<vmem>>, %arg3: memref<1x384xf32, #tpu.memory_space<vmem>>, %arg4: memref<128x128xbf16, #tpu.memory_space<vmem>>, %arg5: memref<1x128xf32, #tpu.memory_space<vmem>>, %arg6: memref<1x128xf32, #tpu.memory_space<vmem>>, %arg7: memref<1x128xf32, #tpu.memory_space<vmem>>, %arg8: memref<128x256xbf16, #tpu.memory_space<vmem>>, %arg9: memref<1x256xf32, #tpu.memory_space<vmem>>, %arg10: memref<256x128xbf16, #tpu.memory_space<vmem>>, %arg11: memref<1x128xf32, #tpu.memory_space<vmem>>, %arg12: memref<1x128xf32, #tpu.memory_space<vmem>>, %arg13: memref<1x128xf32, #tpu.memory_space<vmem>>, %arg14: memref<8x128xf32, #tpu.memory_space<vmem>>) attributes {dimension_semantics = [#tpu.dimension_semantics<arbitrary>], iteration_bounds = array<i64: 1>, scalar_prefetch = 0 : i64, scratch_operands = 0 : i64, tpu.core_type = #tpu.core_type<tc>, window_params = [{pipeline_mode = #tpu.pipeline_mode<synchronous>, transform_indices = @transform_0, window_bounds = array<i64: 8, 128>}, {pipeline_mode = #tpu.pipeline_mode<synchronous>, transform_indices = @transform_1, window_bounds = array<i64: 128, 384>}, {pipeline_mode = #tpu.pipeline_mode<synchronous>, transform_indices = @transform_2, window_bounds = array<i64: 1, 384>}, {pipeline_mode = #tpu.pipeline_mode<synchronous>, transform_indices = @transform_3, window_bounds = array<i64: 128, 128>}, {pipeline_mode = #tpu.pipeline_mode<synchronous>, transform_indices = @transform_4, window_bounds = array<i64: 1, 128>}, {pipeline_mode = #tpu.pipeline_mode<synchronous>, transform_indices = @transform_5, window_bounds = array<i64: 1, 128>}, {pipeline_mode = #tpu.pipeline_mode<synchronous>, transform_indices = @transform_6, window_bounds = array<i64: 1, 128>}, {pipeline_mode = #tpu.pipeline_mode<synchronous>, transform_indices = @transform_7, window_bounds = array<i64: 128, 256>}, {pipeline_mode = #tpu.pipeline_mode<synchronous>, transform_indices = @transform_8, window_bounds = array<i64: 1, 256>}, {pipeline_mode = #tpu.pipeline_mode<synchronous>, transform_indices = @transform_9, window_bounds = array<i64: 256, 128>}, {pipeline_mode = #tpu.pipeline_mode<synchronous>, transform_indices = @transform_10, window_bounds = array<i64: 1, 128>}, {pipeline_mode = #tpu.pipeline_mode<synchronous>, transform_indices = @transform_11, window_bounds = array<i64: 1, 128>}, {pipeline_mode = #tpu.pipeline_mode<synchronous>, transform_indices = @transform_12, window_bounds = array<i64: 1, 128>}, {pipeline_mode = #tpu.pipeline_mode<synchronous>, transform_indices = @transform_13, window_bounds = array<i64: 8, 128>}]} {
    %c0 = arith.constant 0 : index
    %c0_0 = arith.constant 0 : index
    %0 = vector.load %arg1[%c0, %c0_0] : memref<8x128xf32, #tpu.memory_space<vmem>>, vector<8x128xf32>
    %1 = arith.truncf %0 : vector<8x128xf32> to vector<8x128xbf16>
    %c0_1 = arith.constant 0 : index
    %c0_2 = arith.constant 0 : index
    %2 = vector.load %arg2[%c0_1, %c0_2] : memref<128x384xbf16, #tpu.memory_space<vmem>>, vector<128x384xbf16>
    %cst = arith.constant dense<0.000000e+00> : vector<8x384xf32>
    %3 = tpu.matmul %1, %2, %cst {dimension_numbers = #tpu.dot_dimension_numbers<[1], [0], [0], [1], [0, 0, 1, 1], [], []>} : vector<8x128xbf16>, vector<128x384xbf16>, vector<8x384xf32> -> vector<8x384xf32>
    %c0_3 = arith.constant 0 : index
    %c0_4 = arith.constant 0 : index
    %4 = vector.load %arg3[%c0_3, %c0_4] : memref<1x384xf32, #tpu.memory_space<vmem>>, vector<1x384xf32>
    %5 = vector.broadcast %4 : vector<1x384xf32> to vector<8x384xf32>
    %6 = arith.addf %3, %5 : vector<8x384xf32>
    %7 = vector.extract_strided_slice %6 {offsets = [0, 0], sizes = [8, 32], strides = [1, 1]} : vector<8x384xf32> to vector<8x32xf32>
    %8 = vector.extract_strided_slice %6 {offsets = [0, 128], sizes = [8, 32], strides = [1, 1]} : vector<8x384xf32> to vector<8x32xf32>
    %9 = vector.extract_strided_slice %6 {offsets = [0, 256], sizes = [8, 32], strides = [1, 1]} : vector<8x384xf32> to vector<8x32xf32>
    %10 = arith.truncf %7 : vector<8x32xf32> to vector<8x32xbf16>
    %11 = arith.truncf %8 : vector<8x32xf32> to vector<8x32xbf16>
    %cst_5 = arith.constant dense<0.000000e+00> : vector<8x8xf32>
    %12 = tpu.matmul %10, %11, %cst_5 {dimension_numbers = #tpu.dot_dimension_numbers<[1], [1], [0], [0], [0, 0, 1, 0], [], []>} : vector<8x32xbf16>, vector<8x32xbf16>, vector<8x8xf32> -> vector<8x8xf32>
    %cst_6 = arith.constant dense<0xFF800000> : vector<8xf32>
    %13 = vector.multi_reduction <maximumf>, %12, %cst_6 [1] : vector<8x8xf32> to vector<8xf32>
    %14 = vector.shape_cast %13 : vector<8xf32> to vector<8x1xf32>
    %15 = vector.broadcast %14 : vector<8x1xf32> to vector<8x8xf32>
    %16 = arith.subf %12, %15 : vector<8x8xf32>
    %17 = math.exp %16 : vector<8x8xf32>
    %cst_7 = arith.constant dense<0.000000e+00> : vector<8xf32>
    %18 = vector.multi_reduction <add>, %17, %cst_7 [1] : vector<8x8xf32> to vector<8xf32>
    %19 = vector.shape_cast %18 : vector<8xf32> to vector<8x1xf32>
    %20 = vector.broadcast %19 : vector<8x1xf32> to vector<8x8xf32>
    %21 = arith.divf %17, %20 : vector<8x8xf32>
    %22 = arith.truncf %21 : vector<8x8xf32> to vector<8x8xbf16>
    %23 = arith.truncf %9 : vector<8x32xf32> to vector<8x32xbf16>
    %cst_8 = arith.constant dense<0.000000e+00> : vector<8x32xf32>
    %24 = tpu.matmul %22, %23, %cst_8 {dimension_numbers = #tpu.dot_dimension_numbers<[1], [0], [0], [1], [0, 0, 1, 1], [], []>} : vector<8x8xbf16>, vector<8x32xbf16>, vector<8x32xf32> -> vector<8x32xf32>
    %25 = vector.extract_strided_slice %6 {offsets = [0, 32], sizes = [8, 32], strides = [1, 1]} : vector<8x384xf32> to vector<8x32xf32>
    %26 = vector.extract_strided_slice %6 {offsets = [0, 160], sizes = [8, 32], strides = [1, 1]} : vector<8x384xf32> to vector<8x32xf32>
    %27 = vector.extract_strided_slice %6 {offsets = [0, 288], sizes = [8, 32], strides = [1, 1]} : vector<8x384xf32> to vector<8x32xf32>
    %28 = arith.truncf %25 : vector<8x32xf32> to vector<8x32xbf16>
    %29 = arith.truncf %26 : vector<8x32xf32> to vector<8x32xbf16>
    %cst_9 = arith.constant dense<0.000000e+00> : vector<8x8xf32>
    %30 = tpu.matmul %28, %29, %cst_9 {dimension_numbers = #tpu.dot_dimension_numbers<[1], [1], [0], [0], [0, 0, 1, 0], [], []>} : vector<8x32xbf16>, vector<8x32xbf16>, vector<8x8xf32> -> vector<8x8xf32>
    %cst_10 = arith.constant dense<0xFF800000> : vector<8xf32>
    %31 = vector.multi_reduction <maximumf>, %30, %cst_10 [1] : vector<8x8xf32> to vector<8xf32>
    %32 = vector.shape_cast %31 : vector<8xf32> to vector<8x1xf32>
    %33 = vector.broadcast %32 : vector<8x1xf32> to vector<8x8xf32>
    %34 = arith.subf %30, %33 : vector<8x8xf32>
    %35 = math.exp %34 : vector<8x8xf32>
    %cst_11 = arith.constant dense<0.000000e+00> : vector<8xf32>
    %36 = vector.multi_reduction <add>, %35, %cst_11 [1] : vector<8x8xf32> to vector<8xf32>
    %37 = vector.shape_cast %36 : vector<8xf32> to vector<8x1xf32>
    %38 = vector.broadcast %37 : vector<8x1xf32> to vector<8x8xf32>
    %39 = arith.divf %35, %38 : vector<8x8xf32>
    %40 = arith.truncf %39 : vector<8x8xf32> to vector<8x8xbf16>
    %41 = arith.truncf %27 : vector<8x32xf32> to vector<8x32xbf16>
    %cst_12 = arith.constant dense<0.000000e+00> : vector<8x32xf32>
    %42 = tpu.matmul %40, %41, %cst_12 {dimension_numbers = #tpu.dot_dimension_numbers<[1], [0], [0], [1], [0, 0, 1, 1], [], []>} : vector<8x8xbf16>, vector<8x32xbf16>, vector<8x32xf32> -> vector<8x32xf32>
    %43 = vector.extract_strided_slice %6 {offsets = [0, 64], sizes = [8, 32], strides = [1, 1]} : vector<8x384xf32> to vector<8x32xf32>
    %44 = vector.extract_strided_slice %6 {offsets = [0, 192], sizes = [8, 32], strides = [1, 1]} : vector<8x384xf32> to vector<8x32xf32>
    %45 = vector.extract_strided_slice %6 {offsets = [0, 320], sizes = [8, 32], strides = [1, 1]} : vector<8x384xf32> to vector<8x32xf32>
    %46 = arith.truncf %43 : vector<8x32xf32> to vector<8x32xbf16>
    %47 = arith.truncf %44 : vector<8x32xf32> to vector<8x32xbf16>
    %cst_13 = arith.constant dense<0.000000e+00> : vector<8x8xf32>
    %48 = tpu.matmul %46, %47, %cst_13 {dimension_numbers = #tpu.dot_dimension_numbers<[1], [1], [0], [0], [0, 0, 1, 0], [], []>} : vector<8x32xbf16>, vector<8x32xbf16>, vector<8x8xf32> -> vector<8x8xf32>
    %cst_14 = arith.constant dense<0xFF800000> : vector<8xf32>
    %49 = vector.multi_reduction <maximumf>, %48, %cst_14 [1] : vector<8x8xf32> to vector<8xf32>
    %50 = vector.shape_cast %49 : vector<8xf32> to vector<8x1xf32>
    %51 = vector.broadcast %50 : vector<8x1xf32> to vector<8x8xf32>
    %52 = arith.subf %48, %51 : vector<8x8xf32>
    %53 = math.exp %52 : vector<8x8xf32>
    %cst_15 = arith.constant dense<0.000000e+00> : vector<8xf32>
    %54 = vector.multi_reduction <add>, %53, %cst_15 [1] : vector<8x8xf32> to vector<8xf32>
    %55 = vector.shape_cast %54 : vector<8xf32> to vector<8x1xf32>
    %56 = vector.broadcast %55 : vector<8x1xf32> to vector<8x8xf32>
    %57 = arith.divf %53, %56 : vector<8x8xf32>
    %58 = arith.truncf %57 : vector<8x8xf32> to vector<8x8xbf16>
    %59 = arith.truncf %45 : vector<8x32xf32> to vector<8x32xbf16>
    %cst_16 = arith.constant dense<0.000000e+00> : vector<8x32xf32>
    %60 = tpu.matmul %58, %59, %cst_16 {dimension_numbers = #tpu.dot_dimension_numbers<[1], [0], [0], [1], [0, 0, 1, 1], [], []>} : vector<8x8xbf16>, vector<8x32xbf16>, vector<8x32xf32> -> vector<8x32xf32>
    %61 = vector.extract_strided_slice %6 {offsets = [0, 96], sizes = [8, 32], strides = [1, 1]} : vector<8x384xf32> to vector<8x32xf32>
    %62 = vector.extract_strided_slice %6 {offsets = [0, 224], sizes = [8, 32], strides = [1, 1]} : vector<8x384xf32> to vector<8x32xf32>
    %63 = vector.extract_strided_slice %6 {offsets = [0, 352], sizes = [8, 32], strides = [1, 1]} : vector<8x384xf32> to vector<8x32xf32>
    %64 = arith.truncf %61 : vector<8x32xf32> to vector<8x32xbf16>
    %65 = arith.truncf %62 : vector<8x32xf32> to vector<8x32xbf16>
    %cst_17 = arith.constant dense<0.000000e+00> : vector<8x8xf32>
    %66 = tpu.matmul %64, %65, %cst_17 {dimension_numbers = #tpu.dot_dimension_numbers<[1], [1], [0], [0], [0, 0, 1, 0], [], []>} : vector<8x32xbf16>, vector<8x32xbf16>, vector<8x8xf32> -> vector<8x8xf32>
    %cst_18 = arith.constant dense<0xFF800000> : vector<8xf32>
    %67 = vector.multi_reduction <maximumf>, %66, %cst_18 [1] : vector<8x8xf32> to vector<8xf32>
    %68 = vector.shape_cast %67 : vector<8xf32> to vector<8x1xf32>
    %69 = vector.broadcast %68 : vector<8x1xf32> to vector<8x8xf32>
    %70 = arith.subf %66, %69 : vector<8x8xf32>
    %71 = math.exp %70 : vector<8x8xf32>
    %cst_19 = arith.constant dense<0.000000e+00> : vector<8xf32>
    %72 = vector.multi_reduction <add>, %71, %cst_19 [1] : vector<8x8xf32> to vector<8xf32>
    %73 = vector.shape_cast %72 : vector<8xf32> to vector<8x1xf32>
    %74 = vector.broadcast %73 : vector<8x1xf32> to vector<8x8xf32>
    %75 = arith.divf %71, %74 : vector<8x8xf32>
    %76 = arith.truncf %75 : vector<8x8xf32> to vector<8x8xbf16>
    %77 = arith.truncf %63 : vector<8x32xf32> to vector<8x32xbf16>
    %cst_20 = arith.constant dense<0.000000e+00> : vector<8x32xf32>
    %78 = tpu.matmul %76, %77, %cst_20 {dimension_numbers = #tpu.dot_dimension_numbers<[1], [0], [0], [1], [0, 0, 1, 1], [], []>} : vector<8x8xbf16>, vector<8x32xbf16>, vector<8x32xf32> -> vector<8x32xf32>
    %79 = tpu.concatenate %24, %42, %60, %78 in 1 : vector<8x32xf32>, vector<8x32xf32>, vector<8x32xf32>, vector<8x32xf32> -> vector<8x128xf32>
    %80 = arith.truncf %79 : vector<8x128xf32> to vector<8x128xbf16>
    %c0_21 = arith.constant 0 : index
    %c0_22 = arith.constant 0 : index
    %81 = vector.load %arg4[%c0_21, %c0_22] : memref<128x128xbf16, #tpu.memory_space<vmem>>, vector<128x128xbf16>
    %cst_23 = arith.constant dense<0.000000e+00> : vector<8x128xf32>
    %82 = tpu.matmul %80, %81, %cst_23 {dimension_numbers = #tpu.dot_dimension_numbers<[1], [0], [0], [1], [0, 0, 1, 1], [], []>} : vector<8x128xbf16>, vector<128x128xbf16>, vector<8x128xf32> -> vector<8x128xf32>
    %c0_24 = arith.constant 0 : index
    %c0_25 = arith.constant 0 : index
    %83 = vector.load %arg5[%c0_24, %c0_25] : memref<1x128xf32, #tpu.memory_space<vmem>>, vector<1x128xf32>
    %84 = vector.broadcast %83 : vector<1x128xf32> to vector<8x128xf32>
    %85 = arith.addf %82, %84 : vector<8x128xf32>
    %86 = arith.addf %85, %0 : vector<8x128xf32>
    %cst_26 = arith.constant dense<0.000000e+00> : vector<8xf32>
    %87 = vector.multi_reduction <add>, %86, %cst_26 [1] : vector<8x128xf32> to vector<8xf32>
    %88 = vector.shape_cast %87 : vector<8xf32> to vector<8x1xf32>
    %cst_27 = arith.constant 1.280000e+02 : f32
    %89 = vector.broadcast %cst_27 : f32 to vector<8x1xf32>
    %90 = arith.divf %88, %89 : vector<8x1xf32>
    %91 = vector.broadcast %90 : vector<8x1xf32> to vector<8x128xf32>
    %92 = arith.subf %86, %91 : vector<8x128xf32>
    %93 = arith.mulf %92, %92 : vector<8x128xf32>
    %cst_28 = arith.constant dense<0.000000e+00> : vector<8xf32>
    %94 = vector.multi_reduction <add>, %93, %cst_28 [1] : vector<8x128xf32> to vector<8xf32>
    %95 = vector.shape_cast %94 : vector<8xf32> to vector<8x1xf32>
    %cst_29 = arith.constant 1.280000e+02 : f32
    %96 = vector.broadcast %cst_29 : f32 to vector<8x1xf32>
    %97 = arith.divf %95, %96 : vector<8x1xf32>
    %cst_30 = arith.constant 9.99999974E-6 : f32
    %98 = vector.broadcast %cst_30 : f32 to vector<8x1xf32>
    %99 = arith.addf %97, %98 : vector<8x1xf32>
    %100 = math.rsqrt %99 : vector<8x1xf32>
    %101 = vector.broadcast %100 : vector<8x1xf32> to vector<8x128xf32>
    %102 = arith.mulf %92, %101 : vector<8x128xf32>
    %c0_31 = arith.constant 0 : index
    %c0_32 = arith.constant 0 : index
    %103 = vector.load %arg6[%c0_31, %c0_32] : memref<1x128xf32, #tpu.memory_space<vmem>>, vector<1x128xf32>
    %104 = vector.broadcast %103 : vector<1x128xf32> to vector<8x128xf32>
    %105 = arith.mulf %102, %104 : vector<8x128xf32>
    %c0_33 = arith.constant 0 : index
    %c0_34 = arith.constant 0 : index
    %106 = vector.load %arg7[%c0_33, %c0_34] : memref<1x128xf32, #tpu.memory_space<vmem>>, vector<1x128xf32>
    %107 = vector.broadcast %106 : vector<1x128xf32> to vector<8x128xf32>
    %108 = arith.addf %105, %107 : vector<8x128xf32>
    %109 = arith.truncf %108 : vector<8x128xf32> to vector<8x128xbf16>
    %c0_35 = arith.constant 0 : index
    %c0_36 = arith.constant 0 : index
    %110 = vector.load %arg8[%c0_35, %c0_36] : memref<128x256xbf16, #tpu.memory_space<vmem>>, vector<128x256xbf16>
    %cst_37 = arith.constant dense<0.000000e+00> : vector<8x256xf32>
    %111 = tpu.matmul %109, %110, %cst_37 {dimension_numbers = #tpu.dot_dimension_numbers<[1], [0], [0], [1], [0, 0, 1, 1], [], []>} : vector<8x128xbf16>, vector<128x256xbf16>, vector<8x256xf32> -> vector<8x256xf32>
    %c0_38 = arith.constant 0 : index
    %c0_39 = arith.constant 0 : index
    %112 = vector.load %arg9[%c0_38, %c0_39] : memref<1x256xf32, #tpu.memory_space<vmem>>, vector<1x256xf32>
    %113 = vector.broadcast %112 : vector<1x256xf32> to vector<8x256xf32>
    %114 = arith.addf %111, %113 : vector<8x256xf32>
    %cst_40 = arith.constant 0.000000e+00 : f32
    %115 = vector.broadcast %cst_40 : f32 to vector<8x256xf32>
    %116 = arith.maximumf %114, %115 : vector<8x256xf32>
    %117 = arith.truncf %116 : vector<8x256xf32> to vector<8x256xbf16>
    %c0_41 = arith.constant 0 : index
    %c0_42 = arith.constant 0 : index
    %118 = vector.load %arg10[%c0_41, %c0_42] : memref<256x128xbf16, #tpu.memory_space<vmem>>, vector<256x128xbf16>
    %cst_43 = arith.constant dense<0.000000e+00> : vector<8x128xf32>
    %119 = tpu.matmul %117, %118, %cst_43 {dimension_numbers = #tpu.dot_dimension_numbers<[1], [0], [0], [1], [0, 0, 1, 1], [], []>} : vector<8x256xbf16>, vector<256x128xbf16>, vector<8x128xf32> -> vector<8x128xf32>
    %c0_44 = arith.constant 0 : index
    %c0_45 = arith.constant 0 : index
    %120 = vector.load %arg11[%c0_44, %c0_45] : memref<1x128xf32, #tpu.memory_space<vmem>>, vector<1x128xf32>
    %121 = vector.broadcast %120 : vector<1x128xf32> to vector<8x128xf32>
    %122 = arith.addf %119, %121 : vector<8x128xf32>
    %123 = arith.addf %122, %108 : vector<8x128xf32>
    %cst_46 = arith.constant dense<0.000000e+00> : vector<8xf32>
    %124 = vector.multi_reduction <add>, %123, %cst_46 [1] : vector<8x128xf32> to vector<8xf32>
    %125 = vector.shape_cast %124 : vector<8xf32> to vector<8x1xf32>
    %cst_47 = arith.constant 1.280000e+02 : f32
    %126 = vector.broadcast %cst_47 : f32 to vector<8x1xf32>
    %127 = arith.divf %125, %126 : vector<8x1xf32>
    %128 = vector.broadcast %127 : vector<8x1xf32> to vector<8x128xf32>
    %129 = arith.subf %123, %128 : vector<8x128xf32>
    %130 = arith.mulf %129, %129 : vector<8x128xf32>
    %cst_48 = arith.constant dense<0.000000e+00> : vector<8xf32>
    %131 = vector.multi_reduction <add>, %130, %cst_48 [1] : vector<8x128xf32> to vector<8xf32>
    %132 = vector.shape_cast %131 : vector<8xf32> to vector<8x1xf32>
    %cst_49 = arith.constant 1.280000e+02 : f32
    %133 = vector.broadcast %cst_49 : f32 to vector<8x1xf32>
    %134 = arith.divf %132, %133 : vector<8x1xf32>
    %cst_50 = arith.constant 9.99999974E-6 : f32
    %135 = vector.broadcast %cst_50 : f32 to vector<8x1xf32>
    %136 = arith.addf %134, %135 : vector<8x1xf32>
    %137 = math.rsqrt %136 : vector<8x1xf32>
    %138 = vector.broadcast %137 : vector<8x1xf32> to vector<8x128xf32>
    %139 = arith.mulf %129, %138 : vector<8x128xf32>
    %c0_51 = arith.constant 0 : index
    %c0_52 = arith.constant 0 : index
    %140 = vector.load %arg12[%c0_51, %c0_52] : memref<1x128xf32, #tpu.memory_space<vmem>>, vector<1x128xf32>
    %141 = vector.broadcast %140 : vector<1x128xf32> to vector<8x128xf32>
    %142 = arith.mulf %139, %141 : vector<8x128xf32>
    %c0_53 = arith.constant 0 : index
    %c0_54 = arith.constant 0 : index
    %143 = vector.load %arg13[%c0_53, %c0_54] : memref<1x128xf32, #tpu.memory_space<vmem>>, vector<1x128xf32>
    %144 = vector.broadcast %143 : vector<1x128xf32> to vector<8x128xf32>
    %145 = arith.addf %142, %144 : vector<8x128xf32>
    %c0_55 = arith.constant 0 : index
    %c0_56 = arith.constant 0 : index
    %146 = vector.load %arg14[%c0_55, %c0_56] : memref<8x128xf32, #tpu.memory_space<vmem>>, vector<8x128xf32>
    tpu.vector_store %arg14[%c0_55, %c0_56], %145 {strides = array<i32>} : memref<8x128xf32, #tpu.memory_space<vmem>>, vector<8x128xf32>,
    return
  }
  func.func @transform_0(%arg0: i32) -> (i32, i32) {
    %c0_i32 = arith.constant 0 : i32
    %c0_i32_0 = arith.constant 0 : i32
    %c0_i32_1 = arith.constant 0 : i32
    return %c0_i32, %c0_i32_0 : i32, i32
  }
  func.func @transform_1(%arg0: i32) -> (i32, i32) {
    %c0_i32 = arith.constant 0 : i32
    %c0_i32_0 = arith.constant 0 : i32
    %c0_i32_1 = arith.constant 0 : i32
    return %c0_i32, %c0_i32_0 : i32, i32
  }
  func.func @transform_2(%arg0: i32) -> (i32, i32) {
    %c0_i32 = arith.constant 0 : i32
    %c0_i32_0 = arith.constant 0 : i32
    %c0_i32_1 = arith.constant 0 : i32
    return %c0_i32, %c0_i32_0 : i32, i32
  }
  func.func @transform_3(%arg0: i32) -> (i32, i32) {
    %c0_i32 = arith.constant 0 : i32
    %c0_i32_0 = arith.constant 0 : i32
    %c0_i32_1 = arith.constant 0 : i32
    return %c0_i32, %c0_i32_0 : i32, i32
  }
  func.func @transform_4(%arg0: i32) -> (i32, i32) {
    %c0_i32 = arith.constant 0 : i32
    %c0_i32_0 = arith.constant 0 : i32
    %c0_i32_1 = arith.constant 0 : i32
    return %c0_i32, %c0_i32_0 : i32, i32
  }
  func.func @transform_5(%arg0: i32) -> (i32, i32) {
    %c0_i32 = arith.constant 0 : i32
    %c0_i32_0 = arith.constant 0 : i32
    %c0_i32_1 = arith.constant 0 : i32
    return %c0_i32, %c0_i32_0 : i32, i32
  }
  func.func @transform_6(%arg0: i32) -> (i32, i32) {
    %c0_i32 = arith.constant 0 : i32
    %c0_i32_0 = arith.constant 0 : i32
    %c0_i32_1 = arith.constant 0 : i32
    return %c0_i32, %c0_i32_0 : i32, i32
  }
  func.func @transform_7(%arg0: i32) -> (i32, i32) {
    %c0_i32 = arith.constant 0 : i32
    %c0_i32_0 = arith.constant 0 : i32
    %c0_i32_1 = arith.constant 0 : i32
    return %c0_i32, %c0_i32_0 : i32, i32
  }
  func.func @transform_8(%arg0: i32) -> (i32, i32) {
    %c0_i32 = arith.constant 0 : i32
    %c0_i32_0 = arith.constant 0 : i32
    %c0_i32_1 = arith.constant 0 : i32
    return %c0_i32, %c0_i32_0 : i32, i32
  }
  func.func @transform_9(%arg0: i32) -> (i32, i32) {
    %c0_i32 = arith.constant 0 : i32
    %c0_i32_0 = arith.constant 0 : i32
    %c0_i32_1 = arith.constant 0 : i32
    return %c0_i32, %c0_i32_0 : i32, i32
  }
  func.func @transform_10(%arg0: i32) -> (i32, i32) {
    %c0_i32 = arith.constant 0 : i32
    %c0_i32_0 = arith.constant 0 : i32
    %c0_i32_1 = arith.constant 0 : i32
    return %c0_i32, %c0_i32_0 : i32, i32
  }
  func.func @transform_11(%arg0: i32) -> (i32, i32) {
    %c0_i32 = arith.constant 0 : i32
    %c0_i32_0 = arith.constant 0 : i32
    %c0_i32_1 = arith.constant 0 : i32
    return %c0_i32, %c0_i32_0 : i32, i32
  }
  func.func @transform_12(%arg0: i32) -> (i32, i32) {
    %c0_i32 = arith.constant 0 : i32
    %c0_i32_0 = arith.constant 0 : i32
    %c0_i32_1 = arith.constant 0 : i32
    return %c0_i32, %c0_i32_0 : i32, i32
  }
  func.func @transform_13(%arg0: i32) -> (i32, i32) {
    %c0_i32 = arith.constant 0 : i32
    %c0_i32_0 = arith.constant 0 : i32
    %c0_i32_1 = arith.constant 0 : i32
    return %c0_i32, %c0_i32_0 : i32, i32
  }
}

module attributes {stable_mosaic.version = 11 : i64} {
  func.func @_linear_kernel(%arg0: i32, %arg1: i32, %arg2: memref<8x128xbf16, #tpu.memory_space<vmem>>, %arg3: memref<128x128xbf16, #tpu.memory_space<vmem>>, %arg4: memref<1x128xf32, #tpu.memory_space<vmem>>, %arg5: memref<8x128xf32, #tpu.memory_space<vmem>>) attributes {dimension_semantics = [#tpu.dimension_semantics<parallel>, #tpu.dimension_semantics<parallel>], iteration_bounds = array<i64: 1, 1>, scalar_prefetch = 0 : i64, scratch_operands = 0 : i64, tpu.core_type = #tpu.core_type<tc>, window_params = [{transform_indices = @transform_0, window_bounds = array<i64: 8, 128>}, {transform_indices = @transform_1, window_bounds = array<i64: 128, 128>}, {transform_indices = @transform_2, window_bounds = array<i64: 1, 128>}, {transform_indices = @transform_3, window_bounds = array<i64: 8, 128>}]} {
    %c0 = arith.constant 0 : index
    %c0_0 = arith.constant 0 : index
    %0 = vector.load %arg2[%c0, %c0_0] : memref<8x128xbf16, #tpu.memory_space<vmem>>, vector<8x128xbf16>
    %c0_1 = arith.constant 0 : index
    %c0_2 = arith.constant 0 : index
    %1 = vector.load %arg3[%c0_1, %c0_2] : memref<128x128xbf16, #tpu.memory_space<vmem>>, vector<128x128xbf16>
    %cst = arith.constant dense<0.000000e+00> : vector<8x128xf32>
    %2 = tpu.matmul %0, %1, %cst {dimension_numbers = #tpu.dot_dimension_numbers<[1], [0], [0], [1], [0, 0, 1, 1], [], []>} : vector<8x128xbf16>, vector<128x128xbf16>, vector<8x128xf32> -> vector<8x128xf32>
    %c0_3 = arith.constant 0 : index
    %c0_4 = arith.constant 0 : index
    %3 = vector.load %arg4[%c0_3, %c0_4] : memref<1x128xf32, #tpu.memory_space<vmem>>, vector<1x128xf32>
    %4 = vector.broadcast %3 : vector<1x128xf32> to vector<8x128xf32>
    %5 = arith.addf %2, %4 : vector<8x128xf32>
    %c0_5 = arith.constant 0 : index
    %c0_6 = arith.constant 0 : index
    %6 = vector.load %arg5[%c0_5, %c0_6] : memref<8x128xf32, #tpu.memory_space<vmem>>, vector<8x128xf32>
    tpu.vector_store %arg5[%c0_5, %c0_6], %5 {strides = array<i32>} : memref<8x128xf32, #tpu.memory_space<vmem>>, vector<8x128xf32>,
    return
  }
  func.func @transform_0(%arg0: i32, %arg1: i32) -> (i32, i32) {
    %c0_i32 = arith.constant 0 : i32
    %c0_i32_0 = arith.constant 0 : i32
    return %arg0, %c0_i32 : i32, i32
  }
  func.func @transform_1(%arg0: i32, %arg1: i32) -> (i32, i32) {
    %c0_i32 = arith.constant 0 : i32
    %c0_i32_0 = arith.constant 0 : i32
    return %c0_i32, %arg1 : i32, i32
  }
  func.func @transform_2(%arg0: i32, %arg1: i32) -> (i32, i32) {
    %c0_i32 = arith.constant 0 : i32
    %c0_i32_0 = arith.constant 0 : i32
    return %c0_i32, %arg1 : i32, i32
  }
  func.func @transform_3(%arg0: i32, %arg1: i32) -> (i32, i32) {
    %c0_i32 = arith.constant 0 : i32
    return %arg0, %arg1 : i32, i32
  }
}

</mosaic_0001>

<bundles_post_ra>
// kernel: run.24
= control target key start
LH: loop header
LB: loop body
LE: loop exit
PB: predicated region body
PF: predicated region fallthrough
CT: control target
= control target key end

     0   :  { %v149_v1 = vmov 0   ;;  %vm76_vm0 = vcmask 523264   ;;  %v26_v10 = vlaneseq  ;;  %s206_s1 = inlined_call_operand.vmem [shape: bf16[64,256], index: 1, kind: input, shape index: {}]   ;;  %s207_s0 = inlined_call_operand.vmem [shape: bf16[8,64], index: 0, kind: input, shape index: {}]   ;;  %s208_s2 = inlined_call_operand.vmem [shape: f32[1,256], index: 2, kind: input, shape index: {}]   ;;  %s209_s3 = inlined_call_operand.vmem [shape: f32[8,256], index: 3, kind: output, shape index: {}]  }
   0x1   :  { %v137_v0 = vld [vmem:[%s206_s1 + $0x4] ss:$8 sps:$4 sm:$0xff]   ;;  %112 = vmatprep.mubr.bf16.mxu0 %v149_v1  ;;  %v139_v2 = vld [vmem:[%s206_s1] ss:$8 sps:$4 sm:$0xff]   ;;  %v140_v3 = vld [vmem:[%s206_s1 + $0x14] ss:$8 sps:$4 sm:$0xff]  }
   0x2   :  { %80 = vmatprep.subr.bf16.mxu0 %v137_v0  ;;  %v142_v4 = vld [vmem:[%s206_s1 + $0x10] ss:$8 sps:$4 sm:$0xff]   ;;  %v143_v5 = vld [vmem:[%s206_s1 + $0x24] ss:$8 sps:$4 sm:$0xff]   ;;  %v145_v6 = vld [vmem:[%s206_s1 + $0x20] ss:$8 sps:$4 sm:$0xff]  }
   0x3   :  { %81 = vmatpush1.bf16.msra.mxu0 %v139_v2  ;;  %v146_v7 = vld [vmem:[%s206_s1 + $0x34] ss:$8 sps:$4 sm:$0xff]   ;;  %v148_v8 = vld [vmem:[%s206_s1 + $0x30] ss:$8 sps:$4 sm:$0xff]   ;;  %v15_v9 = vld [vmem:[%s207_s0] sm:$0xf] }
   0x4   :  { %82 = vmatprep.subr.bf16.mxu0 %v140_v3  ;;  %v27_v11 = vshrl.u32 %v26_v10, 7  ;;  %v24_v13 = vld [vmem:[%s208_s2] sm:$0x3] }
   0x6   :  { %v28_v12 = vsub.s32 0, %v27_v11  ;;  %v32_v14 = vsub.s32 1, %v27_v11 }
   0x7   :  { %83 = vmatpush1.bf16.msra.mxu0 %v142_v4 }
   0x8   :  { %84 = vmatprep.subr.bf16.mxu0 %v143_v5  ;;  %v29_v15 = vrot.slane %v24_v13, %v28_v12  ;;  %v33_v16 = vrot.slane %v24_v13, %v32_v14 }
   0xb   :  { %85 = vmatpush1.bf16.msra.mxu0 %v145_v6 }
   0xc   :  { %86 = vmatprep.subr.bf16.mxu0 %v146_v7 }
   0xf   :  { %87 = vmatpush1.bf16.msra.mxu0 %v148_v8 }
  0x12   :  { %135 = vmatmul.mubr.msk.bf16.vlgmr.msra.gmra.mrb[0].mxu0 %vm76_vm0, %v15_v9 }
  0xe5   :  { %v114_v17 = vpop.f32.mrb[0].mxu0 }
  0xe6   :  { %v115_v18 = vadd.f32 %v114_v17, %v29_v15  ;;  %v116_v19 = vpop.f32.mrb[1].mxu0 }
  0xe7   :  { %v117_v20 = vadd.f32 %v116_v19, %v33_v16  ;;  %v118_v21 = vpop.f32.mrb[2].mxu0 }
  0xe8   :  { %121 = vst [vmem:[%s209_s3] sm:$0xff] %v115_v18  ;;  %v119_v22 = vpop.f32.mrb[3].mxu0 }
  0xe9   :  { %122 = vst [vmem:[%s209_s3 + $0x8] sm:$0xff] %v117_v20 }

// kernel: run.27
= control target key start
LH: loop header
LB: loop body
LE: loop exit
PB: predicated region body
PF: predicated region fallthrough
CT: control target
= control target key end

     0   :  { %s339_s1 = inlined_call_operand.vmem [shape: bf16[256,128], index: 1, kind: input, shape index: {}]   ;;  %s340_s0 = inlined_call_operand.vmem [shape: bf16[8,256], index: 0, kind: input, shape index: {}]   ;;  %s341_s2 = inlined_call_operand.vmem [shape: f32[1,128], index: 2, kind: input, shape index: {}]   ;;  %s342_s3 = inlined_call_operand.vmem [shape: f32[8,128], index: 3, kind: output, shape index: {}]  }
   0x1   :  { %v244_v0 = vld [vmem:[%s339_s1 + $0x40] sm:$0xff]   ;;  %v246_v2 = vld [vmem:[%s339_s1 + $0x48] sm:$0xff]   ;;  %v248_v4 = vld [vmem:[%s339_s1 + $0x50] sm:$0xff]  }
   0x2   :  { %v245_v1 = vld [vmem:[%s339_s1] sm:$0xff]   ;;  %222 = vmatprep.subr.bf16.mxu0 %v244_v0  ;;  %v247_v3 = vld [vmem:[%s339_s1 + $0x8] sm:$0xff]   ;;  %v249_v5 = vld [vmem:[%s339_s1 + $0x10] sm:$0xff]  }
   0x3   :  { %223 = vmatpush3.bf16.msra.mxu0 %v245_v1  ;;  %v250_v6 = vld [vmem:[%s339_s1 + $0x58] sm:$0xff]   ;;  %v252_v8 = vld [vmem:[%s339_s1 + $0x60] sm:$0xff]   ;;  %v254_v10 = vld [vmem:[%s339_s1 + $0x68] sm:$0xff]  }
   0x4   :  { %224 = vmatprep.subr.bf16.mxu0 %v246_v2  ;;  %v251_v7 = vld [vmem:[%s339_s1 + $0x18] sm:$0xff]   ;;  %v253_v9 = vld [vmem:[%s339_s1 + $0x20] sm:$0xff]   ;;  %v255_v13 = vld [vmem:[%s339_s1 + $0x28] sm:$0xff]  }
   0x5   :  { %v15_v11 = vld [vmem:[%s340_s0] sm:$0xff]  ;;  %v256_v14 = vld [vmem:[%s339_s1 + $0x70] sm:$0xff]   ;;  %v258_v16 = vld [vmem:[%s339_s1 + $0x78] sm:$0xff]  }
   0x6   :  { %v205_v12 = vcombine.high %v15_v11, %v15_v11  ;;  %v257_v15 = vld [vmem:[%s339_s1 + $0x30] sm:$0xff]   ;;  %v259_v17 = vld [vmem:[%s339_s1 + $0x38] sm:$0xff]   ;;  %v204_v18 = vcombine.low %v15_v11, %v15_v11  ;;  %v203_v20 = vld [vmem:[%s341_s2] ss:$0 sm:$0xff] }
   0x7   :  { %225 = vmatpush3.bf16.msra.mxu0 %v247_v3 }
   0x8   :  { %226 = vmatprep.subr.bf16.mxu0 %v248_v4  ;;  %190 = vmatprep.mubr.bf16.mxu0 %v205_v12 }
   0xb   :  { %227 = vmatpush3.bf16.msra.mxu0 %v249_v5 }
   0xc   :  { %228 = vmatprep.subr.bf16.mxu0 %v250_v6 }
   0xf   :  { %229 = vmatpush3.bf16.msra.mxu0 %v251_v7 }
  0x10   :  { %230 = vmatprep.subr.bf16.mxu0 %v252_v8 }
  0x13   :  { %231 = vmatpush3.bf16.msra.mxu0 %v253_v9 }
  0x14   :  { %232 = vmatprep.subr.bf16.mxu0 %v254_v10 }
  0x17   :  { %233 = vmatpush3.bf16.msra.mxu0 %v255_v13 }
  0x18   :  { %234 = vmatprep.subr.bf16.mxu0 %v256_v14 }
  0x1b   :  { %235 = vmatpush3.bf16.msra.mxu0 %v257_v15 }
  0x1c   :  { %236 = vmatprep.subr.bf16.mxu0 %v258_v16 }
  0x1f   :  { %237 = vmatpush3.bf16.msra.mxu0 %v259_v17 }
  0x22   :  { %191 = vmatmul.mubr.bf16.vlgmr.msra.gmra.mrb[0].mxu0 %v204_v18 }
  0xf5   :  { %v238_v19 = vpop.f32.mrb[0].mxu0 }
  0xf6   :  { %v239_v21 = vpop.f32.mrb[1].mxu0 }
  0xf7   :  { %v240_v22 = vadd.f32 %v239_v21, %v238_v19  ;;  %v241_v23 = vpop.f32.mrb[2].mxu0 }
  0xf8   :  { %v242_v24 = vpop.f32.mrb[3].mxu0 }
  0xf9   :  { %v193_v25 = vadd.f32 %v240_v22, %v203_v20 }
  0xfb   :  { %198 = vst [vmem:[%s342_s3] sm:$0xff] %v193_v25 }

// kernel: run.26
= control target key start
LH: loop header
LB: loop body
LE: loop exit
PB: predicated region body
PF: predicated region fallthrough
CT: control target
= control target key end

     0   :  { %s5092_s0 = inlined_call_operand.vmem [shape: f32[8,256], index: 0, kind: input, shape index: {}]   ;;  %s5093_s1 = inlined_call_operand.vmem [shape: bf16[256,768], index: 1, kind: input, shape index: {}]   ;;  %s5094_s2 = inlined_call_operand.vmem [shape: f32[1,768], index: 2, kind: input, shape index: {}]   ;;  %s5095_s3 = inlined_call_operand.vmem [shape: bf16[256,256], index: 3, kind: input, shape index: {}]   ;;  %s5096_s4 = inlined_call_operand.vmem [shape: f32[1,256], index: 4, kind: input, shape index: {}, may-alias: {4,6,10,12}]   ;;  %s5097_s5 = inlined_call_operand.vmem [shape: f32[1,256], index: 5, kind: input, shape index: {}, may-alias: {5,11}]   ;;  %s5098_s6 = inlined_call_operand.vmem [shape: f32[1,256], index: 6, kind: input, shape index: {}, may-alias: {4,6,10,12}]   ;;  %s5099_s7 = inlined_call_operand.vmem [shape: bf16[256,512], index: 7, kind: input, shape index: {}]   ;;  %s5100_s8 = inlined_call_operand.vmem [shape: f32[1,512], index: 8, kind: input, shape index: {}]   ;;  %s5101_s9 = inlined_call_operand.vmem [shape: bf16[512,256], index: 9, kind: input, shape index: {}]   ;;  %s5102_s10 = inlined_call_operand.vmem [shape: f32[1,256], index: 10, kind: input, shape index: {}, may-alias: {4,6,10,12}]   ;;  %s5103_s11 = inlined_call_operand.vmem [shape: f32[1,256], index: 11, kind: input, shape index: {}, may-alias: {5,11}]   ;;  %s5104_s12 = inlined_call_operand.vmem [shape: f32[1,256], index: 12, kind: input, shape index: {}, may-alias: {4,6,10,12}]   ;;  %s5105_s13 = inlined_call_operand.vmem [shape: f32[8,256], index: 13, kind: output, shape index: {0}]   ;;  %s5106_s14 = inlined_call_operand.hbm [shape: f32[8,8,8], index: 14, kind: output, shape index: {1}]  }
   0x1   :  { %v3474_v0 = vld [vmem:[%s5093_s1 + $0xc] ss:$24 sps:$4 sm:$0xff]   ;;  %v3476_v1 = vld [vmem:[%s5093_s1 + $0x8] ss:$24 sps:$4 sm:$0xff]   ;;  %v3477_v2 = vld [vmem:[%s5093_s1 + $0x3c] ss:$24 sps:$4 sm:$0xff]  }
   0x2   :  { %701 = vmatprep.subr.bf16.mxu1 %v3474_v0  ;;  %v3479_v3 = vld [vmem:[%s5093_s1 + $0x38] ss:$24 sps:$4 sm:$0xff]   ;;  %v3480_v4 = vld [vmem:[%s5093_s1 + $0x4] ss:$24 sps:$4 sm:$0xff]   ;;  %v3486_v7 = vld [vmem:[%s5093_s1 + $0x34] ss:$24 sps:$4 sm:$0xff]  }
   0x3   :  { %702 = vmatpush1.bf16.msra.mxu1 %v3476_v1  ;;  %v3482_v5 = vld [vmem:[%s5093_s1] ss:$24 sps:$4 sm:$0xff]   ;;  %v3483_v6 = vld [vmem:[%s5093_s1 + $0x6c] ss:$24 sps:$4 sm:$0xff]   ;;  %660 = vmatprep.subr.bf16.mxu0 %v3480_v4  ;;  %v3488_v8 = vld [vmem:[%s5093_s1 + $0x30] ss:$24 sps:$4 sm:$0xff]  }
   0x4   :  { %703 = vmatprep.subr.bf16.mxu1 %v3477_v2  ;;  %661 = vmatpush1.bf16.msra.mxu0 %v3482_v5  ;;  %v3485_v9 = vld [vmem:[%s5093_s1 + $0x68] ss:$24 sps:$4 sm:$0xff]   ;;  %v3489_v10 = vld [vmem:[%s5093_s1 + $0x9c] ss:$24 sps:$4 sm:$0xff]   ;;  %v3491_v13 = vld [vmem:[%s5093_s1 + $0x98] ss:$24 sps:$4 sm:$0xff]  }
   0x5   :  { %662 = vmatprep.subr.bf16.mxu0 %v3486_v7  ;;  %v3492_v11 = vld [vmem:[%s5093_s1 + $0x64] ss:$24 sps:$4 sm:$0xff]   ;;  %v3494_v12 = vld [vmem:[%s5093_s1 + $0x60] ss:$24 sps:$4 sm:$0xff]   ;;  %v3498_v14 = vld [vmem:[%s5093_s1 + $0x94] ss:$24 sps:$4 sm:$0xff]  }
   0x6   :  { %v3495_v15 = vld [vmem:[%s5093_s1 + $0xcc] ss:$24 sps:$4 sm:$0xff]   ;;  %v3500_v16 = vld [vmem:[%s5093_s1 + $0x90] ss:$24 sps:$4 sm:$0xff]   ;;  %v3501_v19 = vld [vmem:[%s5093_s1 + $0xfc] ss:$24 sps:$4 sm:$0xff]  }
   0x7   :  { %704 = vmatpush1.bf16.msra.mxu1 %v3479_v3  ;;  %v3497_v17 = vld [vmem:[%s5093_s1 + $0xc8] ss:$24 sps:$4 sm:$0xff]   ;;  %v3504_v18 = vld [vmem:[%s5093_s1 + $0xc4] ss:$24 sps:$4 sm:$0xff]   ;;  %v3503_v21 = vld [vmem:[%s5093_s1 + $0xf8] ss:$24 sps:$4 sm:$0xff]  }
   0x8   :  { %705 = vmatprep.subr.bf16.mxu1 %v3483_v6  ;;  %663 = vmatpush1.bf16.msra.mxu0 %v3488_v8  ;;  %v3506_v20 = vld [vmem:[%s5093_s1 + $0xc0] ss:$24 sps:$4 sm:$0xff]   ;;  %v3510_v22 = vld [vmem:[%s5093_s1 + $0xf4] ss:$24 sps:$4 sm:$0xff]   ;;  %v3512_v24 = vld [vmem:[%s5093_s1 + $0xf0] ss:$24 sps:$4 sm:$0xff]  }
   0x9   :  { %664 = vmatprep.subr.bf16.mxu0 %v3492_v11  ;;  %v3507_v23 = vld [vmem:[%s5093_s1 + $0x12c] ss:$24 sps:$4 sm:$0xff]   ;;  %v3509_v25 = vld [vmem:[%s5093_s1 + $0x128] ss:$24 sps:$4 sm:$0xff]   ;;  %v3513_v27 = vld [vmem:[%s5093_s1 + $0x15c] ss:$24 sps:$4 sm:$0xff]  }
   0xa   :  { %v3516_v26 = vld [vmem:[%s5093_s1 + $0x124] ss:$24 sps:$4 sm:$0xff]   ;;  %v3518_v28 = vld [vmem:[%s5093_s1 + $0x120] ss:$24 sps:$4 sm:$0xff]   ;;  %v3522_v30 = vld [vmem:[%s5093_s1 + $0x154] ss:$24 sps:$4 sm:$0xff]  }
   0xb   :  { %706 = vmatpush1.bf16.msra.mxu1 %v3485_v9  ;;  %v3515_v29 = vld [vmem:[%s5093_s1 + $0x158] ss:$24 sps:$4 sm:$0xff]   ;;  %v3519_v31 = vld [vmem:[%s5093_s1 + $0x18c] ss:$24 sps:$4 sm:$0xff]   ;;  %v3521_v33 = vld [vmem:[%s5093_s1 + $0x188] ss:$24 sps:$4 sm:$0xff]  }
   0xc   :  { %707 = vmatprep.subr.bf16.mxu1 %v3489_v10  ;;  %665 = vmatpush1.bf16.msra.mxu0 %v3494_v12  ;;  %v3524_v32 = vld [vmem:[%s5093_s1 + $0x150] ss:$24 sps:$4 sm:$0xff]   ;;  %v3528_v34 = vld [vmem:[%s5093_s1 + $0x184] ss:$24 sps:$4 sm:$0xff]   ;;  %v3530_v36 = vld [vmem:[%s5093_s1 + $0x180] ss:$24 sps:$4 sm:$0xff]  }
   0xd   :  { %666 = vmatprep.subr.bf16.mxu0 %v3498_v14  ;;  %v3525_v35 = vld [vmem:[%s5093_s1 + $0x1bc] ss:$24 sps:$4 sm:$0xff]   ;;  %v3527_v37 = vld [vmem:[%s5093_s1 + $0x1b8] ss:$24 sps:$4 sm:$0xff]   ;;  %v3531_v39 = vld [vmem:[%s5093_s1 + $0x1ec] ss:$24 sps:$4 sm:$0xff]  }
   0xe   :  { %v3534_v38 = vld [vmem:[%s5093_s1 + $0x1b4] ss:$24 sps:$4 sm:$0xff]   ;;  %v3536_v40 = vld [vmem:[%s5093_s1 + $0x1b0] ss:$24 sps:$4 sm:$0xff]   ;;  %v3540_v42 = vld [vmem:[%s5093_s1 + $0x1e4] ss:$24 sps:$4 sm:$0xff]  }
   0xf   :  { %708 = vmatpush1.bf16.msra.mxu1 %v3491_v13  ;;  %v3533_v41 = vld [vmem:[%s5093_s1 + $0x1e8] ss:$24 sps:$4 sm:$0xff]   ;;  %v3537_v43 = vld [vmem:[%s5093_s1 + $0x21c] ss:$24 sps:$4 sm:$0xff]   ;;  %v3539_v44 = vld [vmem:[%s5093_s1 + $0x218] ss:$24 sps:$4 sm:$0xff]  }
  0x10   :  { %709 = vmatprep.subr.bf16.mxu1 %v3495_v15  ;;  %667 = vmatpush1.bf16.msra.mxu0 %v3500_v16  ;;  %v49_v45 = vld [vmem:[%s5092_s0 + $0x8] sm:$0xff]  ;;  %v3542_v46 = vld [vmem:[%s5093_s1 + $0x1e0] ss:$24 sps:$4 sm:$0xff]   ;;  %v3552_v52 = vld [vmem:[%s5093_s1 + $0x244] ss:$24 sps:$4 sm:$0xff]  }
  0x11   :  { %668 = vmatprep.subr.bf16.mxu0 %v3504_v18  ;;  %v51_v47 = vpack.c.bf16 %v49_v45, %v49_v45  ;;  %v3543_v48 = vld [vmem:[%s5093_s1 + $0x24c] ss:$24 sps:$4 sm:$0xff]   ;;  %v3548_v50 = vld [vmem:[%s5093_s1 + $0x210] ss:$24 sps:$4 sm:$0xff]   ;;  %v3549_v53 = vld [vmem:[%s5093_s1 + $0x27c] ss:$24 sps:$4 sm:$0xff]  }
  0x12   :  { %v3546_v49 = vld [vmem:[%s5093_s1 + $0x214] ss:$24 sps:$4 sm:$0xff]   ;;  %v3545_v51 = vld [vmem:[%s5093_s1 + $0x248] ss:$24 sps:$4 sm:$0xff]   ;;  %v3551_v55 = vld [vmem:[%s5093_s1 + $0x278] ss:$24 sps:$4 sm:$0xff]  }
  0x13   :  { %710 = vmatpush1.bf16.msra.mxu1 %v3497_v17  ;;  %733 = vmatprep.mubr.bf16.mxu1 %v51_v47  ;;  %v3554_v54 = vld [vmem:[%s5093_s1 + $0x240] ss:$24 sps:$4 sm:$0xff]   ;;  %v3558_v56 = vld [vmem:[%s5093_s1 + $0x274] ss:$24 sps:$4 sm:$0xff]   ;;  %v3560_v58 = vld [vmem:[%s5093_s1 + $0x270] ss:$24 sps:$4 sm:$0xff]  }
  0x14   :  { %711 = vmatprep.subr.bf16.mxu1 %v3501_v19  ;;  %669 = vmatpush1.bf16.msra.mxu0 %v3506_v20  ;;  %v3555_v57 = vld [vmem:[%s5093_s1 + $0x2ac] ss:$24 sps:$4 sm:$0xff]   ;;  %v3557_v59 = vld [vmem:[%s5093_s1 + $0x2a8] ss:$24 sps:$4 sm:$0xff]   ;;  %v3561_v61 = vld [vmem:[%s5093_s1 + $0x2dc] ss:$24 sps:$4 sm:$0xff]  }
  0x15   :  { %670 = vmatprep.subr.bf16.mxu0 %v3510_v22  ;;  %692 = vmatprep.mubr.bf16.mxu0 %v51_v47  ;;  %v3564_v60 = vld [vmem:[%s5093_s1 + $0x2a4] ss:$24 sps:$4 sm:$0xff]   ;;  %v3566_v62 = vld [vmem:[%s5093_s1 + $0x2a0] ss:$24 sps:$4 sm:$0xff]   ;;  %v3567_v1 = vld [vmem:[%s5093_s1 + $0x2d4] ss:$24 sps:$4 sm:$0xff]  }
  0x16   :  { %v3563_v63 = vld [vmem:[%s5093_s1 + $0x2d8] ss:$24 sps:$4 sm:$0xff]   ;;  %v48_v0 = vld [vmem:[%s5092_s0] sm:$0xff] }
  0x17   :  { %712 = vmatpush1.bf16.msra.mxu1 %v3503_v21  ;;  %v3569_v2 = vld [vmem:[%s5093_s1 + $0x2d0] ss:$24 sps:$4 sm:$0xff]   ;;  %v4201_v3 = vpack.c.bf16 %v48_v0, %v48_v0 }
  0x18   :  { %713 = vmatprep.subr.bf16.mxu1 %v3507_v23  ;;  %671 = vmatpush1.bf16.msra.mxu0 %v3512_v24 }
  0x19   :  { %672 = vmatprep.subr.bf16.mxu0 %v3516_v26 }
  0x1b   :  { %714 = vmatpush1.bf16.msra.mxu1 %v3509_v25 }
  0x1c   :  { %715 = vmatprep.subr.bf16.mxu1 %v3513_v27  ;;  %673 = vmatpush1.bf16.msra.mxu0 %v3518_v28 }
  0x1d   :  { %674 = vmatprep.subr.bf16.mxu0 %v3522_v30 }
  0x1f   :  { %716 = vmatpush1.bf16.msra.mxu1 %v3515_v29 }
  0x20   :  { %717 = vmatprep.subr.bf16.mxu1 %v3519_v31  ;;  %675 = vmatpush1.bf16.msra.mxu0 %v3524_v32 }
  0x21   :  { %676 = vmatprep.subr.bf16.mxu0 %v3528_v34 }
  0x23   :  { %718 = vmatpush1.bf16.msra.mxu1 %v3521_v33 }
  0x24   :  { %719 = vmatprep.subr.bf16.mxu1 %v3525_v35  ;;  %677 = vmatpush1.bf16.msra.mxu0 %v3530_v36 }
  0x25   :  { %678 = vmatprep.subr.bf16.mxu0 %v3534_v38 }
  0x27   :  { %720 = vmatpush1.bf16.msra.mxu1 %v3527_v37 }
  0x28   :  { %721 = vmatprep.subr.bf16.mxu1 %v3531_v39  ;;  %679 = vmatpush1.bf16.msra.mxu0 %v3536_v40 }
  0x29   :  { %680 = vmatprep.subr.bf16.mxu0 %v3540_v42 }
  0x2b   :  { %722 = vmatpush1.bf16.msra.mxu1 %v3533_v41 }
  0x2c   :  { %723 = vmatprep.subr.bf16.mxu1 %v3537_v43  ;;  %681 = vmatpush1.bf16.msra.mxu0 %v3542_v46 }
  0x2d   :  { %682 = vmatprep.subr.bf16.mxu0 %v3546_v49 }
  0x2f   :  { %724 = vmatpush1.bf16.msra.mxu1 %v3539_v44 }
  0x30   :  { %725 = vmatprep.subr.bf16.mxu1 %v3543_v48  ;;  %683 = vmatpush1.bf16.msra.mxu0 %v3548_v50 }
  0x31   :  { %684 = vmatprep.subr.bf16.mxu0 %v3552_v52 }
  0x33   :  { %726 = vmatpush1.bf16.msra.mxu1 %v3545_v51 }
  0x34   :  { %727 = vmatprep.subr.bf16.mxu1 %v3549_v53  ;;  %685 = vmatpush1.bf16.msra.mxu0 %v3554_v54 }
  0x35   :  { %686 = vmatprep.subr.bf16.mxu0 %v3558_v56 }
  0x37   :  { %728 = vmatpush1.bf16.msra.mxu1 %v3551_v55 }
  0x38   :  { %729 = vmatprep.subr.bf16.mxu1 %v3555_v57  ;;  %687 = vmatpush1.bf16.msra.mxu0 %v3560_v58 }
  0x39   :  { %688 = vmatprep.subr.bf16.mxu0 %v3564_v60 }
  0x3b   :  { %730 = vmatpush1.bf16.msra.mxu1 %v3557_v59 }
  0x3c   :  { %731 = vmatprep.subr.bf16.mxu1 %v3561_v61  ;;  %689 = vmatpush1.bf16.msra.mxu0 %v3566_v62 }
  0x3d   :  { %690 = vmatprep.subr.bf16.mxu0 %v3567_v1 }
  0x3f   :  { %732 = vmatpush1.bf16.msra.mxu1 %v3563_v63 }
  0x40   :  { %691 = vmatpush1.bf16.msra.mxu0 %v3569_v2 }
  0x42   :  { %734 = vmatmul.mubr.bf16.vlgmr.msra.gmra.mrb[0].mxu1 %v4201_v3 }
  0x43   :  { %693 = vmatmul.mubr.bf16.vlgmr.msra.gmra.mrb[0].mxu0 %v4201_v3 }
  0x44   :  { %774 = vmatprep.mubr.bf16.mxu0 %v51_v47 }
  0x45   :  { %20 = vsyncpa [#allocation3], 0  ;;  %v3920_v4 = vmov 0.0   ;;  %vm3921_vm0 = vmmov 0   ;;  %v150_v5 = vlaneseq  ;;  %v4214_v8 = vld [vmem:[%s5094_s2] sm:$0x3f] }
  0x46   :  { %3355 = vmatprep.subr.bf16.mxu1 %v3920_v4  ;;  %3357 = vmatprep.mubr.msk.bf16.mxu1 %vm3921_vm0, %v3920_v4  ;;  %vm785_vm1 = vcmask 261120   ;;  %s3922_s2 = smov 96   ;;  %v3570_v25 = vld [vmem:[%s5093_s1 + $0x10] ss:$24 sps:$4 sm:$0xff]   ;;  %v3572_v26 = vld [vmem:[%s5093_s1 + $0x14] ss:$24 sps:$4 sm:$0xff]  }
  0x47   :  { %v4208_v6 = vshrl.u32 %v150_v5, 7  ;;  %v3575_v27 = vld [vmem:[%s5093_s1 + $0x44] ss:$24 sps:$4 sm:$0xff]   ;;  %742 = vmatprep.subr.bf16.mxu0 %v3572_v26  ;;  %v3573_v28 = vld [vmem:[%s5093_s1 + $0x40] ss:$24 sps:$4 sm:$0xff]   ;;  %vm832_vm2 = vcmask 64512  }
  0x48   :  { %743 = vmatpush1.bf16.msra.mxu0 %v3570_v25  ;;  %v3578_v29 = vld [vmem:[%s5093_s1 + $0x74] ss:$24 sps:$4 sm:$0xff]   ;;  %v3576_v30 = vld [vmem:[%s5093_s1 + $0x70] ss:$24 sps:$4 sm:$0xff]   ;;  %v3581_v31 = vld [vmem:[%s5093_s1 + $0xa4] ss:$24 sps:$4 sm:$0xff]  }
  0x49   :  { %v160_v7 = vsub.s32 2, %v4208_v6  ;;  %v4217_v9 = vsub.s32 0, %v4208_v6  ;;  %744 = vmatprep.subr.bf16.mxu0 %v3575_v27  ;;  %v3579_v32 = vld [vmem:[%s5093_s1 + $0xa0] ss:$24 sps:$4 sm:$0xff]   ;;  %v3584_v33 = vld [vmem:[%s5093_s1 + $0xd4] ss:$24 sps:$4 sm:$0xff]  }
  0x4a   :  { %v3582_v34 = vld [vmem:[%s5093_s1 + $0xd0] ss:$24 sps:$4 sm:$0xff]   ;;  %v3587_v35 = vld [vmem:[%s5093_s1 + $0x104] ss:$24 sps:$4 sm:$0xff]   ;;  %v3585_v36 = vld [vmem:[%s5093_s1 + $0x100] ss:$24 sps:$4 sm:$0xff]  }
  0x4b   :  { %v161_v10 = vrot.slane %v4214_v8, %v160_v7  ;;  %v153_v12 = vrot.slane %v4214_v8, %v4217_v9  ;;  %v3590_v37 = vld [vmem:[%s5093_s1 + $0x134] ss:$24 sps:$4 sm:$0xff]   ;;  %v3588_v38 = vld [vmem:[%s5093_s1 + $0x130] ss:$24 sps:$4 sm:$0xff]   ;;  %v3593_v39 = vld [vmem:[%s5093_s1 + $0x164] ss:$24 sps:$4 sm:$0xff]  }
  0x4c   :  { %745 = vmatpush1.bf16.msra.mxu0 %v3573_v28  ;;  %v3591_v40 = vld [vmem:[%s5093_s1 + $0x160] ss:$24 sps:$4 sm:$0xff]   ;;  %v3596_v41 = vld [vmem:[%s5093_s1 + $0x194] ss:$24 sps:$4 sm:$0xff]   ;;  %v3594_v42 = vld [vmem:[%s5093_s1 + $0x190] ss:$24 sps:$4 sm:$0xff]  }
  0x4d   :  { %746 = vmatprep.subr.bf16.mxu0 %v3578_v29  ;;  %v3599_v43 = vld [vmem:[%s5093_s1 + $0x1c4] ss:$24 sps:$4 sm:$0xff]   ;;  %v3597_v44 = vld [vmem:[%s5093_s1 + $0x1c0] ss:$24 sps:$4 sm:$0xff]   ;;  %v3602_v45 = vld [vmem:[%s5093_s1 + $0x1f4] ss:$24 sps:$4 sm:$0xff]  }
  0x4e   :  { %v3600_v46 = vld [vmem:[%s5093_s1 + $0x1f0] ss:$24 sps:$4 sm:$0xff]   ;;  %v3605_v47 = vld [vmem:[%s5093_s1 + $0x224] ss:$24 sps:$4 sm:$0xff]   ;;  %v3603_v48 = vld [vmem:[%s5093_s1 + $0x220] ss:$24 sps:$4 sm:$0xff]  }
  0x4f   :  { %v3608_v49 = vld [vmem:[%s5093_s1 + $0x254] ss:$24 sps:$4 sm:$0xff]   ;;  %v3606_v50 = vld [vmem:[%s5093_s1 + $0x250] ss:$24 sps:$4 sm:$0xff]   ;;  %v3611_v51 = vld [vmem:[%s5093_s1 + $0x284] ss:$24 sps:$4 sm:$0xff]  }
  0x50   :  { %747 = vmatpush1.bf16.msra.mxu0 %v3576_v30  ;;  %v3609_v52 = vld [vmem:[%s5093_s1 + $0x280] ss:$24 sps:$4 sm:$0xff]   ;;  %v3614_v53 = vld [vmem:[%s5093_s1 + $0x2b4] ss:$24 sps:$4 sm:$0xff]   ;;  %v3612_v54 = vld [vmem:[%s5093_s1 + $0x2b0] ss:$24 sps:$4 sm:$0xff]  }
  0x51   :  { %748 = vmatprep.subr.bf16.mxu0 %v3581_v31  ;;  %v3617_v55 = vld [vmem:[%s5093_s1 + $0x2e4] ss:$24 sps:$4 sm:$0xff]   ;;  %v3615_v56 = vld [vmem:[%s5093_s1 + $0x2e0] ss:$24 sps:$4 sm:$0xff]   ;;  %vm850_vm3 = vcmask 1043456   ;;  %s3923_s1 = smov 64  }
  0x52   :  { %s3924_s19 = smov 32   ;;  %vm1706_vm4 = vcmask 523264   ;;  %vm1708_vm5 = vcmask 785408  }
  0x54   :  { %749 = vmatpush1.bf16.msra.mxu0 %v3579_v32 }
  0x55   :  { %750 = vmatprep.subr.bf16.mxu0 %v3584_v33 }
  0x58   :  { %751 = vmatpush1.bf16.msra.mxu0 %v3582_v34 }
  0x59   :  { %752 = vmatprep.subr.bf16.mxu0 %v3587_v35 }
  0x5c   :  { %753 = vmatpush1.bf16.msra.mxu0 %v3585_v36 }
  0x5d   :  { %754 = vmatprep.subr.bf16.mxu0 %v3590_v37 }
  0x60   :  { %755 = vmatpush1.bf16.msra.mxu0 %v3588_v38 }
  0x61   :  { %756 = vmatprep.subr.bf16.mxu0 %v3593_v39 }
  0x64   :  { %757 = vmatpush1.bf16.msra.mxu0 %v3591_v40 }
  0x65   :  { %758 = vmatprep.subr.bf16.mxu0 %v3596_v41 }
  0x68   :  { %759 = vmatpush1.bf16.msra.mxu0 %v3594_v42 }
  0x69   :  { %760 = vmatprep.subr.bf16.mxu0 %v3599_v43 }
  0x6c   :  { %761 = vmatpush1.bf16.msra.mxu0 %v3597_v44 }
  0x6d   :  { %762 = vmatprep.subr.bf16.mxu0 %v3602_v45 }
  0x70   :  { %763 = vmatpush1.bf16.msra.mxu0 %v3600_v46 }
  0x71   :  { %764 = vmatprep.subr.bf16.mxu0 %v3605_v47 }
  0x74   :  { %765 = vmatpush1.bf16.msra.mxu0 %v3603_v48 }
  0x75   :  { %766 = vmatprep.subr.bf16.mxu0 %v3608_v49 }
  0x78   :  { %767 = vmatpush1.bf16.msra.mxu0 %v3606_v50 }
  0x79   :  { %768 = vmatprep.subr.bf16.mxu0 %v3611_v51 }
  0x7c   :  { %769 = vmatpush1.bf16.msra.mxu0 %v3609_v52 }
  0x7d   :  { %770 = vmatprep.subr.bf16.mxu0 %v3614_v53 }
  0x80   :  { %771 = vmatpush1.bf16.msra.mxu0 %v3612_v54 }
  0x81   :  { %772 = vmatprep.subr.bf16.mxu0 %v3617_v55 }
  0x84   :  { %773 = vmatpush1.bf16.msra.mxu0 %v3615_v56 }
  0x87   :  { %775 = vmatmul.mubr.bf16.vlgmr.msra.gmra.mrb[4].mxu0 %v4201_v3 }
 0x115   :  { %v735_v11 = vpop.f32.mrb[0].mxu1 }
 0x116   :  { %v736_v13 = vadd.f32 %v735_v11, %v161_v10  ;;  %v4224_v14 = vpop.f32.mrb[1].mxu1  ;;  %v694_v18 = vpop.f32.mrb[0].mxu0 }
 0x117   :  { %v739_v15 = vpop.f32.mrb[2].mxu1  ;;  %v695_v19 = vadd.f32 %v694_v18, %v153_v12  ;;  %v4228_v20 = vpop.f32.mrb[1].mxu0  ;;  %v168_v12 = vsub.s32 4, %v4208_v6 }
 0x118   :  { %v4226_v16 = vpack.c.bf16 %v736_v13, %v736_v13  ;;  %v740_v17 = vpop.f32.mrb[3].mxu1  ;;  %v698_v22 = vpop.f32.mrb[2].mxu0 }
 0x119   :  { %v4234_v23 = vpack.c.bf16 %v695_v19, %v695_v19  ;;  %v699_v24 = vpop.f32.mrb[3].mxu0  ;;  %v169_v13 = vrot.slane %v4214_v8, %v168_v12 }
 0x11a   :  { %898 = vrot.lane.b32.xlu1 %v4226_v16, %s3922_s2  ;;  %v790_v21 = vsel %vm785_vm1, %v4226_v16, 0 }
 0x11b   :  { %3356 = vmatpush3.bf16.xpose.msra.mxu1 %v790_v21 }
 0x11c   :  { %3361 = vmatprep.subr.bf16.mxu1 %v3920_v4 }
 0x11e   :  { %895 = vrot.lane.b32.xlu1 %v4234_v23, %s3922_s2 }
 0x122   :  { %3358 = vmatmul.mubr.msk.bf16.vlgmr.msra.gmra.mrb[4].mxu1 %vm785_vm1, %v4234_v23 }
 0x123   :  { %3363 = vmatprep.mubr.msk.bf16.mxu1 %vm3921_vm0, %v3920_v4 }
 0x15a   :  { %v776_v1 = vpop.f32.mrb[4].mxu0 }
 0x15b   :  { %v4341_v2 = vpop.f32.mrb[5].mxu0  ;;  %v777_v15 = vadd.f32 %v776_v1, %v169_v13 }
 0x15c   :  { %v780_v5 = vpop.f32.mrb[6].mxu0 }
 0x15d   :  { %v781_v10 = vpop.f32.mrb[7].mxu0  ;;  %v4346_v17 = vpack.c.bf16 %v777_v15, %v777_v15 }
 0x15f   :  { %v852_v18 = vsel %vm850_vm3, %v4346_v17, 0 }
 0x160   :  { %3362 = vmatpush3.bf16.msra.mxu1 %v852_v18 }
 0x161   :  { %3367 = vmatprep.subr.bf16.mxu1 %v3920_v4 }
 0x18c   :  { %v899_v24 = vpop.permute.xlu1 %898 }
 0x18d   :  { %v904_v26 = vsel %vm785_vm1, %v899_v24, 0 }
 0x190   :  { %v896_v27 = vpop.permute.xlu1 %895 }
 0x1f5   :  { %v826_v57 = vpop.f32.mrb[4].mxu1 }
 0x1f6   :  { %v3359_v58 = vpop.f32.mrb[5].mxu1  ;;  %v833_v59 = vsel %vm832_vm2, %v826_v57, -inf }
 0x1f7   :  { %834 = vmax.xlane.f32.xlu0 %v833_v59  ;;  %v829_v60 = vpop.f32.mrb[6].mxu1 }
 0x1f8   :  { %v3360_v61 = vpop.f32.mrb[7].mxu1 }
 0x284   :  { %v835_v62 = vpop.xlane.xlu0 %834 }
 0x285   :  { %v836_v63 = vsub.f32 %v826_v57, %v835_v62 }
 0x287   :  { %v837_v0 = vmul.f32 1.442695, %v836_v63 }
 0x289   :  { %3858 = vpow2.f32 %v837_v0 }
 0x293   :  { %v3859_v11 = vpop.eup %3858 }
 0x294   :  { %v839_v3 = vsel %vm832_vm2, %v3859_v11, 0.0 }
 0x295   :  { %840 = vadd.xlane.f32.xlu0 %v839_v3 }
 0x322   :  { %v841_v19 = vpop.xlane.xlu0 %840 }
 0x323   :  { %3860 = vrcp.f32 %v841_v19 }
 0x32d   :  { %v3861_v21 = vpop.eup %3860 }
 0x32e   :  { %v843_v22 = vmul.f32 %v3861_v21, %v3859_v11 }
 0x330   :  { %844 = vst.msk [vmem:[#allocation2] sm:$0xff] %vm832_vm2, %v843_v22  ;;  %v845_v25 = vpack.c.bf16 %v843_v22, %v843_v22 }
 0x332   :  { %3364 = vmatmul.mubr.msk.bf16.vlgmr.msra.gmra.mrb[8].mxu1 %vm832_vm2, %v845_v25 }
 0x333   :  { %3368 = vmatpush3.bf16.xpose.msra.mxu1 %v904_v26  ;;  %3369 = vmatprep.mubr.msk.bf16.mxu1 %vm3921_vm0, %v3920_v4 }
 0x334   :  { %3373 = vmatprep.subr.bf16.mxu1 %v3920_v4 }
 0x33a   :  { %3370 = vmatmul.mubr.msk.bf16.vlgmr.msra.gmra.mrb[12].mxu1 %vm785_vm1, %v896_v27 }
 0x33b   :  { %3375 = vmatprep.mubr.msk.bf16.mxu1 %vm3921_vm0, %v3920_v4 }
 0x405   :  { %v4360_v28 = vpop.f32.mrb[8].mxu1 }
 0x406   :  { %v3365_v29 = vpop.f32.mrb[9].mxu1 }
 0x407   :  { %v891_v30 = vpop.f32.mrb[10].mxu1 }
 0x408   :  { %v3366_v31 = vpop.f32.mrb[11].mxu1 }
 0x40d   :  { %v940_v32 = vpop.f32.mrb[12].mxu1 }
 0x40e   :  { %v3371_v33 = vpop.f32.mrb[13].mxu1  ;;  %v946_v34 = vsel %vm832_vm2, %v940_v32, -inf }
 0x40f   :  { %947 = vmax.xlane.f32.xlu0 %v946_v34  ;;  %v943_v35 = vpop.f32.mrb[14].mxu1 }
 0x410   :  { %v3372_v36 = vpop.f32.mrb[15].mxu1 }
 0x411   :  { %v164_v36 = vsub.s32 3, %v4208_v6 }
 0x425   :  { %961 = vrot.lane.b32.xlu0 %v4346_v17, %s3922_s2 }
 0x429   :  { %1011 = vrot.lane.b32.xlu0 %v4226_v16, %s3923_s1 }
 0x42d   :  { %1009 = vrot.lane.b32.xlu0 %v4234_v23, %s3923_s1 }
 0x49c   :  { %v948_v37 = vpop.xlane.xlu0 %947 }
 0x49d   :  { %v949_v38 = vsub.f32 %v940_v32, %v948_v37 }
 0x49f   :  { %v950_v39 = vmul.f32 1.442695, %v949_v38 }
 0x4a0   :  { %v962_v40 = vpop.permute.xlu0 %961 }
 0x4a1   :  { %3862 = vpow2.f32 %v950_v39  ;;  %v967_v41 = vsel %vm850_vm3, %v962_v40, 0  ;;  %v172_v39 = vsub.s32 5, %v4208_v6  ;;  %v4417_v40 = vsub.s32 1, %v4208_v6 }
 0x4a2   :  { %3374 = vmatpush3.bf16.msra.mxu1 %v967_v41 }
 0x4a3   :  { %3379 = vmatprep.subr.bf16.mxu1 %v3920_v4 }
 0x4a4   :  { %v1012_v47 = vpop.permute.xlu0 %1011 }
 0x4a5   :  { %v1017_v49 = vsel %vm785_vm1, %v1012_v47, 0 }
 0x4a8   :  { %v1010_v51 = vpop.permute.xlu0 %1009 }
 0x4ab   :  { %v3863_v42 = vpop.eup %3862 }
 0x4ac   :  { %v952_v43 = vsel %vm832_vm2, %v3863_v42, 0.0 }
 0x4ad   :  { %953 = vadd.xlane.f32.xlu1 %v952_v43  ;;  %v173_v43 = vrot.slane %v4214_v8, %v172_v39 }
 0x4af   :  { %v779_v47 = vadd.f32 %v4341_v2, %v173_v43 }
 0x4be   :  { %1073 = vrot.lane.b32.xlu1 %v4346_v17, %s3923_s1 }
 0x53a   :  { %v954_v44 = vpop.xlane.xlu1 %953 }
 0x53b   :  { %3864 = vrcp.f32 %v954_v44 }
 0x53e   :  { %v1074_v50 = vpop.permute.xlu1 %1073 }
 0x53f   :  { %v1079_v52 = vsel %vm850_vm3, %v1074_v50, 0 }
 0x545   :  { %v3865_v45 = vpop.eup %3864 }
 0x546   :  { %v956_v46 = vmul.f32 %v3865_v45, %v3863_v42  ;;  %v157_v45 = vrot.slane %v4214_v8, %v4417_v40 }
 0x548   :  { %958 = vst.msk [vmem:[#allocation2 + $0x8] sm:$0xff] %vm832_vm2, %v956_v46  ;;  %v959_v48 = vpack.c.bf16 %v956_v46, %v956_v46 }
 0x54a   :  { %3376 = vmatmul.mubr.msk.bf16.vlgmr.msra.gmra.mrb[16].mxu1 %vm832_vm2, %v959_v48  ;;  %v697_v48 = vadd.f32 %v4228_v20, %v157_v45 }
 0x54b   :  { %3380 = vmatpush3.bf16.xpose.msra.mxu1 %v1017_v49  ;;  %3381 = vmatprep.mubr.msk.bf16.mxu1 %vm3921_vm0, %v3920_v4  ;;  %v4433_v49 = vpack.c.bf16 %v779_v47, %v779_v47 }
 0x54c   :  { %3385 = vmatprep.subr.bf16.mxu1 %v3920_v4 }
 0x54d   :  { %v1300_v2 = vsel %vm850_vm3, %v4433_v49, 0 }
 0x552   :  { %3382 = vmatmul.mubr.msk.bf16.vlgmr.msra.gmra.mrb[20].mxu1 %vm785_vm1, %v1010_v51 }
 0x553   :  { %3386 = vmatpush3.bf16.msra.mxu1 %v1079_v52  ;;  %3387 = vmatprep.mubr.msk.bf16.mxu1 %vm3921_vm0, %v3920_v4 }
 0x554   :  { %3391 = vmatprep.subr.bf16.mxu1 %v3920_v4 }
 0x61d   :  { %v4385_v53 = vpop.f32.mrb[16].mxu1 }
 0x61e   :  { %v3377_v54 = vpop.f32.mrb[17].mxu1 }
 0x61f   :  { %v1006_v55 = vpop.f32.mrb[18].mxu1 }
 0x620   :  { %v3378_v56 = vpop.f32.mrb[19].mxu1 }
 0x625   :  { %v1053_v57 = vpop.f32.mrb[20].mxu1 }
 0x626   :  { %v3383_v58 = vpop.f32.mrb[21].mxu1  ;;  %v1059_v59 = vsel %vm832_vm2, %v1053_v57, -inf }
 0x627   :  { %1060 = vmax.xlane.f32.xlu0 %v1059_v59  ;;  %v1056_v60 = vpop.f32.mrb[22].mxu1 }
 0x628   :  { %v3384_v61 = vpop.f32.mrb[23].mxu1 }
 0x6b4   :  { %v1061_v62 = vpop.xlane.xlu0 %1060 }
 0x6b5   :  { %v1062_v63 = vsub.f32 %v1053_v57, %v1061_v62 }
 0x6b7   :  { %v1063_v0 = vmul.f32 1.442695, %v1062_v63 }
 0x6b9   :  { %3866 = vpow2.f32 %v1063_v0 }
 0x6c3   :  { %v3867_v1 = vpop.eup %3866 }
 0x6c4   :  { %v1065_v5 = vsel %vm832_vm2, %v3867_v1, 0.0 }
 0x6c5   :  { %1066 = vadd.xlane.f32.xlu1 %v1065_v5 }
 0x6d6   :  { %1123 = vrot.lane.b32.xlu1 %v4226_v16, %s3924_s19 }
 0x6da   :  { %1121 = vrot.lane.b32.xlu1 %v4234_v23, %s3924_s19 }
 0x752   :  { %v1067_v10 = vpop.xlane.xlu1 %1066 }
 0x753   :  { %3868 = vrcp.f32 %v1067_v10 }
 0x756   :  { %v1124_v12 = vpop.permute.xlu1 %1123 }
 0x757   :  { %v1129_v15 = vsel %vm785_vm1, %v1124_v12, 0 }
 0x75a   :  { %v1122_v16 = vpop.permute.xlu1 %1121 }
 0x75d   :  { %v3869_v11 = vpop.eup %3868 }
 0x75e   :  { %v1069_v3 = vmul.f32 %v3869_v11, %v3867_v1 }
 0x760   :  { %1071 = vst.msk [vmem:[#allocation2 + $0x10] sm:$0xff] %vm832_vm2, %v1069_v3  ;;  %v1072_v13 = vpack.c.bf16 %v1069_v3, %v1069_v3 }
 0x762   :  { %3388 = vmatmul.mubr.msk.bf16.vlgmr.msra.gmra.mrb[24].mxu1 %vm832_vm2, %v1072_v13 }
 0x763   :  { %3392 = vmatpush3.bf16.xpose.msra.mxu1 %v1129_v15  ;;  %3393 = vmatprep.mubr.msk.bf16.mxu1 %vm3921_vm0, %v3920_v4 }
 0x764   :  { %3397 = vmatprep.subr.bf16.mxu1 %v3920_v4 }
 0x76a   :  { %3394 = vmatmul.mubr.msk.bf16.vlgmr.msra.gmra.mrb[28].mxu1 %vm785_vm1, %v1122_v16 }
 0x76b   :  { %3399 = vmatprep.mubr.msk.bf16.mxu1 %vm3921_vm0, %v3920_v4 }
 0x835   :  { %v4402_v23 = vpop.f32.mrb[24].mxu1 }
 0x836   :  { %v3389_v18 = vpop.f32.mrb[25].mxu1 }
 0x837   :  { %v1118_v19 = vpop.f32.mrb[26].mxu1 }
 0x838   :  { %v3390_v21 = vpop.f32.mrb[27].mxu1 }
 0x83d   :  { %v1165_v22 = vpop.f32.mrb[28].mxu1 }
 0x83e   :  { %v3395_v24 = vpop.f32.mrb[29].mxu1  ;;  %v1171_v25 = vsel %vm832_vm2, %v1165_v22, -inf }
 0x83f   :  { %1172 = vmax.xlane.f32.xlu0 %v1171_v25  ;;  %v1168_v26 = vpop.f32.mrb[30].mxu1 }
 0x840   :  { %v3396_v27 = vpop.f32.mrb[31].mxu1 }
 0x855   :  { %1185 = vrot.lane.b32.xlu0 %v4346_v17, %s3924_s19  ;;  %v165_v17 = vrot.slane %v4214_v8, %v164_v36  ;;  %v4435_v8 = vpack.c.bf16 %v697_v48, %v697_v48 }
 0x857   :  { %v738_v38 = vadd.f32 %v4224_v14, %v165_v17 }
 0x859   :  { %v4419_v42 = vpack.c.bf16 %v738_v38, %v738_v38 }
 0x85b   :  { %v1239_v14 = vsel %vm785_vm1, %v4419_v42, 0 }
 0x8cc   :  { %v1173_v29 = vpop.xlane.xlu0 %1172 }
 0x8cd   :  { %v1174_v30 = vsub.f32 %v1165_v22, %v1173_v29 }
 0x8cf   :  { %v1175_v31 = vmul.f32 1.442695, %v1174_v30 }
 0x8d0   :  { %v1186_v32 = vpop.permute.xlu0 %1185 }
 0x8d1   :  { %3870 = vpow2.f32 %v1175_v31  ;;  %v1191_v33 = vsel %vm850_vm3, %v1186_v32, 0 }
 0x8d2   :  { %3398 = vmatpush3.bf16.msra.mxu1 %v1191_v33 }
 0x8d3   :  { %3403 = vmatprep.subr.bf16.mxu1 %v3920_v4 }
 0x8db   :  { %v3871_v34 = vpop.eup %3870 }
 0x8dc   :  { %v1177_v35 = vsel %vm832_vm2, %v3871_v34, 0.0 }
 0x8dd   :  { %1178 = vadd.xlane.f32.xlu1 %v1177_v35 }
 0x96a   :  { %v1179_v37 = vpop.xlane.xlu1 %1178 }
 0x96b   :  { %3872 = vrcp.f32 %v1179_v37 }
 0x975   :  { %v3873_v41 = vpop.eup %3872 }
 0x976   :  { %v1181_v44 = vmul.f32 %v3873_v41, %v3871_v34 }
 0x978   :  { %1183 = vst.msk [vmem:[#allocation2 + $0x18] sm:$0xff] %vm832_vm2, %v1181_v44  ;;  %v1184_v46 = vpack.c.bf16 %v1181_v44, %v1181_v44 }
 0x97a   :  { %3400 = vmatmul.mubr.msk.bf16.vlgmr.msra.gmra.mrb[32].mxu1 %vm832_vm2, %v1184_v46 }
 0x97b   :  { %3404 = vmatpush3.bf16.xpose.msra.mxu1 %v1239_v14  ;;  %3405 = vmatprep.mubr.msk.bf16.mxu1 %vm3921_vm0, %v3920_v4 }
 0x97c   :  { %3409 = vmatprep.subr.bf16.mxu1 %v3920_v4 }
 0x982   :  { %3406 = vmatmul.mubr.msk.bf16.vlgmr.msra.gmra.mrb[36].mxu1 %vm785_vm1, %v4435_v8 }
 0x983   :  { %3410 = vmatpush3.bf16.msra.mxu1 %v1300_v2  ;;  %3411 = vmatprep.mubr.msk.bf16.mxu1 %vm3921_vm0, %v3920_v4 }
 0x984   :  { %3415 = vmatprep.subr.bf16.mxu1 %v3920_v4 }
 0xa4d   :  { %v4444_v50 = vpop.f32.mrb[32].mxu1 }
 0xa4e   :  { %v3401_v20 = vpop.f32.mrb[33].mxu1 }
 0xa4f   :  { %v1230_v51 = vpop.f32.mrb[34].mxu1 }
 0xa50   :  { %v3402_v52 = vpop.f32.mrb[35].mxu1 }
 0xa55   :  { %v1275_v54 = vpop.f32.mrb[36].mxu1 }
 0xa56   :  { %v3407_v55 = vpop.f32.mrb[37].mxu1  ;;  %v1281_v56 = vsel %vm832_vm2, %v1275_v54, -inf }
 0xa57   :  { %1282 = vmax.xlane.f32.xlu0 %v1281_v56  ;;  %v1278_v57 = vpop.f32.mrb[38].mxu1 }
 0xa58   :  { %v3408_v58 = vpop.f32.mrb[39].mxu1 }
 0xa6d   :  { %1343 = vrot.lane.b32.xlu0 %v4435_v8, %s3922_s2 }
 0xae4   :  { %v1283_v59 = vpop.xlane.xlu0 %1282 }
 0xae5   :  { %v1284_v60 = vsub.f32 %v1275_v54, %v1283_v59 }
 0xae7   :  { %v1285_v61 = vmul.f32 1.442695, %v1284_v60 }
 0xae8   :  { %v1344_v12 = vpop.permute.xlu0 %1343 }
 0xae9   :  { %3874 = vpow2.f32 %v1285_v61 }
 0xaf3   :  { %v3875_v62 = vpop.eup %3874 }
 0xaf4   :  { %v1287_v63 = vsel %vm832_vm2, %v3875_v62, 0.0 }
 0xaf5   :  { %1288 = vadd.xlane.f32.xlu1 %v1287_v63 }
 0xb06   :  { %1346 = vrot.lane.b32.xlu1 %v4419_v42, %s3922_s2 }
 0xb82   :  { %v1289_v0 = vpop.xlane.xlu1 %1288 }
 0xb83   :  { %3876 = vrcp.f32 %v1289_v0 }
 0xb86   :  { %v1347_v10 = vpop.permute.xlu1 %1346 }
 0xb87   :  { %v1352_v3 = vsel %vm785_vm1, %v1347_v10, 0 }
 0xb8d   :  { %v3877_v1 = vpop.eup %3876 }
 0xb8e   :  { %v1291_v5 = vmul.f32 %v3877_v1, %v3875_v62 }
 0xb90   :  { %1293 = vst.msk [vmem:[#allocation2 + $0x20] sm:$0xff] %vm832_vm2, %v1291_v5  ;;  %v1294_v11 = vpack.c.bf16 %v1291_v5, %v1291_v5 }
 0xb92   :  { %3412 = vmatmul.mubr.msk.bf16.vlgmr.msra.gmra.mrb[40].mxu1 %vm832_vm2, %v1294_v11 }
 0xb93   :  { %3416 = vmatpush3.bf16.xpose.msra.mxu1 %v1352_v3  ;;  %3417 = vmatprep.mubr.msk.bf16.mxu1 %vm3921_vm0, %v3920_v4 }
 0xb94   :  { %3421 = vmatprep.subr.bf16.mxu1 %v3920_v4 }
 0xb9a   :  { %3418 = vmatmul.mubr.msk.bf16.vlgmr.msra.gmra.mrb[44].mxu1 %vm785_vm1, %v1344_v12 }
 0xb9b   :  { %3423 = vmatprep.mubr.msk.bf16.mxu1 %vm3921_vm0, %v3920_v4 }
 0xc65   :  { %v4461_v13 = vpop.f32.mrb[40].mxu1 }
 0xc66   :  { %v3413_v15 = vpop.f32.mrb[41].mxu1 }
 0xc67   :  { %v1339_v16 = vpop.f32.mrb[42].mxu1 }
 0xc68   :  { %v3414_v18 = vpop.f32.mrb[43].mxu1 }
 0xc6d   :  { %v1388_v19 = vpop.f32.mrb[44].mxu1 }
 0xc6e   :  { %v3419_v21 = vpop.f32.mrb[45].mxu1  ;;  %v1394_v22 = vsel %vm832_vm2, %v1388_v19, -inf }
 0xc6f   :  { %1395 = vmax.xlane.f32.xlu1 %v1394_v22  ;;  %v1391_v24 = vpop.f32.mrb[46].mxu1 }
 0xc70   :  { %v3420_v25 = vpop.f32.mrb[47].mxu1 }
 0xc80   :  { %1409 = vrot.lane.b32.xlu1 %v4433_v49, %s3922_s2 }
 0xc84   :  { %1457 = vrot.lane.b32.xlu1 %v4435_v8, %s3923_s1 }
 0xcfc   :  { %v1396_v26 = vpop.xlane.xlu1 %1395 }
 0xcfd   :  { %v1397_v27 = vsub.f32 %v1388_v19, %v1396_v26 }
 0xcff   :  { %v1398_v29 = vmul.f32 1.442695, %v1397_v27 }
 0xd00   :  { %v1410_v30 = vpop.permute.xlu1 %1409 }
 0xd01   :  { %3878 = vpow2.f32 %v1398_v29  ;;  %v1415_v31 = vsel %vm850_vm3, %v1410_v30, 0  ;;  %v3618_v30 = vld [vmem:[%s5095_s3] ss:$8 sps:$4 sm:$0xff]  }
 0xd02   :  { %3422 = vmatpush3.bf16.msra.mxu1 %v1415_v31  ;;  %v3620_v31 = vld [vmem:[%s5095_s3 + $0x4] ss:$8 sps:$4 sm:$0xff]  }
 0xd03   :  { %3427 = vmatprep.subr.bf16.mxu1 %v3920_v4  ;;  %1919 = vmatprep.subr.bf16.mxu0 %v3620_v31 }
 0xd04   :  { %v1458_v41 = vpop.permute.xlu1 %1457  ;;  %1920 = vmatpush1.bf16.msra.mxu0 %v3618_v30 }
 0xd0b   :  { %v3879_v32 = vpop.eup %3878 }
 0xd0c   :  { %v1400_v33 = vsel %vm832_vm2, %v3879_v32, 0.0 }
 0xd0d   :  { %1401 = vadd.xlane.f32.xlu0 %v1400_v33  ;;  %v3621_v33 = vld [vmem:[%s5095_s3 + $0x10] ss:$8 sps:$4 sm:$0xff]  }
 0xd23   :  { %1459 = vrot.lane.b32.xlu0 %v4419_v42, %s3923_s1 }
 0xd9a   :  { %v1402_v34 = vpop.xlane.xlu0 %1401 }
 0xd9b   :  { %3880 = vrcp.f32 %v1402_v34  ;;  %v3626_v34 = vld [vmem:[%s5095_s3 + $0x24] ss:$8 sps:$4 sm:$0xff]  }
 0xd9e   :  { %v1460_v17 = vpop.permute.xlu0 %1459 }
 0xd9f   :  { %v1465_v39 = vsel %vm785_vm1, %v1460_v17, 0  ;;  %v3627_v17 = vld [vmem:[%s5095_s3 + $0x30] ss:$8 sps:$4 sm:$0xff]  }
 0xda5   :  { %v3881_v35 = vpop.eup %3880 }
 0xda6   :  { %v1404_v37 = vmul.f32 %v3881_v35, %v3879_v32  ;;  %v3623_v32 = vld [vmem:[%s5095_s3 + $0x14] ss:$8 sps:$4 sm:$0xff]   ;;  %v3624_v35 = vld [vmem:[%s5095_s3 + $0x20] ss:$8 sps:$4 sm:$0xff]  }
 0xda7   :  { %1921 = vmatprep.subr.bf16.mxu0 %v3623_v32 }
 0xda8   :  { %1406 = vst.msk [vmem:[#allocation2 + $0x28] sm:$0xff] %vm832_vm2, %v1404_v37  ;;  %v1407_v38 = vpack.c.bf16 %v1404_v37, %v1404_v37  ;;  %1922 = vmatpush1.bf16.msra.mxu0 %v3621_v33  ;;  %v3629_v37 = vld [vmem:[%s5095_s3 + $0x34] ss:$8 sps:$4 sm:$0xff]   ;;  %v3894_v33 = vld [vmem:[%s5092_s0] sm:$0xff] }
 0xda9   :  { %1923 = vmatprep.subr.bf16.mxu0 %v3626_v34 }
 0xdaa   :  { %3424 = vmatmul.mubr.msk.bf16.vlgmr.msra.gmra.mrb[48].mxu1 %vm832_vm2, %v1407_v38  ;;  %v3632_v38 = vld [vmem:[%s5095_s3 + $0x44] ss:$8 sps:$4 sm:$0xff]  }
 0xdab   :  { %3428 = vmatpush3.bf16.xpose.msra.mxu1 %v1465_v39  ;;  %3429 = vmatprep.mubr.msk.bf16.mxu1 %vm3921_vm0, %v3920_v4  ;;  %v3630_v39 = vld [vmem:[%s5095_s3 + $0x40] ss:$8 sps:$4 sm:$0xff]  }
 0xdac   :  { %3433 = vmatprep.subr.bf16.mxu1 %v3920_v4  ;;  %1924 = vmatpush1.bf16.msra.mxu0 %v3624_v35 }
 0xdad   :  { %1925 = vmatprep.subr.bf16.mxu0 %v3629_v37  ;;  %v3895_v37 = vld [vmem:[%s5092_s0 + $0x8] sm:$0xff] }
 0xdb0   :  { %1926 = vmatpush1.bf16.msra.mxu0 %v3627_v17 }
 0xdb1   :  { %1927 = vmatprep.subr.bf16.mxu0 %v3632_v38 }
 0xdb2   :  { %3430 = vmatmul.mubr.msk.bf16.vlgmr.msra.gmra.mrb[52].mxu1 %vm785_vm1, %v1458_v41  ;;  %v3635_v41 = vld [vmem:[%s5095_s3 + $0x54] ss:$8 sps:$4 sm:$0xff]  }
 0xdb3   :  { %3435 = vmatprep.mubr.msk.bf16.mxu1 %vm3921_vm0, %v3920_v4 }
 0xdb4   :  { %1928 = vmatpush1.bf16.msra.mxu0 %v3630_v39  ;;  %v3666_v39 = vld [vmem:[%s5099_s7] ss:$16 sps:$4 sm:$0xff]  }
 0xdb5   :  { %1929 = vmatprep.subr.bf16.mxu0 %v3635_v41  ;;  %v3668_v41 = vld [vmem:[%s5099_s7 + $0x4] ss:$16 sps:$4 sm:$0xff]  }
 0xe7d   :  { %v4482_v43 = vpop.f32.mrb[48].mxu1 }
 0xe7e   :  { %v3459_v44 = vpack.i.bf16 %v4385_v53, %v4482_v43  ;;  %v3425_v45 = vpop.f32.mrb[49].mxu1  ;;  %v3633_v43 = vld [vmem:[%s5095_s3 + $0x50] ss:$8 sps:$4 sm:$0xff]  }
 0xe7f   :  { %v1454_v46 = vpop.f32.mrb[50].mxu1  ;;  %1930 = vmatpush1.bf16.msra.mxu0 %v3633_v43  ;;  %v3636_v45 = vld [vmem:[%s5095_s3 + $0x60] ss:$8 sps:$4 sm:$0xff]  }
 0xe80   :  { %v3426_v47 = vpop.f32.mrb[51].mxu1  ;;  %v3641_v46 = vld [vmem:[%s5095_s3 + $0x74] ss:$8 sps:$4 sm:$0xff]   ;;  %v3669_v43 = vld [vmem:[%s5099_s7 + $0x8] ss:$16 sps:$4 sm:$0xff]  }
 0xe81   :  { %v3639_v47 = vld [vmem:[%s5095_s3 + $0x70] ss:$8 sps:$4 sm:$0xff]  }
 0xe85   :  { %v1501_v14 = vpop.f32.mrb[52].mxu1 }
 0xe86   :  { %v3431_v48 = vpop.f32.mrb[53].mxu1  ;;  %v1507_v2 = vsel %vm832_vm2, %v1501_v14, -inf }
 0xe87   :  { %1508 = vmax.xlane.f32.xlu1 %v1507_v2  ;;  %v1504_v20 = vpop.f32.mrb[54].mxu1  ;;  %v3642_v48 = vld [vmem:[%s5095_s3 + $0x80] ss:$8 sps:$4 sm:$0xff]   ;;  %v3647_v2 = vld [vmem:[%s5095_s3 + $0x94] ss:$8 sps:$4 sm:$0xff]  }
 0xe88   :  { %v3432_v51 = vpop.f32.mrb[55].mxu1  ;;  %v3645_v20 = vld [vmem:[%s5095_s3 + $0x90] ss:$8 sps:$4 sm:$0xff]  }
 0xe89   :  { %v3650_v51 = vld [vmem:[%s5095_s3 + $0xa4] ss:$8 sps:$4 sm:$0xff]  }
 0xe98   :  { %1521 = vrot.lane.b32.xlu1 %v4433_v49, %s3923_s1 }
 0xe9c   :  { %1569 = vrot.lane.b32.xlu1 %v4435_v8, %s3924_s19 }
 0xf14   :  { %v1509_v52 = vpop.xlane.xlu1 %1508 }
 0xf15   :  { %v1510_v54 = vsub.f32 %v1501_v14, %v1509_v52  ;;  %v3644_v14 = vld [vmem:[%s5095_s3 + $0x84] ss:$8 sps:$4 sm:$0xff]   ;;  %v3648_v52 = vld [vmem:[%s5095_s3 + $0xa0] ss:$8 sps:$4 sm:$0xff]  }
 0xf17   :  { %v1511_v55 = vmul.f32 1.442695, %v1510_v54  ;;  %v3653_v54 = vld [vmem:[%s5095_s3 + $0xb4] ss:$8 sps:$4 sm:$0xff]  }
 0xf18   :  { %v1522_v53 = vpop.permute.xlu1 %1521 }
 0xf19   :  { %3882 = vpow2.f32 %v1511_v55  ;;  %v1527_v56 = vsel %vm850_vm3, %v1522_v53, 0  ;;  %v3651_v55 = vld [vmem:[%s5095_s3 + $0xb0] ss:$8 sps:$4 sm:$0xff]   ;;  %v3656_v53 = vld [vmem:[%s5095_s3 + $0xc4] ss:$8 sps:$4 sm:$0xff]  }
 0xf1a   :  { %3434 = vmatpush3.bf16.msra.mxu1 %v1527_v56  ;;  %v3654_v56 = vld [vmem:[%s5095_s3 + $0xc0] ss:$8 sps:$4 sm:$0xff]  }
 0xf1b   :  { %3439 = vmatprep.subr.bf16.mxu1 %v3920_v4 }
 0xf1c   :  { %v1570_v0 = vpop.permute.xlu1 %1569 }
 0xf23   :  { %v3883_v57 = vpop.eup %3882 }
 0xf24   :  { %v1513_v58 = vsel %vm832_vm2, %v3883_v57, 0.0 }
 0xf25   :  { %1514 = vadd.xlane.f32.xlu0 %v1513_v58  ;;  %v3657_v58 = vld [vmem:[%s5095_s3 + $0xd0] ss:$8 sps:$4 sm:$0xff]  }
 0xf3b   :  { %1571 = vrot.lane.b32.xlu0 %v4419_v42, %s3924_s19 }
 0xfb2   :  { %v1515_v59 = vpop.xlane.xlu0 %1514 }
 0xfb3   :  { %3884 = vrcp.f32 %v1515_v59  ;;  %v3662_v59 = vld [vmem:[%s5095_s3 + $0xe4] ss:$8 sps:$4 sm:$0xff]  }
 0xfb6   :  { %v1572_v61 = vpop.permute.xlu0 %1571 }
 0xfb7   :  { %v1577_v63 = vsel %vm785_vm1, %v1572_v61, 0  ;;  %v3663_v61 = vld [vmem:[%s5095_s3 + $0xf0] ss:$8 sps:$4 sm:$0xff]  }
 0xfbd   :  { %v3885_v8 = vpop.eup %3884 }
 0xfbe   :  { %v1517_v60 = vmul.f32 %v3885_v8, %v3883_v57  ;;  %v3659_v57 = vld [vmem:[%s5095_s3 + $0xd4] ss:$8 sps:$4 sm:$0xff]   ;;  %v3660_v8 = vld [vmem:[%s5095_s3 + $0xe0] ss:$8 sps:$4 sm:$0xff]  }
 0xfc0   :  { %1519 = vst.msk [vmem:[#allocation2 + $0x30] sm:$0xff] %vm832_vm2, %v1517_v60  ;;  %v1520_v62 = vpack.c.bf16 %v1517_v60, %v1517_v60  ;;  %v3665_v60 = vld [vmem:[%s5095_s3 + $0xf4] ss:$8 sps:$4 sm:$0xff]  }
 0xfc2   :  { %3436 = vmatmul.mubr.msk.bf16.vlgmr.msra.gmra.mrb[56].mxu1 %vm832_vm2, %v1520_v62 }
 0xfc3   :  { %3440 = vmatpush3.bf16.xpose.msra.mxu1 %v1577_v63  ;;  %3441 = vmatprep.mubr.msk.bf16.mxu1 %vm3921_vm0, %v3920_v4 }
 0xfc4   :  { %3445 = vmatprep.subr.bf16.mxu1 %v3920_v4 }
 0xfca   :  { %3442 = vmatmul.mubr.msk.bf16.vlgmr.msra.gmra.mrb[60].mxu1 %vm785_vm1, %v1570_v0 }
 0xfcb   :  { %3447 = vmatprep.mubr.msk.bf16.mxu1 %vm3921_vm0, %v3920_v4 }
0x1095   :  { %v1563_v42 = vpop.f32.mrb[56].mxu1 }
0x1096   :  { %v3464_v1 = vpack.i.bf16 %v4402_v23, %v1563_v42  ;;  %v3437_v5 = vpop.f32.mrb[57].mxu1 }
0x1097   :  { %v1566_v10 = vpop.f32.mrb[58].mxu1 }
0x1098   :  { %v3438_v11 = vpop.f32.mrb[59].mxu1 }
0x109d   :  { %v1613_v3 = vpop.f32.mrb[60].mxu1 }
0x109e   :  { %v3443_v12 = vpop.f32.mrb[61].mxu1  ;;  %v1619_v15 = vsel %vm832_vm2, %v1613_v3, -inf }
0x109f   :  { %1620 = vmax.xlane.f32.xlu1 %v1619_v15  ;;  %v1616_v16 = vpop.f32.mrb[62].mxu1 }
0x10a0   :  { %v3444_v18 = vpop.f32.mrb[63].mxu1 }
0x10b0   :  { %1633 = vrot.lane.b32.xlu1 %v4433_v49, %s3924_s19 }
0x10b4   :  { %3465 = vrot.lane.b32.xlu1 %v3464_v1, %s3923_s1 }
0x112c   :  { %v1621_v19 = vpop.xlane.xlu1 %1620 }
0x112d   :  { %v1622_v4 = vsub.f32 %v1613_v3, %v1621_v19 }
0x112f   :  { %v1623_v21 = vmul.f32 1.442695, %v1622_v4 }
0x1130   :  { %v1634_v22 = vpop.permute.xlu1 %1633 }
0x1131   :  { %3886 = vpow2.f32 %v1623_v21  ;;  %v1639_v23 = vsel %vm850_vm3, %v1634_v22, 0 }
0x1132   :  { %3446 = vmatpush3.bf16.msra.mxu1 %v1639_v23 }
0x1133   :  { %2415 = vmatprep.subr.bf16.mxu1 %v3668_v41  ;;  %v3749_v41 = vld [vmem:[%s5099_s7 + $0x1ac] ss:$16 sps:$4 sm:$0xff]  }
0x1134   :  { %v3466_v3 = vpop.permute.xlu1 %3465 }
0x1135   :  { %v3468_v16 = vunpack.i.h.bf16 %v3466_v3  ;;  %v3467_v18 = vunpack.i.l.bf16 %v3466_v3  ;;  %v3711_v3 = vld [vmem:[%s5099_s7 + $0xe8] ss:$16 sps:$4 sm:$0xff]  }
0x113b   :  { %v3887_v24 = vpop.eup %3886 }
0x113c   :  { %v1625_v25 = vsel %vm832_vm2, %v3887_v24, 0.0 }
0x113d   :  { %1626 = vadd.xlane.f32.xlu0 %v1625_v25 }
0x1153   :  { %3460 = vrot.lane.b32.xlu0 %v3459_v44, %s3924_s19  ;;  %v3638_v44 = vld [vmem:[%s5095_s3 + $0x64] ss:$8 sps:$4 sm:$0xff]  }
0x1154   :  { %1931 = vmatprep.subr.bf16.mxu0 %v3638_v44  ;;  %v3671_v44 = vld [vmem:[%s5099_s7 + $0xc] ss:$16 sps:$4 sm:$0xff]  }
0x1155   :  { %1932 = vmatpush1.bf16.msra.mxu0 %v3636_v45  ;;  %v3674_v45 = vld [vmem:[%s5099_s7 + $0x24] ss:$16 sps:$4 sm:$0xff]  }
0x1156   :  { %1933 = vmatprep.subr.bf16.mxu0 %v3641_v46  ;;  %v3677_v46 = vld [vmem:[%s5099_s7 + $0x2c] ss:$16 sps:$4 sm:$0xff]  }
0x1159   :  { %1934 = vmatpush1.bf16.msra.mxu0 %v3639_v47  ;;  %v3672_v47 = vld [vmem:[%s5099_s7 + $0x20] ss:$16 sps:$4 sm:$0xff]  }
0x115a   :  { %1935 = vmatprep.subr.bf16.mxu0 %v3644_v14  ;;  %v3675_v14 = vld [vmem:[%s5099_s7 + $0x28] ss:$16 sps:$4 sm:$0xff]  }
0x115d   :  { %1936 = vmatpush1.bf16.msra.mxu0 %v3642_v48  ;;  %v3680_v48 = vld [vmem:[%s5099_s7 + $0x44] ss:$16 sps:$4 sm:$0xff]  }
0x115e   :  { %1937 = vmatprep.subr.bf16.mxu0 %v3647_v2  ;;  %v3683_v2 = vld [vmem:[%s5099_s7 + $0x4c] ss:$16 sps:$4 sm:$0xff]  }
0x1161   :  { %1938 = vmatpush1.bf16.msra.mxu0 %v3645_v20  ;;  %v3678_v20 = vld [vmem:[%s5099_s7 + $0x40] ss:$16 sps:$4 sm:$0xff]  }
0x1162   :  { %1939 = vmatprep.subr.bf16.mxu0 %v3650_v51  ;;  %v3681_v51 = vld [vmem:[%s5099_s7 + $0x48] ss:$16 sps:$4 sm:$0xff]  }
0x1165   :  { %1940 = vmatpush1.bf16.msra.mxu0 %v3648_v52  ;;  %v3686_v52 = vld [vmem:[%s5099_s7 + $0x64] ss:$16 sps:$4 sm:$0xff]  }
0x1166   :  { %1941 = vmatprep.subr.bf16.mxu0 %v3653_v54  ;;  %v3689_v54 = vld [vmem:[%s5099_s7 + $0x6c] ss:$16 sps:$4 sm:$0xff]  }
0x1169   :  { %1942 = vmatpush1.bf16.msra.mxu0 %v3651_v55  ;;  %v3684_v55 = vld [vmem:[%s5099_s7 + $0x60] ss:$16 sps:$4 sm:$0xff]  }
0x116a   :  { %1943 = vmatprep.subr.bf16.mxu0 %v3656_v53  ;;  %v3687_v53 = vld [vmem:[%s5099_s7 + $0x68] ss:$16 sps:$4 sm:$0xff]  }
0x116d   :  { %1944 = vmatpush1.bf16.msra.mxu0 %v3654_v56  ;;  %v3692_v56 = vld [vmem:[%s5099_s7 + $0x84] ss:$16 sps:$4 sm:$0xff]  }
0x116e   :  { %1945 = vmatprep.subr.bf16.mxu0 %v3659_v57  ;;  %v3695_v57 = vld [vmem:[%s5099_s7 + $0x8c] ss:$16 sps:$4 sm:$0xff]  }
0x1171   :  { %1946 = vmatpush1.bf16.msra.mxu0 %v3657_v58  ;;  %v3690_v58 = vld [vmem:[%s5099_s7 + $0x80] ss:$16 sps:$4 sm:$0xff]  }
0x1172   :  { %1947 = vmatprep.subr.bf16.mxu0 %v3662_v59  ;;  %v3693_v59 = vld [vmem:[%s5099_s7 + $0x88] ss:$16 sps:$4 sm:$0xff]  }
0x1175   :  { %1948 = vmatpush1.bf16.msra.mxu0 %v3660_v8  ;;  %v3698_v8 = vld [vmem:[%s5099_s7 + $0xa4] ss:$16 sps:$4 sm:$0xff]  }
0x1176   :  { %1949 = vmatprep.subr.bf16.mxu0 %v3665_v60  ;;  %v3701_v60 = vld [vmem:[%s5099_s7 + $0xac] ss:$16 sps:$4 sm:$0xff]  }
0x1179   :  { %1950 = vmatpush1.bf16.msra.mxu0 %v3663_v61  ;;  %v3696_v61 = vld [vmem:[%s5099_s7 + $0xa0] ss:$16 sps:$4 sm:$0xff]  }
0x117a   :  { %2456 = vmatprep.subr.bf16.mxu0 %v3671_v44  ;;  %v3747_v44 = vld [vmem:[%s5099_s7 + $0x1a8] ss:$16 sps:$4 sm:$0xff]  }
0x11ca   :  { %v1627_v26 = vpop.xlane.xlu0 %1626 }
0x11cb   :  { %3888 = vrcp.f32 %v1627_v26 }
0x11ce   :  { %v3461_v5 = vpop.permute.xlu0 %3460 }
0x11cf   :  { %v3463_v10 = vunpack.i.h.bf16 %v3461_v5  ;;  %v3462_v11 = vunpack.i.l.bf16 %v3461_v5  ;;  %v3710_v5 = vld [vmem:[%s5099_s7 + $0xe4] ss:$16 sps:$4 sm:$0xff]  }
0x11d1   :  { %v1705_v12 = vsel %vm785_vm1, %v4360_v28, %v3463_v10  ;;  %v1710_v15 = vsel %vm785_vm1, %v4461_v13, %v3462_v11  ;;  %v1747_v28 = vld [vmem:[%s5096_s4] sm:$0x3]  ;;  %v3713_v10 = vld [vmem:[%s5099_s7 + $0xec] ss:$16 sps:$4 sm:$0xff]  }
0x11d2   :  { %v1707_v21 = vsel %vm1706_vm4, %v1705_v12, %v3468_v16  ;;  %v1711_v22 = vsel %vm1706_vm4, %v1710_v15, %v3467_v18  ;;  %v1752_v13 = vrot.slane %v1747_v28, %v4217_v9  ;;  %v3708_v11 = vld [vmem:[%s5099_s7 + $0xe0] ss:$16 sps:$4 sm:$0xff]   ;;  %v3716_v12 = vld [vmem:[%s5099_s7 + $0x104] ss:$16 sps:$4 sm:$0xff]   ;;  %v3719_v15 = vld [vmem:[%s5099_s7 + $0x10c] ss:$16 sps:$4 sm:$0xff]  }
0x11d3   :  { %v3714_v16 = vld [vmem:[%s5099_s7 + $0x100] ss:$16 sps:$4 sm:$0xff]   ;;  %v3717_v18 = vld [vmem:[%s5099_s7 + $0x108] ss:$16 sps:$4 sm:$0xff]  }
0x11d5   :  { %v3889_v27 = vpop.eup %3888 }
0x11d6   :  { %v1629_v49 = vmul.f32 %v3889_v27, %v3887_v24  ;;  %v1756_v27 = vrot.slane %v1747_v28, %v4417_v40 }
0x11d8   :  { %1631 = vst.msk [vmem:[#allocation2 + $0x38] sm:$0xff] %vm832_vm2, %v1629_v49  ;;  %v1632_v29 = vpack.c.bf16 %v1629_v49, %v1629_v49 }
0x11da   :  { %3448 = vmatmul.mubr.msk.bf16.vlgmr.msra.gmra.mrb[64].mxu1 %vm832_vm2, %v1632_v29 }
0x11db   :  { %2416 = vmatpush1.bf16.msra.mxu1 %v3666_v39  ;;  %v3746_v39 = vld [vmem:[%s5099_s7 + $0x1a4] ss:$16 sps:$4 sm:$0xff]  }
0x11dc   :  { %2417 = vmatprep.subr.bf16.mxu1 %v3674_v45  ;;  %v3750_v45 = vld [vmem:[%s5099_s7 + $0x1c0] ss:$16 sps:$4 sm:$0xff]  }
0x11df   :  { %2418 = vmatpush1.bf16.msra.mxu1 %v3672_v47  ;;  %v3753_v47 = vld [vmem:[%s5099_s7 + $0x1c8] ss:$16 sps:$4 sm:$0xff]  }
0x11e0   :  { %2419 = vmatprep.subr.bf16.mxu1 %v3680_v48  ;;  %v3758_v48 = vld [vmem:[%s5099_s7 + $0x1e4] ss:$16 sps:$4 sm:$0xff]  }
0x11e3   :  { %2420 = vmatpush1.bf16.msra.mxu1 %v3678_v20  ;;  %v3756_v20 = vld [vmem:[%s5099_s7 + $0x1e0] ss:$16 sps:$4 sm:$0xff]  }
0x11e4   :  { %2421 = vmatprep.subr.bf16.mxu1 %v3686_v52  ;;  %v3764_v52 = vld [vmem:[%s5101_s9 + $0x4] ss:$8 sps:$4 sm:$0xff]  }
0x11e7   :  { %2422 = vmatpush1.bf16.msra.mxu1 %v3684_v55 }
0x11e8   :  { %2423 = vmatprep.subr.bf16.mxu1 %v3692_v56 }
0x11eb   :  { %2424 = vmatpush1.bf16.msra.mxu1 %v3690_v58  ;;  %v1993_v58 = vld [vmem:[%s5098_s6] sm:$0x3] }
0x11ec   :  { %2425 = vmatprep.subr.bf16.mxu1 %v3698_v8 }
0x11ef   :  { %2426 = vmatpush1.bf16.msra.mxu1 %v3696_v61 }
0x12ad   :  { %v1675_v62 = vpop.f32.mrb[64].mxu1 }
0x12ae   :  { %v3469_v63 = vpack.i.bf16 %v4444_v50, %v1675_v62  ;;  %v3449_v0 = vpop.f32.mrb[65].mxu1  ;;  %v3699_v62 = vld [vmem:[%s5099_s7 + $0xa8] ss:$16 sps:$4 sm:$0xff]  }
0x12af   :  { %v1678_v42 = vpop.f32.mrb[66].mxu1  ;;  %v3707_v0 = vld [vmem:[%s5099_s7 + $0xcc] ss:$16 sps:$4 sm:$0xff]  }
0x12b0   :  { %3470 = vrot.lane.b32.xlu1 %v3469_v63, %s3922_s2  ;;  %v3450_v1 = vpop.f32.mrb[67].mxu1  ;;  %v3704_v63 = vld [vmem:[%s5099_s7 + $0xc4] ss:$16 sps:$4 sm:$0xff]   ;;  %v3702_v42 = vld [vmem:[%s5099_s7 + $0xc0] ss:$16 sps:$4 sm:$0xff]  }
0x12b1   :  { %2427 = vmatprep.subr.bf16.mxu1 %v3704_v63  ;;  %v3705_v1 = vld [vmem:[%s5099_s7 + $0xc8] ss:$16 sps:$4 sm:$0xff]   ;;  %v1998_v63 = vrot.slane %v1993_v58, %v4217_v9 }
0x12b2   :  { %2428 = vmatpush1.bf16.msra.mxu1 %v3702_v42 }
0x12b3   :  { %2429 = vmatprep.subr.bf16.mxu1 %v3710_v5 }
0x12b6   :  { %2430 = vmatpush1.bf16.msra.mxu1 %v3708_v11 }
0x12b7   :  { %2431 = vmatprep.subr.bf16.mxu1 %v3716_v12  ;;  %v3762_v12 = vld [vmem:[%s5101_s9] ss:$8 sps:$4 sm:$0xff]  }
0x12ba   :  { %2432 = vmatpush1.bf16.msra.mxu1 %v3714_v16  ;;  %v3770_v16 = vld [vmem:[%s5101_s9 + $0x14] ss:$8 sps:$4 sm:$0xff]  }
0x1322   :  { %v3471_v50 = vpop.permute.xlu1 %3470 }
0x1323   :  { %v3473_v19 = vunpack.i.h.bf16 %v3471_v50  ;;  %v3472_v4 = vunpack.i.l.bf16 %v3471_v50  ;;  %v3722_v50 = vld [vmem:[%s5099_s7 + $0x124] ss:$16 sps:$4 sm:$0xff]  }
0x1324   :  { %2433 = vmatprep.subr.bf16.mxu1 %v3722_v50  ;;  %v3768_v50 = vld [vmem:[%s5101_s9 + $0x10] ss:$8 sps:$4 sm:$0xff]  }
0x1325   :  { %v1709_v23 = vsel %vm1708_vm5, %v1707_v21, %v3473_v19  ;;  %v1712_v24 = vsel %vm1708_vm5, %v1711_v22, %v3472_v4  ;;  %v3725_v19 = vld [vmem:[%s5099_s7 + $0x12c] ss:$16 sps:$4 sm:$0xff]   ;;  %v3720_v4 = vld [vmem:[%s5099_s7 + $0x120] ss:$16 sps:$4 sm:$0xff]   ;;  %v3723_v21 = vld [vmem:[%s5099_s7 + $0x128] ss:$16 sps:$4 sm:$0xff]  }
0x1326   :  { %v1713_v25 = vpack.c.bf16 %v1709_v23, %v1709_v23  ;;  %v1714_v26 = vpack.c.bf16 %v1712_v24, %v1712_v24  ;;  %2434 = vmatpush1.bf16.msra.mxu1 %v3720_v4  ;;  %v3776_v4 = vld [vmem:[%s5101_s9 + $0x24] ss:$8 sps:$4 sm:$0xff]  }
0x1328   :  { %1951 = vmatprep.mubr.bf16.mxu0 %v1714_v26 }
0x1329   :  { %1952 = vmatmul.mubr.bf16.vlgmr.msra.gmra.mrb[8].mxu0 %v1713_v25 }
0x132a   :  { %2457 = vmatpush1.bf16.msra.mxu0 %v3669_v43  ;;  %v3744_v43 = vld [vmem:[%s5099_s7 + $0x1a0] ss:$16 sps:$4 sm:$0xff]  }
0x132b   :  { %2458 = vmatprep.subr.bf16.mxu0 %v3677_v46  ;;  %v3752_v46 = vld [vmem:[%s5099_s7 + $0x1c4] ss:$16 sps:$4 sm:$0xff]  }
0x132e   :  { %2459 = vmatpush1.bf16.msra.mxu0 %v3675_v14  ;;  %v3755_v14 = vld [vmem:[%s5099_s7 + $0x1cc] ss:$16 sps:$4 sm:$0xff]  }
0x132f   :  { %2460 = vmatprep.subr.bf16.mxu0 %v3683_v2  ;;  %v3761_v2 = vld [vmem:[%s5099_s7 + $0x1ec] ss:$16 sps:$4 sm:$0xff]  }
0x1332   :  { %2461 = vmatpush1.bf16.msra.mxu0 %v3681_v51  ;;  %v3759_v51 = vld [vmem:[%s5099_s7 + $0x1e8] ss:$16 sps:$4 sm:$0xff]  }
0x1333   :  { %2462 = vmatprep.subr.bf16.mxu0 %v3689_v54  ;;  %v3767_v54 = vld [vmem:[%s5101_s9 + $0x104] ss:$8 sps:$4 sm:$0xff]  }
0x1336   :  { %2463 = vmatpush1.bf16.msra.mxu0 %v3687_v53 }
0x1337   :  { %2464 = vmatprep.subr.bf16.mxu0 %v3695_v57  ;;  %v1979_v57 = vld [vmem:[%s5097_s5] sm:$0x3] }
0x1338   :  { %v1988_v8 = vrot.slane %v1979_v57, %v4417_v40 }
0x133a   :  { %2465 = vmatpush1.bf16.msra.mxu0 %v3693_v59  ;;  %v1984_v59 = vrot.slane %v1979_v57, %v4217_v9  ;;  %v3828_v57 = vld [vmem:[%s5101_s9 + $0xb0] ss:$8 sps:$4 sm:$0xff]  }
0x133b   :  { %2466 = vmatprep.subr.bf16.mxu0 %v3701_v60 }
0x133e   :  { %2467 = vmatpush1.bf16.msra.mxu0 %v3699_v62 }
0x133f   :  { %2468 = vmatprep.subr.bf16.mxu0 %v3707_v0  ;;  %v2002_v0 = vrot.slane %v1993_v58, %v4417_v40  ;;  %v3831_v58 = vld [vmem:[%s5101_s9 + $0x1b0] ss:$8 sps:$4 sm:$0xff]  }
0x1342   :  { %2469 = vmatpush1.bf16.msra.mxu0 %v3705_v1 }
0x1343   :  { %2470 = vmatprep.subr.bf16.mxu0 %v3713_v10 }
0x1346   :  { %2471 = vmatpush1.bf16.msra.mxu0 %v3711_v3 }
0x1347   :  { %2472 = vmatprep.subr.bf16.mxu0 %v3719_v15  ;;  %v3765_v15 = vld [vmem:[%s5101_s9 + $0x100] ss:$8 sps:$4 sm:$0xff]  }
0x134a   :  { %2473 = vmatpush1.bf16.msra.mxu0 %v3717_v18  ;;  %v3773_v18 = vld [vmem:[%s5101_s9 + $0x114] ss:$8 sps:$4 sm:$0xff]  }
0x134b   :  { %2474 = vmatprep.subr.bf16.mxu0 %v3725_v19  ;;  %v3771_v19 = vld [vmem:[%s5101_s9 + $0x110] ss:$8 sps:$4 sm:$0xff]  }
0x134e   :  { %2475 = vmatpush1.bf16.msra.mxu0 %v3723_v21  ;;  %v3779_v21 = vld [vmem:[%s5101_s9 + $0x124] ss:$8 sps:$4 sm:$0xff]  }
0x13fc   :  { %v1953_v49 = vpop.f32.mrb[8].mxu0 }
0x13fd   :  { %v1954_v29 = vadd.f32 %v1953_v49, %v1752_v13  ;;  %v1955_v30 = vpop.f32.mrb[9].mxu0  ;;  %v3731_v49 = vld [vmem:[%s5099_s7 + $0x14c] ss:$16 sps:$4 sm:$0xff]  }
0x13fe   :  { %v1956_v31 = vadd.f32 %v1955_v30, %v1756_v27  ;;  %v1957_v32 = vpop.f32.mrb[10].mxu0  ;;  %v3728_v27 = vld [vmem:[%s5099_s7 + $0x144] ss:$16 sps:$4 sm:$0xff]   ;;  %v3729_v30 = vld [vmem:[%s5099_s7 + $0x148] ss:$16 sps:$4 sm:$0xff]   ;;  %2476 = vmatprep.subr.bf16.mxu0 %v3731_v49 }
0x13ff   :  { %v4625_v34 = vadd.f32 %v3894_v33, %v1954_v29  ;;  %v1958_v35 = vpop.f32.mrb[11].mxu0  ;;  %v3726_v29 = vld [vmem:[%s5099_s7 + $0x140] ss:$16 sps:$4 sm:$0xff]   ;;  %2435 = vmatprep.subr.bf16.mxu1 %v3728_v27  ;;  %2477 = vmatpush1.bf16.msra.mxu0 %v3729_v30  ;;  %v3737_v32 = vld [vmem:[%s5099_s7 + $0x16c] ss:$16 sps:$4 sm:$0xff]  }
0x1400   :  { %v4630_v17 = vadd.f32 %v3895_v37, %v1956_v31  ;;  %2436 = vmatpush1.bf16.msra.mxu1 %v3726_v29  ;;  %v3734_v31 = vld [vmem:[%s5099_s7 + $0x164] ss:$16 sps:$4 sm:$0xff]   ;;  %v3732_v33 = vld [vmem:[%s5099_s7 + $0x160] ss:$16 sps:$4 sm:$0xff]   ;;  %2478 = vmatprep.subr.bf16.mxu0 %v3737_v32  ;;  %v3743_v37 = vld [vmem:[%s5099_s7 + $0x18c] ss:$16 sps:$4 sm:$0xff]  }
0x1401   :  { %2437 = vmatprep.subr.bf16.mxu1 %v3734_v31  ;;  %v3740_v35 = vld [vmem:[%s5099_s7 + $0x184] ss:$16 sps:$4 sm:$0xff]   ;;  %v3786_v49 = vld [vmem:[%s5101_s9 + $0x40] ss:$8 sps:$4 sm:$0xff]   ;;  %v3792_v32 = vld [vmem:[%s5101_s9 + $0x50] ss:$8 sps:$4 sm:$0xff]  }
0x1402   :  { %v1962_v38 = vadd.f32 %v4630_v17, %v4625_v34  ;;  %v3791_v27 = vld [vmem:[%s5101_s9 + $0x144] ss:$8 sps:$4 sm:$0xff]   ;;  %v3789_v29 = vld [vmem:[%s5101_s9 + $0x140] ss:$8 sps:$4 sm:$0xff]   ;;  %v3794_v30 = vld [vmem:[%s5101_s9 + $0x54] ss:$8 sps:$4 sm:$0xff]  }
0x1403   :  { %v3797_v31 = vld [vmem:[%s5101_s9 + $0x154] ss:$8 sps:$4 sm:$0xff]  }
0x1404   :  { %1963 = vadd.xlane.f32.xlu1 %v1962_v38  ;;  %2438 = vmatpush1.bf16.msra.mxu1 %v3732_v33  ;;  %v3741_v38 = vld [vmem:[%s5099_s7 + $0x188] ss:$16 sps:$4 sm:$0xff]  }
0x1405   :  { %2439 = vmatprep.subr.bf16.mxu1 %v3740_v35  ;;  %v3795_v33 = vld [vmem:[%s5101_s9 + $0x150] ss:$8 sps:$4 sm:$0xff]   ;;  %v3803_v35 = vld [vmem:[%s5101_s9 + $0x164] ss:$8 sps:$4 sm:$0xff]  }
0x1491   :  { %v1964_v22 = vpop.xlane.xlu1 %1963 }
0x1492   :  { %v1966_v23 = vmul.f32 0.00390625, %v1964_v22  ;;  %v3774_v22 = vld [vmem:[%s5101_s9 + $0x20] ss:$8 sps:$4 sm:$0xff]  }
0x1494   :  { %v4755_v24 = vsub.f32 %v4625_v34, %v1966_v23  ;;  %v4758_v25 = vsub.f32 %v4630_v17, %v1966_v23  ;;  %v3735_v34 = vld [vmem:[%s5099_s7 + $0x168] ss:$16 sps:$4 sm:$0xff]   ;;  %v3738_v17 = vld [vmem:[%s5099_s7 + $0x180] ss:$16 sps:$4 sm:$0xff]  }
0x1495   :  { %2479 = vmatpush1.bf16.msra.mxu0 %v3735_v34  ;;  %2440 = vmatpush1.bf16.msra.mxu1 %v3738_v17  ;;  %v3777_v23 = vld [vmem:[%s5101_s9 + $0x120] ss:$8 sps:$4 sm:$0xff]   ;;  %v3800_v34 = vld [vmem:[%s5101_s9 + $0x64] ss:$8 sps:$4 sm:$0xff]  }
0x1496   :  { %v1969_v26 = vmul.f32 %v4755_v24, %v4755_v24  ;;  %v1970_v28 = vmul.f32 %v4758_v25, %v4758_v25  ;;  %2480 = vmatprep.subr.bf16.mxu0 %v3743_v37  ;;  %2441 = vmatprep.subr.bf16.mxu1 %v3746_v39  ;;  %v3798_v37 = vld [vmem:[%s5101_s9 + $0x60] ss:$8 sps:$4 sm:$0xff]   ;;  %v3809_v39 = vld [vmem:[%s5101_s9 + $0x174] ss:$8 sps:$4 sm:$0xff]  }
0x1497   :  { %v3801_v17 = vld [vmem:[%s5101_s9 + $0x160] ss:$8 sps:$4 sm:$0xff]  }
0x1498   :  { %v1971_v13 = vadd.f32 %v1970_v28, %v1969_v26  ;;  %v3780_v26 = vld [vmem:[%s5101_s9 + $0x30] ss:$8 sps:$4 sm:$0xff]  }
0x1499   :  { %2481 = vmatpush1.bf16.msra.mxu0 %v3741_v38  ;;  %2442 = vmatpush1.bf16.msra.mxu1 %v3744_v43  ;;  %v3783_v28 = vld [vmem:[%s5101_s9 + $0x130] ss:$8 sps:$4 sm:$0xff]   ;;  %v3806_v38 = vld [vmem:[%s5101_s9 + $0x74] ss:$8 sps:$4 sm:$0xff]  }
0x149a   :  { %1972 = vadd.xlane.f32.xlu0 %v1971_v13  ;;  %2482 = vmatprep.subr.bf16.mxu0 %v3749_v41  ;;  %v3788_v13 = vld [vmem:[%s5101_s9 + $0x44] ss:$8 sps:$4 sm:$0xff]   ;;  %v3804_v41 = vld [vmem:[%s5101_s9 + $0x70] ss:$8 sps:$4 sm:$0xff]  }
0x149b   :  { %2443 = vmatprep.subr.bf16.mxu1 %v3752_v46  ;;  %v3807_v43 = vld [vmem:[%s5101_s9 + $0x170] ss:$8 sps:$4 sm:$0xff]   ;;  %v3810_v46 = vld [vmem:[%s5101_s9 + $0x80] ss:$8 sps:$4 sm:$0xff]  }
0x149d   :  { %2483 = vmatpush1.bf16.msra.mxu0 %v3747_v44  ;;  %2444 = vmatpush1.bf16.msra.mxu1 %v3750_v45  ;;  %v3812_v44 = vld [vmem:[%s5101_s9 + $0x84] ss:$8 sps:$4 sm:$0xff]  }
0x149e   :  { %2484 = vmatprep.subr.bf16.mxu0 %v3755_v14  ;;  %2445 = vmatprep.subr.bf16.mxu1 %v3758_v48  ;;  %v3815_v45 = vld [vmem:[%s5101_s9 + $0x184] ss:$8 sps:$4 sm:$0xff]   ;;  %v3818_v14 = vld [vmem:[%s5101_s9 + $0x94] ss:$8 sps:$4 sm:$0xff]  }
0x149f   :  { %v3821_v48 = vld [vmem:[%s5101_s9 + $0x194] ss:$8 sps:$4 sm:$0xff]  }
0x14a1   :  { %2485 = vmatpush1.bf16.msra.mxu0 %v3753_v47  ;;  %2446 = vmatpush1.bf16.msra.mxu1 %v3756_v20  ;;  %v3813_v47 = vld [vmem:[%s5101_s9 + $0x180] ss:$8 sps:$4 sm:$0xff]   ;;  %v3819_v20 = vld [vmem:[%s5101_s9 + $0x190] ss:$8 sps:$4 sm:$0xff]  }
0x14a2   :  { %2486 = vmatprep.subr.bf16.mxu0 %v3761_v2  ;;  %2901 = vmatprep.subr.bf16.mxu1 %v3764_v52  ;;  %v3816_v2 = vld [vmem:[%s5101_s9 + $0x90] ss:$8 sps:$4 sm:$0xff]   ;;  %v3827_v52 = vld [vmem:[%s5101_s9 + $0x1a4] ss:$8 sps:$4 sm:$0xff]  }
0x14a5   :  { %2487 = vmatpush1.bf16.msra.mxu0 %v3759_v51  ;;  %v3824_v51 = vld [vmem:[%s5101_s9 + $0xa4] ss:$8 sps:$4 sm:$0xff]  }
0x14a6   :  { %2942 = vmatprep.subr.bf16.mxu0 %v3767_v54  ;;  %v3822_v54 = vld [vmem:[%s5101_s9 + $0xa0] ss:$8 sps:$4 sm:$0xff]  }
0x1527   :  { %v1973_v55 = vpop.xlane.xlu0 %1972 }
0x1528   :  { %v1974_v53 = vmul.f32 0.00390625, %v1973_v55  ;;  %v3825_v55 = vld [vmem:[%s5101_s9 + $0x1a0] ss:$8 sps:$4 sm:$0xff]  }
0x152a   :  { %v1975_v56 = vadd.f32 1e-05, %v1974_v53  ;;  %v3830_v53 = vld [vmem:[%s5101_s9 + $0xb4] ss:$8 sps:$4 sm:$0xff]  }
0x152c   :  { %3890 = vrsqrt.f32 %v1975_v56  ;;  %v3833_v56 = vld [vmem:[%s5101_s9 + $0x1b4] ss:$8 sps:$4 sm:$0xff]  }
0x1536   :  { %v3891_v60 = vpop.eup %3890 }
0x1537   :  { %v1977_v61 = vmul.f32 %v3891_v60, %v4755_v24  ;;  %v1978_v62 = vmul.f32 %v3891_v60, %v4758_v25  ;;  %v3782_v24 = vld [vmem:[%s5101_s9 + $0x34] ss:$8 sps:$4 sm:$0xff]   ;;  %v3834_v60 = vld [vmem:[%s5101_s9 + $0xc0] ss:$8 sps:$4 sm:$0xff]  }
0x1538   :  { %v3785_v25 = vld [vmem:[%s5101_s9 + $0x134] ss:$8 sps:$4 sm:$0xff]  }
0x1539   :  { %v1992_v42 = vmul.f32 %v1988_v8, %v1978_v62  ;;  %v1991_v1 = vmul.f32 %v1984_v59, %v1977_v61  ;;  %v3836_v59 = vld [vmem:[%s5101_s9 + $0xc4] ss:$8 sps:$4 sm:$0xff]   ;;  %v3837_v61 = vld [vmem:[%s5101_s9 + $0x1c0] ss:$8 sps:$4 sm:$0xff]   ;;  %v3842_v62 = vld [vmem:[%s5101_s9 + $0xd4] ss:$8 sps:$4 sm:$0xff]  }
0x153a   :  { %v3839_v8 = vld [vmem:[%s5101_s9 + $0x1c4] ss:$8 sps:$4 sm:$0xff]  }
0x153b   :  { %v4854_v5 = vadd.f32 %v2002_v0, %v1992_v42  ;;  %v4856_v10 = vadd.f32 %v1998_v63, %v1991_v1  ;;  %v3845_v63 = vld [vmem:[%s5101_s9 + $0x1d4] ss:$8 sps:$4 sm:$0xff]   ;;  %v3840_v0 = vld [vmem:[%s5101_s9 + $0xd0] ss:$8 sps:$4 sm:$0xff]   ;;  %v3848_v1 = vld [vmem:[%s5101_s9 + $0xe4] ss:$8 sps:$4 sm:$0xff]  }
0x153c   :  { %v3843_v42 = vld [vmem:[%s5101_s9 + $0x1d0] ss:$8 sps:$4 sm:$0xff]  }
0x153d   :  { %v2008_v11 = vpack.c.bf16 %v4854_v5, %v4854_v5  ;;  %v2007_v3 = vpack.c.bf16 %v4856_v10, %v4856_v10 }
0x153f   :  { %2447 = vmatprep.mubr.bf16.mxu1 %v2008_v11  ;;  %2488 = vmatprep.mubr.bf16.mxu0 %v2008_v11  ;;  %v3851_v11 = vld [vmem:[%s5101_s9 + $0x1e4] ss:$8 sps:$4 sm:$0xff]  }
0x1540   :  { %2448 = vmatmul.mubr.bf16.vlgmr.msra.gmra.mrb[68].mxu1 %v2007_v3  ;;  %2489 = vmatmul.mubr.bf16.vlgmr.msra.gmra.mrb[12].mxu0 %v2007_v3  ;;  %v3846_v3 = vld [vmem:[%s5101_s9 + $0xe0] ss:$8 sps:$4 sm:$0xff]  }
0x1541   :  { %2902 = vmatpush1.bf16.msra.mxu1 %v3762_v12  ;;  %2943 = vmatpush1.bf16.msra.mxu0 %v3765_v15  ;;  %v3849_v12 = vld [vmem:[%s5101_s9 + $0x1e0] ss:$8 sps:$4 sm:$0xff]   ;;  %v3854_v15 = vld [vmem:[%s5101_s9 + $0xf4] ss:$8 sps:$4 sm:$0xff]  }
0x1542   :  { %2903 = vmatprep.subr.bf16.mxu1 %v3770_v16  ;;  %2944 = vmatprep.subr.bf16.mxu0 %v3773_v18  ;;  %v3857_v16 = vld [vmem:[%s5101_s9 + $0x1f4] ss:$8 sps:$4 sm:$0xff]   ;;  %v3852_v18 = vld [vmem:[%s5101_s9 + $0xf0] ss:$8 sps:$4 sm:$0xff]  }
0x1545   :  { %2904 = vmatpush1.bf16.msra.mxu1 %v3768_v50  ;;  %2945 = vmatpush1.bf16.msra.mxu0 %v3771_v19  ;;  %v3855_v50 = vld [vmem:[%s5101_s9 + $0x1f0] ss:$8 sps:$4 sm:$0xff]   ;;  %v2073_v19 = vld [vmem:[%s5100_s8] sm:$0xf] }
0x1546   :  { %2905 = vmatprep.subr.bf16.mxu1 %v3776_v4  ;;  %2946 = vmatprep.subr.bf16.mxu0 %v3779_v21  ;;  %v2078_v4 = vrot.slane %v2073_v19, %v4217_v9  ;;  %v2086_v21 = vrot.slane %v2073_v19, %v160_v7 }
0x1549   :  { %2906 = vmatpush1.bf16.msra.mxu1 %v3774_v22  ;;  %2947 = vmatpush1.bf16.msra.mxu0 %v3777_v23  ;;  %v2082_v22 = vrot.slane %v2073_v19, %v4417_v40  ;;  %v2090_v23 = vrot.slane %v2073_v19, %v164_v36 }
0x154a   :  { %2907 = vmatprep.subr.bf16.mxu1 %v3782_v24  ;;  %2948 = vmatprep.subr.bf16.mxu0 %v3785_v25 }
0x154d   :  { %2908 = vmatpush1.bf16.msra.mxu1 %v3780_v26  ;;  %2949 = vmatpush1.bf16.msra.mxu0 %v3783_v28 }
0x154e   :  { %2909 = vmatprep.subr.bf16.mxu1 %v3788_v13  ;;  %2950 = vmatprep.subr.bf16.mxu0 %v3791_v27 }
0x1551   :  { %2910 = vmatpush1.bf16.msra.mxu1 %v3786_v49  ;;  %2951 = vmatpush1.bf16.msra.mxu0 %v3789_v29 }
0x1552   :  { %2911 = vmatprep.subr.bf16.mxu1 %v3794_v30  ;;  %2952 = vmatprep.subr.bf16.mxu0 %v3797_v31 }
0x1555   :  { %2912 = vmatpush1.bf16.msra.mxu1 %v3792_v32  ;;  %2953 = vmatpush1.bf16.msra.mxu0 %v3795_v33 }
0x1556   :  { %2913 = vmatprep.subr.bf16.mxu1 %v3800_v34  ;;  %2954 = vmatprep.subr.bf16.mxu0 %v3803_v35 }
0x1559   :  { %2914 = vmatpush1.bf16.msra.mxu1 %v3798_v37  ;;  %2955 = vmatpush1.bf16.msra.mxu0 %v3801_v17 }
0x155a   :  { %2915 = vmatprep.subr.bf16.mxu1 %v3806_v38  ;;  %2956 = vmatprep.subr.bf16.mxu0 %v3809_v39  ;;  %v2569_v39 = vld [vmem:[%s5102_s10] sm:$0x3]  ;;  %s3925_s10 = smov [#allocation2]  }
0x155b   :  { %s3038_s15 = sshll.u32 %s3925_s10, 4  ;;  %s3039_s15 = int_to_ptr.vmem [resolvable:$true] %s3038_s15 }
0x155c   :  { %s3896_s16 = scalar_lea.vmem %s3039_s15, 1024  ;;  %p3901_p1 = scmp.lt.s32.totalorder %s3039_s15, %s3039_s15 }
0x155d   :  { %2916 = vmatpush1.bf16.msra.mxu1 %v3804_v41  ;;  %2957 = vmatpush1.bf16.msra.mxu0 %v3807_v43  ;;  %v2574_v41 = vrot.slane %v2569_v39, %v4217_v9  ;;  %v2578_v43 = vrot.slane %v2569_v39, %v4417_v40  ;;  %p3897_p0 = scmp.ne.s32.totalorder %s3039_s15, %s3896_s16  ;;  %p3902_p2 = scmp.lt.s32.totalorder %s3896_s16, %s3896_s16 }
0x155e   :  { %2917 = vmatprep.subr.bf16.mxu1 %v3812_v44  ;;  %2958 = vmatprep.subr.bf16.mxu0 %v3815_v45 }
0x155f   :  { %p3903_p3 = por %p3902_p2, %p3901_p1 }
0x1561   :  { %2918 = vmatpush1.bf16.msra.mxu1 %v3810_v46  ;;  %2959 = vmatpush1.bf16.msra.mxu0 %v3813_v47  ;;  %p3904_p4 = pnand %p3903_p3, %p3897_p0 }
0x1562   :  { %2919 = vmatprep.subr.bf16.mxu1 %v3818_v14  ;;  %2960 = vmatprep.subr.bf16.mxu0 %v3821_v48 }
0x1565   :  { %2920 = vmatpush1.bf16.msra.mxu1 %v3816_v2  ;;  %2961 = vmatpush1.bf16.msra.mxu0 %v3819_v20 }
0x1566   :  { %2921 = vmatprep.subr.bf16.mxu1 %v3824_v51  ;;  %2962 = vmatprep.subr.bf16.mxu0 %v3827_v52 }
0x1569   :  { %2922 = vmatpush1.bf16.msra.mxu1 %v3822_v54  ;;  %2963 = vmatpush1.bf16.msra.mxu0 %v3825_v55 }
0x156a   :  { %2923 = vmatprep.subr.bf16.mxu1 %v3830_v53  ;;  %2964 = vmatprep.subr.bf16.mxu0 %v3833_v56 }
0x156d   :  { %2924 = vmatpush1.bf16.msra.mxu1 %v3828_v57  ;;  %2965 = vmatpush1.bf16.msra.mxu0 %v3831_v58 }
0x156e   :  { %2925 = vmatprep.subr.bf16.mxu1 %v3836_v59  ;;  %2966 = vmatprep.subr.bf16.mxu0 %v3839_v8 }
0x1571   :  { %2926 = vmatpush1.bf16.msra.mxu1 %v3834_v60  ;;  %2967 = vmatpush1.bf16.msra.mxu0 %v3837_v61 }
0x1572   :  { %2927 = vmatprep.subr.bf16.mxu1 %v3842_v62  ;;  %2968 = vmatprep.subr.bf16.mxu0 %v3845_v63 }
0x1575   :  { %2928 = vmatpush1.bf16.msra.mxu1 %v3840_v0  ;;  %2969 = vmatpush1.bf16.msra.mxu0 %v3843_v42 }
0x1576   :  { %2929 = vmatprep.subr.bf16.mxu1 %v3848_v1  ;;  %2970 = vmatprep.subr.bf16.mxu0 %v3851_v11 }
0x1579   :  { %2930 = vmatpush1.bf16.msra.mxu1 %v3846_v3  ;;  %2971 = vmatpush1.bf16.msra.mxu0 %v3849_v12 }
0x157a   :  { %2931 = vmatprep.subr.bf16.mxu1 %v3854_v15  ;;  %2972 = vmatprep.subr.bf16.mxu0 %v3857_v16 }
0x157d   :  { %2932 = vmatpush1.bf16.msra.mxu1 %v3852_v18  ;;  %2973 = vmatpush1.bf16.msra.mxu0 %v3855_v50 }
0x1613   :  { %v2449_v24 = vpop.f32.mrb[68].mxu1  ;;  %v2490_v25 = vpop.f32.mrb[12].mxu0 }
0x1614   :  { %v2450_v26 = vadd.f32 %v2449_v24, %v2078_v4  ;;  %v2491_v28 = vadd.f32 %v2490_v25, %v2086_v21  ;;  %v2451_v13 = vpop.f32.mrb[69].mxu1  ;;  %v2492_v27 = vpop.f32.mrb[13].mxu0 }
0x1615   :  { %v2452_v49 = vadd.f32 %v2451_v13, %v2082_v22  ;;  %v2493_v29 = vadd.f32 %v2492_v27, %v2090_v23  ;;  %v2453_v30 = vpop.f32.mrb[70].mxu1  ;;  %v2494_v31 = vpop.f32.mrb[14].mxu0 }
0x1616   :  { %v2497_v32 = vmax.f32 %v2450_v26, 0.0  ;;  %v2499_v33 = vmax.f32 %v2491_v28, 0.0  ;;  %v2454_v34 = vpop.f32.mrb[71].mxu1  ;;  %v2495_v35 = vpop.f32.mrb[15].mxu0 }
0x1617   :  { %v2498_v7 = vmax.f32 %v2452_v49, 0.0  ;;  %v2500_v37 = vmax.f32 %v2493_v29, 0.0 }
0x1618   :  { %v2501_v6 = vpack.c.bf16 %v2497_v32, %v2497_v32  ;;  %v2503_v36 = vpack.c.bf16 %v2499_v33, %v2499_v33 }
0x1619   :  { %v2502_v17 = vpack.c.bf16 %v2498_v7, %v2498_v7  ;;  %v2504_v38 = vpack.c.bf16 %v2500_v37, %v2500_v37 }
0x161b   :  { %2933 = vmatprep.mubr.bf16.mxu1 %v2502_v17  ;;  %2974 = vmatprep.mubr.bf16.mxu0 %v2504_v38 }
0x161c   :  { %2934 = vmatmul.mubr.bf16.vlgmr.msra.gmra.mrb[72].mxu1 %v2501_v6  ;;  %2975 = vmatmul.mubr.bf16.vlgmr.msra.gmra.mrb[16].mxu0 %v2503_v36 }
0x16ef   :  { %v2935_v44 = vpop.f32.mrb[72].mxu1  ;;  %v2976_v45 = vpop.f32.mrb[16].mxu0 }
0x16f0   :  { %v2936_v46 = vadd.f32 %v2935_v44, %v2574_v41  ;;  %v2937_v47 = vpop.f32.mrb[73].mxu1  ;;  %v2978_v14 = vpop.f32.mrb[17].mxu0 }
0x16f1   :  { %v2938_v48 = vadd.f32 %v2937_v47, %v2578_v43  ;;  %v2939_v2 = vpop.f32.mrb[74].mxu1  ;;  %v2980_v20 = vpop.f32.mrb[18].mxu0 }
0x16f2   :  { %v2977_v51 = vadd.f32 %v2976_v45, %v2936_v46  ;;  %v2940_v52 = vpop.f32.mrb[75].mxu1  ;;  %v2981_v54 = vpop.f32.mrb[19].mxu0 }
0x16f3   :  { %v2979_v55 = vadd.f32 %v2978_v14, %v2938_v48 }
0x16f4   :  { %v2983_v53 = vadd.f32 %v2977_v51, %v4856_v10 }
0x16f5   :  { %v2984_v56 = vadd.f32 %v2979_v55, %v4854_v5 }
0x16f7   :  { %v2985_v57 = vadd.f32 %v2984_v56, %v2983_v53 }
0x16f9   :  { %2986 = vadd.xlane.f32.xlu1 %v2985_v57 }
0x1786   :  { %v2987_v58 = vpop.xlane.xlu1 %2986 }
0x1787   :  { %v2988_v59 = vmul.f32 0.00390625, %v2987_v58 }
0x1789   :  { %v2989_v8 = vsub.f32 %v2983_v53, %v2988_v59  ;;  %v2990_v60 = vsub.f32 %v2984_v56, %v2988_v59 }
0x178b   :  { %v2991_v61 = vmul.f32 %v2989_v8, %v2989_v8  ;;  %v2992_v62 = vmul.f32 %v2990_v60, %v2990_v60 }
0x178d   :  { %v2993_v63 = vadd.f32 %v2992_v62, %v2991_v61 }
0x178f   :  { %2994 = vadd.xlane.f32.xlu0 %v2993_v63 }
0x1790   :  { %3907 = shalt.err (!%p3904_p4)
}
0x1791   :  { %s3908_s17 = scalar_lea.hbm %s5106_s14, 1024 }
0x1792   :  { %p3909_p5 = scmp.ne.s32.totalorder %s5106_s14, %s3908_s17  ;;  %p3912_p6 = scmp.lt.u32.totalorder %s3908_s17, %s5106_s14 }
0x1794   :  { %p3914_p7 = pnand %p3912_p6, %p3909_p5 }
0x1796   :  { %3917 = shalt.err (!%p3914_p7)
}
0x1797   :  { %s3926_s20 = smov 128   ;;  %s3927_s21 = smov 8   ;;  %v3001_v42 = vld [vmem:[%s5103_s11] sm:$0x3] }
0x1798   :  { %3044 = dma.vmem_to_hbm [thread:$0]  %s3039_s15, 1024, %s5106_s14, [#allocation3], %s3926_s20, %s3926_s20, %s3927_s21   ;;  %v3006_v11 = vrot.slane %v3001_v42, %v4217_v9  ;;  %v3010_v3 = vrot.slane %v3001_v42, %v4417_v40 }
0x1799   :  { %v3015_v1 = vld [vmem:[%s5104_s12] sm:$0x3] }
0x179a   :  { %v3020_v15 = vrot.slane %v3015_v1, %v4217_v9  ;;  %v3024_v16 = vrot.slane %v3015_v1, %v4417_v40 }
0x181c   :  { %v2995_v5 = vpop.xlane.xlu0 %2994 }
0x181d   :  { %v2996_v10 = vmul.f32 0.00390625, %v2995_v5 }
0x181f   :  { %v2997_v0 = vadd.f32 1e-05, %v2996_v10 }
0x1821   :  { %3892 = vrsqrt.f32 %v2997_v0 }
0x182b   :  { %v3893_v12 = vpop.eup %3892 }
0x182c   :  { %v2999_v18 = vmul.f32 %v3893_v12, %v2989_v8  ;;  %v3000_v50 = vmul.f32 %v3893_v12, %v2990_v60 }
0x182e   :  { %v3013_v19 = vmul.f32 %v3006_v11, %v2999_v18  ;;  %v3014_v4 = vmul.f32 %v3010_v3, %v3000_v50 }
0x1830   :  { %v3027_v21 = vadd.f32 %v3020_v15, %v3013_v19  ;;  %v3028_v22 = vadd.f32 %v3024_v16, %v3014_v4 }
0x1832   :  { %3029 = vst [vmem:[%s5105_s13] sm:$0xff] %v3027_v21  ;;  %3030 = vst [vmem:[%s5105_s13 + $0x8] sm:$0xff] %v3028_v22 }
0x1833   :  { %3918 = dma.done.wait [#allocation3], 1024  }
0x1834   :  { %3919 = vsyncadd [#allocation3], 4294966272 }
0x1835   :  { %3050 = vsyncpa [#allocation3], 1 }

// kernel: run.25
= control target key start
LH: loop header
LB: loop body
LE: loop exit
PB: predicated region body
PF: predicated region fallthrough
CT: control target
= control target key end

     0   :  { %vm3860_vm0 = vmmov 0   ;;  %vm782_vm1 = vcmask 261120   ;;  %vm829_vm2 = vcmask 64512   ;;  %vm846_vm3 = vcmask 1043456   ;;  %s3863_s19 = smov 32   ;;  %s5000_s1 = inlined_call_operand.vmem [shape: bf16[256,768], index: 1, kind: input, shape index: {}]   ;;  %s5001_s0 = inlined_call_operand.vmem [shape: f32[8,256], index: 0, kind: input, shape index: {}]   ;;  %s5002_s2 = inlined_call_operand.vmem [shape: f32[1,768], index: 2, kind: input, shape index: {}]   ;;  %s5003_s3 = inlined_call_operand.vmem [shape: bf16[256,256], index: 3, kind: input, shape index: {}]   ;;  %s5004_s4 = inlined_call_operand.vmem [shape: f32[1,256], index: 4, kind: input, shape index: {}, may-alias: {4,6,10,12}]   ;;  %s5005_s7 = inlined_call_operand.vmem [shape: bf16[256,512], index: 7, kind: input, shape index: {}]   ;;  %s5006_s9 = inlined_call_operand.vmem [shape: bf16[512,256], index: 9, kind: input, shape index: {}]   ;;  %s5007_s5 = inlined_call_operand.vmem [shape: f32[1,256], index: 5, kind: input, shape index: {}, may-alias: {5,11}]   ;;  %s5008_s6 = inlined_call_operand.vmem [shape: f32[1,256], index: 6, kind: input, shape index: {}, may-alias: {4,6,10,12}]   ;;  %s5009_s8 = inlined_call_operand.vmem [shape: f32[1,512], index: 8, kind: input, shape index: {}]   ;;  %s5010_s10 = inlined_call_operand.vmem [shape: f32[1,256], index: 10, kind: input, shape index: {}, may-alias: {4,6,10,12}]   ;;  %s5011_s11 = inlined_call_operand.vmem [shape: f32[1,256], index: 11, kind: input, shape index: {}, may-alias: {5,11}]   ;;  %s5012_s12 = inlined_call_operand.vmem [shape: f32[1,256], index: 12, kind: input, shape index: {}, may-alias: {4,6,10,12}]   ;;  %s5013_s13 = inlined_call_operand.vmem [shape: f32[8,256], index: 13, kind: output, shape index: {}]  }
   0x1   :  { %v3437_v0 = vld [vmem:[%s5000_s1 + $0xc] ss:$24 sps:$4 sm:$0xff]   ;;  %v3439_v1 = vld [vmem:[%s5000_s1 + $0x8] ss:$24 sps:$4 sm:$0xff]   ;;  %v3440_v2 = vld [vmem:[%s5000_s1 + $0x3c] ss:$24 sps:$4 sm:$0xff]  }
   0x2   :  { %698 = vmatprep.subr.bf16.mxu1 %v3437_v0  ;;  %v3442_v3 = vld [vmem:[%s5000_s1 + $0x38] ss:$24 sps:$4 sm:$0xff]   ;;  %v3443_v4 = vld [vmem:[%s5000_s1 + $0x4] ss:$24 sps:$4 sm:$0xff]   ;;  %v3449_v7 = vld [vmem:[%s5000_s1 + $0x34] ss:$24 sps:$4 sm:$0xff]  }
   0x3   :  { %699 = vmatpush1.bf16.msra.mxu1 %v3439_v1  ;;  %v3445_v5 = vld [vmem:[%s5000_s1] ss:$24 sps:$4 sm:$0xff]   ;;  %v3446_v6 = vld [vmem:[%s5000_s1 + $0x6c] ss:$24 sps:$4 sm:$0xff]   ;;  %657 = vmatprep.subr.bf16.mxu0 %v3443_v4  ;;  %v3451_v8 = vld [vmem:[%s5000_s1 + $0x30] ss:$24 sps:$4 sm:$0xff]  }
   0x4   :  { %700 = vmatprep.subr.bf16.mxu1 %v3440_v2  ;;  %658 = vmatpush1.bf16.msra.mxu0 %v3445_v5  ;;  %v3448_v9 = vld [vmem:[%s5000_s1 + $0x68] ss:$24 sps:$4 sm:$0xff]   ;;  %v3452_v10 = vld [vmem:[%s5000_s1 + $0x9c] ss:$24 sps:$4 sm:$0xff]   ;;  %v3454_v13 = vld [vmem:[%s5000_s1 + $0x98] ss:$24 sps:$4 sm:$0xff]   ;;  %v147_v5 = vlaneseq }
   0x5   :  { %659 = vmatprep.subr.bf16.mxu0 %v3449_v7  ;;  %v3455_v11 = vld [vmem:[%s5000_s1 + $0x64] ss:$24 sps:$4 sm:$0xff]   ;;  %v3457_v12 = vld [vmem:[%s5000_s1 + $0x60] ss:$24 sps:$4 sm:$0xff]   ;;  %v3461_v14 = vld [vmem:[%s5000_s1 + $0x94] ss:$24 sps:$4 sm:$0xff]  }
   0x6   :  { %v3458_v15 = vld [vmem:[%s5000_s1 + $0xcc] ss:$24 sps:$4 sm:$0xff]   ;;  %v3463_v16 = vld [vmem:[%s5000_s1 + $0x90] ss:$24 sps:$4 sm:$0xff]   ;;  %v3464_v19 = vld [vmem:[%s5000_s1 + $0xfc] ss:$24 sps:$4 sm:$0xff]  }
   0x7   :  { %701 = vmatpush1.bf16.msra.mxu1 %v3442_v3  ;;  %v3460_v17 = vld [vmem:[%s5000_s1 + $0xc8] ss:$24 sps:$4 sm:$0xff]   ;;  %v3467_v18 = vld [vmem:[%s5000_s1 + $0xc4] ss:$24 sps:$4 sm:$0xff]   ;;  %v3466_v21 = vld [vmem:[%s5000_s1 + $0xf8] ss:$24 sps:$4 sm:$0xff]  }
   0x8   :  { %702 = vmatprep.subr.bf16.mxu1 %v3446_v6  ;;  %660 = vmatpush1.bf16.msra.mxu0 %v3451_v8  ;;  %v3469_v20 = vld [vmem:[%s5000_s1 + $0xc0] ss:$24 sps:$4 sm:$0xff]   ;;  %v3473_v22 = vld [vmem:[%s5000_s1 + $0xf4] ss:$24 sps:$4 sm:$0xff]   ;;  %v3475_v24 = vld [vmem:[%s5000_s1 + $0xf0] ss:$24 sps:$4 sm:$0xff]  }
   0x9   :  { %661 = vmatprep.subr.bf16.mxu0 %v3455_v11  ;;  %v3470_v23 = vld [vmem:[%s5000_s1 + $0x12c] ss:$24 sps:$4 sm:$0xff]   ;;  %v3472_v25 = vld [vmem:[%s5000_s1 + $0x128] ss:$24 sps:$4 sm:$0xff]   ;;  %v3476_v27 = vld [vmem:[%s5000_s1 + $0x15c] ss:$24 sps:$4 sm:$0xff]  }
   0xa   :  { %v3479_v26 = vld [vmem:[%s5000_s1 + $0x124] ss:$24 sps:$4 sm:$0xff]   ;;  %v3481_v28 = vld [vmem:[%s5000_s1 + $0x120] ss:$24 sps:$4 sm:$0xff]   ;;  %v3485_v30 = vld [vmem:[%s5000_s1 + $0x154] ss:$24 sps:$4 sm:$0xff]  }
   0xb   :  { %703 = vmatpush1.bf16.msra.mxu1 %v3448_v9  ;;  %v3478_v29 = vld [vmem:[%s5000_s1 + $0x158] ss:$24 sps:$4 sm:$0xff]   ;;  %v3482_v31 = vld [vmem:[%s5000_s1 + $0x18c] ss:$24 sps:$4 sm:$0xff]   ;;  %v3484_v33 = vld [vmem:[%s5000_s1 + $0x188] ss:$24 sps:$4 sm:$0xff]  }
   0xc   :  { %704 = vmatprep.subr.bf16.mxu1 %v3452_v10  ;;  %662 = vmatpush1.bf16.msra.mxu0 %v3457_v12  ;;  %v3487_v32 = vld [vmem:[%s5000_s1 + $0x150] ss:$24 sps:$4 sm:$0xff]   ;;  %v3491_v34 = vld [vmem:[%s5000_s1 + $0x184] ss:$24 sps:$4 sm:$0xff]   ;;  %v3493_v36 = vld [vmem:[%s5000_s1 + $0x180] ss:$24 sps:$4 sm:$0xff]  }
   0xd   :  { %663 = vmatprep.subr.bf16.mxu0 %v3461_v14  ;;  %v3488_v35 = vld [vmem:[%s5000_s1 + $0x1bc] ss:$24 sps:$4 sm:$0xff]   ;;  %v3490_v37 = vld [vmem:[%s5000_s1 + $0x1b8] ss:$24 sps:$4 sm:$0xff]   ;;  %v3494_v39 = vld [vmem:[%s5000_s1 + $0x1ec] ss:$24 sps:$4 sm:$0xff]  }
   0xe   :  { %v3497_v38 = vld [vmem:[%s5000_s1 + $0x1b4] ss:$24 sps:$4 sm:$0xff]   ;;  %v3499_v40 = vld [vmem:[%s5000_s1 + $0x1b0] ss:$24 sps:$4 sm:$0xff]   ;;  %v3503_v42 = vld [vmem:[%s5000_s1 + $0x1e4] ss:$24 sps:$4 sm:$0xff]  }
   0xf   :  { %705 = vmatpush1.bf16.msra.mxu1 %v3454_v13  ;;  %v3496_v41 = vld [vmem:[%s5000_s1 + $0x1e8] ss:$24 sps:$4 sm:$0xff]   ;;  %v3500_v43 = vld [vmem:[%s5000_s1 + $0x21c] ss:$24 sps:$4 sm:$0xff]   ;;  %v3502_v44 = vld [vmem:[%s5000_s1 + $0x218] ss:$24 sps:$4 sm:$0xff]  }
  0x10   :  { %706 = vmatprep.subr.bf16.mxu1 %v3458_v15  ;;  %664 = vmatpush1.bf16.msra.mxu0 %v3463_v16  ;;  %v46_v45 = vld [vmem:[%s5001_s0 + $0x8] sm:$0xff]  ;;  %v3505_v46 = vld [vmem:[%s5000_s1 + $0x1e0] ss:$24 sps:$4 sm:$0xff]   ;;  %v3515_v52 = vld [vmem:[%s5000_s1 + $0x244] ss:$24 sps:$4 sm:$0xff]   ;;  %v3859_v4 = vmov 0.0  }
  0x11   :  { %665 = vmatprep.subr.bf16.mxu0 %v3467_v18  ;;  %v48_v47 = vpack.c.bf16 %v46_v45, %v46_v45  ;;  %v3506_v48 = vld [vmem:[%s5000_s1 + $0x24c] ss:$24 sps:$4 sm:$0xff]   ;;  %v3511_v50 = vld [vmem:[%s5000_s1 + $0x210] ss:$24 sps:$4 sm:$0xff]   ;;  %v3512_v53 = vld [vmem:[%s5000_s1 + $0x27c] ss:$24 sps:$4 sm:$0xff]  }
  0x12   :  { %v3509_v49 = vld [vmem:[%s5000_s1 + $0x214] ss:$24 sps:$4 sm:$0xff]   ;;  %v3508_v51 = vld [vmem:[%s5000_s1 + $0x248] ss:$24 sps:$4 sm:$0xff]   ;;  %v3514_v55 = vld [vmem:[%s5000_s1 + $0x278] ss:$24 sps:$4 sm:$0xff]  }
  0x13   :  { %707 = vmatpush1.bf16.msra.mxu1 %v3460_v17  ;;  %730 = vmatprep.mubr.bf16.mxu1 %v48_v47  ;;  %v3517_v54 = vld [vmem:[%s5000_s1 + $0x240] ss:$24 sps:$4 sm:$0xff]   ;;  %v3521_v56 = vld [vmem:[%s5000_s1 + $0x274] ss:$24 sps:$4 sm:$0xff]   ;;  %v3523_v58 = vld [vmem:[%s5000_s1 + $0x270] ss:$24 sps:$4 sm:$0xff]  }
  0x14   :  { %708 = vmatprep.subr.bf16.mxu1 %v3464_v19  ;;  %666 = vmatpush1.bf16.msra.mxu0 %v3469_v20  ;;  %v3518_v57 = vld [vmem:[%s5000_s1 + $0x2ac] ss:$24 sps:$4 sm:$0xff]   ;;  %v3520_v59 = vld [vmem:[%s5000_s1 + $0x2a8] ss:$24 sps:$4 sm:$0xff]   ;;  %v3524_v61 = vld [vmem:[%s5000_s1 + $0x2dc] ss:$24 sps:$4 sm:$0xff]  }
  0x15   :  { %667 = vmatprep.subr.bf16.mxu0 %v3473_v22  ;;  %689 = vmatprep.mubr.bf16.mxu0 %v48_v47  ;;  %v3527_v60 = vld [vmem:[%s5000_s1 + $0x2a4] ss:$24 sps:$4 sm:$0xff]   ;;  %v3529_v62 = vld [vmem:[%s5000_s1 + $0x2a0] ss:$24 sps:$4 sm:$0xff]   ;;  %v3530_v1 = vld [vmem:[%s5000_s1 + $0x2d4] ss:$24 sps:$4 sm:$0xff]  }
  0x16   :  { %v3526_v63 = vld [vmem:[%s5000_s1 + $0x2d8] ss:$24 sps:$4 sm:$0xff]   ;;  %v45_v0 = vld [vmem:[%s5001_s0] sm:$0xff]  ;;  %v4139_v6 = vshrl.u32 %v147_v5, 7  ;;  %v3565_v45 = vld [vmem:[%s5000_s1 + $0x1f4] ss:$24 sps:$4 sm:$0xff]  }
  0x17   :  { %709 = vmatpush1.bf16.msra.mxu1 %v3466_v21  ;;  %v4129_v2 = vpack.c.bf16 %v45_v0, %v45_v0  ;;  %v3532_v3 = vld [vmem:[%s5000_s1 + $0x2d0] ss:$24 sps:$4 sm:$0xff]   ;;  %v4145_v8 = vld [vmem:[%s5002_s2] sm:$0x3f]  ;;  %s3861_s2 = smov 96   ;;  %vm1688_vm4 = vcmask 523264  }
  0x18   :  { %710 = vmatprep.subr.bf16.mxu1 %v3470_v23  ;;  %668 = vmatpush1.bf16.msra.mxu0 %v3475_v24  ;;  %v157_v7 = vsub.s32 2, %v4139_v6  ;;  %v4148_v9 = vsub.s32 0, %v4139_v6  ;;  %vm1690_vm5 = vcmask 785408  }
  0x19   :  { %669 = vmatprep.subr.bf16.mxu0 %v3479_v26  ;;  %v3535_v26 = vld [vmem:[%s5000_s1 + $0x14] ss:$24 sps:$4 sm:$0xff]  }
  0x1a   :  { %v158_v10 = vrot.slane %v4145_v8, %v157_v7  ;;  %v150_v12 = vrot.slane %v4145_v8, %v4148_v9 }
  0x1b   :  { %711 = vmatpush1.bf16.msra.mxu1 %v3472_v25  ;;  %v3533_v25 = vld [vmem:[%s5000_s1 + $0x10] ss:$24 sps:$4 sm:$0xff]  }
  0x1c   :  { %712 = vmatprep.subr.bf16.mxu1 %v3476_v27  ;;  %670 = vmatpush1.bf16.msra.mxu0 %v3481_v28  ;;  %v3538_v27 = vld [vmem:[%s5000_s1 + $0x44] ss:$24 sps:$4 sm:$0xff]   ;;  %v3536_v28 = vld [vmem:[%s5000_s1 + $0x40] ss:$24 sps:$4 sm:$0xff]  }
  0x1d   :  { %671 = vmatprep.subr.bf16.mxu0 %v3485_v30  ;;  %v3539_v30 = vld [vmem:[%s5000_s1 + $0x70] ss:$24 sps:$4 sm:$0xff]  }
  0x1f   :  { %713 = vmatpush1.bf16.msra.mxu1 %v3478_v29  ;;  %v3541_v29 = vld [vmem:[%s5000_s1 + $0x74] ss:$24 sps:$4 sm:$0xff]  }
  0x20   :  { %714 = vmatprep.subr.bf16.mxu1 %v3482_v31  ;;  %672 = vmatpush1.bf16.msra.mxu0 %v3487_v32  ;;  %v3544_v31 = vld [vmem:[%s5000_s1 + $0xa4] ss:$24 sps:$4 sm:$0xff]   ;;  %v3542_v32 = vld [vmem:[%s5000_s1 + $0xa0] ss:$24 sps:$4 sm:$0xff]  }
  0x21   :  { %673 = vmatprep.subr.bf16.mxu0 %v3491_v34  ;;  %v3545_v34 = vld [vmem:[%s5000_s1 + $0xd0] ss:$24 sps:$4 sm:$0xff]  }
  0x23   :  { %715 = vmatpush1.bf16.msra.mxu1 %v3484_v33  ;;  %v3547_v33 = vld [vmem:[%s5000_s1 + $0xd4] ss:$24 sps:$4 sm:$0xff]  }
  0x24   :  { %716 = vmatprep.subr.bf16.mxu1 %v3488_v35  ;;  %674 = vmatpush1.bf16.msra.mxu0 %v3493_v36  ;;  %v3550_v35 = vld [vmem:[%s5000_s1 + $0x104] ss:$24 sps:$4 sm:$0xff]   ;;  %v3548_v36 = vld [vmem:[%s5000_s1 + $0x100] ss:$24 sps:$4 sm:$0xff]  }
  0x25   :  { %675 = vmatprep.subr.bf16.mxu0 %v3497_v38  ;;  %v3551_v38 = vld [vmem:[%s5000_s1 + $0x130] ss:$24 sps:$4 sm:$0xff]  }
  0x27   :  { %717 = vmatpush1.bf16.msra.mxu1 %v3490_v37  ;;  %v3553_v37 = vld [vmem:[%s5000_s1 + $0x134] ss:$24 sps:$4 sm:$0xff]  }
  0x28   :  { %718 = vmatprep.subr.bf16.mxu1 %v3494_v39  ;;  %676 = vmatpush1.bf16.msra.mxu0 %v3499_v40  ;;  %v3556_v39 = vld [vmem:[%s5000_s1 + $0x164] ss:$24 sps:$4 sm:$0xff]   ;;  %v3554_v40 = vld [vmem:[%s5000_s1 + $0x160] ss:$24 sps:$4 sm:$0xff]  }
  0x29   :  { %677 = vmatprep.subr.bf16.mxu0 %v3503_v42  ;;  %v3557_v42 = vld [vmem:[%s5000_s1 + $0x190] ss:$24 sps:$4 sm:$0xff]  }
  0x2b   :  { %719 = vmatpush1.bf16.msra.mxu1 %v3496_v41  ;;  %v3559_v41 = vld [vmem:[%s5000_s1 + $0x194] ss:$24 sps:$4 sm:$0xff]  }
  0x2c   :  { %720 = vmatprep.subr.bf16.mxu1 %v3500_v43  ;;  %678 = vmatpush1.bf16.msra.mxu0 %v3505_v46  ;;  %v3562_v43 = vld [vmem:[%s5000_s1 + $0x1c4] ss:$24 sps:$4 sm:$0xff]   ;;  %v3563_v46 = vld [vmem:[%s5000_s1 + $0x1f0] ss:$24 sps:$4 sm:$0xff]  }
  0x2d   :  { %679 = vmatprep.subr.bf16.mxu0 %v3509_v49  ;;  %v3571_v49 = vld [vmem:[%s5000_s1 + $0x254] ss:$24 sps:$4 sm:$0xff]  }
  0x2f   :  { %721 = vmatpush1.bf16.msra.mxu1 %v3502_v44  ;;  %v3560_v44 = vld [vmem:[%s5000_s1 + $0x1c0] ss:$24 sps:$4 sm:$0xff]  }
  0x30   :  { %722 = vmatprep.subr.bf16.mxu1 %v3506_v48  ;;  %680 = vmatpush1.bf16.msra.mxu0 %v3511_v50  ;;  %v3566_v48 = vld [vmem:[%s5000_s1 + $0x220] ss:$24 sps:$4 sm:$0xff]   ;;  %v3569_v50 = vld [vmem:[%s5000_s1 + $0x250] ss:$24 sps:$4 sm:$0xff]  }
  0x31   :  { %681 = vmatprep.subr.bf16.mxu0 %v3515_v52  ;;  %v3572_v52 = vld [vmem:[%s5000_s1 + $0x280] ss:$24 sps:$4 sm:$0xff]  }
  0x33   :  { %723 = vmatpush1.bf16.msra.mxu1 %v3508_v51  ;;  %v3574_v51 = vld [vmem:[%s5000_s1 + $0x284] ss:$24 sps:$4 sm:$0xff]  }
  0x34   :  { %724 = vmatprep.subr.bf16.mxu1 %v3512_v53  ;;  %682 = vmatpush1.bf16.msra.mxu0 %v3517_v54  ;;  %v3577_v53 = vld [vmem:[%s5000_s1 + $0x2b4] ss:$24 sps:$4 sm:$0xff]   ;;  %v3575_v54 = vld [vmem:[%s5000_s1 + $0x2b0] ss:$24 sps:$4 sm:$0xff]  }
  0x35   :  { %683 = vmatprep.subr.bf16.mxu0 %v3521_v56  ;;  %v3578_v56 = vld [vmem:[%s5000_s1 + $0x2e0] ss:$24 sps:$4 sm:$0xff]  }
  0x37   :  { %725 = vmatpush1.bf16.msra.mxu1 %v3514_v55  ;;  %v3580_v55 = vld [vmem:[%s5000_s1 + $0x2e4] ss:$24 sps:$4 sm:$0xff]  }
  0x38   :  { %726 = vmatprep.subr.bf16.mxu1 %v3518_v57  ;;  %684 = vmatpush1.bf16.msra.mxu0 %v3523_v58 }
  0x39   :  { %685 = vmatprep.subr.bf16.mxu0 %v3527_v60 }
  0x3b   :  { %727 = vmatpush1.bf16.msra.mxu1 %v3520_v59 }
  0x3c   :  { %728 = vmatprep.subr.bf16.mxu1 %v3524_v61  ;;  %686 = vmatpush1.bf16.msra.mxu0 %v3529_v62 }
  0x3d   :  { %687 = vmatprep.subr.bf16.mxu0 %v3530_v1 }
  0x3f   :  { %729 = vmatpush1.bf16.msra.mxu1 %v3526_v63 }
  0x40   :  { %688 = vmatpush1.bf16.msra.mxu0 %v3532_v3  ;;  %3321 = vmatprep.subr.bf16.mxu1 %v3859_v4 }
  0x41   :  { %739 = vmatprep.subr.bf16.mxu0 %v3535_v26 }
  0x42   :  { %731 = vmatmul.mubr.bf16.vlgmr.msra.gmra.mrb[0].mxu1 %v4129_v2 }
  0x43   :  { %690 = vmatmul.mubr.bf16.vlgmr.msra.gmra.mrb[0].mxu0 %v4129_v2  ;;  %3323 = vmatprep.mubr.msk.bf16.mxu1 %vm3860_vm0, %v3859_v4 }
  0x44   :  { %771 = vmatprep.mubr.bf16.mxu0 %v48_v47  ;;  %740 = vmatpush1.bf16.msra.mxu0 %v3533_v25  ;;  %v3568_v47 = vld [vmem:[%s5000_s1 + $0x224] ss:$24 sps:$4 sm:$0xff]   ;;  %s3862_s1 = smov 64  }
  0x45   :  { %741 = vmatprep.subr.bf16.mxu0 %v3538_v27 }
  0x48   :  { %742 = vmatpush1.bf16.msra.mxu0 %v3536_v28 }
  0x49   :  { %743 = vmatprep.subr.bf16.mxu0 %v3541_v29 }
  0x4c   :  { %744 = vmatpush1.bf16.msra.mxu0 %v3539_v30 }
  0x4d   :  { %745 = vmatprep.subr.bf16.mxu0 %v3544_v31 }
  0x50   :  { %746 = vmatpush1.bf16.msra.mxu0 %v3542_v32 }
  0x51   :  { %747 = vmatprep.subr.bf16.mxu0 %v3547_v33 }
  0x54   :  { %748 = vmatpush1.bf16.msra.mxu0 %v3545_v34 }
  0x55   :  { %749 = vmatprep.subr.bf16.mxu0 %v3550_v35 }
  0x58   :  { %750 = vmatpush1.bf16.msra.mxu0 %v3548_v36 }
  0x59   :  { %751 = vmatprep.subr.bf16.mxu0 %v3553_v37 }
  0x5c   :  { %752 = vmatpush1.bf16.msra.mxu0 %v3551_v38 }
  0x5d   :  { %753 = vmatprep.subr.bf16.mxu0 %v3556_v39 }
  0x60   :  { %754 = vmatpush1.bf16.msra.mxu0 %v3554_v40 }
  0x61   :  { %755 = vmatprep.subr.bf16.mxu0 %v3559_v41 }
  0x64   :  { %756 = vmatpush1.bf16.msra.mxu0 %v3557_v42 }
  0x65   :  { %757 = vmatprep.subr.bf16.mxu0 %v3562_v43 }
  0x68   :  { %758 = vmatpush1.bf16.msra.mxu0 %v3560_v44 }
  0x69   :  { %759 = vmatprep.subr.bf16.mxu0 %v3565_v45 }
  0x6c   :  { %760 = vmatpush1.bf16.msra.mxu0 %v3563_v46 }
  0x6d   :  { %761 = vmatprep.subr.bf16.mxu0 %v3568_v47 }
  0x70   :  { %762 = vmatpush1.bf16.msra.mxu0 %v3566_v48 }
  0x71   :  { %763 = vmatprep.subr.bf16.mxu0 %v3571_v49 }
  0x74   :  { %764 = vmatpush1.bf16.msra.mxu0 %v3569_v50 }
  0x75   :  { %765 = vmatprep.subr.bf16.mxu0 %v3574_v51 }
  0x78   :  { %766 = vmatpush1.bf16.msra.mxu0 %v3572_v52 }
  0x79   :  { %767 = vmatprep.subr.bf16.mxu0 %v3577_v53 }
  0x7c   :  { %768 = vmatpush1.bf16.msra.mxu0 %v3575_v54 }
  0x7d   :  { %769 = vmatprep.subr.bf16.mxu0 %v3580_v55 }
  0x80   :  { %770 = vmatpush1.bf16.msra.mxu0 %v3578_v56 }
  0x83   :  { %772 = vmatmul.mubr.bf16.vlgmr.msra.gmra.mrb[4].mxu0 %v4129_v2 }
 0x115   :  { %v732_v11 = vpop.f32.mrb[0].mxu1 }
 0x116   :  { %v733_v13 = vadd.f32 %v732_v11, %v158_v10  ;;  %v4155_v14 = vpop.f32.mrb[1].mxu1  ;;  %v691_v18 = vpop.f32.mrb[0].mxu0 }
 0x117   :  { %v736_v15 = vpop.f32.mrb[2].mxu1  ;;  %v692_v19 = vadd.f32 %v691_v18, %v150_v12  ;;  %v4159_v20 = vpop.f32.mrb[1].mxu0  ;;  %v165_v12 = vsub.s32 4, %v4139_v6 }
 0x118   :  { %v4157_v16 = vpack.c.bf16 %v733_v13, %v733_v13  ;;  %v737_v17 = vpop.f32.mrb[3].mxu1  ;;  %v695_v22 = vpop.f32.mrb[2].mxu0 }
 0x119   :  { %v4165_v23 = vpack.c.bf16 %v692_v19, %v692_v19  ;;  %v696_v24 = vpop.f32.mrb[3].mxu0  ;;  %v166_v13 = vrot.slane %v4145_v8, %v165_v12 }
 0x11a   :  { %894 = vrot.lane.b32.xlu1 %v4157_v16, %s3861_s2  ;;  %v787_v21 = vsel %vm782_vm1, %v4157_v16, 0 }
 0x11b   :  { %3322 = vmatpush3.bf16.xpose.msra.mxu1 %v787_v21 }
 0x11c   :  { %3327 = vmatprep.subr.bf16.mxu1 %v3859_v4 }
 0x11e   :  { %891 = vrot.lane.b32.xlu1 %v4165_v23, %s3861_s2 }
 0x122   :  { %3324 = vmatmul.mubr.msk.bf16.vlgmr.msra.gmra.mrb[4].mxu1 %vm782_vm1, %v4165_v23 }
 0x123   :  { %3329 = vmatprep.mubr.msk.bf16.mxu1 %vm3860_vm0, %v3859_v4 }
 0x156   :  { %v773_v1 = vpop.f32.mrb[4].mxu0 }
 0x157   :  { %v4272_v3 = vpop.f32.mrb[5].mxu0  ;;  %v774_v15 = vadd.f32 %v773_v1, %v166_v13 }
 0x158   :  { %v777_v5 = vpop.f32.mrb[6].mxu0 }
 0x159   :  { %v778_v10 = vpop.f32.mrb[7].mxu0  ;;  %v4277_v17 = vpack.c.bf16 %v774_v15, %v774_v15 }
 0x15b   :  { %v848_v18 = vsel %vm846_vm3, %v4277_v17, 0 }
 0x15c   :  { %3328 = vmatpush3.bf16.msra.mxu1 %v848_v18 }
 0x15d   :  { %3333 = vmatprep.subr.bf16.mxu1 %v3859_v4 }
 0x18c   :  { %v895_v24 = vpop.permute.xlu1 %894 }
 0x18d   :  { %v900_v26 = vsel %vm782_vm1, %v895_v24, 0 }
 0x190   :  { %v892_v27 = vpop.permute.xlu1 %891 }
 0x1f5   :  { %v823_v57 = vpop.f32.mrb[4].mxu1 }
 0x1f6   :  { %v3325_v58 = vpop.f32.mrb[5].mxu1  ;;  %v830_v59 = vsel %vm829_vm2, %v823_v57, -inf }
 0x1f7   :  { %831 = vmax.xlane.f32.xlu0 %v830_v59  ;;  %v826_v60 = vpop.f32.mrb[6].mxu1 }
 0x1f8   :  { %v3326_v61 = vpop.f32.mrb[7].mxu1 }
 0x284   :  { %v832_v62 = vpop.xlane.xlu0 %831 }
 0x285   :  { %v833_v63 = vsub.f32 %v823_v57, %v832_v62 }
 0x287   :  { %v834_v0 = vmul.f32 1.442695, %v833_v63 }
 0x289   :  { %3821 = vpow2.f32 %v834_v0 }
 0x293   :  { %v3822_v11 = vpop.eup %3821 }
 0x294   :  { %v836_v2 = vsel %vm829_vm2, %v3822_v11, 0.0 }
 0x295   :  { %837 = vadd.xlane.f32.xlu0 %v836_v2 }
 0x322   :  { %v838_v19 = vpop.xlane.xlu0 %837 }
 0x323   :  { %3823 = vrcp.f32 %v838_v19 }
 0x32d   :  { %v3824_v21 = vpop.eup %3823 }
 0x32e   :  { %v840_v22 = vmul.f32 %v3824_v21, %v3822_v11 }
 0x330   :  { %v841_v25 = vpack.c.bf16 %v840_v22, %v840_v22 }
 0x332   :  { %3330 = vmatmul.mubr.msk.bf16.vlgmr.msra.gmra.mrb[8].mxu1 %vm829_vm2, %v841_v25 }
 0x333   :  { %3334 = vmatpush3.bf16.xpose.msra.mxu1 %v900_v26  ;;  %3335 = vmatprep.mubr.msk.bf16.mxu1 %vm3860_vm0, %v3859_v4 }
 0x334   :  { %3339 = vmatprep.subr.bf16.mxu1 %v3859_v4 }
 0x33a   :  { %3336 = vmatmul.mubr.msk.bf16.vlgmr.msra.gmra.mrb[12].mxu1 %vm782_vm1, %v892_v27 }
 0x33b   :  { %3341 = vmatprep.mubr.msk.bf16.mxu1 %vm3860_vm0, %v3859_v4 }
 0x405   :  { %v4290_v28 = vpop.f32.mrb[8].mxu1 }
 0x406   :  { %v3331_v29 = vpop.f32.mrb[9].mxu1 }
 0x407   :  { %v887_v30 = vpop.f32.mrb[10].mxu1 }
 0x408   :  { %v3332_v31 = vpop.f32.mrb[11].mxu1 }
 0x40d   :  { %v936_v32 = vpop.f32.mrb[12].mxu1 }
 0x40e   :  { %v3337_v33 = vpop.f32.mrb[13].mxu1  ;;  %v942_v34 = vsel %vm829_vm2, %v936_v32, -inf }
 0x40f   :  { %943 = vmax.xlane.f32.xlu0 %v942_v34  ;;  %v939_v35 = vpop.f32.mrb[14].mxu1 }
 0x410   :  { %v3338_v36 = vpop.f32.mrb[15].mxu1 }
 0x411   :  { %v161_v36 = vsub.s32 3, %v4139_v6 }
 0x425   :  { %955 = vrot.lane.b32.xlu0 %v4277_v17, %s3861_s2 }
 0x429   :  { %1005 = vrot.lane.b32.xlu0 %v4157_v16, %s3862_s1 }
 0x42d   :  { %1003 = vrot.lane.b32.xlu0 %v4165_v23, %s3862_s1 }
 0x49c   :  { %v944_v37 = vpop.xlane.xlu0 %943 }
 0x49d   :  { %v945_v38 = vsub.f32 %v936_v32, %v944_v37 }
 0x49f   :  { %v946_v39 = vmul.f32 1.442695, %v945_v38 }
 0x4a0   :  { %v956_v40 = vpop.permute.xlu0 %955 }
 0x4a1   :  { %3825 = vpow2.f32 %v946_v39  ;;  %v961_v41 = vsel %vm846_vm3, %v956_v40, 0  ;;  %v169_v39 = vsub.s32 5, %v4139_v6  ;;  %v4345_v40 = vsub.s32 1, %v4139_v6 }
 0x4a2   :  { %3340 = vmatpush3.bf16.msra.mxu1 %v961_v41 }
 0x4a3   :  { %3345 = vmatprep.subr.bf16.mxu1 %v3859_v4 }
 0x4a4   :  { %v1006_v47 = vpop.permute.xlu0 %1005 }
 0x4a5   :  { %v1011_v49 = vsel %vm782_vm1, %v1006_v47, 0 }
 0x4a8   :  { %v1004_v51 = vpop.permute.xlu0 %1003 }
 0x4ab   :  { %v3826_v42 = vpop.eup %3825 }
 0x4ac   :  { %v948_v43 = vsel %vm829_vm2, %v3826_v42, 0.0 }
 0x4ad   :  { %949 = vadd.xlane.f32.xlu1 %v948_v43  ;;  %v170_v43 = vrot.slane %v4145_v8, %v169_v39 }
 0x4af   :  { %v776_v47 = vadd.f32 %v4272_v3, %v170_v43 }
 0x4be   :  { %1065 = vrot.lane.b32.xlu1 %v4277_v17, %s3862_s1 }
 0x53a   :  { %v950_v44 = vpop.xlane.xlu1 %949 }
 0x53b   :  { %3827 = vrcp.f32 %v950_v44 }
 0x53e   :  { %v1066_v50 = vpop.permute.xlu1 %1065 }
 0x53f   :  { %v1071_v52 = vsel %vm846_vm3, %v1066_v50, 0 }
 0x545   :  { %v3828_v45 = vpop.eup %3827 }
 0x546   :  { %v952_v46 = vmul.f32 %v3828_v45, %v3826_v42  ;;  %v154_v45 = vrot.slane %v4145_v8, %v4345_v40 }
 0x548   :  { %v953_v48 = vpack.c.bf16 %v952_v46, %v952_v46 }
 0x54a   :  { %3342 = vmatmul.mubr.msk.bf16.vlgmr.msra.gmra.mrb[16].mxu1 %vm829_vm2, %v953_v48  ;;  %v694_v48 = vadd.f32 %v4159_v20, %v154_v45 }
 0x54b   :  { %3346 = vmatpush3.bf16.xpose.msra.mxu1 %v1011_v49  ;;  %3347 = vmatprep.mubr.msk.bf16.mxu1 %vm3860_vm0, %v3859_v4  ;;  %v4360_v49 = vpack.c.bf16 %v776_v47, %v776_v47 }
 0x54c   :  { %3351 = vmatprep.subr.bf16.mxu1 %v3859_v4  ;;  %v4362_v50 = vpack.c.bf16 %v694_v48, %v694_v48 }
 0x552   :  { %3348 = vmatmul.mubr.msk.bf16.vlgmr.msra.gmra.mrb[20].mxu1 %vm782_vm1, %v1004_v51 }
 0x553   :  { %3352 = vmatpush3.bf16.msra.mxu1 %v1071_v52  ;;  %3353 = vmatprep.mubr.msk.bf16.mxu1 %vm3860_vm0, %v3859_v4 }
 0x554   :  { %3357 = vmatprep.subr.bf16.mxu1 %v3859_v4 }
 0x61d   :  { %v4314_v53 = vpop.f32.mrb[16].mxu1 }
 0x61e   :  { %v3343_v54 = vpop.f32.mrb[17].mxu1 }
 0x61f   :  { %v1000_v55 = vpop.f32.mrb[18].mxu1 }
 0x620   :  { %v3344_v56 = vpop.f32.mrb[19].mxu1 }
 0x625   :  { %v1047_v57 = vpop.f32.mrb[20].mxu1 }
 0x626   :  { %v3349_v58 = vpop.f32.mrb[21].mxu1  ;;  %v1053_v59 = vsel %vm829_vm2, %v1047_v57, -inf }
 0x627   :  { %1054 = vmax.xlane.f32.xlu0 %v1053_v59  ;;  %v1050_v60 = vpop.f32.mrb[22].mxu1 }
 0x628   :  { %v3350_v61 = vpop.f32.mrb[23].mxu1 }
 0x6b4   :  { %v1055_v62 = vpop.xlane.xlu0 %1054 }
 0x6b5   :  { %v1056_v63 = vsub.f32 %v1047_v57, %v1055_v62 }
 0x6b7   :  { %v1057_v0 = vmul.f32 1.442695, %v1056_v63 }
 0x6b9   :  { %3829 = vpow2.f32 %v1057_v0 }
 0x6c3   :  { %v3830_v1 = vpop.eup %3829 }
 0x6c4   :  { %v1059_v5 = vsel %vm829_vm2, %v3830_v1, 0.0 }
 0x6c5   :  { %1060 = vadd.xlane.f32.xlu1 %v1059_v5 }
 0x6d6   :  { %1115 = vrot.lane.b32.xlu1 %v4157_v16, %s3863_s19 }
 0x6da   :  { %1113 = vrot.lane.b32.xlu1 %v4165_v23, %s3863_s19 }
 0x752   :  { %v1061_v10 = vpop.xlane.xlu1 %1060 }
 0x753   :  { %3831 = vrcp.f32 %v1061_v10 }
 0x756   :  { %v1116_v12 = vpop.permute.xlu1 %1115 }
 0x757   :  { %v1121_v15 = vsel %vm782_vm1, %v1116_v12, 0 }
 0x75a   :  { %v1114_v16 = vpop.permute.xlu1 %1113 }
 0x75d   :  { %v3832_v11 = vpop.eup %3831 }
 0x75e   :  { %v1063_v2 = vmul.f32 %v3832_v11, %v3830_v1 }
 0x760   :  { %v1064_v13 = vpack.c.bf16 %v1063_v2, %v1063_v2 }
 0x762   :  { %3354 = vmatmul.mubr.msk.bf16.vlgmr.msra.gmra.mrb[24].mxu1 %vm829_vm2, %v1064_v13 }
 0x763   :  { %3358 = vmatpush3.bf16.xpose.msra.mxu1 %v1121_v15  ;;  %3359 = vmatprep.mubr.msk.bf16.mxu1 %vm3860_vm0, %v3859_v4 }
 0x764   :  { %3363 = vmatprep.subr.bf16.mxu1 %v3859_v4 }
 0x76a   :  { %3360 = vmatmul.mubr.msk.bf16.vlgmr.msra.gmra.mrb[28].mxu1 %vm782_vm1, %v1114_v16 }
 0x76b   :  { %3365 = vmatprep.mubr.msk.bf16.mxu1 %vm3860_vm0, %v3859_v4 }
 0x835   :  { %v4330_v23 = vpop.f32.mrb[24].mxu1 }
 0x836   :  { %v3355_v18 = vpop.f32.mrb[25].mxu1 }
 0x837   :  { %v1110_v19 = vpop.f32.mrb[26].mxu1 }
 0x838   :  { %v3356_v21 = vpop.f32.mrb[27].mxu1 }
 0x83d   :  { %v1157_v22 = vpop.f32.mrb[28].mxu1 }
 0x83e   :  { %v3361_v24 = vpop.f32.mrb[29].mxu1  ;;  %v1163_v25 = vsel %vm829_vm2, %v1157_v22, -inf }
 0x83f   :  { %1164 = vmax.xlane.f32.xlu0 %v1163_v25  ;;  %v1160_v26 = vpop.f32.mrb[30].mxu1 }
 0x840   :  { %v3362_v27 = vpop.f32.mrb[31].mxu1 }
 0x855   :  { %1175 = vrot.lane.b32.xlu0 %v4277_v17, %s3863_s19  ;;  %v162_v17 = vrot.slane %v4145_v8, %v161_v36  ;;  %v1288_v8 = vsel %vm846_vm3, %v4360_v49, 0 }
 0x857   :  { %v735_v38 = vadd.f32 %v4155_v14, %v162_v17 }
 0x859   :  { %v4347_v42 = vpack.c.bf16 %v735_v38, %v735_v38 }
 0x85b   :  { %v1229_v14 = vsel %vm782_vm1, %v4347_v42, 0 }
 0x8cc   :  { %v1165_v29 = vpop.xlane.xlu0 %1164 }
 0x8cd   :  { %v1166_v30 = vsub.f32 %v1157_v22, %v1165_v29 }
 0x8cf   :  { %v1167_v31 = vmul.f32 1.442695, %v1166_v30 }
 0x8d0   :  { %v1176_v32 = vpop.permute.xlu0 %1175 }
 0x8d1   :  { %3833 = vpow2.f32 %v1167_v31  ;;  %v1181_v33 = vsel %vm846_vm3, %v1176_v32, 0 }
 0x8d2   :  { %3364 = vmatpush3.bf16.msra.mxu1 %v1181_v33 }
 0x8d3   :  { %3369 = vmatprep.subr.bf16.mxu1 %v3859_v4 }
 0x8db   :  { %v3834_v34 = vpop.eup %3833 }
 0x8dc   :  { %v1169_v35 = vsel %vm829_vm2, %v3834_v34, 0.0 }
 0x8dd   :  { %1170 = vadd.xlane.f32.xlu1 %v1169_v35 }
 0x96a   :  { %v1171_v37 = vpop.xlane.xlu1 %1170 }
 0x96b   :  { %3835 = vrcp.f32 %v1171_v37 }
 0x975   :  { %v3836_v41 = vpop.eup %3835 }
 0x976   :  { %v1173_v44 = vmul.f32 %v3836_v41, %v3834_v34 }
 0x978   :  { %v1174_v46 = vpack.c.bf16 %v1173_v44, %v1173_v44 }
 0x97a   :  { %3366 = vmatmul.mubr.msk.bf16.vlgmr.msra.gmra.mrb[32].mxu1 %vm829_vm2, %v1174_v46 }
 0x97b   :  { %3370 = vmatpush3.bf16.xpose.msra.mxu1 %v1229_v14  ;;  %3371 = vmatprep.mubr.msk.bf16.mxu1 %vm3860_vm0, %v3859_v4 }
 0x97c   :  { %3375 = vmatprep.subr.bf16.mxu1 %v3859_v4 }
 0x982   :  { %3372 = vmatmul.mubr.msk.bf16.vlgmr.msra.gmra.mrb[36].mxu1 %vm782_vm1, %v4362_v50 }
 0x983   :  { %3376 = vmatpush3.bf16.msra.mxu1 %v1288_v8  ;;  %3377 = vmatprep.mubr.msk.bf16.mxu1 %vm3860_vm0, %v3859_v4 }
 0x984   :  { %3381 = vmatprep.subr.bf16.mxu1 %v3859_v4 }
 0xa4d   :  { %v4371_v3 = vpop.f32.mrb[32].mxu1 }
 0xa4e   :  { %v3367_v20 = vpop.f32.mrb[33].mxu1 }
 0xa4f   :  { %v1220_v51 = vpop.f32.mrb[34].mxu1 }
 0xa50   :  { %v3368_v52 = vpop.f32.mrb[35].mxu1 }
 0xa55   :  { %v1265_v54 = vpop.f32.mrb[36].mxu1 }
 0xa56   :  { %v3373_v55 = vpop.f32.mrb[37].mxu1  ;;  %v1271_v56 = vsel %vm829_vm2, %v1265_v54, -inf }
 0xa57   :  { %1272 = vmax.xlane.f32.xlu0 %v1271_v56  ;;  %v1268_v57 = vpop.f32.mrb[38].mxu1 }
 0xa58   :  { %v3374_v58 = vpop.f32.mrb[39].mxu1 }
 0xa6d   :  { %1331 = vrot.lane.b32.xlu0 %v4362_v50, %s3861_s2 }
 0xae4   :  { %v1273_v59 = vpop.xlane.xlu0 %1272 }
 0xae5   :  { %v1274_v60 = vsub.f32 %v1265_v54, %v1273_v59 }
 0xae7   :  { %v1275_v61 = vmul.f32 1.442695, %v1274_v60 }
 0xae8   :  { %v1332_v12 = vpop.permute.xlu0 %1331 }
 0xae9   :  { %3837 = vpow2.f32 %v1275_v61 }
 0xaf3   :  { %v3838_v62 = vpop.eup %3837 }
 0xaf4   :  { %v1277_v63 = vsel %vm829_vm2, %v3838_v62, 0.0 }
 0xaf5   :  { %1278 = vadd.xlane.f32.xlu1 %v1277_v63 }
 0xb06   :  { %1334 = vrot.lane.b32.xlu1 %v4347_v42, %s3861_s2 }
 0xb82   :  { %v1279_v0 = vpop.xlane.xlu1 %1278 }
 0xb83   :  { %3839 = vrcp.f32 %v1279_v0 }
 0xb86   :  { %v1335_v10 = vpop.permute.xlu1 %1334 }
 0xb87   :  { %v1340_v2 = vsel %vm782_vm1, %v1335_v10, 0 }
 0xb8d   :  { %v3840_v1 = vpop.eup %3839 }
 0xb8e   :  { %v1281_v5 = vmul.f32 %v3840_v1, %v3838_v62 }
 0xb90   :  { %v1282_v11 = vpack.c.bf16 %v1281_v5, %v1281_v5 }
 0xb92   :  { %3378 = vmatmul.mubr.msk.bf16.vlgmr.msra.gmra.mrb[40].mxu1 %vm829_vm2, %v1282_v11 }
 0xb93   :  { %3382 = vmatpush3.bf16.xpose.msra.mxu1 %v1340_v2  ;;  %3383 = vmatprep.mubr.msk.bf16.mxu1 %vm3860_vm0, %v3859_v4 }
 0xb94   :  { %3387 = vmatprep.subr.bf16.mxu1 %v3859_v4 }
 0xb9a   :  { %3384 = vmatmul.mubr.msk.bf16.vlgmr.msra.gmra.mrb[44].mxu1 %vm782_vm1, %v1332_v12 }
 0xb9b   :  { %3389 = vmatprep.mubr.msk.bf16.mxu1 %vm3860_vm0, %v3859_v4 }
 0xc65   :  { %v4387_v13 = vpop.f32.mrb[40].mxu1 }
 0xc66   :  { %v3379_v15 = vpop.f32.mrb[41].mxu1 }
 0xc67   :  { %v1327_v16 = vpop.f32.mrb[42].mxu1 }
 0xc68   :  { %v3380_v18 = vpop.f32.mrb[43].mxu1 }
 0xc6d   :  { %v1376_v19 = vpop.f32.mrb[44].mxu1 }
 0xc6e   :  { %v3385_v21 = vpop.f32.mrb[45].mxu1  ;;  %v1382_v22 = vsel %vm829_vm2, %v1376_v19, -inf }
 0xc6f   :  { %1383 = vmax.xlane.f32.xlu1 %v1382_v22  ;;  %v1379_v24 = vpop.f32.mrb[46].mxu1 }
 0xc70   :  { %v3386_v25 = vpop.f32.mrb[47].mxu1 }
 0xc80   :  { %1395 = vrot.lane.b32.xlu1 %v4360_v49, %s3861_s2 }
 0xc84   :  { %1443 = vrot.lane.b32.xlu1 %v4362_v50, %s3862_s1 }
 0xcfc   :  { %v1384_v26 = vpop.xlane.xlu1 %1383 }
 0xcfd   :  { %v1385_v27 = vsub.f32 %v1376_v19, %v1384_v26 }
 0xcff   :  { %v1386_v29 = vmul.f32 1.442695, %v1385_v27 }
 0xd00   :  { %v1396_v30 = vpop.permute.xlu1 %1395 }
 0xd01   :  { %3841 = vpow2.f32 %v1386_v29  ;;  %v1401_v31 = vsel %vm846_vm3, %v1396_v30, 0  ;;  %v3581_v30 = vld [vmem:[%s5003_s3] ss:$8 sps:$4 sm:$0xff]  }
 0xd02   :  { %3388 = vmatpush3.bf16.msra.mxu1 %v1401_v31  ;;  %v3583_v31 = vld [vmem:[%s5003_s3 + $0x4] ss:$8 sps:$4 sm:$0xff]  }
 0xd03   :  { %3393 = vmatprep.subr.bf16.mxu1 %v3859_v4  ;;  %1901 = vmatprep.subr.bf16.mxu0 %v3583_v31 }
 0xd04   :  { %v1444_v41 = vpop.permute.xlu1 %1443  ;;  %1902 = vmatpush1.bf16.msra.mxu0 %v3581_v30 }
 0xd0b   :  { %v3842_v32 = vpop.eup %3841 }
 0xd0c   :  { %v1388_v33 = vsel %vm829_vm2, %v3842_v32, 0.0 }
 0xd0d   :  { %1389 = vadd.xlane.f32.xlu0 %v1388_v33  ;;  %v3584_v33 = vld [vmem:[%s5003_s3 + $0x10] ss:$8 sps:$4 sm:$0xff]  }
 0xd23   :  { %1445 = vrot.lane.b32.xlu0 %v4347_v42, %s3862_s1 }
 0xd9a   :  { %v1390_v34 = vpop.xlane.xlu0 %1389 }
 0xd9b   :  { %3843 = vrcp.f32 %v1390_v34  ;;  %v3589_v34 = vld [vmem:[%s5003_s3 + $0x24] ss:$8 sps:$4 sm:$0xff]  }
 0xd9e   :  { %v1446_v17 = vpop.permute.xlu0 %1445 }
 0xd9f   :  { %v1451_v39 = vsel %vm782_vm1, %v1446_v17, 0  ;;  %v3590_v17 = vld [vmem:[%s5003_s3 + $0x30] ss:$8 sps:$4 sm:$0xff]  }
 0xda5   :  { %v3844_v35 = vpop.eup %3843 }
 0xda6   :  { %v1392_v37 = vmul.f32 %v3844_v35, %v3842_v32  ;;  %v3586_v32 = vld [vmem:[%s5003_s3 + $0x14] ss:$8 sps:$4 sm:$0xff]   ;;  %v3587_v35 = vld [vmem:[%s5003_s3 + $0x20] ss:$8 sps:$4 sm:$0xff]  }
 0xda7   :  { %1903 = vmatprep.subr.bf16.mxu0 %v3586_v32 }
 0xda8   :  { %v1393_v38 = vpack.c.bf16 %v1392_v37, %v1392_v37  ;;  %1904 = vmatpush1.bf16.msra.mxu0 %v3584_v33  ;;  %v3592_v37 = vld [vmem:[%s5003_s3 + $0x34] ss:$8 sps:$4 sm:$0xff]   ;;  %v3857_v33 = vld [vmem:[%s5001_s0] sm:$0xff] }
 0xda9   :  { %1905 = vmatprep.subr.bf16.mxu0 %v3589_v34 }
 0xdaa   :  { %3390 = vmatmul.mubr.msk.bf16.vlgmr.msra.gmra.mrb[48].mxu1 %vm829_vm2, %v1393_v38  ;;  %v3595_v38 = vld [vmem:[%s5003_s3 + $0x44] ss:$8 sps:$4 sm:$0xff]  }
 0xdab   :  { %3394 = vmatpush3.bf16.xpose.msra.mxu1 %v1451_v39  ;;  %3395 = vmatprep.mubr.msk.bf16.mxu1 %vm3860_vm0, %v3859_v4  ;;  %v3593_v39 = vld [vmem:[%s5003_s3 + $0x40] ss:$8 sps:$4 sm:$0xff]  }
 0xdac   :  { %3399 = vmatprep.subr.bf16.mxu1 %v3859_v4  ;;  %1906 = vmatpush1.bf16.msra.mxu0 %v3587_v35 }
 0xdad   :  { %1907 = vmatprep.subr.bf16.mxu0 %v3592_v37  ;;  %v3858_v37 = vld [vmem:[%s5001_s0 + $0x8] sm:$0xff] }
 0xdb0   :  { %1908 = vmatpush1.bf16.msra.mxu0 %v3590_v17 }
 0xdb1   :  { %1909 = vmatprep.subr.bf16.mxu0 %v3595_v38 }
 0xdb2   :  { %3396 = vmatmul.mubr.msk.bf16.vlgmr.msra.gmra.mrb[52].mxu1 %vm782_vm1, %v1444_v41  ;;  %v3598_v41 = vld [vmem:[%s5003_s3 + $0x54] ss:$8 sps:$4 sm:$0xff]  }
 0xdb3   :  { %3401 = vmatprep.mubr.msk.bf16.mxu1 %vm3860_vm0, %v3859_v4 }
 0xdb4   :  { %1910 = vmatpush1.bf16.msra.mxu0 %v3593_v39  ;;  %v3629_v39 = vld [vmem:[%s5005_s7] ss:$16 sps:$4 sm:$0xff]  }
 0xdb5   :  { %1911 = vmatprep.subr.bf16.mxu0 %v3598_v41  ;;  %v3631_v41 = vld [vmem:[%s5005_s7 + $0x4] ss:$16 sps:$4 sm:$0xff]  }
 0xe7d   :  { %v1437_v43 = vpop.f32.mrb[48].mxu1 }
 0xe7e   :  { %v3422_v44 = vpack.i.bf16 %v4314_v53, %v1437_v43  ;;  %v3391_v45 = vpop.f32.mrb[49].mxu1  ;;  %v3596_v43 = vld [vmem:[%s5003_s3 + $0x50] ss:$8 sps:$4 sm:$0xff]  }
 0xe7f   :  { %v1440_v46 = vpop.f32.mrb[50].mxu1  ;;  %1912 = vmatpush1.bf16.msra.mxu0 %v3596_v43  ;;  %v3599_v45 = vld [vmem:[%s5003_s3 + $0x60] ss:$8 sps:$4 sm:$0xff]  }
 0xe80   :  { %v3392_v47 = vpop.f32.mrb[51].mxu1  ;;  %v3604_v46 = vld [vmem:[%s5003_s3 + $0x74] ss:$8 sps:$4 sm:$0xff]   ;;  %v3632_v43 = vld [vmem:[%s5005_s7 + $0x8] ss:$16 sps:$4 sm:$0xff]  }
 0xe81   :  { %v3602_v47 = vld [vmem:[%s5003_s3 + $0x70] ss:$8 sps:$4 sm:$0xff]  }
 0xe85   :  { %v1487_v14 = vpop.f32.mrb[52].mxu1 }
 0xe86   :  { %v3397_v48 = vpop.f32.mrb[53].mxu1  ;;  %v1493_v8 = vsel %vm829_vm2, %v1487_v14, -inf }
 0xe87   :  { %1494 = vmax.xlane.f32.xlu1 %v1493_v8  ;;  %v1490_v20 = vpop.f32.mrb[54].mxu1  ;;  %v3605_v48 = vld [vmem:[%s5003_s3 + $0x80] ss:$8 sps:$4 sm:$0xff]   ;;  %v3610_v8 = vld [vmem:[%s5003_s3 + $0x94] ss:$8 sps:$4 sm:$0xff]  }
 0xe88   :  { %v3398_v51 = vpop.f32.mrb[55].mxu1  ;;  %v3608_v20 = vld [vmem:[%s5003_s3 + $0x90] ss:$8 sps:$4 sm:$0xff]  }
 0xe89   :  { %v3613_v51 = vld [vmem:[%s5003_s3 + $0xa4] ss:$8 sps:$4 sm:$0xff]  }
 0xe98   :  { %1505 = vrot.lane.b32.xlu1 %v4360_v49, %s3862_s1 }
 0xe9c   :  { %1553 = vrot.lane.b32.xlu1 %v4362_v50, %s3863_s19 }
 0xf14   :  { %v1495_v52 = vpop.xlane.xlu1 %1494 }
 0xf15   :  { %v1496_v54 = vsub.f32 %v1487_v14, %v1495_v52  ;;  %v3607_v14 = vld [vmem:[%s5003_s3 + $0x84] ss:$8 sps:$4 sm:$0xff]   ;;  %v3611_v52 = vld [vmem:[%s5003_s3 + $0xa0] ss:$8 sps:$4 sm:$0xff]  }
 0xf17   :  { %v1497_v55 = vmul.f32 1.442695, %v1496_v54  ;;  %v3616_v54 = vld [vmem:[%s5003_s3 + $0xb4] ss:$8 sps:$4 sm:$0xff]  }
 0xf18   :  { %v1506_v53 = vpop.permute.xlu1 %1505 }
 0xf19   :  { %3845 = vpow2.f32 %v1497_v55  ;;  %v1511_v56 = vsel %vm846_vm3, %v1506_v53, 0  ;;  %v3614_v55 = vld [vmem:[%s5003_s3 + $0xb0] ss:$8 sps:$4 sm:$0xff]   ;;  %v3619_v53 = vld [vmem:[%s5003_s3 + $0xc4] ss:$8 sps:$4 sm:$0xff]  }
 0xf1a   :  { %3400 = vmatpush3.bf16.msra.mxu1 %v1511_v56  ;;  %v3617_v56 = vld [vmem:[%s5003_s3 + $0xc0] ss:$8 sps:$4 sm:$0xff]  }
 0xf1b   :  { %3405 = vmatprep.subr.bf16.mxu1 %v3859_v4 }
 0xf1c   :  { %v1554_v0 = vpop.permute.xlu1 %1553 }
 0xf23   :  { %v3846_v57 = vpop.eup %3845 }
 0xf24   :  { %v1499_v58 = vsel %vm829_vm2, %v3846_v57, 0.0 }
 0xf25   :  { %1500 = vadd.xlane.f32.xlu0 %v1499_v58  ;;  %v3620_v58 = vld [vmem:[%s5003_s3 + $0xd0] ss:$8 sps:$4 sm:$0xff]  }
 0xf3b   :  { %1555 = vrot.lane.b32.xlu0 %v4347_v42, %s3863_s19 }
 0xfb2   :  { %v1501_v59 = vpop.xlane.xlu0 %1500 }
 0xfb3   :  { %3847 = vrcp.f32 %v1501_v59  ;;  %v3625_v59 = vld [vmem:[%s5003_s3 + $0xe4] ss:$8 sps:$4 sm:$0xff]  }
 0xfb6   :  { %v1556_v61 = vpop.permute.xlu0 %1555 }
 0xfb7   :  { %v1561_v63 = vsel %vm782_vm1, %v1556_v61, 0  ;;  %v3626_v61 = vld [vmem:[%s5003_s3 + $0xf0] ss:$8 sps:$4 sm:$0xff]  }
 0xfbd   :  { %v3848_v50 = vpop.eup %3847 }
 0xfbe   :  { %v1503_v60 = vmul.f32 %v3848_v50, %v3846_v57  ;;  %v3622_v57 = vld [vmem:[%s5003_s3 + $0xd4] ss:$8 sps:$4 sm:$0xff]   ;;  %v3623_v50 = vld [vmem:[%s5003_s3 + $0xe0] ss:$8 sps:$4 sm:$0xff]  }
 0xfc0   :  { %v1504_v62 = vpack.c.bf16 %v1503_v60, %v1503_v60  ;;  %v3628_v60 = vld [vmem:[%s5003_s3 + $0xf4] ss:$8 sps:$4 sm:$0xff]  }
 0xfc2   :  { %3402 = vmatmul.mubr.msk.bf16.vlgmr.msra.gmra.mrb[56].mxu1 %vm829_vm2, %v1504_v62 }
 0xfc3   :  { %3406 = vmatpush3.bf16.xpose.msra.mxu1 %v1561_v63  ;;  %3407 = vmatprep.mubr.msk.bf16.mxu1 %vm3860_vm0, %v3859_v4 }
 0xfc4   :  { %3411 = vmatprep.subr.bf16.mxu1 %v3859_v4 }
 0xfca   :  { %3408 = vmatmul.mubr.msk.bf16.vlgmr.msra.gmra.mrb[60].mxu1 %vm782_vm1, %v1554_v0 }
 0xfcb   :  { %3413 = vmatprep.mubr.msk.bf16.mxu1 %vm3860_vm0, %v3859_v4 }
0x1095   :  { %v1547_v42 = vpop.f32.mrb[56].mxu1 }
0x1096   :  { %v3427_v1 = vpack.i.bf16 %v4330_v23, %v1547_v42  ;;  %v3403_v5 = vpop.f32.mrb[57].mxu1 }
0x1097   :  { %v1550_v10 = vpop.f32.mrb[58].mxu1 }
0x1098   :  { %v3404_v11 = vpop.f32.mrb[59].mxu1 }
0x109d   :  { %v1597_v2 = vpop.f32.mrb[60].mxu1 }
0x109e   :  { %v3409_v12 = vpop.f32.mrb[61].mxu1  ;;  %v1603_v15 = vsel %vm829_vm2, %v1597_v2, -inf }
0x109f   :  { %1604 = vmax.xlane.f32.xlu1 %v1603_v15  ;;  %v1600_v16 = vpop.f32.mrb[62].mxu1 }
0x10a0   :  { %v3410_v18 = vpop.f32.mrb[63].mxu1 }
0x10b0   :  { %1615 = vrot.lane.b32.xlu1 %v4360_v49, %s3863_s19 }
0x10b4   :  { %3428 = vrot.lane.b32.xlu1 %v3427_v1, %s3862_s1 }
0x112c   :  { %v1605_v19 = vpop.xlane.xlu1 %1604 }
0x112d   :  { %v1606_v4 = vsub.f32 %v1597_v2, %v1605_v19 }
0x112f   :  { %v1607_v21 = vmul.f32 1.442695, %v1606_v4 }
0x1130   :  { %v1616_v22 = vpop.permute.xlu1 %1615 }
0x1131   :  { %3849 = vpow2.f32 %v1607_v21  ;;  %v1621_v23 = vsel %vm846_vm3, %v1616_v22, 0 }
0x1132   :  { %3412 = vmatpush3.bf16.msra.mxu1 %v1621_v23 }
0x1133   :  { %2397 = vmatprep.subr.bf16.mxu1 %v3631_v41  ;;  %v3712_v41 = vld [vmem:[%s5005_s7 + $0x1ac] ss:$16 sps:$4 sm:$0xff]  }
0x1134   :  { %v3429_v2 = vpop.permute.xlu1 %3428 }
0x1135   :  { %v3431_v16 = vunpack.i.h.bf16 %v3429_v2  ;;  %v3430_v18 = vunpack.i.l.bf16 %v3429_v2  ;;  %v3674_v2 = vld [vmem:[%s5005_s7 + $0xe8] ss:$16 sps:$4 sm:$0xff]  }
0x113b   :  { %v3850_v24 = vpop.eup %3849 }
0x113c   :  { %v1609_v25 = vsel %vm829_vm2, %v3850_v24, 0.0 }
0x113d   :  { %1610 = vadd.xlane.f32.xlu0 %v1609_v25 }
0x1153   :  { %3423 = vrot.lane.b32.xlu0 %v3422_v44, %s3863_s19  ;;  %v3601_v44 = vld [vmem:[%s5003_s3 + $0x64] ss:$8 sps:$4 sm:$0xff]  }
0x1154   :  { %1913 = vmatprep.subr.bf16.mxu0 %v3601_v44  ;;  %v3634_v44 = vld [vmem:[%s5005_s7 + $0xc] ss:$16 sps:$4 sm:$0xff]  }
0x1155   :  { %1914 = vmatpush1.bf16.msra.mxu0 %v3599_v45  ;;  %v3635_v45 = vld [vmem:[%s5005_s7 + $0x20] ss:$16 sps:$4 sm:$0xff]  }
0x1156   :  { %1915 = vmatprep.subr.bf16.mxu0 %v3604_v46  ;;  %v3637_v46 = vld [vmem:[%s5005_s7 + $0x24] ss:$16 sps:$4 sm:$0xff]  }
0x1159   :  { %1916 = vmatpush1.bf16.msra.mxu0 %v3602_v47  ;;  %v3638_v47 = vld [vmem:[%s5005_s7 + $0x28] ss:$16 sps:$4 sm:$0xff]  }
0x115a   :  { %1917 = vmatprep.subr.bf16.mxu0 %v3607_v14  ;;  %v3640_v14 = vld [vmem:[%s5005_s7 + $0x2c] ss:$16 sps:$4 sm:$0xff]  }
0x115d   :  { %1918 = vmatpush1.bf16.msra.mxu0 %v3605_v48  ;;  %v3643_v48 = vld [vmem:[%s5005_s7 + $0x44] ss:$16 sps:$4 sm:$0xff]  }
0x115e   :  { %1919 = vmatprep.subr.bf16.mxu0 %v3610_v8  ;;  %v3641_v8 = vld [vmem:[%s5005_s7 + $0x40] ss:$16 sps:$4 sm:$0xff]  }
0x1161   :  { %1920 = vmatpush1.bf16.msra.mxu0 %v3608_v20  ;;  %v3646_v20 = vld [vmem:[%s5005_s7 + $0x4c] ss:$16 sps:$4 sm:$0xff]  }
0x1162   :  { %1921 = vmatprep.subr.bf16.mxu0 %v3613_v51  ;;  %v3644_v51 = vld [vmem:[%s5005_s7 + $0x48] ss:$16 sps:$4 sm:$0xff]  }
0x1165   :  { %1922 = vmatpush1.bf16.msra.mxu0 %v3611_v52  ;;  %v3649_v52 = vld [vmem:[%s5005_s7 + $0x64] ss:$16 sps:$4 sm:$0xff]  }
0x1166   :  { %1923 = vmatprep.subr.bf16.mxu0 %v3616_v54  ;;  %v3652_v54 = vld [vmem:[%s5005_s7 + $0x6c] ss:$16 sps:$4 sm:$0xff]  }
0x1169   :  { %1924 = vmatpush1.bf16.msra.mxu0 %v3614_v55  ;;  %v3647_v55 = vld [vmem:[%s5005_s7 + $0x60] ss:$16 sps:$4 sm:$0xff]  }
0x116a   :  { %1925 = vmatprep.subr.bf16.mxu0 %v3619_v53  ;;  %v3650_v53 = vld [vmem:[%s5005_s7 + $0x68] ss:$16 sps:$4 sm:$0xff]  }
0x116d   :  { %1926 = vmatpush1.bf16.msra.mxu0 %v3617_v56  ;;  %v3655_v56 = vld [vmem:[%s5005_s7 + $0x84] ss:$16 sps:$4 sm:$0xff]  }
0x116e   :  { %1927 = vmatprep.subr.bf16.mxu0 %v3622_v57  ;;  %v3658_v57 = vld [vmem:[%s5005_s7 + $0x8c] ss:$16 sps:$4 sm:$0xff]  }
0x1171   :  { %1928 = vmatpush1.bf16.msra.mxu0 %v3620_v58  ;;  %v3653_v58 = vld [vmem:[%s5005_s7 + $0x80] ss:$16 sps:$4 sm:$0xff]  }
0x1172   :  { %1929 = vmatprep.subr.bf16.mxu0 %v3625_v59  ;;  %v3656_v59 = vld [vmem:[%s5005_s7 + $0x88] ss:$16 sps:$4 sm:$0xff]  }
0x1175   :  { %1930 = vmatpush1.bf16.msra.mxu0 %v3623_v50  ;;  %v3661_v50 = vld [vmem:[%s5005_s7 + $0xa4] ss:$16 sps:$4 sm:$0xff]  }
0x1176   :  { %1931 = vmatprep.subr.bf16.mxu0 %v3628_v60  ;;  %v3664_v60 = vld [vmem:[%s5005_s7 + $0xac] ss:$16 sps:$4 sm:$0xff]  }
0x1179   :  { %1932 = vmatpush1.bf16.msra.mxu0 %v3626_v61  ;;  %v3659_v61 = vld [vmem:[%s5005_s7 + $0xa0] ss:$16 sps:$4 sm:$0xff]  }
0x117a   :  { %2438 = vmatprep.subr.bf16.mxu0 %v3634_v44  ;;  %v3710_v44 = vld [vmem:[%s5005_s7 + $0x1a8] ss:$16 sps:$4 sm:$0xff]  }
0x11ca   :  { %v1611_v26 = vpop.xlane.xlu0 %1610 }
0x11cb   :  { %3851 = vrcp.f32 %v1611_v26 }
0x11ce   :  { %v3424_v5 = vpop.permute.xlu0 %3423 }
0x11cf   :  { %v3426_v10 = vunpack.i.h.bf16 %v3424_v5  ;;  %v3425_v11 = vunpack.i.l.bf16 %v3424_v5  ;;  %v3673_v5 = vld [vmem:[%s5005_s7 + $0xe4] ss:$16 sps:$4 sm:$0xff]  }
0x11d1   :  { %v1687_v12 = vsel %vm782_vm1, %v4290_v28, %v3426_v10  ;;  %v1692_v15 = vsel %vm782_vm1, %v4387_v13, %v3425_v11  ;;  %v1729_v28 = vld [vmem:[%s5004_s4] sm:$0x3]  ;;  %v3676_v11 = vld [vmem:[%s5005_s7 + $0xec] ss:$16 sps:$4 sm:$0xff]  }
0x11d2   :  { %v1689_v21 = vsel %vm1688_vm4, %v1687_v12, %v3431_v16  ;;  %v1693_v22 = vsel %vm1688_vm4, %v1692_v15, %v3430_v18  ;;  %v1734_v13 = vrot.slane %v1729_v28, %v4148_v9  ;;  %v3671_v10 = vld [vmem:[%s5005_s7 + $0xe0] ss:$16 sps:$4 sm:$0xff]   ;;  %v3679_v12 = vld [vmem:[%s5005_s7 + $0x104] ss:$16 sps:$4 sm:$0xff]   ;;  %v3682_v15 = vld [vmem:[%s5005_s7 + $0x10c] ss:$16 sps:$4 sm:$0xff]  }
0x11d3   :  { %v3677_v16 = vld [vmem:[%s5005_s7 + $0x100] ss:$16 sps:$4 sm:$0xff]   ;;  %v3680_v18 = vld [vmem:[%s5005_s7 + $0x108] ss:$16 sps:$4 sm:$0xff]  }
0x11d5   :  { %v3852_v27 = vpop.eup %3851 }
0x11d6   :  { %v1613_v49 = vmul.f32 %v3852_v27, %v3850_v24  ;;  %v1738_v27 = vrot.slane %v1729_v28, %v4345_v40 }
0x11d8   :  { %v1614_v29 = vpack.c.bf16 %v1613_v49, %v1613_v49 }
0x11da   :  { %3414 = vmatmul.mubr.msk.bf16.vlgmr.msra.gmra.mrb[64].mxu1 %vm829_vm2, %v1614_v29 }
0x11db   :  { %2398 = vmatpush1.bf16.msra.mxu1 %v3629_v39  ;;  %v3709_v39 = vld [vmem:[%s5005_s7 + $0x1a4] ss:$16 sps:$4 sm:$0xff]  }
0x11dc   :  { %2399 = vmatprep.subr.bf16.mxu1 %v3637_v46  ;;  %v3715_v46 = vld [vmem:[%s5005_s7 + $0x1c4] ss:$16 sps:$4 sm:$0xff]  }
0x11df   :  { %2400 = vmatpush1.bf16.msra.mxu1 %v3635_v45  ;;  %v3713_v45 = vld [vmem:[%s5005_s7 + $0x1c0] ss:$16 sps:$4 sm:$0xff]  }
0x11e0   :  { %2401 = vmatprep.subr.bf16.mxu1 %v3643_v48  ;;  %v3721_v48 = vld [vmem:[%s5005_s7 + $0x1e4] ss:$16 sps:$4 sm:$0xff]  }
0x11e3   :  { %2402 = vmatpush1.bf16.msra.mxu1 %v3641_v8  ;;  %v3724_v8 = vld [vmem:[%s5005_s7 + $0x1ec] ss:$16 sps:$4 sm:$0xff]  }
0x11e4   :  { %2403 = vmatprep.subr.bf16.mxu1 %v3649_v52  ;;  %v3727_v52 = vld [vmem:[%s5006_s9 + $0x4] ss:$8 sps:$4 sm:$0xff]  }
0x11e7   :  { %2404 = vmatpush1.bf16.msra.mxu1 %v3647_v55 }
0x11e8   :  { %2405 = vmatprep.subr.bf16.mxu1 %v3655_v56 }
0x11eb   :  { %2406 = vmatpush1.bf16.msra.mxu1 %v3653_v58  ;;  %v1975_v58 = vld [vmem:[%s5008_s6] sm:$0x3] }
0x11ec   :  { %2407 = vmatprep.subr.bf16.mxu1 %v3661_v50 }
0x11ef   :  { %2408 = vmatpush1.bf16.msra.mxu1 %v3659_v61 }
0x12ad   :  { %v1657_v62 = vpop.f32.mrb[64].mxu1 }
0x12ae   :  { %v3432_v63 = vpack.i.bf16 %v4371_v3, %v1657_v62  ;;  %v3415_v0 = vpop.f32.mrb[65].mxu1  ;;  %v3662_v62 = vld [vmem:[%s5005_s7 + $0xa8] ss:$16 sps:$4 sm:$0xff]  }
0x12af   :  { %v1660_v42 = vpop.f32.mrb[66].mxu1  ;;  %v3670_v0 = vld [vmem:[%s5005_s7 + $0xcc] ss:$16 sps:$4 sm:$0xff]  }
0x12b0   :  { %3433 = vrot.lane.b32.xlu1 %v3432_v63, %s3861_s2  ;;  %v3416_v1 = vpop.f32.mrb[67].mxu1  ;;  %v3667_v63 = vld [vmem:[%s5005_s7 + $0xc4] ss:$16 sps:$4 sm:$0xff]   ;;  %v3665_v42 = vld [vmem:[%s5005_s7 + $0xc0] ss:$16 sps:$4 sm:$0xff]  }
0x12b1   :  { %v3668_v1 = vld [vmem:[%s5005_s7 + $0xc8] ss:$16 sps:$4 sm:$0xff]   ;;  %2409 = vmatprep.subr.bf16.mxu1 %v3667_v63  ;;  %v1980_v63 = vrot.slane %v1975_v58, %v4148_v9 }
0x12b2   :  { %2410 = vmatpush1.bf16.msra.mxu1 %v3665_v42 }
0x12b3   :  { %2411 = vmatprep.subr.bf16.mxu1 %v3673_v5 }
0x12b6   :  { %2412 = vmatpush1.bf16.msra.mxu1 %v3671_v10 }
0x12b7   :  { %2413 = vmatprep.subr.bf16.mxu1 %v3679_v12  ;;  %v3725_v12 = vld [vmem:[%s5006_s9] ss:$8 sps:$4 sm:$0xff]  }
0x12ba   :  { %2414 = vmatpush1.bf16.msra.mxu1 %v3677_v16  ;;  %v3733_v16 = vld [vmem:[%s5006_s9 + $0x14] ss:$8 sps:$4 sm:$0xff]  }
0x1322   :  { %v3434_v3 = vpop.permute.xlu1 %3433 }
0x1323   :  { %v3436_v19 = vunpack.i.h.bf16 %v3434_v3  ;;  %v3435_v4 = vunpack.i.l.bf16 %v3434_v3  ;;  %v3685_v3 = vld [vmem:[%s5005_s7 + $0x124] ss:$16 sps:$4 sm:$0xff]  }
0x1324   :  { %2415 = vmatprep.subr.bf16.mxu1 %v3685_v3  ;;  %v3731_v3 = vld [vmem:[%s5006_s9 + $0x10] ss:$8 sps:$4 sm:$0xff]  }
0x1325   :  { %v1691_v23 = vsel %vm1690_vm5, %v1689_v21, %v3436_v19  ;;  %v1694_v24 = vsel %vm1690_vm5, %v1693_v22, %v3435_v4  ;;  %v3688_v19 = vld [vmem:[%s5005_s7 + $0x12c] ss:$16 sps:$4 sm:$0xff]   ;;  %v3683_v4 = vld [vmem:[%s5005_s7 + $0x120] ss:$16 sps:$4 sm:$0xff]   ;;  %v3686_v21 = vld [vmem:[%s5005_s7 + $0x128] ss:$16 sps:$4 sm:$0xff]  }
0x1326   :  { %v1695_v25 = vpack.c.bf16 %v1691_v23, %v1691_v23  ;;  %v1696_v26 = vpack.c.bf16 %v1694_v24, %v1694_v24  ;;  %2416 = vmatpush1.bf16.msra.mxu1 %v3683_v4  ;;  %v3739_v4 = vld [vmem:[%s5006_s9 + $0x24] ss:$8 sps:$4 sm:$0xff]  }
0x1328   :  { %1933 = vmatprep.mubr.bf16.mxu0 %v1696_v26 }
0x1329   :  { %1934 = vmatmul.mubr.bf16.vlgmr.msra.gmra.mrb[8].mxu0 %v1695_v25 }
0x132a   :  { %2439 = vmatpush1.bf16.msra.mxu0 %v3632_v43  ;;  %v3707_v43 = vld [vmem:[%s5005_s7 + $0x1a0] ss:$16 sps:$4 sm:$0xff]  }
0x132b   :  { %2440 = vmatprep.subr.bf16.mxu0 %v3640_v14  ;;  %v3718_v14 = vld [vmem:[%s5005_s7 + $0x1cc] ss:$16 sps:$4 sm:$0xff]  }
0x132e   :  { %2441 = vmatpush1.bf16.msra.mxu0 %v3638_v47  ;;  %v3716_v47 = vld [vmem:[%s5005_s7 + $0x1c8] ss:$16 sps:$4 sm:$0xff]  }
0x132f   :  { %2442 = vmatprep.subr.bf16.mxu0 %v3646_v20  ;;  %v3719_v20 = vld [vmem:[%s5005_s7 + $0x1e0] ss:$16 sps:$4 sm:$0xff]  }
0x1332   :  { %2443 = vmatpush1.bf16.msra.mxu0 %v3644_v51  ;;  %v3722_v51 = vld [vmem:[%s5005_s7 + $0x1e8] ss:$16 sps:$4 sm:$0xff]  }
0x1333   :  { %2444 = vmatprep.subr.bf16.mxu0 %v3652_v54  ;;  %v3730_v54 = vld [vmem:[%s5006_s9 + $0x104] ss:$8 sps:$4 sm:$0xff]  }
0x1336   :  { %2445 = vmatpush1.bf16.msra.mxu0 %v3650_v53 }
0x1337   :  { %2446 = vmatprep.subr.bf16.mxu0 %v3658_v57  ;;  %v1961_v57 = vld [vmem:[%s5007_s5] sm:$0x3] }
0x1338   :  { %v1970_v50 = vrot.slane %v1961_v57, %v4345_v40 }
0x133a   :  { %2447 = vmatpush1.bf16.msra.mxu0 %v3656_v59  ;;  %v1966_v59 = vrot.slane %v1961_v57, %v4148_v9  ;;  %v3791_v57 = vld [vmem:[%s5006_s9 + $0xb0] ss:$8 sps:$4 sm:$0xff]  }
0x133b   :  { %2448 = vmatprep.subr.bf16.mxu0 %v3664_v60 }
0x133e   :  { %2449 = vmatpush1.bf16.msra.mxu0 %v3662_v62 }
0x133f   :  { %2450 = vmatprep.subr.bf16.mxu0 %v3670_v0  ;;  %v1984_v0 = vrot.slane %v1975_v58, %v4345_v40  ;;  %v3794_v58 = vld [vmem:[%s5006_s9 + $0x1b0] ss:$8 sps:$4 sm:$0xff]  }
0x1342   :  { %2451 = vmatpush1.bf16.msra.mxu0 %v3668_v1 }
0x1343   :  { %2452 = vmatprep.subr.bf16.mxu0 %v3676_v11 }
0x1346   :  { %2453 = vmatpush1.bf16.msra.mxu0 %v3674_v2 }
0x1347   :  { %2454 = vmatprep.subr.bf16.mxu0 %v3682_v15  ;;  %v3728_v15 = vld [vmem:[%s5006_s9 + $0x100] ss:$8 sps:$4 sm:$0xff]  }
0x134a   :  { %2455 = vmatpush1.bf16.msra.mxu0 %v3680_v18  ;;  %v3736_v18 = vld [vmem:[%s5006_s9 + $0x114] ss:$8 sps:$4 sm:$0xff]  }
0x134b   :  { %2456 = vmatprep.subr.bf16.mxu0 %v3688_v19  ;;  %v3734_v19 = vld [vmem:[%s5006_s9 + $0x110] ss:$8 sps:$4 sm:$0xff]  }
0x134e   :  { %2457 = vmatpush1.bf16.msra.mxu0 %v3686_v21  ;;  %v3742_v21 = vld [vmem:[%s5006_s9 + $0x124] ss:$8 sps:$4 sm:$0xff]  }
0x13fc   :  { %v1935_v49 = vpop.f32.mrb[8].mxu0 }
0x13fd   :  { %v1936_v29 = vadd.f32 %v1935_v49, %v1734_v13  ;;  %v1937_v30 = vpop.f32.mrb[9].mxu0  ;;  %v3694_v49 = vld [vmem:[%s5005_s7 + $0x14c] ss:$16 sps:$4 sm:$0xff]  }
0x13fe   :  { %v1938_v31 = vadd.f32 %v1937_v30, %v1738_v27  ;;  %v1939_v32 = vpop.f32.mrb[10].mxu0  ;;  %v3691_v27 = vld [vmem:[%s5005_s7 + $0x144] ss:$16 sps:$4 sm:$0xff]   ;;  %v3692_v30 = vld [vmem:[%s5005_s7 + $0x148] ss:$16 sps:$4 sm:$0xff]   ;;  %2458 = vmatprep.subr.bf16.mxu0 %v3694_v49 }
0x13ff   :  { %v4545_v34 = vadd.f32 %v3857_v33, %v1936_v29  ;;  %v1940_v35 = vpop.f32.mrb[11].mxu0  ;;  %v3689_v29 = vld [vmem:[%s5005_s7 + $0x140] ss:$16 sps:$4 sm:$0xff]   ;;  %2417 = vmatprep.subr.bf16.mxu1 %v3691_v27  ;;  %2459 = vmatpush1.bf16.msra.mxu0 %v3692_v30  ;;  %v3700_v32 = vld [vmem:[%s5005_s7 + $0x16c] ss:$16 sps:$4 sm:$0xff]  }
0x1400   :  { %v4550_v17 = vadd.f32 %v3858_v37, %v1938_v31  ;;  %2418 = vmatpush1.bf16.msra.mxu1 %v3689_v29  ;;  %v3697_v31 = vld [vmem:[%s5005_s7 + $0x164] ss:$16 sps:$4 sm:$0xff]   ;;  %v3695_v33 = vld [vmem:[%s5005_s7 + $0x160] ss:$16 sps:$4 sm:$0xff]   ;;  %2460 = vmatprep.subr.bf16.mxu0 %v3700_v32  ;;  %v3706_v37 = vld [vmem:[%s5005_s7 + $0x18c] ss:$16 sps:$4 sm:$0xff]  }
0x1401   :  { %2419 = vmatprep.subr.bf16.mxu1 %v3697_v31  ;;  %v3703_v35 = vld [vmem:[%s5005_s7 + $0x184] ss:$16 sps:$4 sm:$0xff]   ;;  %v3749_v49 = vld [vmem:[%s5006_s9 + $0x40] ss:$8 sps:$4 sm:$0xff]   ;;  %v3755_v32 = vld [vmem:[%s5006_s9 + $0x50] ss:$8 sps:$4 sm:$0xff]  }
0x1402   :  { %v1944_v38 = vadd.f32 %v4550_v17, %v4545_v34  ;;  %v3754_v27 = vld [vmem:[%s5006_s9 + $0x144] ss:$8 sps:$4 sm:$0xff]   ;;  %v3752_v29 = vld [vmem:[%s5006_s9 + $0x140] ss:$8 sps:$4 sm:$0xff]   ;;  %v3757_v30 = vld [vmem:[%s5006_s9 + $0x54] ss:$8 sps:$4 sm:$0xff]  }
0x1403   :  { %v3760_v31 = vld [vmem:[%s5006_s9 + $0x154] ss:$8 sps:$4 sm:$0xff]  }
0x1404   :  { %1945 = vadd.xlane.f32.xlu1 %v1944_v38  ;;  %2420 = vmatpush1.bf16.msra.mxu1 %v3695_v33  ;;  %v3704_v38 = vld [vmem:[%s5005_s7 + $0x188] ss:$16 sps:$4 sm:$0xff]  }
0x1405   :  { %2421 = vmatprep.subr.bf16.mxu1 %v3703_v35  ;;  %v3758_v33 = vld [vmem:[%s5006_s9 + $0x150] ss:$8 sps:$4 sm:$0xff]   ;;  %v3766_v35 = vld [vmem:[%s5006_s9 + $0x164] ss:$8 sps:$4 sm:$0xff]  }
0x1491   :  { %v1946_v22 = vpop.xlane.xlu1 %1945 }
0x1492   :  { %v1948_v23 = vmul.f32 0.00390625, %v1946_v22  ;;  %v3737_v22 = vld [vmem:[%s5006_s9 + $0x20] ss:$8 sps:$4 sm:$0xff]  }
0x1494   :  { %v4675_v24 = vsub.f32 %v4545_v34, %v1948_v23  ;;  %v4678_v25 = vsub.f32 %v4550_v17, %v1948_v23  ;;  %v3698_v34 = vld [vmem:[%s5005_s7 + $0x168] ss:$16 sps:$4 sm:$0xff]   ;;  %v3701_v17 = vld [vmem:[%s5005_s7 + $0x180] ss:$16 sps:$4 sm:$0xff]  }
0x1495   :  { %2461 = vmatpush1.bf16.msra.mxu0 %v3698_v34  ;;  %2422 = vmatpush1.bf16.msra.mxu1 %v3701_v17  ;;  %v3740_v23 = vld [vmem:[%s5006_s9 + $0x120] ss:$8 sps:$4 sm:$0xff]   ;;  %v3763_v34 = vld [vmem:[%s5006_s9 + $0x64] ss:$8 sps:$4 sm:$0xff]  }
0x1496   :  { %v1951_v26 = vmul.f32 %v4675_v24, %v4675_v24  ;;  %v1952_v28 = vmul.f32 %v4678_v25, %v4678_v25  ;;  %2462 = vmatprep.subr.bf16.mxu0 %v3706_v37  ;;  %2423 = vmatprep.subr.bf16.mxu1 %v3709_v39  ;;  %v3761_v37 = vld [vmem:[%s5006_s9 + $0x60] ss:$8 sps:$4 sm:$0xff]   ;;  %v3772_v39 = vld [vmem:[%s5006_s9 + $0x174] ss:$8 sps:$4 sm:$0xff]  }
0x1497   :  { %v3764_v17 = vld [vmem:[%s5006_s9 + $0x160] ss:$8 sps:$4 sm:$0xff]  }
0x1498   :  { %v1953_v13 = vadd.f32 %v1952_v28, %v1951_v26  ;;  %v3743_v26 = vld [vmem:[%s5006_s9 + $0x30] ss:$8 sps:$4 sm:$0xff]  }
0x1499   :  { %2463 = vmatpush1.bf16.msra.mxu0 %v3704_v38  ;;  %2424 = vmatpush1.bf16.msra.mxu1 %v3707_v43  ;;  %v3746_v28 = vld [vmem:[%s5006_s9 + $0x130] ss:$8 sps:$4 sm:$0xff]   ;;  %v3769_v38 = vld [vmem:[%s5006_s9 + $0x74] ss:$8 sps:$4 sm:$0xff]  }
0x149a   :  { %1954 = vadd.xlane.f32.xlu0 %v1953_v13  ;;  %2464 = vmatprep.subr.bf16.mxu0 %v3712_v41  ;;  %v3751_v13 = vld [vmem:[%s5006_s9 + $0x44] ss:$8 sps:$4 sm:$0xff]   ;;  %v3767_v41 = vld [vmem:[%s5006_s9 + $0x70] ss:$8 sps:$4 sm:$0xff]  }
0x149b   :  { %2425 = vmatprep.subr.bf16.mxu1 %v3715_v46  ;;  %v3770_v43 = vld [vmem:[%s5006_s9 + $0x170] ss:$8 sps:$4 sm:$0xff]   ;;  %v3773_v46 = vld [vmem:[%s5006_s9 + $0x80] ss:$8 sps:$4 sm:$0xff]  }
0x149d   :  { %2465 = vmatpush1.bf16.msra.mxu0 %v3710_v44  ;;  %2426 = vmatpush1.bf16.msra.mxu1 %v3713_v45  ;;  %v3775_v44 = vld [vmem:[%s5006_s9 + $0x84] ss:$8 sps:$4 sm:$0xff]  }
0x149e   :  { %2466 = vmatprep.subr.bf16.mxu0 %v3718_v14  ;;  %2427 = vmatprep.subr.bf16.mxu1 %v3721_v48  ;;  %v3778_v45 = vld [vmem:[%s5006_s9 + $0x184] ss:$8 sps:$4 sm:$0xff]   ;;  %v3781_v14 = vld [vmem:[%s5006_s9 + $0x94] ss:$8 sps:$4 sm:$0xff]  }
0x149f   :  { %v3784_v48 = vld [vmem:[%s5006_s9 + $0x194] ss:$8 sps:$4 sm:$0xff]  }
0x14a1   :  { %2467 = vmatpush1.bf16.msra.mxu0 %v3716_v47  ;;  %2428 = vmatpush1.bf16.msra.mxu1 %v3719_v20  ;;  %v3776_v47 = vld [vmem:[%s5006_s9 + $0x180] ss:$8 sps:$4 sm:$0xff]   ;;  %v3782_v20 = vld [vmem:[%s5006_s9 + $0x190] ss:$8 sps:$4 sm:$0xff]  }
0x14a2   :  { %2468 = vmatprep.subr.bf16.mxu0 %v3724_v8  ;;  %2883 = vmatprep.subr.bf16.mxu1 %v3727_v52  ;;  %v3779_v8 = vld [vmem:[%s5006_s9 + $0x90] ss:$8 sps:$4 sm:$0xff]   ;;  %v3790_v52 = vld [vmem:[%s5006_s9 + $0x1a4] ss:$8 sps:$4 sm:$0xff]  }
0x14a5   :  { %2469 = vmatpush1.bf16.msra.mxu0 %v3722_v51  ;;  %v3787_v51 = vld [vmem:[%s5006_s9 + $0xa4] ss:$8 sps:$4 sm:$0xff]  }
0x14a6   :  { %2924 = vmatprep.subr.bf16.mxu0 %v3730_v54  ;;  %v3785_v54 = vld [vmem:[%s5006_s9 + $0xa0] ss:$8 sps:$4 sm:$0xff]  }
0x1527   :  { %v1955_v55 = vpop.xlane.xlu0 %1954 }
0x1528   :  { %v1956_v53 = vmul.f32 0.00390625, %v1955_v55  ;;  %v3788_v55 = vld [vmem:[%s5006_s9 + $0x1a0] ss:$8 sps:$4 sm:$0xff]  }
0x152a   :  { %v1957_v56 = vadd.f32 1e-05, %v1956_v53  ;;  %v3793_v53 = vld [vmem:[%s5006_s9 + $0xb4] ss:$8 sps:$4 sm:$0xff]  }
0x152c   :  { %3853 = vrsqrt.f32 %v1957_v56  ;;  %v3796_v56 = vld [vmem:[%s5006_s9 + $0x1b4] ss:$8 sps:$4 sm:$0xff]  }
0x1536   :  { %v3854_v60 = vpop.eup %3853 }
0x1537   :  { %v1959_v61 = vmul.f32 %v3854_v60, %v4675_v24  ;;  %v1960_v62 = vmul.f32 %v3854_v60, %v4678_v25  ;;  %v3745_v24 = vld [vmem:[%s5006_s9 + $0x34] ss:$8 sps:$4 sm:$0xff]   ;;  %v3797_v60 = vld [vmem:[%s5006_s9 + $0xc0] ss:$8 sps:$4 sm:$0xff]  }
0x1538   :  { %v3748_v25 = vld [vmem:[%s5006_s9 + $0x134] ss:$8 sps:$4 sm:$0xff]  }
0x1539   :  { %v1974_v42 = vmul.f32 %v1970_v50, %v1960_v62  ;;  %v1973_v1 = vmul.f32 %v1966_v59, %v1959_v61  ;;  %v3799_v59 = vld [vmem:[%s5006_s9 + $0xc4] ss:$8 sps:$4 sm:$0xff]   ;;  %v3800_v61 = vld [vmem:[%s5006_s9 + $0x1c0] ss:$8 sps:$4 sm:$0xff]   ;;  %v3805_v62 = vld [vmem:[%s5006_s9 + $0xd4] ss:$8 sps:$4 sm:$0xff]  }
0x153a   :  { %v3802_v50 = vld [vmem:[%s5006_s9 + $0x1c4] ss:$8 sps:$4 sm:$0xff]  }
0x153b   :  { %v4774_v5 = vadd.f32 %v1984_v0, %v1974_v42  ;;  %v4776_v10 = vadd.f32 %v1980_v63, %v1973_v1  ;;  %v3808_v63 = vld [vmem:[%s5006_s9 + $0x1d4] ss:$8 sps:$4 sm:$0xff]   ;;  %v3803_v0 = vld [vmem:[%s5006_s9 + $0xd0] ss:$8 sps:$4 sm:$0xff]   ;;  %v3811_v1 = vld [vmem:[%s5006_s9 + $0xe4] ss:$8 sps:$4 sm:$0xff]  }
0x153c   :  { %v3806_v42 = vld [vmem:[%s5006_s9 + $0x1d0] ss:$8 sps:$4 sm:$0xff]  }
0x153d   :  { %v1990_v11 = vpack.c.bf16 %v4774_v5, %v4774_v5  ;;  %v1989_v2 = vpack.c.bf16 %v4776_v10, %v4776_v10 }
0x153f   :  { %2429 = vmatprep.mubr.bf16.mxu1 %v1990_v11  ;;  %2470 = vmatprep.mubr.bf16.mxu0 %v1990_v11  ;;  %v3814_v11 = vld [vmem:[%s5006_s9 + $0x1e4] ss:$8 sps:$4 sm:$0xff]  }
0x1540   :  { %2430 = vmatmul.mubr.bf16.vlgmr.msra.gmra.mrb[68].mxu1 %v1989_v2  ;;  %2471 = vmatmul.mubr.bf16.vlgmr.msra.gmra.mrb[12].mxu0 %v1989_v2  ;;  %v3809_v2 = vld [vmem:[%s5006_s9 + $0xe0] ss:$8 sps:$4 sm:$0xff]  }
0x1541   :  { %2884 = vmatpush1.bf16.msra.mxu1 %v3725_v12  ;;  %2925 = vmatpush1.bf16.msra.mxu0 %v3728_v15  ;;  %v3812_v12 = vld [vmem:[%s5006_s9 + $0x1e0] ss:$8 sps:$4 sm:$0xff]   ;;  %v3817_v15 = vld [vmem:[%s5006_s9 + $0xf4] ss:$8 sps:$4 sm:$0xff]  }
0x1542   :  { %2885 = vmatprep.subr.bf16.mxu1 %v3733_v16  ;;  %2926 = vmatprep.subr.bf16.mxu0 %v3736_v18  ;;  %v3820_v16 = vld [vmem:[%s5006_s9 + $0x1f4] ss:$8 sps:$4 sm:$0xff]   ;;  %v3815_v18 = vld [vmem:[%s5006_s9 + $0xf0] ss:$8 sps:$4 sm:$0xff]  }
0x1545   :  { %2886 = vmatpush1.bf16.msra.mxu1 %v3731_v3  ;;  %2927 = vmatpush1.bf16.msra.mxu0 %v3734_v19  ;;  %v3818_v3 = vld [vmem:[%s5006_s9 + $0x1f0] ss:$8 sps:$4 sm:$0xff]   ;;  %v2055_v19 = vld [vmem:[%s5009_s8] sm:$0xf] }
0x1546   :  { %2887 = vmatprep.subr.bf16.mxu1 %v3739_v4  ;;  %2928 = vmatprep.subr.bf16.mxu0 %v3742_v21  ;;  %v2060_v4 = vrot.slane %v2055_v19, %v4148_v9  ;;  %v2068_v21 = vrot.slane %v2055_v19, %v157_v7 }
0x1549   :  { %2888 = vmatpush1.bf16.msra.mxu1 %v3737_v22  ;;  %2929 = vmatpush1.bf16.msra.mxu0 %v3740_v23  ;;  %v2064_v22 = vrot.slane %v2055_v19, %v4345_v40  ;;  %v2072_v23 = vrot.slane %v2055_v19, %v161_v36 }
0x154a   :  { %2889 = vmatprep.subr.bf16.mxu1 %v3745_v24  ;;  %2930 = vmatprep.subr.bf16.mxu0 %v3748_v25 }
0x154d   :  { %2890 = vmatpush1.bf16.msra.mxu1 %v3743_v26  ;;  %2931 = vmatpush1.bf16.msra.mxu0 %v3746_v28 }
0x154e   :  { %2891 = vmatprep.subr.bf16.mxu1 %v3751_v13  ;;  %2932 = vmatprep.subr.bf16.mxu0 %v3754_v27 }
0x1551   :  { %2892 = vmatpush1.bf16.msra.mxu1 %v3749_v49  ;;  %2933 = vmatpush1.bf16.msra.mxu0 %v3752_v29 }
0x1552   :  { %2893 = vmatprep.subr.bf16.mxu1 %v3757_v30  ;;  %2934 = vmatprep.subr.bf16.mxu0 %v3760_v31 }
0x1555   :  { %2894 = vmatpush1.bf16.msra.mxu1 %v3755_v32  ;;  %2935 = vmatpush1.bf16.msra.mxu0 %v3758_v33 }
0x1556   :  { %2895 = vmatprep.subr.bf16.mxu1 %v3763_v34  ;;  %2936 = vmatprep.subr.bf16.mxu0 %v3766_v35 }
0x1559   :  { %2896 = vmatpush1.bf16.msra.mxu1 %v3761_v37  ;;  %2937 = vmatpush1.bf16.msra.mxu0 %v3764_v17 }
0x155a   :  { %2897 = vmatprep.subr.bf16.mxu1 %v3769_v38  ;;  %2938 = vmatprep.subr.bf16.mxu0 %v3772_v39  ;;  %v2551_v39 = vld [vmem:[%s5010_s10] sm:$0x3] }
0x155d   :  { %2898 = vmatpush1.bf16.msra.mxu1 %v3767_v41  ;;  %2939 = vmatpush1.bf16.msra.mxu0 %v3770_v43  ;;  %v2556_v41 = vrot.slane %v2551_v39, %v4148_v9  ;;  %v2560_v43 = vrot.slane %v2551_v39, %v4345_v40 }
0x155e   :  { %2899 = vmatprep.subr.bf16.mxu1 %v3775_v44  ;;  %2940 = vmatprep.subr.bf16.mxu0 %v3778_v45 }
0x1561   :  { %2900 = vmatpush1.bf16.msra.mxu1 %v3773_v46  ;;  %2941 = vmatpush1.bf16.msra.mxu0 %v3776_v47 }
0x1562   :  { %2901 = vmatprep.subr.bf16.mxu1 %v3781_v14  ;;  %2942 = vmatprep.subr.bf16.mxu0 %v3784_v48 }
0x1565   :  { %2902 = vmatpush1.bf16.msra.mxu1 %v3779_v8  ;;  %2943 = vmatpush1.bf16.msra.mxu0 %v3782_v20 }
0x1566   :  { %2903 = vmatprep.subr.bf16.mxu1 %v3787_v51  ;;  %2944 = vmatprep.subr.bf16.mxu0 %v3790_v52 }
0x1569   :  { %2904 = vmatpush1.bf16.msra.mxu1 %v3785_v54  ;;  %2945 = vmatpush1.bf16.msra.mxu0 %v3788_v55 }
0x156a   :  { %2905 = vmatprep.subr.bf16.mxu1 %v3793_v53  ;;  %2946 = vmatprep.subr.bf16.mxu0 %v3796_v56 }
0x156d   :  { %2906 = vmatpush1.bf16.msra.mxu1 %v3791_v57  ;;  %2947 = vmatpush1.bf16.msra.mxu0 %v3794_v58 }
0x156e   :  { %2907 = vmatprep.subr.bf16.mxu1 %v3799_v59  ;;  %2948 = vmatprep.subr.bf16.mxu0 %v3802_v50 }
0x1571   :  { %2908 = vmatpush1.bf16.msra.mxu1 %v3797_v60  ;;  %2949 = vmatpush1.bf16.msra.mxu0 %v3800_v61 }
0x1572   :  { %2909 = vmatprep.subr.bf16.mxu1 %v3805_v62  ;;  %2950 = vmatprep.subr.bf16.mxu0 %v3808_v63 }
0x1575   :  { %2910 = vmatpush1.bf16.msra.mxu1 %v3803_v0  ;;  %2951 = vmatpush1.bf16.msra.mxu0 %v3806_v42 }
0x1576   :  { %2911 = vmatprep.subr.bf16.mxu1 %v3811_v1  ;;  %2952 = vmatprep.subr.bf16.mxu0 %v3814_v11 }
0x1579   :  { %2912 = vmatpush1.bf16.msra.mxu1 %v3809_v2  ;;  %2953 = vmatpush1.bf16.msra.mxu0 %v3812_v12 }
0x157a   :  { %2913 = vmatprep.subr.bf16.mxu1 %v3817_v15  ;;  %2954 = vmatprep.subr.bf16.mxu0 %v3820_v16 }
0x157d   :  { %2914 = vmatpush1.bf16.msra.mxu1 %v3815_v18  ;;  %2955 = vmatpush1.bf16.msra.mxu0 %v3818_v3 }
0x1613   :  { %v2431_v24 = vpop.f32.mrb[68].mxu1  ;;  %v2472_v25 = vpop.f32.mrb[12].mxu0 }
0x1614   :  { %v2432_v26 = vadd.f32 %v2431_v24, %v2060_v4  ;;  %v2473_v28 = vadd.f32 %v2472_v25, %v2068_v21  ;;  %v2433_v13 = vpop.f32.mrb[69].mxu1  ;;  %v2474_v27 = vpop.f32.mrb[13].mxu0 }
0x1615   :  { %v2434_v49 = vadd.f32 %v2433_v13, %v2064_v22  ;;  %v2475_v29 = vadd.f32 %v2474_v27, %v2072_v23  ;;  %v2435_v30 = vpop.f32.mrb[70].mxu1  ;;  %v2476_v31 = vpop.f32.mrb[14].mxu0 }
0x1616   :  { %v2479_v32 = vmax.f32 %v2432_v26, 0.0  ;;  %v2481_v33 = vmax.f32 %v2473_v28, 0.0  ;;  %v2436_v34 = vpop.f32.mrb[71].mxu1  ;;  %v2477_v35 = vpop.f32.mrb[15].mxu0 }
0x1617   :  { %v2480_v7 = vmax.f32 %v2434_v49, 0.0  ;;  %v2482_v37 = vmax.f32 %v2475_v29, 0.0 }
0x1618   :  { %v2483_v6 = vpack.c.bf16 %v2479_v32, %v2479_v32  ;;  %v2485_v36 = vpack.c.bf16 %v2481_v33, %v2481_v33 }
0x1619   :  { %v2484_v17 = vpack.c.bf16 %v2480_v7, %v2480_v7  ;;  %v2486_v38 = vpack.c.bf16 %v2482_v37, %v2482_v37 }
0x161b   :  { %2915 = vmatprep.mubr.bf16.mxu1 %v2484_v17  ;;  %2956 = vmatprep.mubr.bf16.mxu0 %v2486_v38 }
0x161c   :  { %2916 = vmatmul.mubr.bf16.vlgmr.msra.gmra.mrb[72].mxu1 %v2483_v6  ;;  %2957 = vmatmul.mubr.bf16.vlgmr.msra.gmra.mrb[16].mxu0 %v2485_v36 }
0x16ef   :  { %v2917_v44 = vpop.f32.mrb[72].mxu1  ;;  %v2958_v45 = vpop.f32.mrb[16].mxu0 }
0x16f0   :  { %v2918_v46 = vadd.f32 %v2917_v44, %v2556_v41  ;;  %v2919_v47 = vpop.f32.mrb[73].mxu1  ;;  %v2960_v14 = vpop.f32.mrb[17].mxu0 }
0x16f1   :  { %v2920_v48 = vadd.f32 %v2919_v47, %v2560_v43  ;;  %v2921_v8 = vpop.f32.mrb[74].mxu1  ;;  %v2962_v20 = vpop.f32.mrb[18].mxu0 }
0x16f2   :  { %v2959_v51 = vadd.f32 %v2958_v45, %v2918_v46  ;;  %v2922_v52 = vpop.f32.mrb[75].mxu1  ;;  %v2963_v54 = vpop.f32.mrb[19].mxu0 }
0x16f3   :  { %v2961_v55 = vadd.f32 %v2960_v14, %v2920_v48 }
0x16f4   :  { %v2965_v53 = vadd.f32 %v2959_v51, %v4776_v10  ;;  %v2983_v10 = vld [vmem:[%s5011_s11] sm:$0x3] }
0x16f5   :  { %v2966_v56 = vadd.f32 %v2961_v55, %v4774_v5  ;;  %v2997_v5 = vld [vmem:[%s5012_s12] sm:$0x3]  ;;  %v2988_v11 = vrot.slane %v2983_v10, %v4148_v9  ;;  %v2992_v2 = vrot.slane %v2983_v10, %v4345_v40 }
0x16f6   :  { %v3002_v15 = vrot.slane %v2997_v5, %v4148_v9  ;;  %v3006_v16 = vrot.slane %v2997_v5, %v4345_v40 }
0x16f7   :  { %v2967_v57 = vadd.f32 %v2966_v56, %v2965_v53 }
0x16f9   :  { %2968 = vadd.xlane.f32.xlu1 %v2967_v57 }
0x1786   :  { %v2969_v58 = vpop.xlane.xlu1 %2968 }
0x1787   :  { %v2970_v59 = vmul.f32 0.00390625, %v2969_v58 }
0x1789   :  { %v2971_v50 = vsub.f32 %v2965_v53, %v2970_v59  ;;  %v2972_v60 = vsub.f32 %v2966_v56, %v2970_v59 }
0x178b   :  { %v2973_v61 = vmul.f32 %v2971_v50, %v2971_v50  ;;  %v2974_v62 = vmul.f32 %v2972_v60, %v2972_v60 }
0x178d   :  { %v2975_v63 = vadd.f32 %v2974_v62, %v2973_v61 }
0x178f   :  { %2976 = vadd.xlane.f32.xlu0 %v2975_v63 }
0x181c   :  { %v2977_v0 = vpop.xlane.xlu0 %2976 }
0x181d   :  { %v2978_v42 = vmul.f32 0.00390625, %v2977_v0 }
0x181f   :  { %v2979_v1 = vadd.f32 1e-05, %v2978_v42 }
0x1821   :  { %3855 = vrsqrt.f32 %v2979_v1 }
0x182b   :  { %v3856_v12 = vpop.eup %3855 }
0x182c   :  { %v2981_v18 = vmul.f32 %v3856_v12, %v2971_v50  ;;  %v2982_v3 = vmul.f32 %v3856_v12, %v2972_v60 }
0x182e   :  { %v2995_v19 = vmul.f32 %v2988_v11, %v2981_v18  ;;  %v2996_v4 = vmul.f32 %v2992_v2, %v2982_v3 }
0x1830   :  { %v3009_v21 = vadd.f32 %v3002_v15, %v2995_v19  ;;  %v3010_v22 = vadd.f32 %v3006_v16, %v2996_v4 }
0x1832   :  { %3011 = vst [vmem:[%s5013_s13] sm:$0xff] %v3009_v21  ;;  %3012 = vst [vmem:[%s5013_s13 + $0x8] sm:$0xff] %v3010_v22 }

// kernel: run.28
= control target key start
LH: loop header
LB: loop body
LE: loop exit
PB: predicated region body
PF: predicated region fallthrough
CT: control target
= control target key end

     0   :  { %v133_v0 = vmov 0.0   ;;  %vm134_vm0 = vmmov 0   ;;  %vm55_vm1 = vcmask 523264   ;;  %s176_s1 = inlined_call_operand.vmem [shape: bf16[64,128], index: 1, kind: input, shape index: {}]   ;;  %s177_s0 = inlined_call_operand.vmem [shape: bf16[8,64], index: 0, kind: input, shape index: {}]   ;;  %s178_s2 = inlined_call_operand.vmem [shape: f32[1,128], index: 2, kind: input, shape index: {}]   ;;  %s179_s3 = inlined_call_operand.vmem [shape: f32[8,128], index: 3, kind: output, shape index: {}]  }
   0x1   :  { %115 = vmatprep.subr.bf16.mxu0 %v133_v0  ;;  %v129_v1 = vld [vmem:[%s176_s1] sm:$0xff]   ;;  %123 = vmatprep.mubr.msk.bf16.mxu0 %vm134_vm0, %v133_v0  ;;  %v130_v2 = vld [vmem:[%s176_s1 + $0x8] sm:$0xff]   ;;  %v131_v3 = vld [vmem:[%s176_s1 + $0x10] sm:$0xff]  }
   0x2   :  { %116 = vmatpush3.bf16.msra.mxu0 %v129_v1  ;;  %v132_v4 = vld [vmem:[%s176_s1 + $0x18] sm:$0xff]   ;;  %v15_v5 = vld [vmem:[%s177_s0] sm:$0xf] }
   0x3   :  { %117 = vmatprep.subr.bf16.mxu0 %v133_v0  ;;  %v104_v6 = vld [vmem:[%s178_s2] ss:$0 sm:$0xff] }
   0x6   :  { %118 = vmatpush3.bf16.msra.mxu0 %v130_v2 }
   0x7   :  { %119 = vmatprep.subr.bf16.mxu0 %v133_v0 }
   0xa   :  { %120 = vmatpush3.bf16.msra.mxu0 %v131_v3 }
   0xb   :  { %121 = vmatprep.subr.bf16.mxu0 %v133_v0 }
   0xe   :  { %122 = vmatpush3.bf16.msra.mxu0 %v132_v4 }
  0x11   :  { %124 = vmatmul.mubr.msk.bf16.vlgmr.msra.gmra.mrb[0].mxu0 %vm55_vm1, %v15_v5 }
  0xe4   :  { %v93_v7 = vpop.f32.mrb[0].mxu0 }
  0xe5   :  { %v94_v8 = vadd.f32 %v104_v6, %v93_v7  ;;  %v125_v9 = vpop.f32.mrb[1].mxu0 }
  0xe6   :  { %v96_v10 = vpop.f32.mrb[2].mxu0 }
  0xe7   :  { %99 = vst [vmem:[%s179_s3] sm:$0xff] %v94_v8  ;;  %v126_v11 = vpop.f32.mrb[3].mxu0 }

// kernel: run.29
= control target key start
LH: loop header
LB: loop body
LE: loop exit
PB: predicated region body
PF: predicated region fallthrough
CT: control target
= control target key end

     0   :  { %v1596_v1 = vmov 0   ;;  %v1597_v2 = vmov 0.0   ;;  %vm1598_vm0 = vmmov 0   ;;  %v81_v28 = vlaneseq  ;;  %s1599_s24 = smov 96   ;;  %s1601_s25 = smov 32   ;;  %s2004_s1 = inlined_call_operand.vmem [shape: bf16[128,384], index: 1, kind: input, shape index: {}]   ;;  %s2005_s0 = inlined_call_operand.vmem [shape: f32[8,128], index: 0, kind: input, shape index: {}]   ;;  %s2006_s2 = inlined_call_operand.vmem [shape: f32[1,384], index: 2, kind: input, shape index: {}]   ;;  %s2007_s3 = inlined_call_operand.vmem [shape: bf16[128,128], index: 3, kind: input, shape index: {}]   ;;  %s2008_s4 = inlined_call_operand.vmem [shape: f32[1,128], index: 4, kind: input, shape index: {}, may-alias: {4,6,10,12}]   ;;  %s2009_s7 = inlined_call_operand.vmem [shape: bf16[128,256], index: 7, kind: input, shape index: {}]   ;;  %s2010_s9 = inlined_call_operand.vmem [shape: bf16[256,128], index: 9, kind: input, shape index: {}]   ;;  %s2011_s5 = inlined_call_operand.vmem [shape: f32[1,128], index: 5, kind: input, shape index: {}, may-alias: {5,11}]   ;;  %s2012_s6 = inlined_call_operand.vmem [shape: f32[1,128], index: 6, kind: input, shape index: {}, may-alias: {4,6,10,12}]   ;;  %s2013_s8 = inlined_call_operand.vmem [shape: f32[1,256], index: 8, kind: input, shape index: {}]   ;;  %s2014_s10 = inlined_call_operand.vmem [shape: f32[1,128], index: 10, kind: input, shape index: {}, may-alias: {4,6,10,12}]   ;;  %s2015_s11 = inlined_call_operand.vmem [shape: f32[1,128], index: 11, kind: input, shape index: {}, may-alias: {5,11}]   ;;  %s2016_s12 = inlined_call_operand.vmem [shape: f32[1,128], index: 12, kind: input, shape index: {}, may-alias: {4,6,10,12}]   ;;  %s2017_s13 = inlined_call_operand.vmem [shape: f32[8,128], index: 13, kind: output, shape index: {}]  }
   0x1   :  { %v1496_v0 = vld [vmem:[%s2004_s1 + $0x4] ss:$12 sps:$4 sm:$0xff]   ;;  %256 = vmatprep.mubr.bf16.mxu0 %v1596_v1  ;;  %1402 = vmatprep.subr.bf16.mxu1 %v1597_v2  ;;  %v1498_v3 = vld [vmem:[%s2004_s1] ss:$12 sps:$4 sm:$0xff]   ;;  %v1499_v4 = vld [vmem:[%s2004_s1 + $0x1c] ss:$12 sps:$4 sm:$0xff]  }
   0x2   :  { %224 = vmatprep.subr.bf16.mxu0 %v1496_v0  ;;  %v1501_v5 = vld [vmem:[%s2004_s1 + $0x18] ss:$12 sps:$4 sm:$0xff]   ;;  %v1502_v6 = vld [vmem:[%s2004_s1 + $0x34] ss:$12 sps:$4 sm:$0xff]   ;;  %v1504_v7 = vld [vmem:[%s2004_s1 + $0x30] ss:$12 sps:$4 sm:$0xff]   ;;  %1418 = vmatprep.mubr.msk.bf16.mxu1 %vm1598_vm0, %v1597_v2 }
   0x3   :  { %225 = vmatpush1.bf16.msra.mxu0 %v1498_v3  ;;  %v1505_v8 = vld [vmem:[%s2004_s1 + $0x4c] ss:$12 sps:$4 sm:$0xff]   ;;  %v1507_v9 = vld [vmem:[%s2004_s1 + $0x48] ss:$12 sps:$4 sm:$0xff]   ;;  %v1508_v11 = vld [vmem:[%s2004_s1 + $0x64] ss:$12 sps:$4 sm:$0xff]  }
   0x4   :  { %226 = vmatprep.subr.bf16.mxu0 %v1499_v4  ;;  %v1520_v10 = vld [vmem:[%s2004_s1 + $0x8] ss:$12 sps:$4 sm:$0xff]   ;;  %v1521_v12 = vld [vmem:[%s2004_s1 + $0x20] ss:$12 sps:$4 sm:$0xff]   ;;  %v1522_v15 = vld [vmem:[%s2004_s1 + $0x38] ss:$12 sps:$4 sm:$0xff]  }
   0x5   :  { %1403 = vmatpush3.bf16.msra.mxu1 %v1520_v10  ;;  %v1510_v13 = vld [vmem:[%s2004_s1 + $0x60] ss:$12 sps:$4 sm:$0xff]   ;;  %v1511_v14 = vld [vmem:[%s2004_s1 + $0x7c] ss:$12 sps:$4 sm:$0xff]   ;;  %v1513_v16 = vld [vmem:[%s2004_s1 + $0x78] ss:$12 sps:$4 sm:$0xff]  }
   0x6   :  { %1404 = vmatprep.subr.bf16.mxu1 %v1597_v2  ;;  %v1514_v17 = vld [vmem:[%s2004_s1 + $0x94] ss:$12 sps:$4 sm:$0xff]   ;;  %v1523_v18 = vld [vmem:[%s2004_s1 + $0x50] ss:$12 sps:$4 sm:$0xff]   ;;  %v1517_v20 = vld [vmem:[%s2004_s1 + $0xac] ss:$12 sps:$4 sm:$0xff]  }
   0x7   :  { %227 = vmatpush1.bf16.msra.mxu0 %v1501_v5  ;;  %v1516_v19 = vld [vmem:[%s2004_s1 + $0x90] ss:$12 sps:$4 sm:$0xff]   ;;  %v1524_v21 = vld [vmem:[%s2004_s1 + $0x68] ss:$12 sps:$4 sm:$0xff]   ;;  %v1744_v23 = vld [vmem:[%s2005_s0] sm:$0xff]  ;;  %v1768_v29 = vshrl.u32 %v81_v28, 7 }
   0x8   :  { %228 = vmatprep.subr.bf16.mxu0 %v1502_v6  ;;  %v1519_v22 = vld [vmem:[%s2004_s1 + $0xa8] ss:$12 sps:$4 sm:$0xff]   ;;  %v1525_v24 = vld [vmem:[%s2004_s1 + $0x80] ss:$12 sps:$4 sm:$0xff]   ;;  %v46_v25 = vpack.c.bf16 %v1744_v23, %v1744_v23  ;;  %v1526_v26 = vld [vmem:[%s2004_s1 + $0x98] ss:$12 sps:$4 sm:$0xff]  }
   0x9   :  { %1405 = vmatpush3.bf16.msra.mxu1 %v1521_v12  ;;  %v1527_v27 = vld [vmem:[%s2004_s1 + $0xb0] ss:$12 sps:$4 sm:$0xff]   ;;  %v87_v30 = vsub.s32 1, %v1768_v29  ;;  %v79_v31 = vld [vmem:[%s2006_s2] sm:$0x7]  ;;  %v83_v32 = vsub.s32 0, %v1768_v29 }
   0xa   :  { %1406 = vmatprep.subr.bf16.mxu1 %v1597_v2  ;;  %vm307_vm1 = vcmask 261120   ;;  %s1600_s2 = smov 64   ;;  %v91_v44 = vsub.s32 2, %v1768_v29  ;;  %vm371_vm2 = vcmask 1043456   ;;  %vm354_vm3 = vcmask 64512  }
   0xb   :  { %229 = vmatpush1.bf16.msra.mxu0 %v1504_v7  ;;  %v88_v33 = vrot.slane %v79_v31, %v87_v30  ;;  %v84_v34 = vrot.slane %v79_v31, %v83_v32  ;;  %vm761_vm4 = vcmask 523264   ;;  %vm763_vm5 = vcmask 785408  }
   0xc   :  { %230 = vmatprep.subr.bf16.mxu0 %v1505_v8  ;;  %v92_v45 = vrot.slane %v79_v31, %v91_v44 }
   0xd   :  { %1407 = vmatpush3.bf16.msra.mxu1 %v1522_v15 }
   0xe   :  { %1408 = vmatprep.subr.bf16.mxu1 %v1597_v2 }
   0xf   :  { %231 = vmatpush1.bf16.msra.mxu0 %v1507_v9 }
  0x10   :  { %232 = vmatprep.subr.bf16.mxu0 %v1508_v11 }
  0x11   :  { %1409 = vmatpush3.bf16.msra.mxu1 %v1523_v18 }
  0x12   :  { %1410 = vmatprep.subr.bf16.mxu1 %v1597_v2 }
  0x13   :  { %233 = vmatpush1.bf16.msra.mxu0 %v1510_v13 }
  0x14   :  { %234 = vmatprep.subr.bf16.mxu0 %v1511_v14 }
  0x15   :  { %1411 = vmatpush3.bf16.msra.mxu1 %v1524_v21 }
  0x16   :  { %1412 = vmatprep.subr.bf16.mxu1 %v1597_v2 }
  0x17   :  { %235 = vmatpush1.bf16.msra.mxu0 %v1513_v16 }
  0x18   :  { %236 = vmatprep.subr.bf16.mxu0 %v1514_v17 }
  0x19   :  { %1413 = vmatpush3.bf16.msra.mxu1 %v1525_v24 }
  0x1a   :  { %1414 = vmatprep.subr.bf16.mxu1 %v1597_v2 }
  0x1b   :  { %237 = vmatpush1.bf16.msra.mxu0 %v1516_v19 }
  0x1c   :  { %238 = vmatprep.subr.bf16.mxu0 %v1517_v20 }
  0x1d   :  { %1415 = vmatpush3.bf16.msra.mxu1 %v1526_v26 }
  0x1e   :  { %1416 = vmatprep.subr.bf16.mxu1 %v1597_v2 }
  0x1f   :  { %239 = vmatpush1.bf16.msra.mxu0 %v1519_v22 }
  0x20   :  { %1446 = vmatprep.subr.bf16.mxu0 %v1597_v2 }
  0x21   :  { %1417 = vmatpush3.bf16.msra.mxu1 %v1527_v27 }
  0x22   :  { %257 = vmatmul.mubr.bf16.vlgmr.msra.gmra.mrb[0].mxu0 %v46_v25  ;;  %1422 = vmatprep.subr.bf16.mxu1 %v1597_v2 }
  0x23   :  { %1448 = vmatprep.mubr.msk.bf16.mxu0 %vm1598_vm0, %v1597_v2 }
  0x24   :  { %1419 = vmatmul.mubr.bf16.vlgmr.msra.gmra.mrb[0].mxu1 %v46_v25 }
  0x25   :  { %1424 = vmatprep.mubr.msk.bf16.mxu1 %vm1598_vm0, %v1597_v2 }
  0xf5   :  { %v258_v35 = vpop.f32.mrb[0].mxu0 }
  0xf6   :  { %v260_v36 = vpop.f32.mrb[1].mxu0  ;;  %v259_v40 = vadd.f32 %v258_v35, %v84_v34 }
  0xf7   :  { %v261_v37 = vadd.f32 %v260_v36, %v88_v33  ;;  %v262_v38 = vpop.f32.mrb[2].mxu0  ;;  %v299_v46 = vpop.f32.mrb[0].mxu1 }
  0xf8   :  { %v263_v39 = vpop.f32.mrb[3].mxu0  ;;  %v305_v43 = vpack.c.bf16 %v259_v40, %v259_v40  ;;  %v300_v47 = vadd.f32 %v299_v46, %v92_v45  ;;  %v1420_v48 = vpop.f32.mrb[1].mxu1 }
  0xf9   :  { %v306_v41 = vpack.c.bf16 %v261_v37, %v261_v37  ;;  %v302_v49 = vpop.f32.mrb[2].mxu1 }
  0xfa   :  { %v1790_v50 = vpack.c.bf16 %v300_v47, %v300_v47  ;;  %v1421_v51 = vpop.f32.mrb[3].mxu1 }
  0xfb   :  { %419 = vrot.lane.b32.xlu1 %v306_v41, %s1599_s24  ;;  %v312_v42 = vsel %vm307_vm1, %v306_v41, 0 }
  0xfc   :  { %1423 = vmatpush3.bf16.xpose.msra.mxu1 %v312_v42  ;;  %v373_v52 = vsel %vm371_vm2, %v1790_v50, 0 }
  0xfd   :  { %1428 = vmatprep.subr.bf16.mxu1 %v1597_v2 }
  0xff   :  { %416 = vrot.lane.b32.xlu1 %v305_v43, %s1599_s24 }
 0x103   :  { %528 = vrot.lane.b32.xlu1 %v305_v43, %s1600_s2  ;;  %1425 = vmatmul.mubr.msk.bf16.vlgmr.msra.gmra.mrb[4].mxu1 %vm307_vm1, %v305_v43 }
 0x104   :  { %1430 = vmatprep.mubr.msk.bf16.mxu1 %vm1598_vm0, %v1597_v2  ;;  %1429 = vmatpush3.bf16.msra.mxu1 %v373_v52 }
 0x105   :  { %1434 = vmatprep.subr.bf16.mxu1 %v1597_v2 }
 0x107   :  { %640 = vrot.lane.b32.xlu1 %v306_v41, %s1601_s25 }
 0x10b   :  { %638 = vrot.lane.b32.xlu1 %v305_v43, %s1601_s25 }
 0x16d   :  { %v420_v63 = vpop.permute.xlu1 %419 }
 0x16e   :  { %v425_v12 = vsel %vm307_vm1, %v420_v63, 0 }
 0x171   :  { %v417_v0 = vpop.permute.xlu1 %416 }
 0x175   :  { %v529_v4 = vpop.permute.xlu1 %528 }
 0x179   :  { %v641_v7 = vpop.permute.xlu1 %640 }
 0x17a   :  { %v646_v10 = vsel %vm307_vm1, %v641_v7, 0 }
 0x17d   :  { %v639_v13 = vpop.permute.xlu1 %638 }
 0x1d6   :  { %v348_v53 = vpop.f32.mrb[4].mxu1 }
 0x1d7   :  { %v1426_v54 = vpop.f32.mrb[5].mxu1  ;;  %v355_v55 = vsel %vm354_vm3, %v348_v53, -inf }
 0x1d8   :  { %356 = vmax.xlane.f32.xlu0 %v355_v55  ;;  %v351_v56 = vpop.f32.mrb[6].mxu1 }
 0x1d9   :  { %v1427_v57 = vpop.f32.mrb[7].mxu1 }
 0x265   :  { %v357_v58 = vpop.xlane.xlu0 %356 }
 0x266   :  { %v358_v59 = vsub.f32 %v348_v53, %v357_v58 }
 0x268   :  { %v359_v60 = vmul.f32 1.442695, %v358_v59 }
 0x26a   :  { %1576 = vpow2.f32 %v359_v60 }
 0x274   :  { %v1577_v61 = vpop.eup %1576 }
 0x275   :  { %v361_v62 = vsel %vm354_vm3, %v1577_v61, 0.0 }
 0x276   :  { %362 = vadd.xlane.f32.xlu0 %v361_v62 }
 0x28c   :  { %530 = vrot.lane.b32.xlu0 %v306_v41, %s1600_s2 }
 0x303   :  { %v363_v3 = vpop.xlane.xlu0 %362 }
 0x304   :  { %1578 = vrcp.f32 %v363_v3 }
 0x307   :  { %v531_v5 = vpop.permute.xlu0 %530 }
 0x308   :  { %v536_v6 = vsel %vm307_vm1, %v531_v5, 0 }
 0x309   :  { %1447 = vmatpush3.bf16.xpose.msra.mxu0 %v536_v6 }
 0x30a   :  { %1458 = vmatprep.subr.bf16.mxu0 %v1597_v2 }
 0x30e   :  { %v1579_v8 = vpop.eup %1578 }
 0x30f   :  { %v365_v9 = vmul.f32 %v1579_v8, %v1577_v61  ;;  %v1528_v8 = vld [vmem:[%s2007_s3] sm:$0xff]  }
 0x310   :  { %1449 = vmatmul.mubr.msk.bf16.vlgmr.msra.gmra.mrb[4].mxu0 %vm307_vm1, %v529_v4 }
 0x311   :  { %1459 = vmatpush3.bf16.xpose.msra.mxu0 %v646_v10  ;;  %v366_v11 = vpack.c.bf16 %v365_v9, %v365_v9  ;;  %1460 = vmatprep.mubr.msk.bf16.mxu0 %vm1598_vm0, %v1597_v2  ;;  %v1529_v9 = vld [vmem:[%s2007_s3 + $0x8] sm:$0xff]   ;;  %v1530_v10 = vld [vmem:[%s2007_s3 + $0x10] sm:$0xff]  }
 0x312   :  { %1470 = vmatprep.subr.bf16.mxu0 %v1597_v2 }
 0x313   :  { %1431 = vmatmul.mubr.msk.bf16.vlgmr.msra.gmra.mrb[8].mxu1 %vm354_vm3, %v366_v11  ;;  %v1532_v11 = vld [vmem:[%s2007_s3 + $0x20] sm:$0xff]  }
 0x314   :  { %1435 = vmatpush3.bf16.xpose.msra.mxu1 %v425_v12  ;;  %1436 = vmatprep.mubr.msk.bf16.mxu1 %vm1598_vm0, %v1597_v2  ;;  %v1533_v12 = vld [vmem:[%s2007_s3 + $0x28] sm:$0xff]  }
 0x315   :  { %1440 = vmatprep.subr.bf16.mxu1 %v1597_v2 }
 0x318   :  { %1461 = vmatmul.mubr.msk.bf16.vlgmr.msra.gmra.mrb[8].mxu0 %vm307_vm1, %v639_v13  ;;  %v1534_v13 = vld [vmem:[%s2007_s3 + $0x30] sm:$0xff]  }
 0x319   :  { %1486 = vmatprep.mubr.msk.bf16.mxu0 %vm1598_vm0, %v1597_v2  ;;  %1471 = vmatpush3.bf16.msra.mxu0 %v1528_v8  ;;  %v1567_v8 = vld [vmem:[%s2010_s9 + $0x18] sm:$0xff]  }
 0x31a   :  { %1472 = vmatprep.subr.bf16.mxu0 %v1597_v2 }
 0x31b   :  { %1437 = vmatmul.mubr.msk.bf16.vlgmr.msra.gmra.mrb[12].mxu1 %vm307_vm1, %v417_v0 }
 0x31c   :  { %1442 = vmatprep.mubr.msk.bf16.mxu1 %vm1598_vm0, %v1597_v2 }
 0x31d   :  { %1473 = vmatpush3.bf16.msra.mxu0 %v1529_v9  ;;  %v1568_v9 = vld [vmem:[%s2010_s9 + $0x60] sm:$0xff]  }
 0x31e   :  { %1474 = vmatprep.subr.bf16.mxu0 %v1597_v2 }
 0x321   :  { %1475 = vmatpush3.bf16.msra.mxu0 %v1530_v10  ;;  %v1569_v10 = vld [vmem:[%s2010_s9 + $0x20] sm:$0xff]  }
 0x322   :  { %1476 = vmatprep.subr.bf16.mxu0 %v1597_v2 }
 0x3e3   :  { %v572_v14 = vpop.f32.mrb[4].mxu0 }
 0x3e4   :  { %v1450_v15 = vpop.f32.mrb[5].mxu0  ;;  %v578_v16 = vsel %vm354_vm3, %v572_v14, -inf }
 0x3e5   :  { %579 = vmax.xlane.f32.xlu0 %v578_v16  ;;  %v575_v17 = vpop.f32.mrb[6].mxu0 }
 0x3e6   :  { %v1817_v18 = vpop.f32.mrb[8].mxu1  ;;  %v1451_v19 = vpop.f32.mrb[7].mxu0 }
 0x3e7   :  { %v1432_v20 = vpop.f32.mrb[9].mxu1  ;;  %v1535_v19 = vld [vmem:[%s2007_s3 + $0x38] sm:$0xff]  }
 0x3e8   :  { %v412_v21 = vpop.f32.mrb[10].mxu1 }
 0x3e9   :  { %v1433_v22 = vpop.f32.mrb[11].mxu1 }
 0x3eb   :  { %v682_v24 = vpop.f32.mrb[8].mxu0 }
 0x3ec   :  { %v1462_v25 = vpop.f32.mrb[9].mxu0  ;;  %v688_v36 = vsel %vm354_vm3, %v682_v24, -inf }
 0x3ed   :  { %v685_v26 = vpop.f32.mrb[10].mxu0 }
 0x3ee   :  { %v461_v27 = vpop.f32.mrb[12].mxu1  ;;  %v1463_v28 = vpop.f32.mrb[11].mxu0 }
 0x3ef   :  { %v1438_v31 = vpop.f32.mrb[13].mxu1  ;;  %v467_v33 = vsel %vm354_vm3, %v461_v27, -inf }
 0x3f0   :  { %468 = vmax.xlane.f32.xlu1 %v467_v33  ;;  %v464_v34 = vpop.f32.mrb[14].mxu1 }
 0x3f1   :  { %v1439_v35 = vpop.f32.mrb[15].mxu1 }
 0x3f4   :  { %689 = vmax.xlane.f32.xlu1 %v688_v36 }
 0x472   :  { %v580_v37 = vpop.xlane.xlu0 %579 }
 0x473   :  { %v581_v38 = vsub.f32 %v572_v14, %v580_v37 }
 0x475   :  { %v582_v39 = vmul.f32 1.442695, %v581_v38  ;;  %v1300_v38 = vld [vmem:[%s2008_s4] ss:$0 sm:$0xff] }
 0x477   :  { %1580 = vpow2.f32 %v582_v39 }
 0x47d   :  { %v469_v40 = vpop.xlane.xlu1 %468 }
 0x47e   :  { %v470_v41 = vsub.f32 %v461_v27, %v469_v40 }
 0x480   :  { %v471_v46 = vmul.f32 1.442695, %v470_v41 }
 0x481   :  { %v1581_v42 = vpop.eup %1580  ;;  %v690_v43 = vpop.xlane.xlu1 %689 }
 0x482   :  { %v691_v44 = vsub.f32 %v682_v24, %v690_v43  ;;  %v584_v45 = vsel %vm354_vm3, %v1581_v42, 0.0 }
 0x483   :  { %585 = vadd.xlane.f32.xlu0 %v584_v45  ;;  %v1538_v45 = vld [vmem:[%s2009_s7 + $0x4] ss:$8 sps:$4 sm:$0xff]  }
 0x484   :  { %v692_v47 = vmul.f32 1.442695, %v691_v44 }
 0x486   :  { %1582 = vpow2.f32 %v692_v47  ;;  %v1539_v47 = vld [vmem:[%s2009_s7 + $0x10] ss:$8 sps:$4 sm:$0xff]  }
 0x487   :  { %1584 = vpow2.f32 %v471_v46  ;;  %v1541_v46 = vld [vmem:[%s2009_s7 + $0x14] ss:$8 sps:$4 sm:$0xff]  }
 0x490   :  { %v1583_v48 = vpop.eup %1582 }
 0x491   :  { %v694_v49 = vsel %vm354_vm3, %v1583_v48, 0.0  ;;  %v1585_v51 = vpop.eup %1584 }
 0x492   :  { %695 = vadd.xlane.f32.xlu1 %v694_v49  ;;  %v473_v52 = vsel %vm354_vm3, %v1585_v51, 0.0 }
 0x496   :  { %474 = vadd.xlane.f32.xlu1 %v473_v52 }
 0x499   :  { %480 = vrot.lane.b32.xlu0 %v1790_v50, %s1599_s24 }
 0x4a7   :  { %590 = vrot.lane.b32.xlu1 %v1790_v50, %s1600_s2 }
 0x4ab   :  { %700 = vrot.lane.b32.xlu1 %v1790_v50, %s1601_s25 }
 0x510   :  { %v586_v53 = vpop.xlane.xlu0 %585 }
 0x514   :  { %v481_v54 = vpop.permute.xlu0 %480 }
 0x515   :  { %v486_v55 = vsel %vm371_vm2, %v481_v54, 0  ;;  %v1547_v54 = vld [vmem:[%s2009_s7 + $0x34] ss:$8 sps:$4 sm:$0xff]  }
 0x516   :  { %1441 = vmatpush3.bf16.msra.mxu1 %v486_v55  ;;  %v1545_v55 = vld [vmem:[%s2009_s7 + $0x30] ss:$8 sps:$4 sm:$0xff]  }
 0x517   :  { %1452 = vmatprep.subr.bf16.mxu1 %v1597_v2 }
 0x51f   :  { %v696_v56 = vpop.xlane.xlu1 %695 }
 0x523   :  { %v475_v57 = vpop.xlane.xlu1 %474 }
 0x524   :  { %1586 = vrcp.f32 %v475_v57  ;;  %v1548_v57 = vld [vmem:[%s2009_s7 + $0x40] ss:$8 sps:$4 sm:$0xff]  }
 0x525   :  { %1588 = vrcp.f32 %v586_v53 }
 0x526   :  { %1590 = vrcp.f32 %v696_v56  ;;  %v1550_v56 = vld [vmem:[%s2009_s7 + $0x44] ss:$8 sps:$4 sm:$0xff]  }
 0x527   :  { %v591_v60 = vpop.permute.xlu1 %590 }
 0x528   :  { %v596_v63 = vsel %vm371_vm2, %v591_v60, 0  ;;  %v1556_v60 = vld [vmem:[%s2009_s7 + $0x64] ss:$8 sps:$4 sm:$0xff]  }
 0x52b   :  { %v701_v0 = vpop.permute.xlu1 %700 }
 0x52c   :  { %v706_v5 = vsel %vm371_vm2, %v701_v0, 0  ;;  %v1561_v0 = vld [vmem:[%s2010_s9] sm:$0xff]  }
 0x52e   :  { %v1587_v58 = vpop.eup %1586 }
 0x52f   :  { %v477_v59 = vmul.f32 %v1587_v58, %v1585_v51  ;;  %v1589_v62 = vpop.eup %1588  ;;  %v1553_v58 = vld [vmem:[%s2009_s7 + $0x54] ss:$8 sps:$4 sm:$0xff]  }
 0x530   :  { %v588_v50 = vmul.f32 %v1589_v62, %v1581_v42  ;;  %v1591_v4 = vpop.eup %1590  ;;  %v1559_v62 = vld [vmem:[%s2009_s7 + $0x74] ss:$8 sps:$4 sm:$0xff]  }
 0x531   :  { %v478_v61 = vpack.c.bf16 %v477_v59, %v477_v59  ;;  %v698_v6 = vmul.f32 %v1591_v4, %v1583_v48  ;;  %v1542_v48 = vld [vmem:[%s2009_s7 + $0x20] ss:$8 sps:$4 sm:$0xff]   ;;  %v1551_v59 = vld [vmem:[%s2009_s7 + $0x50] ss:$8 sps:$4 sm:$0xff]  }
 0x532   :  { %v589_v3 = vpack.c.bf16 %v588_v50, %v588_v50  ;;  %v1560_v50 = vld [vmem:[%s2010_s9 + $0x40] sm:$0xff]   ;;  %v1563_v4 = vld [vmem:[%s2010_s9 + $0x8] sm:$0xff]  }
 0x533   :  { %1443 = vmatmul.mubr.msk.bf16.vlgmr.msra.gmra.mrb[16].mxu1 %vm354_vm3, %v478_v61  ;;  %v699_v7 = vpack.c.bf16 %v698_v6, %v698_v6  ;;  %v1554_v61 = vld [vmem:[%s2009_s7 + $0x60] ss:$8 sps:$4 sm:$0xff]   ;;  %v1565_v6 = vld [vmem:[%s2010_s9 + $0x10] sm:$0xff]  }
 0x534   :  { %1453 = vmatpush3.bf16.msra.mxu1 %v596_v63  ;;  %1454 = vmatprep.mubr.msk.bf16.mxu1 %vm1598_vm0, %v1597_v2  ;;  %v1557_v63 = vld [vmem:[%s2009_s7 + $0x70] ss:$8 sps:$4 sm:$0xff]  }
 0x535   :  { %1464 = vmatprep.subr.bf16.mxu1 %v1597_v2 }
 0x53b   :  { %1455 = vmatmul.mubr.msk.bf16.vlgmr.msra.gmra.mrb[20].mxu1 %vm354_vm3, %v589_v3  ;;  %v1562_v3 = vld [vmem:[%s2010_s9 + $0x48] sm:$0xff]  }
 0x53c   :  { %1465 = vmatpush3.bf16.msra.mxu1 %v706_v5  ;;  %1466 = vmatprep.mubr.msk.bf16.mxu1 %vm1598_vm0, %v1597_v2  ;;  %v1564_v5 = vld [vmem:[%s2010_s9 + $0x50] sm:$0xff]  }
 0x53d   :  { %1015 = vmatprep.subr.bf16.mxu1 %v1538_v45 }
 0x543   :  { %1467 = vmatmul.mubr.msk.bf16.vlgmr.msra.gmra.mrb[24].mxu1 %vm354_vm3, %v699_v7  ;;  %v1566_v7 = vld [vmem:[%s2010_s9 + $0x58] sm:$0xff]  }
 0x544   :  { %1047 = vmatprep.mubr.bf16.mxu1 %v1596_v1  ;;  %v1531_v1 = vld [vmem:[%s2007_s3 + $0x18] sm:$0xff]  }
 0x545   :  { %1477 = vmatpush3.bf16.msra.mxu0 %v1531_v1  ;;  %v1570_v1 = vld [vmem:[%s2010_s9 + $0x68] sm:$0xff]  }
 0x546   :  { %1478 = vmatprep.subr.bf16.mxu0 %v1597_v2 }
 0x549   :  { %1479 = vmatpush3.bf16.msra.mxu0 %v1532_v11  ;;  %v1571_v11 = vld [vmem:[%s2010_s9 + $0x28] sm:$0xff]  }
 0x54a   :  { %1480 = vmatprep.subr.bf16.mxu0 %v1597_v2 }
 0x54d   :  { %1481 = vmatpush3.bf16.msra.mxu0 %v1533_v12 }
 0x54e   :  { %1482 = vmatprep.subr.bf16.mxu0 %v1597_v2 }
 0x551   :  { %1483 = vmatpush3.bf16.msra.mxu0 %v1534_v13 }
 0x552   :  { %1484 = vmatprep.subr.bf16.mxu0 %v1597_v2 }
 0x555   :  { %1485 = vmatpush3.bf16.msra.mxu0 %v1535_v19  ;;  %v1310_v19 = vld [vmem:[%s2012_s6] ss:$0 sm:$0xff] }
 0x556   :  { %1380 = vmatprep.subr.bf16.mxu0 %v1560_v50 }
 0x606   :  { %v522_v14 = vpop.f32.mrb[16].mxu1 }
 0x607   :  { %749 = vrot.lane.b32.xlu0 %v522_v14, %s1601_s25  ;;  %v1444_v15 = vpop.f32.mrb[17].mxu1 }
 0x608   :  { %v525_v16 = vpop.f32.mrb[18].mxu1 }
 0x609   :  { %v1445_v17 = vpop.f32.mrb[19].mxu1  ;;  %v1309_v16 = vld [vmem:[%s2011_s5] ss:$0 sm:$0xff] }
 0x60e   :  { %v632_v20 = vpop.f32.mrb[20].mxu1 }
 0x60f   :  { %753 = vrot.lane.b32.xlu1 %v632_v20, %s1600_s2  ;;  %v1456_v21 = vpop.f32.mrb[21].mxu1 }
 0x610   :  { %v635_v22 = vpop.f32.mrb[22].mxu1 }
 0x611   :  { %v1457_v24 = vpop.f32.mrb[23].mxu1 }
 0x612   :  { %v1572_v24 = vld [vmem:[%s2010_s9 + $0x70] sm:$0xff]  }
 0x616   :  { %v742_v25 = vpop.f32.mrb[24].mxu1 }
 0x617   :  { %757 = vrot.lane.b32.xlu0 %v742_v25, %s1599_s24  ;;  %v1468_v26 = vpop.f32.mrb[25].mxu1  ;;  %v1573_v25 = vld [vmem:[%s2010_s9 + $0x30] sm:$0xff]  }
 0x618   :  { %v745_v27 = vpop.f32.mrb[26].mxu1  ;;  %v1574_v26 = vld [vmem:[%s2010_s9 + $0x78] sm:$0xff]  }
 0x619   :  { %v1469_v28 = vpop.f32.mrb[27].mxu1  ;;  %v1575_v27 = vld [vmem:[%s2010_s9 + $0x38] sm:$0xff]  }
 0x61a   :  { %v923_v28 = vld [vmem:[%s2013_s8] sm:$0x3] }
 0x679   :  { %v750_v31 = vpop.permute.xlu0 %749 }
 0x67a   :  { %v760_v33 = vsel %vm307_vm1, %v1817_v18, %v750_v31  ;;  %v1536_v18 = vld [vmem:[%s2009_s7] ss:$8 sps:$4 sm:$0xff]   ;;  %v928_v31 = vrot.slane %v923_v28, %v83_v32 }
 0x67b   :  { %1016 = vmatpush1.bf16.msra.mxu1 %v1536_v18  ;;  %v1327_v32 = vld [vmem:[%s2014_s10] ss:$0 sm:$0xff] }
 0x67c   :  { %1017 = vmatprep.subr.bf16.mxu1 %v1541_v46 }
 0x67f   :  { %1018 = vmatpush1.bf16.msra.mxu1 %v1539_v47 }
 0x681   :  { %v754_v2 = vpop.permute.xlu1 %753 }
 0x682   :  { %v762_v34 = vsel %vm761_vm4, %v760_v33, %v754_v2  ;;  %v932_v2 = vrot.slane %v923_v28, %v87_v30 }
 0x689   :  { %v758_v35 = vpop.permute.xlu0 %757 }
 0x68a   :  { %v764_v36 = vsel %vm763_vm5, %v762_v34, %v758_v35 }
 0x68b   :  { %v765_v37 = vpack.c.bf16 %v764_v36, %v764_v36 }
 0x68d   :  { %1487 = vmatmul.mubr.bf16.vlgmr.msra.gmra.mrb[12].mxu0 %v765_v37 }
 0x68e   :  { %1381 = vmatpush3.bf16.msra.mxu0 %v1561_v0 }
 0x68f   :  { %1382 = vmatprep.subr.bf16.mxu0 %v1562_v3 }
 0x692   :  { %1383 = vmatpush3.bf16.msra.mxu0 %v1563_v4 }
 0x693   :  { %1384 = vmatprep.subr.bf16.mxu0 %v1564_v5 }
 0x696   :  { %1385 = vmatpush3.bf16.msra.mxu0 %v1565_v6 }
 0x697   :  { %1386 = vmatprep.subr.bf16.mxu0 %v1566_v7 }
 0x69a   :  { %1387 = vmatpush3.bf16.msra.mxu0 %v1567_v8 }
 0x69b   :  { %1388 = vmatprep.subr.bf16.mxu0 %v1568_v9 }
 0x69e   :  { %1389 = vmatpush3.bf16.msra.mxu0 %v1569_v10 }
 0x69f   :  { %1390 = vmatprep.subr.bf16.mxu0 %v1570_v1 }
 0x6a2   :  { %1391 = vmatpush3.bf16.msra.mxu0 %v1571_v11 }
 0x6a3   :  { %1392 = vmatprep.subr.bf16.mxu0 %v1572_v24 }
 0x6a6   :  { %1393 = vmatpush3.bf16.msra.mxu0 %v1573_v25 }
 0x6a7   :  { %1394 = vmatprep.subr.bf16.mxu0 %v1574_v26 }
 0x6aa   :  { %1395 = vmatpush3.bf16.msra.mxu0 %v1575_v27 }
 0x760   :  { %v871_v39 = vpop.f32.mrb[12].mxu0 }
 0x761   :  { %v872_v40 = vadd.f32 %v1300_v38, %v871_v39  ;;  %v1488_v41 = vpop.f32.mrb[13].mxu0 }
 0x762   :  { %v874_v42 = vpop.f32.mrb[14].mxu0 }
 0x763   :  { %v1489_v43 = vpop.f32.mrb[15].mxu0  ;;  %v877_v44 = vadd.f32 %v872_v40, %v1744_v23  ;;  %v1544_v23 = vld [vmem:[%s2009_s7 + $0x24] ss:$8 sps:$4 sm:$0xff]  }
 0x764   :  { %1019 = vmatprep.subr.bf16.mxu1 %v1544_v23 }
 0x765   :  { %878 = vadd.xlane.f32.xlu1 %v877_v44  ;;  %1020 = vmatpush1.bf16.msra.mxu1 %v1542_v48 }
 0x766   :  { %1021 = vmatprep.subr.bf16.mxu1 %v1547_v54 }
 0x769   :  { %1022 = vmatpush1.bf16.msra.mxu1 %v1545_v55  ;;  %v1344_v55 = vld [vmem:[%s2015_s11] ss:$0 sm:$0xff] }
 0x76a   :  { %1023 = vmatprep.subr.bf16.mxu1 %v1550_v56 }
 0x76d   :  { %1024 = vmatpush1.bf16.msra.mxu1 %v1548_v57  ;;  %v1345_v57 = vld [vmem:[%s2016_s12] ss:$0 sm:$0xff] }
 0x76e   :  { %1025 = vmatprep.subr.bf16.mxu1 %v1553_v58 }
 0x771   :  { %1026 = vmatpush1.bf16.msra.mxu1 %v1551_v59 }
 0x772   :  { %1027 = vmatprep.subr.bf16.mxu1 %v1556_v60 }
 0x775   :  { %1028 = vmatpush1.bf16.msra.mxu1 %v1554_v61 }
 0x776   :  { %1029 = vmatprep.subr.bf16.mxu1 %v1559_v62 }
 0x779   :  { %1030 = vmatpush1.bf16.msra.mxu1 %v1557_v63 }
 0x7f2   :  { %v879_v49 = vpop.xlane.xlu1 %878 }
 0x7f3   :  { %v881_v51 = vmul.f32 0.0078125, %v879_v49 }
 0x7f5   :  { %v882_v52 = vsub.f32 %v877_v44, %v881_v51 }
 0x7f7   :  { %v883_v53 = vmul.f32 %v882_v52, %v882_v52 }
 0x7f9   :  { %884 = vadd.xlane.f32.xlu0 %v883_v53 }
 0x886   :  { %v885_v12 = vpop.xlane.xlu0 %884 }
 0x887   :  { %v886_v13 = vmul.f32 0.0078125, %v885_v12 }
 0x889   :  { %v887_v14 = vadd.f32 1e-05, %v886_v13 }
 0x88b   :  { %1592 = vrsqrt.f32 %v887_v14 }
 0x895   :  { %v1593_v15 = vpop.eup %1592 }
 0x896   :  { %v889_v17 = vmul.f32 %v1593_v15, %v882_v52 }
 0x898   :  { %v897_v20 = vmul.f32 %v1309_v16, %v889_v17 }
 0x89a   :  { %v905_v21 = vadd.f32 %v1310_v19, %v897_v20 }
 0x89c   :  { %v906_v22 = vpack.c.bf16 %v905_v21, %v905_v21 }
 0x89e   :  { %1048 = vmatmul.mubr.bf16.vlgmr.msra.gmra.mrb[28].mxu1 %v906_v22 }
 0x971   :  { %v1049_v33 = vpop.f32.mrb[28].mxu1 }
 0x972   :  { %v1050_v34 = vadd.f32 %v1049_v33, %v928_v31  ;;  %v1051_v35 = vpop.f32.mrb[29].mxu1 }
 0x973   :  { %v1052_v36 = vadd.f32 %v1051_v35, %v932_v2  ;;  %v1053_v37 = vpop.f32.mrb[30].mxu1 }
 0x974   :  { %v1056_v38 = vmax.f32 %v1050_v34, 0.0  ;;  %v1054_v39 = vpop.f32.mrb[31].mxu1 }
 0x975   :  { %v1057_v40 = vmax.f32 %v1052_v36, 0.0 }
 0x976   :  { %v1058_v42 = vpack.c.bf16 %v1056_v38, %v1056_v38 }
 0x977   :  { %v1059_v41 = vpack.c.bf16 %v1057_v40, %v1057_v40 }
 0x979   :  { %1227 = vmatprep.mubr.bf16.mxu0 %v1059_v41 }
 0x97a   :  { %1228 = vmatmul.mubr.bf16.vlgmr.msra.gmra.mrb[16].mxu0 %v1058_v42 }
 0xa4d   :  { %v1396_v43 = vpop.f32.mrb[16].mxu0 }
 0xa4e   :  { %v1397_v44 = vpop.f32.mrb[17].mxu0 }
 0xa4f   :  { %v1398_v29 = vadd.f32 %v1397_v44, %v1396_v43  ;;  %v1399_v30 = vpop.f32.mrb[18].mxu0 }
 0xa50   :  { %v1400_v18 = vpop.f32.mrb[19].mxu0 }
 0xa51   :  { %v1230_v45 = vadd.f32 %v1398_v29, %v1327_v32 }
 0xa53   :  { %v1235_v46 = vadd.f32 %v1230_v45, %v905_v21 }
 0xa55   :  { %1236 = vadd.xlane.f32.xlu0 %v1235_v46 }
 0xae2   :  { %v1237_v47 = vpop.xlane.xlu0 %1236 }
 0xae3   :  { %v1238_v23 = vmul.f32 0.0078125, %v1237_v47 }
 0xae5   :  { %v1239_v48 = vsub.f32 %v1235_v46, %v1238_v23 }
 0xae7   :  { %v1240_v49 = vmul.f32 %v1239_v48, %v1239_v48 }
 0xae9   :  { %1241 = vadd.xlane.f32.xlu1 %v1240_v49 }
 0xb76   :  { %v1242_v51 = vpop.xlane.xlu1 %1241 }
 0xb77   :  { %v1243_v52 = vmul.f32 0.0078125, %v1242_v51 }
 0xb79   :  { %v1244_v53 = vadd.f32 1e-05, %v1243_v52 }
 0xb7b   :  { %1594 = vrsqrt.f32 %v1244_v53 }
 0xb85   :  { %v1595_v54 = vpop.eup %1594 }
 0xb86   :  { %v1246_v56 = vmul.f32 %v1595_v54, %v1239_v48 }
 0xb88   :  { %v1254_v58 = vmul.f32 %v1344_v55, %v1246_v56 }
 0xb8a   :  { %v1262_v59 = vadd.f32 %v1345_v57, %v1254_v58 }
 0xb8c   :  { %1263 = vst [vmem:[%s2017_s13] sm:$0xff] %v1262_v59 }

// kernel: run.31
= control target key start
LH: loop header
LB: loop body
LE: loop exit
PB: predicated region body
PF: predicated region fallthrough
CT: control target
= control target key end

     0   :  { %v180_v0 = vmov 0.0   ;;  %vm181_vm0 = vmmov 0   ;;  %s235_s1 = inlined_call_operand.vmem [shape: bf16[128,128], index: 1, kind: input, shape index: {}]   ;;  %s236_s0 = inlined_call_operand.vmem [shape: bf16[8,128], index: 0, kind: input, shape index: {}]   ;;  %s237_s2 = inlined_call_operand.vmem [shape: f32[1,128], index: 2, kind: input, shape index: {}]   ;;  %s238_s3 = inlined_call_operand.vmem [shape: f32[8,128], index: 3, kind: output, shape index: {}]  }
   0x1   :  { %150 = vmatprep.subr.bf16.mxu0 %v180_v0  ;;  %v172_v1 = vld [vmem:[%s235_s1] sm:$0xff]   ;;  %166 = vmatprep.mubr.msk.bf16.mxu0 %vm181_vm0, %v180_v0  ;;  %v173_v2 = vld [vmem:[%s235_s1 + $0x8] sm:$0xff]   ;;  %v174_v3 = vld [vmem:[%s235_s1 + $0x10] sm:$0xff]  }
   0x2   :  { %151 = vmatpush3.bf16.msra.mxu0 %v172_v1  ;;  %v175_v4 = vld [vmem:[%s235_s1 + $0x18] sm:$0xff]   ;;  %v176_v5 = vld [vmem:[%s235_s1 + $0x20] sm:$0xff]   ;;  %v177_v6 = vld [vmem:[%s235_s1 + $0x28] sm:$0xff]  }
   0x3   :  { %152 = vmatprep.subr.bf16.mxu0 %v180_v0  ;;  %v178_v7 = vld [vmem:[%s235_s1 + $0x30] sm:$0xff]   ;;  %v179_v8 = vld [vmem:[%s235_s1 + $0x38] sm:$0xff]   ;;  %v15_v9 = vld [vmem:[%s236_s0] sm:$0xf] }
   0x4   :  { %v132_v10 = vld [vmem:[%s237_s2] ss:$0 sm:$0xff] }
   0x6   :  { %153 = vmatpush3.bf16.msra.mxu0 %v173_v2 }
   0x7   :  { %154 = vmatprep.subr.bf16.mxu0 %v180_v0 }
   0xa   :  { %155 = vmatpush3.bf16.msra.mxu0 %v174_v3 }
   0xb   :  { %156 = vmatprep.subr.bf16.mxu0 %v180_v0 }
   0xe   :  { %157 = vmatpush3.bf16.msra.mxu0 %v175_v4 }
   0xf   :  { %158 = vmatprep.subr.bf16.mxu0 %v180_v0 }
  0x12   :  { %159 = vmatpush3.bf16.msra.mxu0 %v176_v5 }
  0x13   :  { %160 = vmatprep.subr.bf16.mxu0 %v180_v0 }
  0x16   :  { %161 = vmatpush3.bf16.msra.mxu0 %v177_v6 }
  0x17   :  { %162 = vmatprep.subr.bf16.mxu0 %v180_v0 }
  0x1a   :  { %163 = vmatpush3.bf16.msra.mxu0 %v178_v7 }
  0x1b   :  { %164 = vmatprep.subr.bf16.mxu0 %v180_v0 }
  0x1e   :  { %165 = vmatpush3.bf16.msra.mxu0 %v179_v8 }
  0x21   :  { %167 = vmatmul.mubr.bf16.vlgmr.msra.gmra.mrb[0].mxu0 %v15_v9 }
  0xf4   :  { %v121_v11 = vpop.f32.mrb[0].mxu0 }
  0xf5   :  { %v122_v12 = vadd.f32 %v132_v10, %v121_v11  ;;  %v168_v13 = vpop.f32.mrb[1].mxu0 }
  0xf6   :  { %v124_v14 = vpop.f32.mrb[2].mxu0 }
  0xf7   :  { %127 = vst [vmem:[%s238_s3] sm:$0xff] %v122_v12  ;;  %v169_v15 = vpop.f32.mrb[3].mxu0 }

// kernel: sub.908
= control target key start
LH: loop header
LB: loop body
LE: loop exit
PB: predicated region body
PF: predicated region fallthrough
CT: control target
= control target key end

     0   :  { %3 = vsyncpa [#allocation1], 0  ;;  %s168_s0 = inlined_call_operand.hbm [shape: f32[4096], index: 0, kind: input, shape index: {}]   ;;  %s169_s1 = inlined_call_operand.hbm [shape: f32[4096], index: 1, kind: input, shape index: {}]   ;;  %s170_s2 = inlined_call_operand.vmem [shape: f32[4096], index: 2, kind: output, shape index: {}]  }
   0x1   :  { %4 = vsyncpa [#allocation3], 0  ;;  %s115_s9 = smov [#allocation0]   ;;  %s116_s11 = smov [#allocation2]  }
   0x2   :  { %s9_s10 = sshll.u32 %s115_s9, 4  ;;  %s17_s12 = sshll.u32 %s116_s11, 4  ;;  %s10_s10 = int_to_ptr.vmem [resolvable:$true] %s9_s10  ;;  %s18_s12 = int_to_ptr.vmem [resolvable:$true] %s17_s12 }
   0x3   :  { %s67_s15 = scalar_lea.hbm %s168_s0, 512 }
   0x4   :  { %p68_p0 = scmp.ne.s32.totalorder %s168_s0, %s67_s15  ;;  %p71_p1 = scmp.lt.u32.totalorder %s67_s15, %s168_s0 }
   0x6   :  { %p73_p2 = pnand %p71_p1, %p68_p0 }
   0x8   :  { %76 = shalt.err (!%p73_p2)
}
   0x9   :  { %s77_s20 = scalar_lea.vmem %s10_s10, 512  ;;  %p82_p4 = scmp.lt.s32.totalorder %s10_s10, %s10_s10 }
   0xa   :  { %p78_p3 = scmp.ne.s32.totalorder %s10_s10, %s77_s20  ;;  %p83_p5 = scmp.lt.s32.totalorder %s77_s20, %s77_s20 }
   0xc   :  { %p84_p6 = por %p83_p5, %p82_p4 }
   0xe   :  { %p85_p7 = pnand %p84_p6, %p78_p3 }
  0x10   :  { %88 = shalt.err (!%p85_p7)
}
  0x11   :  { %12 = dma.hbm_to_vmem [thread:$0]  %s168_s0, 512, %s10_s10, [#allocation1]  }
  0x12   :  { %s89_s24 = scalar_lea.hbm %s169_s1, 512 }
  0x13   :  { %p90_p8 = scmp.ne.s32.totalorder %s169_s1, %s89_s24  ;;  %p93_p9 = scmp.lt.u32.totalorder %s89_s24, %s169_s1 }
  0x15   :  { %p95_p10 = pnand %p93_p9, %p90_p8 }
  0x17   :  { %98 = shalt.err (!%p95_p10)
}
  0x18   :  { %s99_s29 = scalar_lea.vmem %s18_s12, 512  ;;  %p104_p12 = scmp.lt.s32.totalorder %s18_s12, %s18_s12 }
  0x19   :  { %p100_p11 = scmp.ne.s32.totalorder %s18_s12, %s99_s29  ;;  %p105_p13 = scmp.lt.s32.totalorder %s99_s29, %s99_s29 }
  0x1b   :  { %p106_p0 = por %p105_p13, %p104_p12 }
  0x1d   :  { %p107_p1 = pnand %p106_p0, %p100_p11 }
  0x1f   :  { %110 = shalt.err (!%p107_p1)
}
  0x20   :  { %20 = dma.hbm_to_vmem [thread:$0]  %s169_s1, 512, %s18_s12, [#allocation3]  }
  0x21   :  { %111 = dma.done.wait [#allocation1], 512  }
  0x22   :  { %112 = vsyncadd [#allocation1], 4294966784 }
  0x23   :  { %113 = dma.done.wait [#allocation3], 512  }
  0x24   :  { %114 = vsyncadd [#allocation3], 4294966784  ;;  %v23_v0 = vld [vmem:[#allocation0] sm:$0xff]  ;;  %v31_v2 = vld [vmem:[#allocation0 + $0x8] sm:$0xff] }
  0x25   :  { %v24_v1 = vld [vmem:[#allocation2] sm:$0xff]  ;;  %v33_v4 = vld [vmem:[#allocation2 + $0x8] sm:$0xff]  ;;  %v41_v5 = vld [vmem:[#allocation0 + $0x10] sm:$0xff] }
  0x26   :  { %v27_v3 = vsub.f32 %v23_v0, %v24_v1  ;;  %v43_v6 = vld [vmem:[#allocation2 + $0x10] sm:$0xff]  ;;  %v36_v7 = vsub.f32 %v31_v2, %v33_v4  ;;  %v51_v9 = vld [vmem:[#allocation0 + $0x18] sm:$0xff] }
  0x27   :  { %v46_v8 = vsub.f32 %v41_v5, %v43_v6  ;;  %v53_v10 = vld [vmem:[#allocation2 + $0x18] sm:$0xff] }
  0x28   :  { %29 = vst [vmem:[%s170_s2] sm:$0xff] %v27_v3  ;;  %v56_v11 = vsub.f32 %v51_v9, %v53_v10  ;;  %62 = vst [vmem:[%s170_s2 + $0x8] sm:$0xff] %v36_v7 }
  0x29   :  { %63 = vst [vmem:[%s170_s2 + $0x10] sm:$0xff] %v46_v8 }
  0x2a   :  { %64 = vst [vmem:[%s170_s2 + $0x18] sm:$0xff] %v56_v11 }
  0x2b   :  { %60 = vsyncpa [#allocation1], 1 }
  0x2c   :  { %61 = vsyncpa [#allocation3], 1 }

</bundles_post_ra>
